<compile_context>
chip_gen: v6e
topology: v6e:2x2x1
jax: 0.10.0
libtpu: 0.0.40
codegen_flags: <defaults>
</compile_context>

<pallas_src>
import functools

import numpy as np

import jax
import jax.numpy as jnp
from jax import lax
from jax.experimental import pallas as pl
from jax.experimental.pallas import tpu as pltpu

EPS = 1e-3  # BatchNorm2d(eps=0.001)


# --------------------------------------------------------------------------
# Fused kernel: one grid step processes a block of Nb samples end-to-end.
#   x_ref  : (Nb, H*W, C)      NHWC flattened over space, channels in lanes
#   pm_ref : (25, H*W)         constant average-pooling matrix (f32)
#   w0_ref : (C, 128)          1x1 conv weight, BN0 folded (f32)
#   b0_ref : (1, 128)          BN0 folded bias
#   w1_ref : (25, 128, 768)    5x5 conv weight, BN1 folded (bf16)
#   b1_ref : (1, 768)          BN1 folded bias
#   wfc_ref: (768, Kp)         fc weight, class dim padded to 128 (bf16)
#   bfc_ref: (1, Kp)           fc bias (padded with zeros)
#   out_ref: (Nb, Kp)          logits (f32)
# --------------------------------------------------------------------------
def _fused_aux_kernel(x_ref, pm_ref, w0_ref, b0_ref, w1_ref, b1_ref,
                      wfc_ref, bfc_ref, out_ref):
    nb = x_ref.shape[0]              # static block batch size
    pm = pm_ref[...]                 # (25, H*W)
    w0 = w0_ref[...]                 # (C, 128)
    b0 = b0_ref[...]                 # (1, 128)
    b1 = b1_ref[...]                 # (1, 768)
    wfc = wfc_ref[...]               # (768, Kp) bf16
    bfc = bfc_ref[...]               # (1, Kp)

    # ---- stage 1: avg_pool (MXU matmul) + 1x1 conv + folded BN + ReLU.
    h0s = []
    for i in range(nb):
        pooled = jnp.dot(pm, x_ref[i],
                         preferred_element_type=jnp.float32)                 # (25, C)
        h0 = jnp.dot(pooled, w0,
                     preferred_element_type=jnp.float32) + b0                # (25, 128)
        h0s.append(jnp.maximum(h0, 0.0).astype(jnp.bfloat16))

    # ---- stage 2: 5x5 conv on the 5x5 map == contraction over (p, c).
    # p-major loop: each (128, 768) weight slab is read from VMEM once and
    # reused across all samples in the block.
    ys = [jnp.zeros((1, 768), jnp.float32) for _ in range(nb)]
    for p in range(25):
        wp = w1_ref[p]                                                       # (128, 768) bf16
        for i in range(nb):
            ys[i] = ys[i] + jnp.dot(h0s[i][p:p + 1, :], wp,
                                    preferred_element_type=jnp.float32)      # (1, 768)

    # ---- stage 3: folded BN1 + ReLU, then fc; lane-dense (Kp % 128 == 0) store.
    for i in range(nb):
        y = jnp.maximum(ys[i] + b1, 0.0).astype(jnp.bfloat16)                # (1, 768)
        out_ref[i:i + 1, :] = (
            jnp.dot(y, wfc, preferred_element_type=jnp.float32) + bfc)       # (1, Kp)


# --------------------------------------------------------------------------
# Wrapper: layout conversion, BN folding, weight packing, one pallas_call.
# --------------------------------------------------------------------------
def _avg_pool_matrix(H, W):
    """(25, H*W) matrix M so that (M @ x_flat) == avg_pool2d(x, k=5, s=3)."""
    m = np.zeros((25, H * W), np.float32)
    for oh in range(5):
        for ow in range(5):
            p = oh * 5 + ow
            for dh in range(5):
                for dw in range(5):
                    m[p, (3 * oh + dh) * W + (3 * ow + dw)] = 1.0 / 25.0
    return jnp.asarray(m)


def inception_aux_forward(x_nchw, params, block_n=8):
    """InceptionAux forward (eval-mode BN).  block_n = samples per grid step;
    keep it a multiple of 8 when the batch is larger than block_n."""
    N, C, H, W = x_nchw.shape
    assert (H - 5) // 3 + 1 == 5 and (W - 5) // 3 + 1 == 5, \
        "fc(768) requires the pooled map to be 5x5 (e.g. 17x17 input)"
    HW = H * W

    # NCHW -> (N, H*W, C): channels in the TPU lane dimension.
    x = jnp.transpose(x_nchw, (0, 2, 3, 1)).reshape(N, HW, C)

    pm = _avg_pool_matrix(H, W)                                               # (25, HW)

    # Fold eval-mode BatchNorm into the conv weights / biases.
    scale0 = params["bn0_gamma"] * lax.rsqrt(params["bn0_var"] + EPS)         # (128,)
    w0 = jnp.transpose(params["conv0_w"].reshape(128, C)) * scale0[None, :]   # (C, 128)
    b0 = (params["bn0_beta"] - params["bn0_mean"] * scale0).reshape(1, 128)

    scale1 = params["bn1_gamma"] * lax.rsqrt(params["bn1_var"] + EPS)         # (768,)
    w1 = jnp.transpose(params["conv1_w"], (2, 3, 1, 0)).reshape(25, 128, 768)
    w1 = (w1 * scale1[None, None, :]).astype(jnp.bfloat16)                    # bf16 weights
    b1 = (params["bn1_beta"] - params["bn1_mean"] * scale1).reshape(1, 768)

    # fc, with the class dimension padded to a lane-dense multiple of 128.
    K = params["fc_w"].shape[0]
    Kp = ((K + 127) // 128) * 128
    wfc = jnp.zeros((768, Kp), jnp.float32).at[:, :K].set(
        jnp.transpose(params["fc_w"])).astype(jnp.bfloat16)
    bfc = jnp.zeros((1, Kp), jnp.float32).at[0, :K].set(params["fc_b"])

    # Batch blocking: one grid step handles Nb samples.
    Nb = N if N <= block_n else block_n
    Np = ((N + Nb - 1) // Nb) * Nb
    if Np != N:
        x = jnp.pad(x, ((0, Np - N), (0, 0), (0, 0)))

    out = pl.pallas_call(
        _fused_aux_kernel,
        out_shape=jax.ShapeDtypeStruct((Np, Kp), jnp.float32),
        grid_spec=pltpu.PrefetchScalarGridSpec(
            num_scalar_prefetch=0,
            grid=(Np // Nb,),
            in_specs=[
                pl.BlockSpec((Nb, HW, C), lambda n: (n, 0, 0)),
                pl.BlockSpec((25, HW), lambda n: (0, 0)),
                pl.BlockSpec((C, 128), lambda n: (0, 0)),
                pl.BlockSpec((1, 128), lambda n: (0, 0)),
                pl.BlockSpec((25, 128, 768), lambda n: (0, 0, 0)),
                pl.BlockSpec((1, 768), lambda n: (0, 0)),
                pl.BlockSpec((768, Kp), lambda n: (0, 0)),
                pl.BlockSpec((1, Kp), lambda n: (0, 0)),
            ],
            out_specs=pl.BlockSpec((Nb, Kp), lambda n: (n, 0)),
        ),
        compiler_params=pltpu.CompilerParams(
            dimension_semantics=("parallel",)),
    )(x, pm, w0, b0, w1, b1, wfc, bfc)

    return out[:N, :K]


# --------------------------------------------------------------------------
# Pure-JAX reference (NCHW, matches PyTorch semantics with eval-mode BN).
# --------------------------------------------------------------------------
def reference_forward(x, p):
    def bn_relu(y, g, b, m, v):
        g = g.reshape(1, -1, 1, 1)
        b = b.reshape(1, -1, 1, 1)
        m = m.reshape(1, -1, 1, 1)
        v = v.reshape(1, -1, 1, 1)
        return jnp.maximum((y - m) * g * lax.rsqrt(v + EPS) + b, 0.0)

    pooled = lax.reduce_window(x, 0.0, lax.add,
                               (1, 1, 5, 5), (1, 1, 3, 3), "VALID") / 25.0
    conv = functools.partial(
        lax.conv_general_dilated, window_strides=(1, 1), padding="VALID",
        dimension_numbers=("NCHW", "OIHW", "NCHW"),
        precision=lax.Precision.HIGHEST)
    y0 = bn_relu(conv(pooled, p["conv0_w"]),
                 p["bn0_gamma"], p["bn0_beta"], p["bn0_mean"], p["bn0_var"])
    y1 = bn_relu(conv(y0, p["conv1_w"]),
                 p["bn1_gamma"], p["bn1_beta"], p["bn1_mean"], p["bn1_var"])
    flat = y1.reshape(x.shape[0], -1)
    return jnp.dot(flat, p["fc_w"].T, precision=lax.Precision.HIGHEST) + p["fc_b"]


def make_params(key, in_channels, num_classes):
    ks = jax.random.split(key, 12)
    f32 = jnp.float32
    return {
        "conv0_w":   jax.random.normal(ks[0], (128, in_channels, 1, 1), f32) * 0.1,
        "bn0_gamma": jax.random.uniform(ks[1], (128,), f32, 0.5, 1.5),
        "bn0_beta":  jax.random.normal(ks[2], (128,), f32) * 0.1,
        "bn0_mean":  jax.random.normal(ks[3], (128,), f32) * 0.1,
        "bn0_var":   jax.random.uniform(ks[4], (128,), f32, 0.5, 1.5),
        "conv1_w":   jax.random.normal(ks[5], (768, 128, 5, 5), f32) * 0.01,
        "bn1_gamma": jax.random.uniform(ks[6], (768,), f32, 0.5, 1.5),
        "bn1_beta":  jax.random.normal(ks[7], (768,), f32) * 0.1,
        "bn1_mean":  jax.random.normal(ks[8], (768,), f32) * 0.1,
        "bn1_var":   jax.random.uniform(ks[9], (768,), f32, 0.5, 1.5),
        "fc_w":      jax.random.normal(ks[10], (num_classes, 768), f32) * 0.001,
        "fc_b":      jax.random.normal(ks[11], (num_classes,), f32) * 0.001,
    }


if __name__ == "__main__":
    batch, in_channels, spatial, num_classes = 2, 8, 17, 10  # 17x17 -> pool -> 5x5
    key = jax.random.PRNGKey(0)
    kx, kp = jax.random.split(key)
    x = jax.random.normal(kx, (batch, in_channels, spatial, spatial), jnp.float32)
    params = make_params(kp, in_channels, num_classes)

    out = inception_aux_forward(x, params)
    out = jax.block_until_ready(out)

    ref = jax.block_until_ready(reference_forward(x, params))
    assert out.shape == (batch, num_classes)
    assert jnp.allclose(out, ref, rtol=2e-2, atol=1e-3), \
        f"mismatch: max abs err = {float(jnp.max(jnp.abs(out - ref)))}"

    print("KERNEL_OK")
</pallas_src>

<mosaic_0001>
module attributes {stable_mosaic.version = 11 : i64} {
  func.func @_fused_aux_kernel(%arg0: i32, %arg1: memref<2x289x8xf32, #tpu.memory_space<vmem>>, %arg2: memref<25x289xf32, #tpu.memory_space<vmem>>, %arg3: memref<8x128xf32, #tpu.memory_space<vmem>>, %arg4: memref<1x128xf32, #tpu.memory_space<vmem>>, %arg5: memref<25x128x768xbf16, #tpu.memory_space<vmem>>, %arg6: memref<1x768xf32, #tpu.memory_space<vmem>>, %arg7: memref<768x128xbf16, #tpu.memory_space<vmem>>, %arg8: memref<1x128xf32, #tpu.memory_space<vmem>>, %arg9: memref<2x128xf32, #tpu.memory_space<vmem>>) attributes {dimension_semantics = [#tpu.dimension_semantics<parallel>], iteration_bounds = array<i64: 1>, scalar_prefetch = 0 : i64, scratch_operands = 0 : i64, tpu.core_type = #tpu.core_type<tc>, window_params = [{transform_indices = @transform_0, window_bounds = array<i64: 2, 289, 8>}, {pipeline_mode = #tpu.pipeline_mode<synchronous>, transform_indices = @transform_1, window_bounds = array<i64: 25, 289>}, {pipeline_mode = #tpu.pipeline_mode<synchronous>, transform_indices = @transform_2, window_bounds = array<i64: 8, 128>}, {pipeline_mode = #tpu.pipeline_mode<synchronous>, transform_indices = @transform_3, window_bounds = array<i64: 1, 128>}, {pipeline_mode = #tpu.pipeline_mode<synchronous>, transform_indices = @transform_4, window_bounds = array<i64: 25, 128, 768>}, {pipeline_mode = #tpu.pipeline_mode<synchronous>, transform_indices = @transform_5, window_bounds = array<i64: 1, 768>}, {pipeline_mode = #tpu.pipeline_mode<synchronous>, transform_indices = @transform_6, window_bounds = array<i64: 768, 128>}, {pipeline_mode = #tpu.pipeline_mode<synchronous>, transform_indices = @transform_7, window_bounds = array<i64: 1, 128>}, {transform_indices = @transform_8, window_bounds = array<i64: 2, 128>}]} {
    %c0 = arith.constant 0 : index
    %c0_0 = arith.constant 0 : index
    %0 = vector.load %arg2[%c0, %c0_0] : memref<25x289xf32, #tpu.memory_space<vmem>>, vector<25x289xf32>
    %c0_1 = arith.constant 0 : index
    %c0_2 = arith.constant 0 : index
    %1 = vector.load %arg3[%c0_1, %c0_2] : memref<8x128xf32, #tpu.memory_space<vmem>>, vector<8x128xf32>
    %c0_3 = arith.constant 0 : index
    %c0_4 = arith.constant 0 : index
    %2 = vector.load %arg4[%c0_3, %c0_4] : memref<1x128xf32, #tpu.memory_space<vmem>>, vector<1x128xf32>
    %c0_5 = arith.constant 0 : index
    %c0_6 = arith.constant 0 : index
    %3 = vector.load %arg6[%c0_5, %c0_6] : memref<1x768xf32, #tpu.memory_space<vmem>>, vector<1x768xf32>
    %c0_7 = arith.constant 0 : index
    %c0_8 = arith.constant 0 : index
    %4 = vector.load %arg7[%c0_7, %c0_8] : memref<768x128xbf16, #tpu.memory_space<vmem>>, vector<768x128xbf16>
    %c0_9 = arith.constant 0 : index
    %c0_10 = arith.constant 0 : index
    %5 = vector.load %arg8[%c0_9, %c0_10] : memref<1x128xf32, #tpu.memory_space<vmem>>, vector<1x128xf32>
    %c0_11 = arith.constant 0 : index
    %c0_12 = arith.constant 0 : index
    %c0_13 = arith.constant 0 : index
    %6 = vector.load %arg1[%c0_11, %c0_12, %c0_13] : memref<2x289x8xf32, #tpu.memory_space<vmem>>, vector<1x289x8xf32>
    %7 = vector.shape_cast %6 : vector<1x289x8xf32> to vector<289x8xf32>
    %cst = arith.constant dense<0.000000e+00> : vector<25x8xf32>
    %8 = tpu.matmul %0, %7, %cst {dimension_numbers = #tpu.dot_dimension_numbers<[1], [0], [0], [1], [0, 0, 1, 1], [], []>} : vector<25x289xf32>, vector<289x8xf32>, vector<25x8xf32> -> vector<25x8xf32>
    %cst_14 = arith.constant dense<0.000000e+00> : vector<25x128xf32>
    %9 = tpu.matmul %8, %1, %cst_14 {dimension_numbers = #tpu.dot_dimension_numbers<[1], [0], [0], [1], [0, 0, 1, 1], [], []>} : vector<25x8xf32>, vector<8x128xf32>, vector<25x128xf32> -> vector<25x128xf32>
    %10 = vector.broadcast %2 : vector<1x128xf32> to vector<25x128xf32>
    %11 = arith.addf %9, %10 : vector<25x128xf32>
    %cst_15 = arith.constant 0.000000e+00 : f32
    %12 = vector.broadcast %cst_15 : f32 to vector<25x128xf32>
    %13 = arith.maximumf %11, %12 : vector<25x128xf32>
    %14 = arith.truncf %13 : vector<25x128xf32> to vector<25x128xbf16>
    %c1 = arith.constant 1 : index
    %c0_16 = arith.constant 0 : index
    %c0_17 = arith.constant 0 : index
    %15 = vector.load %arg1[%c1, %c0_16, %c0_17] : memref<2x289x8xf32, #tpu.memory_space<vmem>>, vector<1x289x8xf32>
    %16 = vector.shape_cast %15 : vector<1x289x8xf32> to vector<289x8xf32>
    %cst_18 = arith.constant dense<0.000000e+00> : vector<25x8xf32>
    %17 = tpu.matmul %0, %16, %cst_18 {dimension_numbers = #tpu.dot_dimension_numbers<[1], [0], [0], [1], [0, 0, 1, 1], [], []>} : vector<25x289xf32>, vector<289x8xf32>, vector<25x8xf32> -> vector<25x8xf32>
    %cst_19 = arith.constant dense<0.000000e+00> : vector<25x128xf32>
    %18 = tpu.matmul %17, %1, %cst_19 {dimension_numbers = #tpu.dot_dimension_numbers<[1], [0], [0], [1], [0, 0, 1, 1], [], []>} : vector<25x8xf32>, vector<8x128xf32>, vector<25x128xf32> -> vector<25x128xf32>
    %19 = vector.broadcast %2 : vector<1x128xf32> to vector<25x128xf32>
    %20 = arith.addf %18, %19 : vector<25x128xf32>
    %cst_20 = arith.constant 0.000000e+00 : f32
    %21 = vector.broadcast %cst_20 : f32 to vector<25x128xf32>
    %22 = arith.maximumf %20, %21 : vector<25x128xf32>
    %23 = arith.truncf %22 : vector<25x128xf32> to vector<25x128xbf16>
    %cst_21 = arith.constant 0.000000e+00 : f32
    %24 = vector.broadcast %cst_21 : f32 to vector<1x768xf32>
    %cst_22 = arith.constant 0.000000e+00 : f32
    %25 = vector.broadcast %cst_22 : f32 to vector<1x768xf32>
    %c0_23 = arith.constant 0 : index
    %c0_24 = arith.constant 0 : index
    %c0_25 = arith.constant 0 : index
    %26 = vector.load %arg5[%c0_23, %c0_24, %c0_25] : memref<25x128x768xbf16, #tpu.memory_space<vmem>>, vector<1x128x768xbf16>
    %27 = vector.shape_cast %26 : vector<1x128x768xbf16> to vector<128x768xbf16>
    %28 = vector.extract_strided_slice %14 {offsets = [0, 0], sizes = [1, 128], strides = [1, 1]} : vector<25x128xbf16> to vector<1x128xbf16>
    %cst_26 = arith.constant dense<0.000000e+00> : vector<1x768xf32>
    %29 = tpu.matmul %28, %27, %cst_26 {dimension_numbers = #tpu.dot_dimension_numbers<[1], [0], [0], [1], [0, 0, 1, 1], [], []>} : vector<1x128xbf16>, vector<128x768xbf16>, vector<1x768xf32> -> vector<1x768xf32>
    %30 = arith.addf %24, %29 : vector<1x768xf32>
    %31 = vector.extract_strided_slice %23 {offsets = [0, 0], sizes = [1, 128], strides = [1, 1]} : vector<25x128xbf16> to vector<1x128xbf16>
    %cst_27 = arith.constant dense<0.000000e+00> : vector<1x768xf32>
    %32 = tpu.matmul %31, %27, %cst_27 {dimension_numbers = #tpu.dot_dimension_numbers<[1], [0], [0], [1], [0, 0, 1, 1], [], []>} : vector<1x128xbf16>, vector<128x768xbf16>, vector<1x768xf32> -> vector<1x768xf32>
    %33 = arith.addf %25, %32 : vector<1x768xf32>
    %c1_28 = arith.constant 1 : index
    %c0_29 = arith.constant 0 : index
    %c0_30 = arith.constant 0 : index
    %34 = vector.load %arg5[%c1_28, %c0_29, %c0_30] : memref<25x128x768xbf16, #tpu.memory_space<vmem>>, vector<1x128x768xbf16>
    %35 = vector.shape_cast %34 : vector<1x128x768xbf16> to vector<128x768xbf16>
    %36 = vector.extract_strided_slice %14 {offsets = [1, 0], sizes = [1, 128], strides = [1, 1]} : vector<25x128xbf16> to vector<1x128xbf16>
    %cst_31 = arith.constant dense<0.000000e+00> : vector<1x768xf32>
    %37 = tpu.matmul %36, %35, %cst_31 {dimension_numbers = #tpu.dot_dimension_numbers<[1], [0], [0], [1], [0, 0, 1, 1], [], []>} : vector<1x128xbf16>, vector<128x768xbf16>, vector<1x768xf32> -> vector<1x768xf32>
    %38 = arith.addf %30, %37 : vector<1x768xf32>
    %39 = vector.extract_strided_slice %23 {offsets = [1, 0], sizes = [1, 128], strides = [1, 1]} : vector<25x128xbf16> to vector<1x128xbf16>
    %cst_32 = arith.constant dense<0.000000e+00> : vector<1x768xf32>
    %40 = tpu.matmul %39, %35, %cst_32 {dimension_numbers = #tpu.dot_dimension_numbers<[1], [0], [0], [1], [0, 0, 1, 1], [], []>} : vector<1x128xbf16>, vector<128x768xbf16>, vector<1x768xf32> -> vector<1x768xf32>
    %41 = arith.addf %33, %40 : vector<1x768xf32>
    %c2 = arith.constant 2 : index
    %c0_33 = arith.constant 0 : index
    %c0_34 = arith.constant 0 : index
    %42 = vector.load %arg5[%c2, %c0_33, %c0_34] : memref<25x128x768xbf16, #tpu.memory_space<vmem>>, vector<1x128x768xbf16>
    %43 = vector.shape_cast %42 : vector<1x128x768xbf16> to vector<128x768xbf16>
    %44 = vector.extract_strided_slice %14 {offsets = [2, 0], sizes = [1, 128], strides = [1, 1]} : vector<25x128xbf16> to vector<1x128xbf16>
    %cst_35 = arith.constant dense<0.000000e+00> : vector<1x768xf32>
    %45 = tpu.matmul %44, %43, %cst_35 {dimension_numbers = #tpu.dot_dimension_numbers<[1], [0], [0], [1], [0, 0, 1, 1], [], []>} : vector<1x128xbf16>, vector<128x768xbf16>, vector<1x768xf32> -> vector<1x768xf32>
    %46 = arith.addf %38, %45 : vector<1x768xf32>
    %47 = vector.extract_strided_slice %23 {offsets = [2, 0], sizes = [1, 128], strides = [1, 1]} : vector<25x128xbf16> to vector<1x128xbf16>
    %cst_36 = arith.constant dense<0.000000e+00> : vector<1x768xf32>
    %48 = tpu.matmul %47, %43, %cst_36 {dimension_numbers = #tpu.dot_dimension_numbers<[1], [0], [0], [1], [0, 0, 1, 1], [], []>} : vector<1x128xbf16>, vector<128x768xbf16>, vector<1x768xf32> -> vector<1x768xf32>
    %49 = arith.addf %41, %48 : vector<1x768xf32>
    %c3 = arith.constant 3 : index
    %c0_37 = arith.constant 0 : index
    %c0_38 = arith.constant 0 : index
    %50 = vector.load %arg5[%c3, %c0_37, %c0_38] : memref<25x128x768xbf16, #tpu.memory_space<vmem>>, vector<1x128x768xbf16>
    %51 = vector.shape_cast %50 : vector<1x128x768xbf16> to vector<128x768xbf16>
    %52 = vector.extract_strided_slice %14 {offsets = [3, 0], sizes = [1, 128], strides = [1, 1]} : vector<25x128xbf16> to vector<1x128xbf16>
    %cst_39 = arith.constant dense<0.000000e+00> : vector<1x768xf32>
    %53 = tpu.matmul %52, %51, %cst_39 {dimension_numbers = #tpu.dot_dimension_numbers<[1], [0], [0], [1], [0, 0, 1, 1], [], []>} : vector<1x128xbf16>, vector<128x768xbf16>, vector<1x768xf32> -> vector<1x768xf32>
    %54 = arith.addf %46, %53 : vector<1x768xf32>
    %55 = vector.extract_strided_slice %23 {offsets = [3, 0], sizes = [1, 128], strides = [1, 1]} : vector<25x128xbf16> to vector<1x128xbf16>
    %cst_40 = arith.constant dense<0.000000e+00> : vector<1x768xf32>
    %56 = tpu.matmul %55, %51, %cst_40 {dimension_numbers = #tpu.dot_dimension_numbers<[1], [0], [0], [1], [0, 0, 1, 1], [], []>} : vector<1x128xbf16>, vector<128x768xbf16>, vector<1x768xf32> -> vector<1x768xf32>
    %57 = arith.addf %49, %56 : vector<1x768xf32>
    %c4 = arith.constant 4 : index
    %c0_41 = arith.constant 0 : index
    %c0_42 = arith.constant 0 : index
    %58 = vector.load %arg5[%c4, %c0_41, %c0_42] : memref<25x128x768xbf16, #tpu.memory_space<vmem>>, vector<1x128x768xbf16>
    %59 = vector.shape_cast %58 : vector<1x128x768xbf16> to vector<128x768xbf16>
    %60 = vector.extract_strided_slice %14 {offsets = [4, 0], sizes = [1, 128], strides = [1, 1]} : vector<25x128xbf16> to vector<1x128xbf16>
    %cst_43 = arith.constant dense<0.000000e+00> : vector<1x768xf32>
    %61 = tpu.matmul %60, %59, %cst_43 {dimension_numbers = #tpu.dot_dimension_numbers<[1], [0], [0], [1], [0, 0, 1, 1], [], []>} : vector<1x128xbf16>, vector<128x768xbf16>, vector<1x768xf32> -> vector<1x768xf32>
    %62 = arith.addf %54, %61 : vector<1x768xf32>
    %63 = vector.extract_strided_slice %23 {offsets = [4, 0], sizes = [1, 128], strides = [1, 1]} : vector<25x128xbf16> to vector<1x128xbf16>
    %cst_44 = arith.constant dense<0.000000e+00> : vector<1x768xf32>
    %64 = tpu.matmul %63, %59, %cst_44 {dimension_numbers = #tpu.dot_dimension_numbers<[1], [0], [0], [1], [0, 0, 1, 1], [], []>} : vector<1x128xbf16>, vector<128x768xbf16>, vector<1x768xf32> -> vector<1x768xf32>
    %65 = arith.addf %57, %64 : vector<1x768xf32>
    %c5 = arith.constant 5 : index
    %c0_45 = arith.constant 0 : index
    %c0_46 = arith.constant 0 : index
    %66 = vector.load %arg5[%c5, %c0_45, %c0_46] : memref<25x128x768xbf16, #tpu.memory_space<vmem>>, vector<1x128x768xbf16>
    %67 = vector.shape_cast %66 : vector<1x128x768xbf16> to vector<128x768xbf16>
    %68 = vector.extract_strided_slice %14 {offsets = [5, 0], sizes = [1, 128], strides = [1, 1]} : vector<25x128xbf16> to vector<1x128xbf16>
    %cst_47 = arith.constant dense<0.000000e+00> : vector<1x768xf32>
    %69 = tpu.matmul %68, %67, %cst_47 {dimension_numbers = #tpu.dot_dimension_numbers<[1], [0], [0], [1], [0, 0, 1, 1], [], []>} : vector<1x128xbf16>, vector<128x768xbf16>, vector<1x768xf32> -> vector<1x768xf32>
    %70 = arith.addf %62, %69 : vector<1x768xf32>
    %71 = vector.extract_strided_slice %23 {offsets = [5, 0], sizes = [1, 128], strides = [1, 1]} : vector<25x128xbf16> to vector<1x128xbf16>
    %cst_48 = arith.constant dense<0.000000e+00> : vector<1x768xf32>
    %72 = tpu.matmul %71, %67, %cst_48 {dimension_numbers = #tpu.dot_dimension_numbers<[1], [0], [0], [1], [0, 0, 1, 1], [], []>} : vector<1x128xbf16>, vector<128x768xbf16>, vector<1x768xf32> -> vector<1x768xf32>
    %73 = arith.addf %65, %72 : vector<1x768xf32>
    %c6 = arith.constant 6 : index
    %c0_49 = arith.constant 0 : index
    %c0_50 = arith.constant 0 : index
    %74 = vector.load %arg5[%c6, %c0_49, %c0_50] : memref<25x128x768xbf16, #tpu.memory_space<vmem>>, vector<1x128x768xbf16>
    %75 = vector.shape_cast %74 : vector<1x128x768xbf16> to vector<128x768xbf16>
    %76 = vector.extract_strided_slice %14 {offsets = [6, 0], sizes = [1, 128], strides = [1, 1]} : vector<25x128xbf16> to vector<1x128xbf16>
    %cst_51 = arith.constant dense<0.000000e+00> : vector<1x768xf32>
    %77 = tpu.matmul %76, %75, %cst_51 {dimension_numbers = #tpu.dot_dimension_numbers<[1], [0], [0], [1], [0, 0, 1, 1], [], []>} : vector<1x128xbf16>, vector<128x768xbf16>, vector<1x768xf32> -> vector<1x768xf32>
    %78 = arith.addf %70, %77 : vector<1x768xf32>
    %79 = vector.extract_strided_slice %23 {offsets = [6, 0], sizes = [1, 128], strides = [1, 1]} : vector<25x128xbf16> to vector<1x128xbf16>
    %cst_52 = arith.constant dense<0.000000e+00> : vector<1x768xf32>
    %80 = tpu.matmul %79, %75, %cst_52 {dimension_numbers = #tpu.dot_dimension_numbers<[1], [0], [0], [1], [0, 0, 1, 1], [], []>} : vector<1x128xbf16>, vector<128x768xbf16>, vector<1x768xf32> -> vector<1x768xf32>
    %81 = arith.addf %73, %80 : vector<1x768xf32>
    %c7 = arith.constant 7 : index
    %c0_53 = arith.constant 0 : index
    %c0_54 = arith.constant 0 : index
    %82 = vector.load %arg5[%c7, %c0_53, %c0_54] : memref<25x128x768xbf16, #tpu.memory_space<vmem>>, vector<1x128x768xbf16>
    %83 = vector.shape_cast %82 : vector<1x128x768xbf16> to vector<128x768xbf16>
    %84 = vector.extract_strided_slice %14 {offsets = [7, 0], sizes = [1, 128], strides = [1, 1]} : vector<25x128xbf16> to vector<1x128xbf16>
    %cst_55 = arith.constant dense<0.000000e+00> : vector<1x768xf32>
    %85 = tpu.matmul %84, %83, %cst_55 {dimension_numbers = #tpu.dot_dimension_numbers<[1], [0], [0], [1], [0, 0, 1, 1], [], []>} : vector<1x128xbf16>, vector<128x768xbf16>, vector<1x768xf32> -> vector<1x768xf32>
    %86 = arith.addf %78, %85 : vector<1x768xf32>
    %87 = vector.extract_strided_slice %23 {offsets = [7, 0], sizes = [1, 128], strides = [1, 1]} : vector<25x128xbf16> to vector<1x128xbf16>
    %cst_56 = arith.constant dense<0.000000e+00> : vector<1x768xf32>
    %88 = tpu.matmul %87, %83, %cst_56 {dimension_numbers = #tpu.dot_dimension_numbers<[1], [0], [0], [1], [0, 0, 1, 1], [], []>} : vector<1x128xbf16>, vector<128x768xbf16>, vector<1x768xf32> -> vector<1x768xf32>
    %89 = arith.addf %81, %88 : vector<1x768xf32>
    %c8 = arith.constant 8 : index
    %c0_57 = arith.constant 0 : index
    %c0_58 = arith.constant 0 : index
    %90 = vector.load %arg5[%c8, %c0_57, %c0_58] : memref<25x128x768xbf16, #tpu.memory_space<vmem>>, vector<1x128x768xbf16>
    %91 = vector.shape_cast %90 : vector<1x128x768xbf16> to vector<128x768xbf16>
    %92 = vector.extract_strided_slice %14 {offsets = [8, 0], sizes = [1, 128], strides = [1, 1]} : vector<25x128xbf16> to vector<1x128xbf16>
    %cst_59 = arith.constant dense<0.000000e+00> : vector<1x768xf32>
    %93 = tpu.matmul %92, %91, %cst_59 {dimension_numbers = #tpu.dot_dimension_numbers<[1], [0], [0], [1], [0, 0, 1, 1], [], []>} : vector<1x128xbf16>, vector<128x768xbf16>, vector<1x768xf32> -> vector<1x768xf32>
    %94 = arith.addf %86, %93 : vector<1x768xf32>
    %95 = vector.extract_strided_slice %23 {offsets = [8, 0], sizes = [1, 128], strides = [1, 1]} : vector<25x128xbf16> to vector<1x128xbf16>
    %cst_60 = arith.constant dense<0.000000e+00> : vector<1x768xf32>
    %96 = tpu.matmul %95, %91, %cst_60 {dimension_numbers = #tpu.dot_dimension_numbers<[1], [0], [0], [1], [0, 0, 1, 1], [], []>} : vector<1x128xbf16>, vector<128x768xbf16>, vector<1x768xf32> -> vector<1x768xf32>
    %97 = arith.addf %89, %96 : vector<1x768xf32>
    %c9 = arith.constant 9 : index
    %c0_61 = arith.constant 0 : index
    %c0_62 = arith.constant 0 : index
    %98 = vector.load %arg5[%c9, %c0_61, %c0_62] : memref<25x128x768xbf16, #tpu.memory_space<vmem>>, vector<1x128x768xbf16>
    %99 = vector.shape_cast %98 : vector<1x128x768xbf16> to vector<128x768xbf16>
    %100 = vector.extract_strided_slice %14 {offsets = [9, 0], sizes = [1, 128], strides = [1, 1]} : vector<25x128xbf16> to vector<1x128xbf16>
    %cst_63 = arith.constant dense<0.000000e+00> : vector<1x768xf32>
    %101 = tpu.matmul %100, %99, %cst_63 {dimension_numbers = #tpu.dot_dimension_numbers<[1], [0], [0], [1], [0, 0, 1, 1], [], []>} : vector<1x128xbf16>, vector<128x768xbf16>, vector<1x768xf32> -> vector<1x768xf32>
    %102 = arith.addf %94, %101 : vector<1x768xf32>
    %103 = vector.extract_strided_slice %23 {offsets = [9, 0], sizes = [1, 128], strides = [1, 1]} : vector<25x128xbf16> to vector<1x128xbf16>
    %cst_64 = arith.constant dense<0.000000e+00> : vector<1x768xf32>
    %104 = tpu.matmul %103, %99, %cst_64 {dimension_numbers = #tpu.dot_dimension_numbers<[1], [0], [0], [1], [0, 0, 1, 1], [], []>} : vector<1x128xbf16>, vector<128x768xbf16>, vector<1x768xf32> -> vector<1x768xf32>
    %105 = arith.addf %97, %104 : vector<1x768xf32>
    %c10 = arith.constant 10 : index
    %c0_65 = arith.constant 0 : index
    %c0_66 = arith.constant 0 : index
    %106 = vector.load %arg5[%c10, %c0_65, %c0_66] : memref<25x128x768xbf16, #tpu.memory_space<vmem>>, vector<1x128x768xbf16>
    %107 = vector.shape_cast %106 : vector<1x128x768xbf16> to vector<128x768xbf16>
    %108 = vector.extract_strided_slice %14 {offsets = [10, 0], sizes = [1, 128], strides = [1, 1]} : vector<25x128xbf16> to vector<1x128xbf16>
    %cst_67 = arith.constant dense<0.000000e+00> : vector<1x768xf32>
    %109 = tpu.matmul %108, %107, %cst_67 {dimension_numbers = #tpu.dot_dimension_numbers<[1], [0], [0], [1], [0, 0, 1, 1], [], []>} : vector<1x128xbf16>, vector<128x768xbf16>, vector<1x768xf32> -> vector<1x768xf32>
    %110 = arith.addf %102, %109 : vector<1x768xf32>
    %111 = vector.extract_strided_slice %23 {offsets = [10, 0], sizes = [1, 128], strides = [1, 1]} : vector<25x128xbf16> to vector<1x128xbf16>
    %cst_68 = arith.constant dense<0.000000e+00> : vector<1x768xf32>
    %112 = tpu.matmul %111, %107, %cst_68 {dimension_numbers = #tpu.dot_dimension_numbers<[1], [0], [0], [1], [0, 0, 1, 1], [], []>} : vector<1x128xbf16>, vector<128x768xbf16>, vector<1x768xf32> -> vector<1x768xf32>
    %113 = arith.addf %105, %112 : vector<1x768xf32>
    %c11 = arith.constant 11 : index
    %c0_69 = arith.constant 0 : index
    %c0_70 = arith.constant 0 : index
    %114 = vector.load %arg5[%c11, %c0_69, %c0_70] : memref<25x128x768xbf16, #tpu.memory_space<vmem>>, vector<1x128x768xbf16>
    %115 = vector.shape_cast %114 : vector<1x128x768xbf16> to vector<128x768xbf16>
    %116 = vector.extract_strided_slice %14 {offsets = [11, 0], sizes = [1, 128], strides = [1, 1]} : vector<25x128xbf16> to vector<1x128xbf16>
    %cst_71 = arith.constant dense<0.000000e+00> : vector<1x768xf32>
    %117 = tpu.matmul %116, %115, %cst_71 {dimension_numbers = #tpu.dot_dimension_numbers<[1], [0], [0], [1], [0, 0, 1, 1], [], []>} : vector<1x128xbf16>, vector<128x768xbf16>, vector<1x768xf32> -> vector<1x768xf32>
    %118 = arith.addf %110, %117 : vector<1x768xf32>
    %119 = vector.extract_strided_slice %23 {offsets = [11, 0], sizes = [1, 128], strides = [1, 1]} : vector<25x128xbf16> to vector<1x128xbf16>
    %cst_72 = arith.constant dense<0.000000e+00> : vector<1x768xf32>
    %120 = tpu.matmul %119, %115, %cst_72 {dimension_numbers = #tpu.dot_dimension_numbers<[1], [0], [0], [1], [0, 0, 1, 1], [], []>} : vector<1x128xbf16>, vector<128x768xbf16>, vector<1x768xf32> -> vector<1x768xf32>
    %121 = arith.addf %113, %120 : vector<1x768xf32>
    %c12 = arith.constant 12 : index
    %c0_73 = arith.constant 0 : index
    %c0_74 = arith.constant 0 : index
    %122 = vector.load %arg5[%c12, %c0_73, %c0_74] : memref<25x128x768xbf16, #tpu.memory_space<vmem>>, vector<1x128x768xbf16>
    %123 = vector.shape_cast %122 : vector<1x128x768xbf16> to vector<128x768xbf16>
    %124 = vector.extract_strided_slice %14 {offsets = [12, 0], sizes = [1, 128], strides = [1, 1]} : vector<25x128xbf16> to vector<1x128xbf16>
    %cst_75 = arith.constant dense<0.000000e+00> : vector<1x768xf32>
    %125 = tpu.matmul %124, %123, %cst_75 {dimension_numbers = #tpu.dot_dimension_numbers<[1], [0], [0], [1], [0, 0, 1, 1], [], []>} : vector<1x128xbf16>, vector<128x768xbf16>, vector<1x768xf32> -> vector<1x768xf32>
    %126 = arith.addf %118, %125 : vector<1x768xf32>
    %127 = vector.extract_strided_slice %23 {offsets = [12, 0], sizes = [1, 128], strides = [1, 1]} : vector<25x128xbf16> to vector<1x128xbf16>
    %cst_76 = arith.constant dense<0.000000e+00> : vector<1x768xf32>
    %128 = tpu.matmul %127, %123, %cst_76 {dimension_numbers = #tpu.dot_dimension_numbers<[1], [0], [0], [1], [0, 0, 1, 1], [], []>} : vector<1x128xbf16>, vector<128x768xbf16>, vector<1x768xf32> -> vector<1x768xf32>
    %129 = arith.addf %121, %128 : vector<1x768xf32>
    %c13 = arith.constant 13 : index
    %c0_77 = arith.constant 0 : index
    %c0_78 = arith.constant 0 : index
    %130 = vector.load %arg5[%c13, %c0_77, %c0_78] : memref<25x128x768xbf16, #tpu.memory_space<vmem>>, vector<1x128x768xbf16>
    %131 = vector.shape_cast %130 : vector<1x128x768xbf16> to vector<128x768xbf16>
    %132 = vector.extract_strided_slice %14 {offsets = [13, 0], sizes = [1, 128], strides = [1, 1]} : vector<25x128xbf16> to vector<1x128xbf16>
    %cst_79 = arith.constant dense<0.000000e+00> : vector<1x768xf32>
    %133 = tpu.matmul %132, %131, %cst_79 {dimension_numbers = #tpu.dot_dimension_numbers<[1], [0], [0], [1], [0, 0, 1, 1], [], []>} : vector<1x128xbf16>, vector<128x768xbf16>, vector<1x768xf32> -> vector<1x768xf32>
    %134 = arith.addf %126, %133 : vector<1x768xf32>
    %135 = vector.extract_strided_slice %23 {offsets = [13, 0], sizes = [1, 128], strides = [1, 1]} : vector<25x128xbf16> to vector<1x128xbf16>
    %cst_80 = arith.constant dense<0.000000e+00> : vector<1x768xf32>
    %136 = tpu.matmul %135, %131, %cst_80 {dimension_numbers = #tpu.dot_dimension_numbers<[1], [0], [0], [1], [0, 0, 1, 1], [], []>} : vector<1x128xbf16>, vector<128x768xbf16>, vector<1x768xf32> -> vector<1x768xf32>
    %137 = arith.addf %129, %136 : vector<1x768xf32>
    %c14 = arith.constant 14 : index
    %c0_81 = arith.constant 0 : index
    %c0_82 = arith.constant 0 : index
    %138 = vector.load %arg5[%c14, %c0_81, %c0_82] : memref<25x128x768xbf16, #tpu.memory_space<vmem>>, vector<1x128x768xbf16>
    %139 = vector.shape_cast %138 : vector<1x128x768xbf16> to vector<128x768xbf16>
    %140 = vector.extract_strided_slice %14 {offsets = [14, 0], sizes = [1, 128], strides = [1, 1]} : vector<25x128xbf16> to vector<1x128xbf16>
    %cst_83 = arith.constant dense<0.000000e+00> : vector<1x768xf32>
    %141 = tpu.matmul %140, %139, %cst_83 {dimension_numbers = #tpu.dot_dimension_numbers<[1], [0], [0], [1], [0, 0, 1, 1], [], []>} : vector<1x128xbf16>, vector<128x768xbf16>, vector<1x768xf32> -> vector<1x768xf32>
    %142 = arith.addf %134, %141 : vector<1x768xf32>
    %143 = vector.extract_strided_slice %23 {offsets = [14, 0], sizes = [1, 128], strides = [1, 1]} : vector<25x128xbf16> to vector<1x128xbf16>
    %cst_84 = arith.constant dense<0.000000e+00> : vector<1x768xf32>
    %144 = tpu.matmul %143, %139, %cst_84 {dimension_numbers = #tpu.dot_dimension_numbers<[1], [0], [0], [1], [0, 0, 1, 1], [], []>} : vector<1x128xbf16>, vector<128x768xbf16>, vector<1x768xf32> -> vector<1x768xf32>
    %145 = arith.addf %137, %144 : vector<1x768xf32>
    %c15 = arith.constant 15 : index
    %c0_85 = arith.constant 0 : index
    %c0_86 = arith.constant 0 : index
    %146 = vector.load %arg5[%c15, %c0_85, %c0_86] : memref<25x128x768xbf16, #tpu.memory_space<vmem>>, vector<1x128x768xbf16>
    %147 = vector.shape_cast %146 : vector<1x128x768xbf16> to vector<128x768xbf16>
    %148 = vector.extract_strided_slice %14 {offsets = [15, 0], sizes = [1, 128], strides = [1, 1]} : vector<25x128xbf16> to vector<1x128xbf16>
    %cst_87 = arith.constant dense<0.000000e+00> : vector<1x768xf32>
    %149 = tpu.matmul %148, %147, %cst_87 {dimension_numbers = #tpu.dot_dimension_numbers<[1], [0], [0], [1], [0, 0, 1, 1], [], []>} : vector<1x128xbf16>, vector<128x768xbf16>, vector<1x768xf32> -> vector<1x768xf32>
    %150 = arith.addf %142, %149 : vector<1x768xf32>
    %151 = vector.extract_strided_slice %23 {offsets = [15, 0], sizes = [1, 128], strides = [1, 1]} : vector<25x128xbf16> to vector<1x128xbf16>
    %cst_88 = arith.constant dense<0.000000e+00> : vector<1x768xf32>
    %152 = tpu.matmul %151, %147, %cst_88 {dimension_numbers = #tpu.dot_dimension_numbers<[1], [0], [0], [1], [0, 0, 1, 1], [], []>} : vector<1x128xbf16>, vector<128x768xbf16>, vector<1x768xf32> -> vector<1x768xf32>
    %153 = arith.addf %145, %152 : vector<1x768xf32>
    %c16 = arith.constant 16 : index
    %c0_89 = arith.constant 0 : index
    %c0_90 = arith.constant 0 : index
    %154 = vector.load %arg5[%c16, %c0_89, %c0_90] : memref<25x128x768xbf16, #tpu.memory_space<vmem>>, vector<1x128x768xbf16>
    %155 = vector.shape_cast %154 : vector<1x128x768xbf16> to vector<128x768xbf16>
    %156 = vector.extract_strided_slice %14 {offsets = [16, 0], sizes = [1, 128], strides = [1, 1]} : vector<25x128xbf16> to vector<1x128xbf16>
    %cst_91 = arith.constant dense<0.000000e+00> : vector<1x768xf32>
    %157 = tpu.matmul %156, %155, %cst_91 {dimension_numbers = #tpu.dot_dimension_numbers<[1], [0], [0], [1], [0, 0, 1, 1], [], []>} : vector<1x128xbf16>, vector<128x768xbf16>, vector<1x768xf32> -> vector<1x768xf32>
    %158 = arith.addf %150, %157 : vector<1x768xf32>
    %159 = vector.extract_strided_slice %23 {offsets = [16, 0], sizes = [1, 128], strides = [1, 1]} : vector<25x128xbf16> to vector<1x128xbf16>
    %cst_92 = arith.constant dense<0.000000e+00> : vector<1x768xf32>
    %160 = tpu.matmul %159, %155, %cst_92 {dimension_numbers = #tpu.dot_dimension_numbers<[1], [0], [0], [1], [0, 0, 1, 1], [], []>} : vector<1x128xbf16>, vector<128x768xbf16>, vector<1x768xf32> -> vector<1x768xf32>
    %161 = arith.addf %153, %160 : vector<1x768xf32>
    %c17 = arith.constant 17 : index
    %c0_93 = arith.constant 0 : index
    %c0_94 = arith.constant 0 : index
    %162 = vector.load %arg5[%c17, %c0_93, %c0_94] : memref<25x128x768xbf16, #tpu.memory_space<vmem>>, vector<1x128x768xbf16>
    %163 = vector.shape_cast %162 : vector<1x128x768xbf16> to vector<128x768xbf16>
    %164 = vector.extract_strided_slice %14 {offsets = [17, 0], sizes = [1, 128], strides = [1, 1]} : vector<25x128xbf16> to vector<1x128xbf16>
    %cst_95 = arith.constant dense<0.000000e+00> : vector<1x768xf32>
    %165 = tpu.matmul %164, %163, %cst_95 {dimension_numbers = #tpu.dot_dimension_numbers<[1], [0], [0], [1], [0, 0, 1, 1], [], []>} : vector<1x128xbf16>, vector<128x768xbf16>, vector<1x768xf32> -> vector<1x768xf32>
    %166 = arith.addf %158, %165 : vector<1x768xf32>
    %167 = vector.extract_strided_slice %23 {offsets = [17, 0], sizes = [1, 128], strides = [1, 1]} : vector<25x128xbf16> to vector<1x128xbf16>
    %cst_96 = arith.constant dense<0.000000e+00> : vector<1x768xf32>
    %168 = tpu.matmul %167, %163, %cst_96 {dimension_numbers = #tpu.dot_dimension_numbers<[1], [0], [0], [1], [0, 0, 1, 1], [], []>} : vector<1x128xbf16>, vector<128x768xbf16>, vector<1x768xf32> -> vector<1x768xf32>
    %169 = arith.addf %161, %168 : vector<1x768xf32>
    %c18 = arith.constant 18 : index
    %c0_97 = arith.constant 0 : index
    %c0_98 = arith.constant 0 : index
    %170 = vector.load %arg5[%c18, %c0_97, %c0_98] : memref<25x128x768xbf16, #tpu.memory_space<vmem>>, vector<1x128x768xbf16>
    %171 = vector.shape_cast %170 : vector<1x128x768xbf16> to vector<128x768xbf16>
    %172 = vector.extract_strided_slice %14 {offsets = [18, 0], sizes = [1, 128], strides = [1, 1]} : vector<25x128xbf16> to vector<1x128xbf16>
    %cst_99 = arith.constant dense<0.000000e+00> : vector<1x768xf32>
    %173 = tpu.matmul %172, %171, %cst_99 {dimension_numbers = #tpu.dot_dimension_numbers<[1], [0], [0], [1], [0, 0, 1, 1], [], []>} : vector<1x128xbf16>, vector<128x768xbf16>, vector<1x768xf32> -> vector<1x768xf32>
    %174 = arith.addf %166, %173 : vector<1x768xf32>
    %175 = vector.extract_strided_slice %23 {offsets = [18, 0], sizes = [1, 128], strides = [1, 1]} : vector<25x128xbf16> to vector<1x128xbf16>
    %cst_100 = arith.constant dense<0.000000e+00> : vector<1x768xf32>
    %176 = tpu.matmul %175, %171, %cst_100 {dimension_numbers = #tpu.dot_dimension_numbers<[1], [0], [0], [1], [0, 0, 1, 1], [], []>} : vector<1x128xbf16>, vector<128x768xbf16>, vector<1x768xf32> -> vector<1x768xf32>
    %177 = arith.addf %169, %176 : vector<1x768xf32>
    %c19 = arith.constant 19 : index
    %c0_101 = arith.constant 0 : index
    %c0_102 = arith.constant 0 : index
    %178 = vector.load %arg5[%c19, %c0_101, %c0_102] : memref<25x128x768xbf16, #tpu.memory_space<vmem>>, vector<1x128x768xbf16>
    %179 = vector.shape_cast %178 : vector<1x128x768xbf16> to vector<128x768xbf16>
    %180 = vector.extract_strided_slice %14 {offsets = [19, 0], sizes = [1, 128], strides = [1, 1]} : vector<25x128xbf16> to vector<1x128xbf16>
    %cst_103 = arith.constant dense<0.000000e+00> : vector<1x768xf32>
    %181 = tpu.matmul %180, %179, %cst_103 {dimension_numbers = #tpu.dot_dimension_numbers<[1], [0], [0], [1], [0, 0, 1, 1], [], []>} : vector<1x128xbf16>, vector<128x768xbf16>, vector<1x768xf32> -> vector<1x768xf32>
    %182 = arith.addf %174, %181 : vector<1x768xf32>
    %183 = vector.extract_strided_slice %23 {offsets = [19, 0], sizes = [1, 128], strides = [1, 1]} : vector<25x128xbf16> to vector<1x128xbf16>
    %cst_104 = arith.constant dense<0.000000e+00> : vector<1x768xf32>
    %184 = tpu.matmul %183, %179, %cst_104 {dimension_numbers = #tpu.dot_dimension_numbers<[1], [0], [0], [1], [0, 0, 1, 1], [], []>} : vector<1x128xbf16>, vector<128x768xbf16>, vector<1x768xf32> -> vector<1x768xf32>
    %185 = arith.addf %177, %184 : vector<1x768xf32>
    %c20 = arith.constant 20 : index
    %c0_105 = arith.constant 0 : index
    %c0_106 = arith.constant 0 : index
    %186 = vector.load %arg5[%c20, %c0_105, %c0_106] : memref<25x128x768xbf16, #tpu.memory_space<vmem>>, vector<1x128x768xbf16>
    %187 = vector.shape_cast %186 : vector<1x128x768xbf16> to vector<128x768xbf16>
    %188 = vector.extract_strided_slice %14 {offsets = [20, 0], sizes = [1, 128], strides = [1, 1]} : vector<25x128xbf16> to vector<1x128xbf16>
    %cst_107 = arith.constant dense<0.000000e+00> : vector<1x768xf32>
    %189 = tpu.matmul %188, %187, %cst_107 {dimension_numbers = #tpu.dot_dimension_numbers<[1], [0], [0], [1], [0, 0, 1, 1], [], []>} : vector<1x128xbf16>, vector<128x768xbf16>, vector<1x768xf32> -> vector<1x768xf32>
    %190 = arith.addf %182, %189 : vector<1x768xf32>
    %191 = vector.extract_strided_slice %23 {offsets = [20, 0], sizes = [1, 128], strides = [1, 1]} : vector<25x128xbf16> to vector<1x128xbf16>
    %cst_108 = arith.constant dense<0.000000e+00> : vector<1x768xf32>
    %192 = tpu.matmul %191, %187, %cst_108 {dimension_numbers = #tpu.dot_dimension_numbers<[1], [0], [0], [1], [0, 0, 1, 1], [], []>} : vector<1x128xbf16>, vector<128x768xbf16>, vector<1x768xf32> -> vector<1x768xf32>
    %193 = arith.addf %185, %192 : vector<1x768xf32>
    %c21 = arith.constant 21 : index
    %c0_109 = arith.constant 0 : index
    %c0_110 = arith.constant 0 : index
    %194 = vector.load %arg5[%c21, %c0_109, %c0_110] : memref<25x128x768xbf16, #tpu.memory_space<vmem>>, vector<1x128x768xbf16>
    %195 = vector.shape_cast %194 : vector<1x128x768xbf16> to vector<128x768xbf16>
    %196 = vector.extract_strided_slice %14 {offsets = [21, 0], sizes = [1, 128], strides = [1, 1]} : vector<25x128xbf16> to vector<1x128xbf16>
    %cst_111 = arith.constant dense<0.000000e+00> : vector<1x768xf32>
    %197 = tpu.matmul %196, %195, %cst_111 {dimension_numbers = #tpu.dot_dimension_numbers<[1], [0], [0], [1], [0, 0, 1, 1], [], []>} : vector<1x128xbf16>, vector<128x768xbf16>, vector<1x768xf32> -> vector<1x768xf32>
    %198 = arith.addf %190, %197 : vector<1x768xf32>
    %199 = vector.extract_strided_slice %23 {offsets = [21, 0], sizes = [1, 128], strides = [1, 1]} : vector<25x128xbf16> to vector<1x128xbf16>
    %cst_112 = arith.constant dense<0.000000e+00> : vector<1x768xf32>
    %200 = tpu.matmul %199, %195, %cst_112 {dimension_numbers = #tpu.dot_dimension_numbers<[1], [0], [0], [1], [0, 0, 1, 1], [], []>} : vector<1x128xbf16>, vector<128x768xbf16>, vector<1x768xf32> -> vector<1x768xf32>
    %201 = arith.addf %193, %200 : vector<1x768xf32>
    %c22 = arith.constant 22 : index
    %c0_113 = arith.constant 0 : index
    %c0_114 = arith.constant 0 : index
    %202 = vector.load %arg5[%c22, %c0_113, %c0_114] : memref<25x128x768xbf16, #tpu.memory_space<vmem>>, vector<1x128x768xbf16>
    %203 = vector.shape_cast %202 : vector<1x128x768xbf16> to vector<128x768xbf16>
    %204 = vector.extract_strided_slice %14 {offsets = [22, 0], sizes = [1, 128], strides = [1, 1]} : vector<25x128xbf16> to vector<1x128xbf16>
    %cst_115 = arith.constant dense<0.000000e+00> : vector<1x768xf32>
    %205 = tpu.matmul %204, %203, %cst_115 {dimension_numbers = #tpu.dot_dimension_numbers<[1], [0], [0], [1], [0, 0, 1, 1], [], []>} : vector<1x128xbf16>, vector<128x768xbf16>, vector<1x768xf32> -> vector<1x768xf32>
    %206 = arith.addf %198, %205 : vector<1x768xf32>
    %207 = vector.extract_strided_slice %23 {offsets = [22, 0], sizes = [1, 128], strides = [1, 1]} : vector<25x128xbf16> to vector<1x128xbf16>
    %cst_116 = arith.constant dense<0.000000e+00> : vector<1x768xf32>
    %208 = tpu.matmul %207, %203, %cst_116 {dimension_numbers = #tpu.dot_dimension_numbers<[1], [0], [0], [1], [0, 0, 1, 1], [], []>} : vector<1x128xbf16>, vector<128x768xbf16>, vector<1x768xf32> -> vector<1x768xf32>
    %209 = arith.addf %201, %208 : vector<1x768xf32>
    %c23 = arith.constant 23 : index
    %c0_117 = arith.constant 0 : index
    %c0_118 = arith.constant 0 : index
    %210 = vector.load %arg5[%c23, %c0_117, %c0_118] : memref<25x128x768xbf16, #tpu.memory_space<vmem>>, vector<1x128x768xbf16>
    %211 = vector.shape_cast %210 : vector<1x128x768xbf16> to vector<128x768xbf16>
    %212 = vector.extract_strided_slice %14 {offsets = [23, 0], sizes = [1, 128], strides = [1, 1]} : vector<25x128xbf16> to vector<1x128xbf16>
    %cst_119 = arith.constant dense<0.000000e+00> : vector<1x768xf32>
    %213 = tpu.matmul %212, %211, %cst_119 {dimension_numbers = #tpu.dot_dimension_numbers<[1], [0], [0], [1], [0, 0, 1, 1], [], []>} : vector<1x128xbf16>, vector<128x768xbf16>, vector<1x768xf32> -> vector<1x768xf32>
    %214 = arith.addf %206, %213 : vector<1x768xf32>
    %215 = vector.extract_strided_slice %23 {offsets = [23, 0], sizes = [1, 128], strides = [1, 1]} : vector<25x128xbf16> to vector<1x128xbf16>
    %cst_120 = arith.constant dense<0.000000e+00> : vector<1x768xf32>
    %216 = tpu.matmul %215, %211, %cst_120 {dimension_numbers = #tpu.dot_dimension_numbers<[1], [0], [0], [1], [0, 0, 1, 1], [], []>} : vector<1x128xbf16>, vector<128x768xbf16>, vector<1x768xf32> -> vector<1x768xf32>
    %217 = arith.addf %209, %216 : vector<1x768xf32>
    %c24 = arith.constant 24 : index
    %c0_121 = arith.constant 0 : index
    %c0_122 = arith.constant 0 : index
    %218 = vector.load %arg5[%c24, %c0_121, %c0_122] : memref<25x128x768xbf16, #tpu.memory_space<vmem>>, vector<1x128x768xbf16>
    %219 = vector.shape_cast %218 : vector<1x128x768xbf16> to vector<128x768xbf16>
    %220 = vector.extract_strided_slice %14 {offsets = [24, 0], sizes = [1, 128], strides = [1, 1]} : vector<25x128xbf16> to vector<1x128xbf16>
    %cst_123 = arith.constant dense<0.000000e+00> : vector<1x768xf32>
    %221 = tpu.matmul %220, %219, %cst_123 {dimension_numbers = #tpu.dot_dimension_numbers<[1], [0], [0], [1], [0, 0, 1, 1], [], []>} : vector<1x128xbf16>, vector<128x768xbf16>, vector<1x768xf32> -> vector<1x768xf32>
    %222 = arith.addf %214, %221 : vector<1x768xf32>
    %223 = vector.extract_strided_slice %23 {offsets = [24, 0], sizes = [1, 128], strides = [1, 1]} : vector<25x128xbf16> to vector<1x128xbf16>
    %cst_124 = arith.constant dense<0.000000e+00> : vector<1x768xf32>
    %224 = tpu.matmul %223, %219, %cst_124 {dimension_numbers = #tpu.dot_dimension_numbers<[1], [0], [0], [1], [0, 0, 1, 1], [], []>} : vector<1x128xbf16>, vector<128x768xbf16>, vector<1x768xf32> -> vector<1x768xf32>
    %225 = arith.addf %217, %224 : vector<1x768xf32>
    %226 = arith.addf %222, %3 : vector<1x768xf32>
    %cst_125 = arith.constant 0.000000e+00 : f32
    %227 = vector.broadcast %cst_125 : f32 to vector<1x768xf32>
    %228 = arith.maximumf %226, %227 : vector<1x768xf32>
    %229 = arith.truncf %228 : vector<1x768xf32> to vector<1x768xbf16>
    %cst_126 = arith.constant dense<0.000000e+00> : vector<1x128xf32>
    %230 = tpu.matmul %229, %4, %cst_126 {dimension_numbers = #tpu.dot_dimension_numbers<[1], [0], [0], [1], [0, 0, 1, 1], [], []>} : vector<1x768xbf16>, vector<768x128xbf16>, vector<1x128xf32> -> vector<1x128xf32>
    %231 = arith.addf %230, %5 : vector<1x128xf32>
    %c0_127 = arith.constant 0 : index
    %c0_128 = arith.constant 0 : index
    %232 = vector.load %arg9[%c0_127, %c0_128] : memref<2x128xf32, #tpu.memory_space<vmem>>, vector<1x128xf32>
    tpu.vector_store %arg9[%c0_127, %c0_128], %231 {strides = array<i32>} : memref<2x128xf32, #tpu.memory_space<vmem>>, vector<1x128xf32>,
    %233 = arith.addf %225, %3 : vector<1x768xf32>
    %cst_129 = arith.constant 0.000000e+00 : f32
    %234 = vector.broadcast %cst_129 : f32 to vector<1x768xf32>
    %235 = arith.maximumf %233, %234 : vector<1x768xf32>
    %236 = arith.truncf %235 : vector<1x768xf32> to vector<1x768xbf16>
    %cst_130 = arith.constant dense<0.000000e+00> : vector<1x128xf32>
    %237 = tpu.matmul %236, %4, %cst_130 {dimension_numbers = #tpu.dot_dimension_numbers<[1], [0], [0], [1], [0, 0, 1, 1], [], []>} : vector<1x768xbf16>, vector<768x128xbf16>, vector<1x128xf32> -> vector<1x128xf32>
    %238 = arith.addf %237, %5 : vector<1x128xf32>
    %c1_131 = arith.constant 1 : index
    %c0_132 = arith.constant 0 : index
    %239 = vector.load %arg9[%c1_131, %c0_132] : memref<2x128xf32, #tpu.memory_space<vmem>>, vector<1x128xf32>
    tpu.vector_store %arg9[%c1_131, %c0_132], %238 {strides = array<i32>} : memref<2x128xf32, #tpu.memory_space<vmem>>, vector<1x128xf32>,
    return
  }
  func.func @transform_0(%arg0: i32) -> (i32, i32, i32) {
    %c0_i32 = arith.constant 0 : i32
    %c0_i32_0 = arith.constant 0 : i32
    %c0_i32_1 = arith.constant 0 : i32
    return %arg0, %c0_i32, %c0_i32_0 : i32, i32, i32
  }
  func.func @transform_1(%arg0: i32) -> (i32, i32) {
    %c0_i32 = arith.constant 0 : i32
    %c0_i32_0 = arith.constant 0 : i32
    %c0_i32_1 = arith.constant 0 : i32
    return %c0_i32, %c0_i32_0 : i32, i32
  }
  func.func @transform_2(%arg0: i32) -> (i32, i32) {
    %c0_i32 = arith.constant 0 : i32
    %c0_i32_0 = arith.constant 0 : i32
    %c0_i32_1 = arith.constant 0 : i32
    return %c0_i32, %c0_i32_0 : i32, i32
  }
  func.func @transform_3(%arg0: i32) -> (i32, i32) {
    %c0_i32 = arith.constant 0 : i32
    %c0_i32_0 = arith.constant 0 : i32
    %c0_i32_1 = arith.constant 0 : i32
    return %c0_i32, %c0_i32_0 : i32, i32
  }
  func.func @transform_4(%arg0: i32) -> (i32, i32, i32) {
    %c0_i32 = arith.constant 0 : i32
    %c0_i32_0 = arith.constant 0 : i32
    %c0_i32_1 = arith.constant 0 : i32
    %c0_i32_2 = arith.constant 0 : i32
    return %c0_i32, %c0_i32_0, %c0_i32_1 : i32, i32, i32
  }
  func.func @transform_5(%arg0: i32) -> (i32, i32) {
    %c0_i32 = arith.constant 0 : i32
    %c0_i32_0 = arith.constant 0 : i32
    %c0_i32_1 = arith.constant 0 : i32
    return %c0_i32, %c0_i32_0 : i32, i32
  }
  func.func @transform_6(%arg0: i32) -> (i32, i32) {
    %c0_i32 = arith.constant 0 : i32
    %c0_i32_0 = arith.constant 0 : i32
    %c0_i32_1 = arith.constant 0 : i32
    return %c0_i32, %c0_i32_0 : i32, i32
  }
  func.func @transform_7(%arg0: i32) -> (i32, i32) {
    %c0_i32 = arith.constant 0 : i32
    %c0_i32_0 = arith.constant 0 : i32
    %c0_i32_1 = arith.constant 0 : i32
    return %c0_i32, %c0_i32_0 : i32, i32
  }
  func.func @transform_8(%arg0: i32) -> (i32, i32) {
    %c0_i32 = arith.constant 0 : i32
    %c0_i32_0 = arith.constant 0 : i32
    return %arg0, %c0_i32 : i32, i32
  }
}

</mosaic_0001>

<bundles_post_ra>
// kernel: tpu_custom_call.1
= control target key start
LH: loop header
LB: loop body
LE: loop exit
PB: predicated region body
PF: predicated region fallthrough
CT: control target
= control target key end

     0   :  { %13 = vsyncpa [#allocation3], 0  ;;  %s24451_s0 = inlined_call_operand.vmem [shape: f32[2,289,8], index: 0, kind: input, shape index: {}]   ;;  %s24452_s1 = inlined_call_operand.hbm [shape: f32[25,289], index: 1, kind: input, shape index: {}]   ;;  %s24453_s2 = inlined_call_operand.hbm [shape: f32[8,128], index: 2, kind: input, shape index: {}]   ;;  %s24454_s3 = inlined_call_operand.hbm [shape: f32[1,128], index: 3, kind: input, shape index: {}]   ;;  %s24455_s4 = inlined_call_operand.hbm [shape: bf16[25,128,768], index: 4, kind: input, shape index: {}]   ;;  %s24456_s5 = inlined_call_operand.hbm [shape: f32[1,768], index: 5, kind: input, shape index: {}]   ;;  %s24457_s6 = inlined_call_operand.hbm [shape: bf16[768,128], index: 6, kind: input, shape index: {}]   ;;  %s24458_s7 = inlined_call_operand.hbm [shape: f32[1,128], index: 7, kind: input, shape index: {}]   ;;  %s24459_s8 = inlined_call_operand.hbm [shape: f32[2,128], index: 8, kind: output, shape index: {}]  }
   0x1   :  { %14 = vsyncpa [#allocation6], 0 }
   0x2   :  { %15 = vsyncpa [#allocation9], 0 }
   0x3   :  { %16 = vsyncpa [#allocation12], 0 }
   0x4   :  { %17 = vsyncpa [#allocation4], 0  ;;  %s18905_s27 = smov [#allocation5]  }
   0x5   :  { %s38_s28 = sshll.u32 %s18905_s27, 4  ;;  %s39_s28 = int_to_ptr.vmem [resolvable:$true] %s38_s28 }
   0x6   :  { %s18743_s29 = scalar_lea.vmem %s39_s28, 128  ;;  %p18748_p1 = scmp.lt.s32.totalorder %s39_s28, %s39_s28 }
   0x7   :  { %p18744_p0 = scmp.ne.s32.totalorder %s39_s28, %s18743_s29  ;;  %p18749_p2 = scmp.lt.s32.totalorder %s18743_s29, %s18743_s29 }
   0x9   :  { %p18750_p3 = por %p18749_p2, %p18748_p1 }
   0xb   :  { %p18751_p4 = pnand %p18750_p3, %p18744_p0 }
   0xd   :  { %18754 = shalt.err (!%p18751_p4)
}
   0xe   :  { %41 = dma.hbm_to_vmem [thread:$0]  %s24453_s2, 128, %s39_s28, [#allocation6]  }
   0xf   :  { %s18906_s10 = smov [#allocation8]   ;;  %s18907_s12 = smov [#allocation11]  }
  0x10   :  { %s57_s11 = sshll.u32 %s18906_s10, 4  ;;  %s79_s13 = sshll.u32 %s18907_s12, 4  ;;  %s58_s11 = int_to_ptr.vmem [resolvable:$true] %s57_s11  ;;  %s80_s13 = int_to_ptr.vmem [resolvable:$true] %s79_s13 }
  0x11   :  { %s18763_s14 = scalar_lea.vmem %s58_s11, 153600  ;;  %p18768_p6 = scmp.lt.s32.totalorder %s58_s11, %s58_s11 }
  0x12   :  { %p18764_p5 = scmp.ne.s32.totalorder %s58_s11, %s18763_s14  ;;  %p18769_p7 = scmp.lt.s32.totalorder %s18763_s14, %s18763_s14 }
  0x14   :  { %p18770_p8 = por %p18769_p7, %p18768_p6 }
  0x16   :  { %p18771_p9 = pnand %p18770_p8, %p18764_p5 }
  0x18   :  { %18774 = shalt.err (!%p18771_p9)
}
  0x19   :  { %s18908_s15 = smov 384   ;;  %s18909_s16 = smov 24  }
  0x1a   :  { %63 = dma.hbm_to_vmem [thread:$0]  %s24455_s4, 153600, %s58_s11, [#allocation9], %s18908_s15, %s18908_s15, %s18909_s16  }
  0x1b   :  { %s18783_s2 = scalar_lea.vmem %s80_s13, 6144  ;;  %p18788_p11 = scmp.lt.s32.totalorder %s80_s13, %s80_s13 }
  0x1c   :  { %p18784_p10 = scmp.ne.s32.totalorder %s80_s13, %s18783_s2  ;;  %p18789_p12 = scmp.lt.s32.totalorder %s18783_s2, %s18783_s2 }
  0x1e   :  { %p18790_p13 = por %p18789_p12, %p18788_p11 }
  0x20   :  { %p18791_p0 = pnand %p18790_p13, %p18784_p10 }
  0x22   :  { %18794 = shalt.err (!%p18791_p0)
}
  0x23   :  { %s18910_s19 = smov 64   ;;  %s18911_s20 = smov 4  }
  0x24   :  { %85 = dma.hbm_to_vmem [thread:$0]  %s24457_s6, 6144, %s80_s13, [#allocation12], %s18910_s19, %s18910_s19, %s18911_s20  }
  0x25   :  { %s18912_s23 = smov [#allocation2]   ;;  %s18913_s25 = smov [#allocation7]  }
  0x26   :  { %s25_s24 = sshll.u32 %s18912_s23, 4  ;;  %s48_s26 = sshll.u32 %s18913_s25, 4  ;;  %s26_s24 = int_to_ptr.vmem [resolvable:$true] %s25_s24  ;;  %s49_s26 = int_to_ptr.vmem [resolvable:$true] %s48_s26 }
  0x27   :  { %s18803_s4 = scalar_lea.vmem %s26_s24, 1536  ;;  %p18808_p2 = scmp.lt.s32.totalorder %s26_s24, %s26_s24 }
  0x28   :  { %p18804_p1 = scmp.ne.s32.totalorder %s26_s24, %s18803_s4  ;;  %p18809_p3 = scmp.lt.s32.totalorder %s18803_s4, %s18803_s4 }
  0x2a   :  { %p18810_p4 = por %p18809_p3, %p18808_p2 }
  0x2c   :  { %p18811_p5 = pnand %p18810_p4, %p18804_p1 }
  0x2e   :  { %18814 = shalt.err (!%p18811_p5)
}
  0x2f   :  { %31 = dma.hbm_to_vmem [thread:$0]  %s24452_s1, 1536, %s26_s24, [#allocation3], %s18908_s15, %s18908_s15, %s18909_s16  }
  0x30   :  { %s18823_s29 = scalar_lea.vmem %s49_s26, 16  ;;  %s18827_s6 = scalar_lea.vmem %s49_s26, 32 }
  0x31   :  { %p18824_p6 = scmp.ne.s32.totalorder %s49_s26, %s18823_s29  ;;  %p18828_p7 = scmp.lt.s32.totalorder %s49_s26, %s49_s26 }
  0x32   :  { %p18829_p8 = scmp.lt.s32.totalorder %s18827_s6, %s18823_s29 }
  0x34   :  { %p18830_p9 = por %p18829_p8, %p18828_p7 }
  0x36   :  { %p18831_p10 = pnand %p18830_p9, %p18824_p6 }
  0x38   :  { %18834 = shalt.err (!%p18831_p10)
}
  0x39   :  { %51 = dma.hbm_to_vmem [thread:$0]  %s24454_s3, 16, %s49_s26, [#allocation6]  }
  0x3a   :  { %s18914_s10 = smov [#allocation10]   ;;  %s18915_s12 = smov [#allocation13]  }
  0x3b   :  { %s70_s11 = sshll.u32 %s18914_s10, 4  ;;  %s92_s13 = sshll.u32 %s18915_s12, 4  ;;  %s71_s11 = int_to_ptr.vmem [resolvable:$true] %s70_s11  ;;  %s93_s13 = int_to_ptr.vmem [resolvable:$true] %s92_s13 }
  0x3c   :  { %s18843_s14 = scalar_lea.vmem %s71_s11, 96  ;;  %p18848_p12 = scmp.lt.s32.totalorder %s71_s11, %s71_s11 }
  0x3d   :  { %p18844_p11 = scmp.ne.s32.totalorder %s71_s11, %s18843_s14  ;;  %p18849_p13 = scmp.lt.s32.totalorder %s18843_s14, %s18843_s14 }
  0x3f   :  { %p18850_p0 = por %p18849_p13, %p18848_p12 }
  0x41   :  { %p18851_p1 = pnand %p18850_p0, %p18844_p11 }
  0x43   :  { %18854 = shalt.err (!%p18851_p1)
}
  0x44   :  { %73 = dma.hbm_to_vmem [thread:$0]  %s24456_s5, 96, %s71_s11, [#allocation9]  }
  0x45   :  { %s18863_s16 = scalar_lea.vmem %s93_s13, 16  ;;  %s18867_s3 = scalar_lea.vmem %s93_s13, 32 }
  0x46   :  { %p18864_p2 = scmp.ne.s32.totalorder %s93_s13, %s18863_s16  ;;  %p18868_p3 = scmp.lt.s32.totalorder %s93_s13, %s93_s13 }
  0x47   :  { %p18869_p4 = scmp.lt.s32.totalorder %s18867_s3, %s18863_s16 }
  0x49   :  { %p18870_p5 = por %p18869_p4, %p18868_p3 }
  0x4b   :  { %p18871_p6 = pnand %p18870_p5, %p18864_p2 }
  0x4d   :  { %18874 = shalt.err (!%p18871_p6)
}
  0x4e   :  { %95 = dma.hbm_to_vmem [thread:$0]  %s24458_s7, 16, %s93_s13, [#allocation12]  }
  0x4f   :  { %18895 = dma.done.wait [#allocation3], 1536  }
  0x50   :  { %18896 = vsyncadd [#allocation3], 4294965760 }
  0x51   :  { %18897 = dma.done.wait [#allocation6], 144  }
  0x52   :  { %18898 = vsyncadd [#allocation6], 4294967152 }
  0x53   :  { %18899 = dma.done.wait [#allocation9], 153696  }
  0x54   :  { %18900 = vsyncadd [#allocation9], 4294813600 }
  0x55   :  { %18901 = dma.done.wait [#allocation12], 6160  }
  0x56   :  { %18902 = vsyncadd [#allocation12], 4294961136  ;;  %v261_v0 = vld [vmem:[%s24451_s0 + $0xf8] sm:$0xff]  ;;  %v260_v2 = vld [vmem:[%s24451_s0 + $0xf0] sm:$0xff]  ;;  %vm280_vm0 = vcmask 1040384   ;;  %vm267_vm1 = vcmask 269312  }
  0x57   :  { %v245_v1 = vld [vmem:[%s24451_s0 + $0x78] sm:$0xff]  ;;  %16551 = vmatprep.subr.mxu0 %v261_v0  ;;  %v244_v3 = vld [vmem:[%s24451_s0 + $0x70] sm:$0xff]  ;;  %v259_v4 = vld [vmem:[%s24451_s0 + $0xe8] sm:$0xff]  ;;  %vm460_vm2 = vcmask 64512  }
  0x58   :  { %16552 = vmatpush3.msra.mxu0 %v245_v1  ;;  %v243_v5 = vld [vmem:[%s24451_s0 + $0x68] sm:$0xff]  ;;  %v258_v6 = vld [vmem:[%s24451_s0 + $0xe0] sm:$0xff]  ;;  %v257_v8 = vld [vmem:[%s24451_s0 + $0xd8] sm:$0xff] }
  0x59   :  { %16553 = vmatprep.subr.mxu0 %v260_v2  ;;  %v242_v7 = vld [vmem:[%s24451_s0 + $0x60] sm:$0xff]  ;;  %v241_v9 = vld [vmem:[%s24451_s0 + $0x58] sm:$0xff]  ;;  %v256_v10 = vld [vmem:[%s24451_s0 + $0xd0] sm:$0xff] }
  0x5a   :  { %16554 = vmatpush3.msra.mxu0 %v244_v3  ;;  %v266_v11 = vld [vmem:[%s24451_s0 + $0x120] sm:$0x1]  ;;  %v240_v12 = vld [vmem:[%s24451_s0 + $0x50] sm:$0xff]  ;;  %v265_v13 = vld [vmem:[%s24451_s0 + $0x118] sm:$0xff] }
  0x5b   :  { %16555 = vmatprep.subr.mxu0 %v259_v4  ;;  %16799 = vmatprep.subr.msk.mxu1 %vm280_vm0, %v266_v11  ;;  %v255_v14 = vld [vmem:[%s24451_s0 + $0xc8] sm:$0xff]  ;;  %v264_v15 = vld [vmem:[%s24451_s0 + $0x110] sm:$0xff]  ;;  %v254_v17 = vld [vmem:[%s24451_s0 + $0xc0] sm:$0xff] }
  0x5c   :  { %16556 = vmatpush3.msra.mxu0 %v243_v5  ;;  %16800 = vmatpush3.msk.msra.mxu1 %vm280_vm0, %v266_v11  ;;  %v239_v16 = vld [vmem:[%s24451_s0 + $0x48] sm:$0xff]  ;;  %v238_v19 = vld [vmem:[%s24451_s0 + $0x40] sm:$0xff]  ;;  %v253_v21 = vld [vmem:[%s24451_s0 + $0xb8] sm:$0xff] }
  0x5d   :  { %16557 = vmatprep.subr.mxu0 %v258_v6  ;;  %16801 = vmatprep.subr.mxu1 %v265_v13  ;;  %v263_v18 = vld [vmem:[%s24451_s0 + $0x108] sm:$0xff]  ;;  %v237_v22 = vld [vmem:[%s24451_s0 + $0x38] sm:$0xff]  ;;  %v252_v23 = vld [vmem:[%s24451_s0 + $0xb0] sm:$0xff] }
  0x5e   :  { %16558 = vmatpush3.msra.mxu0 %v242_v7  ;;  %16802 = vmatpush3.msra.mxu1 %v265_v13  ;;  %v119_v20 = vld [vmem:[#allocation2 + $0x8] sm:$0xff]  ;;  %v236_v24 = vld [vmem:[%s24451_s0 + $0x30] sm:$0xff]  ;;  %v262_v25 = vld [vmem:[%s24451_s0 + $0x100] sm:$0xff] }
  0x5f   :  { %16559 = vmatprep.subr.mxu0 %v257_v8  ;;  %16803 = vmatprep.subr.mxu1 %v264_v15  ;;  %v120_v26 = vld [vmem:[#allocation2 + $0x10] sm:$0xff]  ;;  %v251_v27 = vld [vmem:[%s24451_s0 + $0xa8] sm:$0xff]  ;;  %v19069_v30 = vld [vmem:[#allocation2 + $0x40] sm:$0xff] }
  0x60   :  { %16560 = vmatpush3.msra.mxu0 %v241_v9  ;;  %16804 = vmatpush3.msra.mxu1 %v264_v15  ;;  %v19064_v28 = vld [vmem:[#allocation2 + $0x28] sm:$0xff]  ;;  %v250_v31 = vld [vmem:[%s24451_s0 + $0xa0] sm:$0xff]  ;;  %v249_v33 = vld [vmem:[%s24451_s0 + $0x98] sm:$0xff] }
  0x61   :  { %16561 = vmatprep.subr.mxu0 %v256_v10  ;;  %16805 = vmatprep.subr.mxu1 %v263_v18  ;;  %v235_v29 = vld [vmem:[%s24451_s0 + $0x28] sm:$0xff]  ;;  %v234_v32 = vld [vmem:[%s24451_s0 + $0x20] sm:$0xff]  ;;  %v129_v34 = vld [vmem:[#allocation2 + $0x58] sm:$0x1] }
  0x62   :  { %16562 = vmatpush3.msra.mxu0 %v240_v12  ;;  %348 = vmatprep.mubr.f32.mxu0 %v119_v20  ;;  %v233_v35 = vld [vmem:[%s24451_s0 + $0x18] sm:$0xff]  ;;  %v248_v36 = vld [vmem:[%s24451_s0 + $0x90] sm:$0xff]  ;;  %v247_v38 = vld [vmem:[%s24451_s0 + $0x88] sm:$0xff] }
  0x63   :  { %16563 = vmatprep.subr.mxu0 %v255_v14  ;;  %16806 = vmatpush3.msra.mxu1 %v263_v18  ;;  %v232_v37 = vld [vmem:[%s24451_s0 + $0x10] sm:$0xff]  ;;  %v231_v39 = vld [vmem:[%s24451_s0 + $0x8] sm:$0xff]  ;;  %v246_v40 = vld [vmem:[%s24451_s0 + $0x80] sm:$0xff] }
  0x64   :  { %16564 = vmatpush3.msra.mxu0 %v239_v16  ;;  %16807 = vmatprep.subr.mxu1 %v262_v25  ;;  %v230_v41 = vld [vmem:[%s24451_s0] sm:$0xff]  ;;  %v121_v44 = vld [vmem:[#allocation2 + $0x18] sm:$0xff]  ;;  %v124_v46 = vld [vmem:[#allocation2 + $0x30] sm:$0xff] }
  0x65   :  { %16565 = vmatprep.subr.mxu0 %v254_v17  ;;  %16808 = vmatpush3.msra.mxu1 %v262_v25  ;;  %v118_v42 = vld [vmem:[#allocation2] sm:$0xff]  ;;  %v125_v45 = vld [vmem:[#allocation2 + $0x38] sm:$0xff]  ;;  %v128_v47 = vld [vmem:[#allocation2 + $0x50] sm:$0x1] }
  0x66   :  { %16566 = vmatpush3.msra.mxu0 %v238_v19  ;;  %16809 = vmatprep.mubr.msk.f32.mxu1 %vm267_vm1, %v120_v26  ;;  %v122_v43 = vld [vmem:[#allocation2 + $0x20] sm:$0xff]  ;;  %v127_v48 = vld [vmem:[#allocation2 + $0x48] sm:$0x1]  ;;  %v15291_v53 = vld [vmem:[%s24451_s0 + $0x238] sm:$0xff] }
  0x67   :  { %16567 = vmatprep.subr.mxu0 %v253_v21  ;;  %16810 = vmatmul.mubr.msk.f32.vlgmr.msra.gmra.mxu1 %vm267_vm1, %v19064_v28  ;;  %v130_v49 = vld [vmem:[#allocation5] sm:$0xff]  ;;  %v15293_v51 = vld [vmem:[%s24451_s0 + $0x248] sm:$0x1]  ;;  %v15290_v54 = vld [vmem:[%s24451_s0 + $0x230] sm:$0xff] }
  0x68   :  { %16568 = vmatpush3.msra.mxu0 %v237_v22  ;;  %16812 = vmatprep.mubr.msk.f32.mxu1 %vm267_vm1, %v19069_v30  ;;  %v15288_v50 = vld [vmem:[%s24451_s0 + $0x220] sm:$0xff]  ;;  %v15289_v55 = vld [vmem:[%s24451_s0 + $0x228] sm:$0xff]  ;;  %v15287_v3 = vld [vmem:[%s24451_s0 + $0x218] sm:$0xff] }
  0x69   :  { %16569 = vmatprep.subr.mxu0 %v252_v23  ;;  %16815 = vmatprep.subr.mxu1 %v130_v49  ;;  %v15292_v52 = vld [vmem:[%s24451_s0 + $0x240] sm:$0xff]  ;;  %v15271_v6 = vld [vmem:[%s24451_s0 + $0x198] sm:$0xff]  ;;  %v15286_v7 = vld [vmem:[%s24451_s0 + $0x210] sm:$0xff] }
  0x6a   :  { %16570 = vmatpush3.msra.mxu0 %v236_v24  ;;  %16816 = vmatpush3.msra.mxu1 %v130_v49  ;;  %v15272_v2 = vld [vmem:[%s24451_s0 + $0x1a0] sm:$0xff]  ;;  %v15270_v10 = vld [vmem:[%s24451_s0 + $0x190] sm:$0xff]  ;;  %v15285_v12 = vld [vmem:[%s24451_s0 + $0x208] sm:$0xff] }
  0x6b   :  { %16571 = vmatprep.subr.mxu0 %v251_v27  ;;  %16813 = vmatmul.mubr.msk.f32.gmra.mxu1 %vm267_vm1, %v129_v34  ;;  %v15269_v14 = vld [vmem:[%s24451_s0 + $0x188] sm:$0xff]  ;;  %v15284_v16 = vld [vmem:[%s24451_s0 + $0x200] sm:$0xff]  ;;  %v15283_v20 = vld [vmem:[%s24451_s0 + $0x1f8] sm:$0xff] }
  0x6c   :  { %16572 = vmatpush3.msra.mxu0 %v235_v29  ;;  %16609 = vmatprep.subr.mxu1 %v15288_v50  ;;  %v15268_v18 = vld [vmem:[%s24451_s0 + $0x180] sm:$0xff]  ;;  %v15267_v21 = vld [vmem:[%s24451_s0 + $0x178] sm:$0xff]  ;;  %v15282_v23 = vld [vmem:[%s24451_s0 + $0x1f0] sm:$0xff] }
  0x6d   :  { %16573 = vmatprep.subr.mxu0 %v250_v31  ;;  %v15266_v24 = vld [vmem:[%s24451_s0 + $0x170] sm:$0xff]  ;;  %v15281_v25 = vld [vmem:[%s24451_s0 + $0x1e8] sm:$0xff]  ;;  %v15264_v29 = vld [vmem:[%s24451_s0 + $0x160] sm:$0xff] }
  0x6e   :  { %16574 = vmatpush3.msra.mxu0 %v234_v32  ;;  %v15265_v27 = vld [vmem:[%s24451_s0 + $0x168] sm:$0xff]  ;;  %v15263_v31 = vld [vmem:[%s24451_s0 + $0x158] sm:$0xff]  ;;  %v15278_v32 = vld [vmem:[%s24451_s0 + $0x1d0] sm:$0xff] }
  0x6f   :  { %16575 = vmatprep.subr.mxu0 %v249_v33  ;;  %v15262_v33 = vld [vmem:[%s24451_s0 + $0x150] sm:$0xff]  ;;  %v18710_v50 = vld [vmem:[#allocation2 + $0x20] sm:$0xff] }
  0x70   :  { %16576 = vmatpush3.msra.mxu0 %v233_v35  ;;  %v15261_v35 = vld [vmem:[%s24451_s0 + $0x148] sm:$0xff] }
  0x71   :  { %16577 = vmatprep.subr.mxu0 %v248_v36  ;;  %v15276_v36 = vld [vmem:[%s24451_s0 + $0x1c0] sm:$0xff] }
  0x72   :  { %16578 = vmatpush3.msra.mxu0 %v232_v37  ;;  %v15260_v37 = vld [vmem:[%s24451_s0 + $0x140] sm:$0xff] }
  0x73   :  { %16579 = vmatprep.subr.mxu0 %v247_v38  ;;  %v15275_v38 = vld [vmem:[%s24451_s0 + $0x1b8] sm:$0xff] }
  0x74   :  { %16580 = vmatpush3.msra.mxu0 %v231_v39  ;;  %v15259_v39 = vld [vmem:[%s24451_s0 + $0x138] sm:$0xff] }
  0x75   :  { %16581 = vmatprep.subr.mxu0 %v246_v40  ;;  %v15274_v40 = vld [vmem:[%s24451_s0 + $0x1b0] sm:$0xff] }
  0x76   :  { %16582 = vmatpush3.msra.mxu0 %v230_v41  ;;  %v15258_v41 = vld [vmem:[%s24451_s0 + $0x130] sm:$0xff] }
  0x77   :  { %349 = vmatmul.mubr.f32.vlgmr.msra.gmra.mxu0 %v118_v42  ;;  %16823 = vmatprep.subr.msk.mxu0 %vm280_vm0, %v15293_v51  ;;  %v15273_v42 = vld [vmem:[%s24451_s0 + $0x1a8] sm:$0xff] }
  0x78   :  { %353 = vmatprep.mubr.f32.mxu0 %v122_v43  ;;  %16824 = vmatpush3.msk.msra.mxu0 %vm280_vm0, %v15293_v51  ;;  %v15257_v43 = vld [vmem:[%s24451_s0 + $0x128] sm:$0xff]  ;;  %v16866_v51 = vld [vmem:[#allocation8 + $0x270] ss:$24 sps:$4 sm:$0xff]  }
  0x79   :  { %16825 = vmatprep.subr.mxu0 %v15292_v52 }
  0x7a   :  { %16826 = vmatpush3.msra.mxu0 %v15292_v52  ;;  %v18711_v52 = vld [vmem:[#allocation2 + $0x18] sm:$0xff] }
  0x7b   :  { %354 = vmatmul.mubr.f32.gmra.mxu0 %v121_v44  ;;  %16827 = vmatprep.subr.mxu0 %v15291_v53  ;;  %v16862_v44 = vld [vmem:[#allocation8 + $0x2d4] ss:$24 sps:$4 sm:$0xff]  }
  0x7c   :  { %358 = vmatprep.mubr.f32.mxu0 %v125_v45  ;;  %16828 = vmatpush3.msra.mxu0 %v15291_v53  ;;  %v16860_v45 = vld [vmem:[#allocation8 + $0x2d0] ss:$24 sps:$4 sm:$0xff]   ;;  %v16871_v53 = vld [vmem:[#allocation8 + $0x244] ss:$24 sps:$4 sm:$0xff]  }
  0x7d   :  { %16829 = vmatprep.subr.mxu0 %v15290_v54 }
  0x7e   :  { %16830 = vmatpush3.msra.mxu0 %v15290_v54  ;;  %v18712_v54 = vld [vmem:[#allocation2 + $0x38] sm:$0xff] }
  0x7f   :  { %359 = vmatmul.mubr.f32.gmra.mxu0 %v124_v46  ;;  %16831 = vmatprep.subr.mxu0 %v15289_v55  ;;  %v16865_v46 = vld [vmem:[#allocation8 + $0x2a4] ss:$24 sps:$4 sm:$0xff]  }
  0x80   :  { %363 = vmatprep.mubr.f32.mxu0 %v128_v47  ;;  %16832 = vmatpush3.msra.mxu0 %v15289_v55  ;;  %v16863_v47 = vld [vmem:[#allocation8 + $0x2a0] ss:$24 sps:$4 sm:$0xff]  }
  0x81   :  { %16839 = vmatprep.subr.mxu0 %v130_v49  ;;  %v16869_v55 = vld [vmem:[#allocation8 + $0x240] ss:$24 sps:$4 sm:$0xff]  }
  0x83   :  { %364 = vmatmul.mubr.f32.gmra.mxu0 %v127_v48  ;;  %v18709_v48 = vld [vmem:[#allocation2] sm:$0xff] }
  0x84   :  { %16833 = vmatprep.mubr.msk.f32.mxu0 %vm267_vm1, %v120_v26  ;;  %v18708_v26 = vld [vmem:[#allocation2 + $0x8] sm:$0xff] }
  0x87   :  { %16834 = vmatmul.mubr.msk.f32.vlgmr.msra.gmra.mxu0 %vm267_vm1, %v19064_v28  ;;  %v15280_v28 = vld [vmem:[%s24451_s0 + $0x1e0] sm:$0xff] }
  0x88   :  { %16836 = vmatprep.mubr.msk.f32.mxu0 %vm267_vm1, %v19069_v30  ;;  %16840 = vmatpush3.msra.mxu0 %v130_v49  ;;  %v15279_v30 = vld [vmem:[%s24451_s0 + $0x1d8] sm:$0xff] }
  0x89   :  { %v16868_v49 = vld [vmem:[#allocation8 + $0x274] ss:$24 sps:$4 sm:$0xff]  }
  0x8b   :  { %16837 = vmatmul.mubr.msk.f32.gmra.mxu0 %vm267_vm1, %v129_v34  ;;  %v15277_v34 = vld [vmem:[%s24451_s0 + $0x1c8] sm:$0xff]  ;;  %s18917_s0 = smov [#allocation14]  }
  0x8c   :  { %s15235_s20 = sshll.u32 %s18917_s0, 4  ;;  %s15236_s20 = int_to_ptr.vmem [resolvable:$true] %s15235_s20 }
  0x8d   :  { %s18875_s21 = scalar_lea.vmem %s15236_s20, 32  ;;  %p18880_p8 = scmp.lt.s32.totalorder %s15236_s20, %s15236_s20 }
  0x8e   :  { %p18876_p7 = scmp.ne.s32.totalorder %s15236_s20, %s18875_s21  ;;  %p18881_p9 = scmp.lt.s32.totalorder %s18875_s21, %s18875_s21 }
  0x90   :  { %p18882_p10 = por %p18881_p9, %p18880_p8 }
  0x92   :  { %p18883_p11 = pnand %p18882_p10, %p18876_p7 }
 0x127   :  { %v16811_v56 = vpop.f32.mrf.mxu1 }
 0x129   :  { %v435_v59 = vpop.f32.mrf.mxu1 }
 0x12b   :  { %v16814_v0 = vpop.f32.mrf.mxu1 }
 0x12d   :  { %v445_v9 = vpop.f32.mrf.mxu1 }
 0x137   :  { %v16583_v57 = vpop.f32.mrf.mxu0 }
 0x139   :  { %v16584_v58 = vpop.f32.mrf.mxu0 }
 0x13a   :  { %v16585_v60 = vadd.f32 %v16584_v58, %v16583_v57  ;;  %v16874_v57 = vld [vmem:[#allocation8 + $0x214] ss:$24 sps:$4 sm:$0xff]   ;;  %v18714_v58 = vld [vmem:[#allocation2 + $0x50] sm:$0x1] }
 0x13b   :  { %v16586_v61 = vpop.f32.mrf.mxu0 }
 0x13c   :  { %v436_v62 = vadd.f32 %v16585_v60, %v435_v59  ;;  %v16872_v59 = vld [vmem:[#allocation8 + $0x210] ss:$24 sps:$4 sm:$0xff]   ;;  %v18715_v60 = vld [vmem:[#allocation2 + $0x48] sm:$0x1] }
 0x13d   :  { %v16587_v63 = vpop.f32.mrf.mxu0 }
 0x13e   :  { %v16588_v1 = vadd.f32 %v16587_v63, %v16586_v61  ;;  %16817 = vmatprep.mubr.msk.f32.mxu1 %vm460_vm2, %v436_v62  ;;  %v16877_v61 = vld [vmem:[#allocation8 + $0x1e4] ss:$24 sps:$4 sm:$0xff]   ;;  %v16875_v62 = vld [vmem:[#allocation8 + $0x1e0] ss:$24 sps:$4 sm:$0xff]   ;;  %v16880_v63 = vld [vmem:[#allocation8 + $0x1b4] ss:$24 sps:$4 sm:$0xff]  }
 0x13f   :  { %v16589_v4 = vpop.f32.mrf.mxu0 }
 0x140   :  { %v441_v5 = vadd.f32 %v16811_v56, %v16588_v1  ;;  %v18713_v56 = vld [vmem:[#allocation2 + $0x30] sm:$0xff] }
 0x141   :  { %v16590_v8 = vpop.f32.mrf.mxu0  ;;  %v16883_v1 = vld [vmem:[#allocation8 + $0x184] ss:$24 sps:$4 sm:$0xff]  }
 0x142   :  { %16818 = vmatmul.mubr.msk.f32.vlgmr.msra.gmra.mxu1 %vm460_vm2, %v441_v5  ;;  %v16591_v11 = vadd.f32 %v16590_v8, %v16589_v4  ;;  %v24460_v4 = vmov 0   ;;  %v16910_v5 = vld [vmem:[#allocation8 + $0x2dc] ss:$24 sps:$4 sm:$0xff]  }
 0x143   :  { %16610 = vmatpush3.msra.mxu1 %v15272_v2  ;;  %v16592_v13 = vpop.f32.mrf.mxu0  ;;  %v16881_v2 = vld [vmem:[#allocation8 + $0x180] ss:$24 sps:$4 sm:$0xff]   ;;  %1260 = vmatprep.subr.bf16.mxu0 %v16910_v5  ;;  %v19337_v5 = vld [vmem:[#allocation8 + $0x9c] ss:$24 sps:$4 sm:$0xff]  }
 0x144   :  { %16611 = vmatprep.subr.mxu1 %v15287_v3  ;;  %v446_v15 = vadd.f32 %v16591_v11, %v445_v9  ;;  %v16886_v3 = vld [vmem:[#allocation8 + $0x2e4] ss:$24 sps:$4 sm:$0xff]   ;;  %24492 = vst [vmem:[#allocation27_spill] sm:$0xff] %v19337_v5 }
 0x145   :  { %16612 = vmatpush3.msra.mxu1 %v15271_v6  ;;  %v16593_v17 = vpop.f32.mrf.mxu0  ;;  %v19231_v6 = vld [vmem:[#allocation7] ss:$0 sm:$0xff] }
 0x146   :  { %16613 = vmatprep.subr.mxu1 %v15286_v7  ;;  %v16594_v19 = vadd.f32 %v16593_v17, %v16592_v13  ;;  %16820 = vmatprep.mubr.msk.f32.mxu1 %vm460_vm2, %v446_v15  ;;  %v19235_v13 = vld [vmem:[#allocation8 + $0x2e0] ss:$24 sps:$4 sm:$0xff]   ;;  %v19239_v15 = vld [vmem:[#allocation8 + $0x2b4] ss:$24 sps:$4 sm:$0xff]   ;;  %v19244_v17 = vld [vmem:[#allocation8 + $0x2b0] ss:$24 sps:$4 sm:$0xff]  }
 0x147   :  { %16614 = vmatpush3.msra.mxu1 %v15270_v10 }
 0x148   :  { %16615 = vmatprep.subr.mxu1 %v15285_v12  ;;  %v451_v22 = vadd.f32 %v16814_v0, %v16594_v19  ;;  %v16878_v0 = vld [vmem:[#allocation8 + $0x1b0] ss:$24 sps:$4 sm:$0xff]   ;;  %v19252_v19 = vld [vmem:[#allocation8 + $0x280] ss:$24 sps:$4 sm:$0xff]  }
 0x149   :  { %16616 = vmatpush3.msra.mxu1 %v15269_v14 }
 0x14a   :  { %16617 = vmatprep.subr.mxu1 %v15284_v16  ;;  %16821 = vmatmul.mubr.msk.f32.gmra.mxu1 %vm460_vm2, %v451_v22  ;;  %v19260_v22 = vld [vmem:[#allocation8 + $0x224] ss:$24 sps:$4 sm:$0xff]  }
 0x14b   :  { %16618 = vmatpush3.msra.mxu1 %v15268_v18  ;;  %669 = vmatprep.mubr.f32.mxu1 %v18708_v26  ;;  %v19248_v18 = vld [vmem:[#allocation8 + $0x284] ss:$24 sps:$4 sm:$0xff]   ;;  %v19272_v26 = vld [vmem:[#allocation8 + $0x1f0] ss:$24 sps:$4 sm:$0xff]  }
 0x14c   :  { %16619 = vmatprep.subr.mxu1 %v15283_v20  ;;  %v19256_v20 = vld [vmem:[#allocation8 + $0x254] ss:$24 sps:$4 sm:$0xff]  }
 0x14d   :  { %16620 = vmatpush3.msra.mxu1 %v15267_v21  ;;  %v19258_v21 = vld [vmem:[#allocation8 + $0x250] ss:$24 sps:$4 sm:$0xff]  }
 0x14e   :  { %16621 = vmatprep.subr.mxu1 %v15282_v23  ;;  %v19264_v23 = vld [vmem:[#allocation8 + $0x220] ss:$24 sps:$4 sm:$0xff]  }
 0x14f   :  { %16622 = vmatpush3.msra.mxu1 %v15266_v24  ;;  %v19266_v24 = vld [vmem:[#allocation8 + $0x1f4] ss:$24 sps:$4 sm:$0xff]  }
 0x150   :  { %16623 = vmatprep.subr.mxu1 %v15281_v25 }
 0x151   :  { %16624 = vmatpush3.msra.mxu1 %v15265_v27  ;;  %v19274_v27 = vld [vmem:[#allocation8 + $0x1c4] ss:$24 sps:$4 sm:$0xff]  }
 0x152   :  { %16625 = vmatprep.subr.mxu1 %v15280_v28 }
 0x153   :  { %16626 = vmatpush3.msra.mxu1 %v15264_v29  ;;  %v16835_v29 = vpop.f32.mrf.mxu0 }
 0x154   :  { %16627 = vmatprep.subr.mxu1 %v15279_v30  ;;  %v19280_v30 = vld [vmem:[#allocation8 + $0x1c0] ss:$24 sps:$4 sm:$0xff]  }
 0x155   :  { %16628 = vmatpush3.msra.mxu1 %v15263_v31  ;;  %v19282_v31 = vld [vmem:[#allocation8 + $0x194] ss:$24 sps:$4 sm:$0xff]  }
 0x156   :  { %16629 = vmatprep.subr.mxu1 %v15278_v32 }
 0x157   :  { %16630 = vmatpush3.msra.mxu1 %v15262_v33 }
 0x158   :  { %16631 = vmatprep.subr.mxu1 %v15277_v34  ;;  %v756_v34 = vpop.f32.mrf.mxu0 }
 0x159   :  { %16632 = vmatpush3.msra.mxu1 %v15261_v35  ;;  %v19286_v35 = vld [vmem:[#allocation8 + $0x190] ss:$24 sps:$4 sm:$0xff]  }
 0x15a   :  { %16633 = vmatprep.subr.mxu1 %v15276_v36 }
 0x15b   :  { %16634 = vmatpush3.msra.mxu1 %v15260_v37  ;;  %v19288_v37 = vld [vmem:[#allocation8 + $0x15c] ss:$24 sps:$4 sm:$0xff]  }
 0x15c   :  { %16635 = vmatprep.subr.mxu1 %v15275_v38 }
 0x15d   :  { %16636 = vmatpush3.msra.mxu1 %v15259_v39 }
 0x15e   :  { %16637 = vmatprep.subr.mxu1 %v15274_v40 }
 0x15f   :  { %16638 = vmatpush3.msra.mxu1 %v15258_v41  ;;  %v19292_v41 = vld [vmem:[#allocation8 + $0x2d8] ss:$24 sps:$4 sm:$0xff]  }
 0x160   :  { %16639 = vmatprep.subr.mxu1 %v15273_v42  ;;  %v19294_v42 = vld [vmem:[#allocation8 + $0x158] ss:$24 sps:$4 sm:$0xff]  }
 0x161   :  { %16640 = vmatpush3.msra.mxu1 %v15257_v43  ;;  %v16838_v43 = vpop.f32.mrf.mxu0 }
 0x162   :  { %670 = vmatmul.mubr.f32.vlgmr.msra.gmra.mxu1 %v18709_v48  ;;  %1219 = vmatprep.subr.bf16.mxu1 %v16862_v44 }
 0x163   :  { %674 = vmatprep.mubr.f32.mxu1 %v18710_v50  ;;  %1220 = vmatpush1.bf16.msra.mxu1 %v16860_v45  ;;  %v19297_v45 = vld [vmem:[#allocation8 + $0x2ac] ss:$24 sps:$4 sm:$0xff]   ;;  %v19305_v50 = vld [vmem:[#allocation8 + $0x128] ss:$24 sps:$4 sm:$0xff]  }
 0x164   :  { %1221 = vmatprep.subr.bf16.mxu1 %v16865_v46  ;;  %v19299_v46 = vld [vmem:[#allocation8 + $0x12c] ss:$24 sps:$4 sm:$0xff]  }
 0x166   :  { %675 = vmatmul.mubr.f32.gmra.mxu1 %v18711_v52  ;;  %v766_v52 = vpop.f32.mrf.mxu0 }
 0x167   :  { %679 = vmatprep.mubr.f32.mxu1 %v18712_v54  ;;  %1222 = vmatpush1.bf16.msra.mxu1 %v16863_v47  ;;  %v19311_v54 = vld [vmem:[#allocation8 + $0xfc] ss:$24 sps:$4 sm:$0xff]  }
 0x168   :  { %1223 = vmatprep.subr.bf16.mxu1 %v16868_v49  ;;  %v19303_v49 = vld [vmem:[#allocation8 + $0x2a8] ss:$24 sps:$4 sm:$0xff]   ;;  %24488 = vst [vmem:[#allocation23_spill] sm:$0xff] %v19311_v54 }
 0x16a   :  { %680 = vmatmul.mubr.f32.gmra.mxu1 %v18713_v56 }
 0x16b   :  { %684 = vmatprep.mubr.f32.mxu1 %v18714_v58  ;;  %1224 = vmatpush1.bf16.msra.mxu1 %v16866_v51  ;;  %v19317_v58 = vld [vmem:[#allocation8 + $0x278] ss:$24 sps:$4 sm:$0xff]  }
 0x16c   :  { %1225 = vmatprep.subr.bf16.mxu1 %v16871_v53  ;;  %v19309_v53 = vld [vmem:[#allocation8 + $0x27c] ss:$24 sps:$4 sm:$0xff]  }
 0x16e   :  { %685 = vmatmul.mubr.f32.gmra.mxu1 %v18715_v60 }
 0x16f   :  { %1226 = vmatpush1.bf16.msra.mxu1 %v16869_v55  ;;  %1251 = vmatprep.mubr.bf16.mxu1 %v24460_v4 }
 0x170   :  { %1227 = vmatprep.subr.bf16.mxu1 %v16874_v57 }
 0x173   :  { %1228 = vmatpush1.bf16.msra.mxu1 %v16872_v59  ;;  %v19319_v59 = vld [vmem:[#allocation8 + $0xf8] ss:$24 sps:$4 sm:$0xff]  }
 0x174   :  { %1229 = vmatprep.subr.bf16.mxu1 %v16877_v61  ;;  %24489 = vst [vmem:[#allocation24_spill] sm:$0xff] %v19319_v59  ;;  %v19322_v61 = vld [vmem:[#allocation8 + $0x24c] ss:$24 sps:$4 sm:$0xff]  }
 0x177   :  { %1230 = vmatpush1.bf16.msra.mxu1 %v16875_v62  ;;  %v19324_v62 = vld [vmem:[#allocation8 + $0xcc] ss:$24 sps:$4 sm:$0xff]  }
 0x178   :  { %1231 = vmatprep.subr.bf16.mxu1 %v16880_v63  ;;  %24490 = vst [vmem:[#allocation25_spill] sm:$0xff] %v19324_v62 }
 0x17b   :  { %1232 = vmatpush1.bf16.msra.mxu1 %v16878_v0 }
 0x17c   :  { %1233 = vmatprep.subr.bf16.mxu1 %v16883_v1  ;;  %v19331_v1 = vld [vmem:[#allocation8 + $0x248] ss:$24 sps:$4 sm:$0xff]  }
 0x17f   :  { %1234 = vmatpush1.bf16.msra.mxu1 %v16881_v2  ;;  %v19333_v2 = vld [vmem:[#allocation8 + $0xc8] ss:$24 sps:$4 sm:$0xff]  }
 0x180   :  { %1301 = vmatprep.subr.bf16.mxu1 %v16886_v3  ;;  %24491 = vst [vmem:[#allocation26_spill] sm:$0xff] %v19333_v2  ;;  %v19335_v3 = vld [vmem:[#allocation8 + $0x21c] ss:$24 sps:$4 sm:$0xff]  }
 0x202   :  { %v16819_v7 = vpop.f32.mrf.mxu1 }
 0x203   :  { %v545_v8 = vadd.f32 %v16819_v7, %v19231_v6  ;;  %v19344_v7 = vld [vmem:[#allocation8 + $0x218] ss:$24 sps:$4 sm:$0xff]  }
 0x204   :  { %v539_v9 = vpop.f32.mrf.mxu1 }
 0x205   :  { %v540_v10 = vadd.f32 %v19231_v6, %v539_v9  ;;  %v559_v11 = vmax.f32 %v545_v8, 0.0  ;;  %v19346_v8 = vld [vmem:[#allocation8 + $0x98] ss:$24 sps:$4 sm:$0xff]   ;;  %v19349_v9 = vld [vmem:[#allocation8 + $0x1ec] ss:$24 sps:$4 sm:$0xff]  }
 0x206   :  { %24493 = vst [vmem:[#allocation28_spill] sm:$0xff] %v19346_v8 }
 0x207   :  { %v558_v12 = vmax.f32 %v540_v10, 0.0  ;;  %v19351_v10 = vld [vmem:[#allocation8 + $0x6c] ss:$24 sps:$4 sm:$0xff]  }
 0x208   :  { %24494 = vst [vmem:[#allocation29_spill] sm:$0xff] %v19351_v10 }
 0x209   :  { %v19237_v14 = vpack.c.bf16 %v559_v11, %v558_v12  ;;  %v19357_v11 = vld [vmem:[#allocation8 + $0x1e8] ss:$24 sps:$4 sm:$0xff]  }
 0x20a   :  { %v19270_v25 = vpop.f32.mrf.mxu1  ;;  %v19359_v12 = vld [vmem:[#allocation8 + $0x68] ss:$24 sps:$4 sm:$0xff]  }
 0x20b   :  { %v19242_v16 = vshrl.u32 %v19237_v14, 16  ;;  %24486 = vst [vmem:[#allocation21_spill] sm:$0xff] %v19270_v25  ;;  %24495 = vst [vmem:[#allocation30_spill] sm:$0xff] %v19359_v12  ;;  %v18724_v25 = vld [vmem:[#allocation8 + $0x214] ss:$24 sps:$4 sm:$0xff]  }
 0x20c   :  { %v19278_v28 = vpop.f32.mrf.mxu1 }
 0x20d   :  { %24485 = vst [vmem:[#allocation20_spill] sm:$0xff] %v19242_v16  ;;  %1252 = vmatmul.mubr.bf16.vlgmr.msra.gmra.mxu1 %v19242_v16  ;;  %24487 = vst [vmem:[#allocation22_spill] sm:$0xff] %v19278_v28  ;;  %v19421_v28 = vld [vmem:[#allocation8 + $0x90] ss:$24 sps:$4 sm:$0xff]  }
 0x20e   :  { %1302 = vmatpush1.bf16.msra.mxu1 %v19235_v13  ;;  %1333 = vmatprep.mubr.bf16.mxu1 %v24460_v4 }
 0x20f   :  { %1303 = vmatprep.subr.bf16.mxu1 %v19239_v15 }
 0x212   :  { %1304 = vmatpush1.bf16.msra.mxu1 %v19244_v17 }
 0x213   :  { %1305 = vmatprep.subr.bf16.mxu1 %v19248_v18 }
 0x216   :  { %1306 = vmatpush1.bf16.msra.mxu1 %v19252_v19 }
 0x217   :  { %1307 = vmatprep.subr.bf16.mxu1 %v19256_v20 }
 0x21a   :  { %1308 = vmatpush1.bf16.msra.mxu1 %v19258_v21 }
 0x21b   :  { %1309 = vmatprep.subr.bf16.mxu1 %v19260_v22 }
 0x21e   :  { %1310 = vmatpush1.bf16.msra.mxu1 %v19264_v23 }
 0x21f   :  { %1311 = vmatprep.subr.bf16.mxu1 %v19266_v24 }
 0x222   :  { %v16641_v32 = vpop.f32.mrf.mxu1  ;;  %1312 = vmatpush1.bf16.msra.mxu1 %v19272_v26 }
 0x223   :  { %1313 = vmatprep.subr.bf16.mxu1 %v19274_v27 }
 0x224   :  { %v16642_v33 = vpop.f32.mrf.mxu1 }
 0x225   :  { %v16643_v36 = vadd.f32 %v16642_v33, %v16641_v32  ;;  %v19363_v32 = vld [vmem:[#allocation8 + $0x3c] ss:$24 sps:$4 sm:$0xff]   ;;  %v19369_v33 = vld [vmem:[#allocation8 + $0x1b8] ss:$24 sps:$4 sm:$0xff]  }
 0x226   :  { %v16644_v38 = vpop.f32.mrf.mxu1  ;;  %1314 = vmatpush1.bf16.msra.mxu1 %v19280_v30  ;;  %24496 = vst [vmem:[#allocation31_spill] sm:$0xff] %v19363_v32 }
 0x227   :  { %v757_v39 = vadd.f32 %v16643_v36, %v756_v34  ;;  %1315 = vmatprep.subr.bf16.mxu1 %v19282_v31  ;;  %v19371_v34 = vld [vmem:[#allocation8 + $0x38] ss:$24 sps:$4 sm:$0xff]   ;;  %v19373_v36 = vld [vmem:[#allocation8 + $0x18c] ss:$24 sps:$4 sm:$0xff]  }
 0x228   :  { %v16645_v40 = vpop.f32.mrf.mxu1  ;;  %24497 = vst [vmem:[#allocation32_spill] sm:$0xff] %v19371_v34 }
 0x229   :  { %v16646_v44 = vadd.f32 %v16645_v40, %v16644_v38  ;;  %16841 = vmatprep.mubr.msk.f32.mxu0 %vm460_vm2, %v757_v39  ;;  %v19375_v38 = vld [vmem:[#allocation8 + $0xc] ss:$24 sps:$4 sm:$0xff]   ;;  %v19383_v39 = vld [vmem:[#allocation8 + $0x188] ss:$24 sps:$4 sm:$0xff]  }
 0x22a   :  { %1316 = vmatpush1.bf16.msra.mxu1 %v19286_v35  ;;  %v16647_v47 = vpop.f32.mrf.mxu1  ;;  %24498 = vst [vmem:[#allocation33_spill] sm:$0xff] %v19375_v38  ;;  %v19385_v40 = vld [vmem:[#allocation8 + $0x8] ss:$24 sps:$4 sm:$0xff]  }
 0x22b   :  { %v762_v48 = vadd.f32 %v16835_v29, %v16646_v44  ;;  %1623 = vmatprep.subr.bf16.mxu1 %v19288_v37  ;;  %v19361_v29 = vld [vmem:[#allocation8 + $0x1bc] ss:$24 sps:$4 sm:$0xff]   ;;  %24499 = vst [vmem:[#allocation34_spill] sm:$0xff] %v19385_v40  ;;  %v19393_v44 = vld [vmem:[#allocation8 + $0x150] ss:$24 sps:$4 sm:$0xff]  }
 0x22c   :  { %v16648_v51 = vpop.f32.mrf.mxu1 }
 0x22d   :  { %16842 = vmatmul.mubr.msk.f32.vlgmr.msra.gmra.mxu0 %vm460_vm2, %v762_v48  ;;  %1334 = vmatmul.mubr.bf16.vlgmr.msra.gmra.mxu1 %v19242_v16  ;;  %v16649_v55 = vadd.f32 %v16648_v51, %v16647_v47  ;;  %v19396_v47 = vld [vmem:[#allocation8 + $0x124] ss:$24 sps:$4 sm:$0xff]   ;;  %v18716_v48 = vld [vmem:[#allocation8 + $0x2d4] ss:$24 sps:$4 sm:$0xff]   ;;  %v19401_v51 = vld [vmem:[#allocation8 + $0x120] ss:$24 sps:$4 sm:$0xff]  }
 0x22e   :  { %1261 = vmatpush1.bf16.msra.mxu0 %v19292_v41  ;;  %1624 = vmatpush1.bf16.msra.mxu1 %v19294_v42  ;;  %v16650_v56 = vpop.f32.mrf.mxu1 }
 0x22f   :  { %1262 = vmatprep.subr.bf16.mxu0 %v19297_v45  ;;  %1625 = vmatprep.subr.bf16.mxu1 %v19299_v46  ;;  %v767_v57 = vadd.f32 %v16649_v55, %v766_v52  ;;  %v19405_v52 = vld [vmem:[#allocation8 + $0xf4] ss:$24 sps:$4 sm:$0xff]   ;;  %v18717_v55 = vld [vmem:[#allocation8 + $0x2d0] ss:$24 sps:$4 sm:$0xff]  }
 0x230   :  { %v16651_v60 = vpop.f32.mrf.mxu1  ;;  %1655 = vmatprep.mubr.bf16.mxu1 %v24460_v4 }
 0x231   :  { %v16652_v63 = vadd.f32 %v16651_v60, %v16650_v56  ;;  %16844 = vmatprep.mubr.msk.f32.mxu0 %vm460_vm2, %v767_v57  ;;  %v18718_v56 = vld [vmem:[#allocation8 + $0x2a4] ss:$24 sps:$4 sm:$0xff]   ;;  %v19409_v57 = vld [vmem:[#allocation8 + $0xf0] ss:$24 sps:$4 sm:$0xff]  }
 0x232   :  { %1263 = vmatpush1.bf16.msra.mxu0 %v19303_v49  ;;  %1626 = vmatpush1.bf16.msra.mxu1 %v19305_v50  ;;  %v19412_v60 = vld [vmem:[#allocation8 + $0xc4] ss:$24 sps:$4 sm:$0xff]  }
 0x233   :  { %1264 = vmatprep.subr.bf16.mxu0 %v19309_v53  ;;  %1627 = vmatprep.subr.bf16.mxu1 %v19311_v54  ;;  %v772_v0 = vadd.f32 %v16838_v43, %v16652_v63  ;;  %v19389_v43 = vld [vmem:[#allocation8 + $0x154] ss:$24 sps:$4 sm:$0xff]   ;;  %v18719_v63 = vld [vmem:[#allocation8 + $0x2a0] ss:$24 sps:$4 sm:$0xff]  }
 0x234   :  { %v19474_v54 = vld [vmem:[#allocation8 + $0x74] ss:$24 sps:$4 sm:$0xff]  }
 0x235   :  { %16845 = vmatmul.mubr.msk.f32.gmra.mxu0 %vm460_vm2, %v772_v0  ;;  %v18720_v0 = vld [vmem:[#allocation8 + $0x274] ss:$24 sps:$4 sm:$0xff]  }
 0x236   :  { %1265 = vmatpush1.bf16.msra.mxu0 %v19317_v58  ;;  %1628 = vmatpush1.bf16.msra.mxu1 %v19319_v59  ;;  %v19471_v59 = vld [vmem:[#allocation8 + $0xa0] ss:$24 sps:$4 sm:$0xff]  }
 0x237   :  { %1266 = vmatprep.subr.bf16.mxu0 %v19322_v61  ;;  %1629 = vmatprep.subr.bf16.mxu1 %v19324_v62  ;;  %v19468_v62 = vld [vmem:[#allocation8 + $0xa4] ss:$24 sps:$4 sm:$0xff]   ;;  %24506 = vst [vmem:[#allocation40_spill] sm:$0xff] %v19471_v59 }
 0x238   :  { %1292 = vmatprep.mubr.bf16.mxu0 %v24460_v4  ;;  %24505 = vst [vmem:[#allocation39_spill] sm:$0xff] %v19468_v62 }
 0x23a   :  { %1267 = vmatpush1.bf16.msra.mxu0 %v19331_v1  ;;  %1630 = vmatpush1.bf16.msra.mxu1 %v19333_v2  ;;  %v19459_v2 = vld [vmem:[#allocation8 + $0x100] ss:$24 sps:$4 sm:$0xff]  }
 0x23b   :  { %1268 = vmatprep.subr.bf16.mxu0 %v19335_v3  ;;  %1631 = vmatprep.subr.bf16.mxu1 %v19337_v5  ;;  %v19452_v5 = vld [vmem:[#allocation8 + $0x130] ss:$24 sps:$4 sm:$0xff]   ;;  %24502 = vst [vmem:[#allocation36_spill] sm:$0xff] %v19459_v2 }
 0x23e   :  { %1269 = vmatpush1.bf16.msra.mxu0 %v19344_v7  ;;  %1632 = vmatpush1.bf16.msra.mxu1 %v19346_v8  ;;  %v18732_v8 = vld [vmem:[#allocation8 + $0x2e4] ss:$24 sps:$4 sm:$0xff]  }
 0x23f   :  { %1270 = vmatprep.subr.bf16.mxu0 %v19349_v9  ;;  %1633 = vmatprep.subr.bf16.mxu1 %v19351_v10  ;;  %v19445_v10 = vld [vmem:[#allocation8 + $0x160] ss:$24 sps:$4 sm:$0xff]  }
 0x242   :  { %1271 = vmatpush1.bf16.msra.mxu0 %v19357_v11  ;;  %1634 = vmatpush1.bf16.msra.mxu1 %v19359_v12  ;;  %v18730_v12 = vld [vmem:[#allocation8 + $0x184] ss:$24 sps:$4 sm:$0xff]  }
 0x243   :  { %1272 = vmatprep.subr.bf16.mxu0 %v19361_v29  ;;  %1635 = vmatprep.subr.bf16.mxu1 %v19363_v32  ;;  %v19439_v32 = vld [vmem:[#allocation8] ss:$24 sps:$4 sm:$0xff]  }
 0x246   :  { %1273 = vmatpush1.bf16.msra.mxu0 %v19369_v33  ;;  %1636 = vmatpush1.bf16.msra.mxu1 %v19371_v34  ;;  %v18728_v34 = vld [vmem:[#allocation8 + $0x1b4] ss:$24 sps:$4 sm:$0xff]  }
 0x247   :  { %1274 = vmatprep.subr.bf16.mxu0 %v19373_v36  ;;  %1637 = vmatprep.subr.bf16.mxu1 %v19375_v38  ;;  %v19433_v38 = vld [vmem:[#allocation8 + $0x30] ss:$24 sps:$4 sm:$0xff]  }
 0x24a   :  { %1275 = vmatpush1.bf16.msra.mxu0 %v19383_v39  ;;  %1638 = vmatpush1.bf16.msra.mxu1 %v19385_v40  ;;  %v18726_v40 = vld [vmem:[#allocation8 + $0x1e4] ss:$24 sps:$4 sm:$0xff]  }
 0x24b   :  { %1582 = vmatprep.subr.bf16.mxu0 %v19389_v43  ;;  %1709 = vmatprep.subr.bf16.mxu1 %v18716_v48  ;;  %v19415_v48 = vld [vmem:[#allocation8 + $0xc0] ss:$24 sps:$4 sm:$0xff]  }
 0x24d   :  { %1293 = vmatmul.mubr.bf16.vlgmr.msra.gmra.mxu0 %v19242_v16  ;;  %1656 = vmatmul.mubr.bf16.vlgmr.msra.gmra.mxu1 %v19237_v14  ;;  %v19427_v16 = vld [vmem:[#allocation8 + $0x60] ss:$24 sps:$4 sm:$0xff]  }
 0x24e   :  { %1583 = vmatpush1.bf16.msra.mxu0 %v19393_v44  ;;  %1614 = vmatprep.mubr.bf16.mxu0 %v24460_v4 }
 0x24f   :  { %1584 = vmatprep.subr.bf16.mxu0 %v19396_v47  ;;  %1710 = vmatpush1.bf16.msra.mxu1 %v18717_v55  ;;  %v19418_v55 = vld [vmem:[#allocation8 + $0x94] ss:$24 sps:$4 sm:$0xff]  }
 0x250   :  { %1711 = vmatprep.subr.bf16.mxu1 %v18718_v56  ;;  %1741 = vmatprep.mubr.bf16.mxu1 %v24460_v4  ;;  %v18721_v56 = vld [vmem:[#allocation8 + $0x270] ss:$24 sps:$4 sm:$0xff]   ;;  %v18722_v4 = vld [vmem:[#allocation8 + $0x244] ss:$24 sps:$4 sm:$0xff]  }
 0x252   :  { %1585 = vmatpush1.bf16.msra.mxu0 %v19401_v51 }
 0x253   :  { %1586 = vmatprep.subr.bf16.mxu0 %v19405_v52  ;;  %1712 = vmatpush1.bf16.msra.mxu1 %v18719_v63  ;;  %v19424_v63 = vld [vmem:[#allocation8 + $0x64] ss:$24 sps:$4 sm:$0xff]  }
 0x254   :  { %1713 = vmatprep.subr.bf16.mxu1 %v18720_v0  ;;  %v18723_v0 = vld [vmem:[#allocation8 + $0x240] ss:$24 sps:$4 sm:$0xff]  }
 0x256   :  { %1587 = vmatpush1.bf16.msra.mxu0 %v19409_v57 }
 0x257   :  { %1588 = vmatprep.subr.bf16.mxu0 %v19412_v60  ;;  %1714 = vmatpush1.bf16.msra.mxu1 %v18721_v56  ;;  %v19430_v56 = vld [vmem:[#allocation8 + $0x34] ss:$24 sps:$4 sm:$0xff]  }
 0x258   :  { %1715 = vmatprep.subr.bf16.mxu1 %v18722_v4  ;;  %v18725_v4 = vld [vmem:[#allocation8 + $0x210] ss:$24 sps:$4 sm:$0xff]  }
 0x25a   :  { %1589 = vmatpush1.bf16.msra.mxu0 %v19415_v48 }
 0x25b   :  { %1590 = vmatprep.subr.bf16.mxu0 %v19418_v55  ;;  %1716 = vmatpush1.bf16.msra.mxu1 %v18723_v0  ;;  %v19436_v0 = vld [vmem:[#allocation8 + $0x4] ss:$24 sps:$4 sm:$0xff]  }
 0x25c   :  { %1717 = vmatprep.subr.bf16.mxu1 %v18724_v25  ;;  %v18727_v25 = vld [vmem:[#allocation8 + $0x1e0] ss:$24 sps:$4 sm:$0xff]  }
 0x25e   :  { %1591 = vmatpush1.bf16.msra.mxu0 %v19421_v28 }
 0x25f   :  { %1592 = vmatprep.subr.bf16.mxu0 %v19424_v63  ;;  %1718 = vmatpush1.bf16.msra.mxu1 %v18725_v4  ;;  %v19442_v4 = vld [vmem:[#allocation8 + $0x164] ss:$24 sps:$4 sm:$0xff]  }
 0x260   :  { %1719 = vmatprep.subr.bf16.mxu1 %v18726_v40  ;;  %v18729_v40 = vld [vmem:[#allocation8 + $0x1b0] ss:$24 sps:$4 sm:$0xff]  }
 0x262   :  { %1593 = vmatpush1.bf16.msra.mxu0 %v19427_v16 }
 0x263   :  { %1594 = vmatprep.subr.bf16.mxu0 %v19430_v56  ;;  %1720 = vmatpush1.bf16.msra.mxu1 %v18727_v25  ;;  %v19448_v25 = vld [vmem:[#allocation8 + $0x134] ss:$24 sps:$4 sm:$0xff]  }
 0x264   :  { %1721 = vmatprep.subr.bf16.mxu1 %v18728_v34  ;;  %v18731_v34 = vld [vmem:[#allocation8 + $0x180] ss:$24 sps:$4 sm:$0xff]  }
 0x266   :  { %1595 = vmatpush1.bf16.msra.mxu0 %v19433_v38 }
 0x267   :  { %1596 = vmatprep.subr.bf16.mxu0 %v19436_v0  ;;  %1722 = vmatpush1.bf16.msra.mxu1 %v18729_v40  ;;  %v24500_v40 = vmov 0  }
 0x268   :  { %1723 = vmatprep.subr.bf16.mxu1 %v18730_v12  ;;  %v19456_v12 = vld [vmem:[#allocation8 + $0x104] ss:$24 sps:$4 sm:$0xff]  }
 0x269   :  { %24501 = vst [vmem:[#allocation35_spill] sm:$0xff] %v19456_v12 }
 0x26a   :  { %1597 = vmatpush1.bf16.msra.mxu0 %v19439_v32 }
 0x26b   :  { %1664 = vmatprep.subr.bf16.mxu0 %v19442_v4  ;;  %1724 = vmatpush1.bf16.msra.mxu1 %v18731_v34  ;;  %v19462_v34 = vld [vmem:[#allocation8 + $0xd4] ss:$24 sps:$4 sm:$0xff]  }
 0x26c   :  { %1791 = vmatprep.subr.bf16.mxu1 %v18732_v8  ;;  %24503 = vst [vmem:[#allocation37_spill] sm:$0xff] %v19462_v34  ;;  %v19465_v8 = vld [vmem:[#allocation8 + $0xd0] ss:$24 sps:$4 sm:$0xff]  }
 0x26d   :  { %1615 = vmatmul.mubr.bf16.vlgmr.msra.gmra.mxu0 %v19237_v14  ;;  %24504 = vst [vmem:[#allocation38_spill] sm:$0xff] %v19465_v8 }
 0x26e   :  { %1665 = vmatpush1.bf16.msra.mxu0 %v19445_v10  ;;  %1696 = vmatprep.mubr.bf16.mxu0 %v24500_v40 }
 0x26f   :  { %1666 = vmatprep.subr.bf16.mxu0 %v19448_v25 }
 0x272   :  { %1667 = vmatpush1.bf16.msra.mxu0 %v19452_v5 }
 0x273   :  { %1668 = vmatprep.subr.bf16.mxu0 %v19456_v12  ;;  %v19477_v12 = vld [vmem:[#allocation8 + $0x70] ss:$24 sps:$4 sm:$0xff]  }
 0x276   :  { %1669 = vmatpush1.bf16.msra.mxu0 %v19459_v2  ;;  %v19480_v2 = vld [vmem:[#allocation8 + $0x44] ss:$24 sps:$4 sm:$0xff]  }
 0x277   :  { %1670 = vmatprep.subr.bf16.mxu0 %v19462_v34  ;;  %v19483_v34 = vld [vmem:[#allocation8 + $0x40] ss:$24 sps:$4 sm:$0xff]  }
 0x27a   :  { %1671 = vmatpush1.bf16.msra.mxu0 %v19465_v8  ;;  %v19486_v8 = vld [vmem:[#allocation8 + $0x14] ss:$24 sps:$4 sm:$0xff]  }
 0x27b   :  { %1672 = vmatprep.subr.bf16.mxu0 %v19468_v62  ;;  %v19489_v62 = vld [vmem:[#allocation8 + $0x10] ss:$24 sps:$4 sm:$0xff]  }
 0x27e   :  { %1673 = vmatpush1.bf16.msra.mxu0 %v19471_v59  ;;  %v18733_v59 = vld [vmem:[#allocation8 + $0x2dc] ss:$24 sps:$4 sm:$0xff]  }
 0x27f   :  { %1674 = vmatprep.subr.bf16.mxu0 %v19474_v54 }
 0x282   :  { %1675 = vmatpush1.bf16.msra.mxu0 %v19477_v12 }
 0x283   :  { %1676 = vmatprep.subr.bf16.mxu0 %v19480_v2 }
 0x286   :  { %1677 = vmatpush1.bf16.msra.mxu0 %v19483_v34 }
 0x287   :  { %1678 = vmatprep.subr.bf16.mxu0 %v19486_v8 }
 0x28a   :  { %1679 = vmatpush1.bf16.msra.mxu0 %v19489_v62 }
 0x28b   :  { %1750 = vmatprep.subr.bf16.mxu0 %v18733_v59 }
 0x28d   :  { %1697 = vmatmul.mubr.bf16.vlgmr.msra.gmra.mxu0 %v19237_v14 }
 0x28e   :  { %1751 = vmatpush1.bf16.msra.mxu0 %v19292_v41  ;;  %1782 = vmatprep.mubr.bf16.mxu0 %v24500_v40 }
 0x28f   :  { %1752 = vmatprep.subr.bf16.mxu0 %v19297_v45 }
 0x292   :  { %1753 = vmatpush1.bf16.msra.mxu0 %v19303_v49 }
 0x293   :  { %1754 = vmatprep.subr.bf16.mxu0 %v19309_v53 }
 0x296   :  { %1755 = vmatpush1.bf16.msra.mxu0 %v19317_v58 }
 0x297   :  { %1756 = vmatprep.subr.bf16.mxu0 %v19322_v61 }
 0x29a   :  { %1757 = vmatpush1.bf16.msra.mxu0 %v19331_v1 }
 0x29b   :  { %1758 = vmatprep.subr.bf16.mxu0 %v19335_v3 }
 0x29e   :  { %1759 = vmatpush1.bf16.msra.mxu0 %v19344_v7 }
 0x29f   :  { %1760 = vmatprep.subr.bf16.mxu0 %v19349_v9 }
 0x2a2   :  { %1761 = vmatpush1.bf16.msra.mxu0 %v19357_v11 }
 0x2a3   :  { %1762 = vmatprep.subr.bf16.mxu0 %v19361_v29 }
 0x2a6   :  { %1763 = vmatpush1.bf16.msra.mxu0 %v19369_v33 }
 0x2a7   :  { %1764 = vmatprep.subr.bf16.mxu0 %v19373_v36 }
 0x2aa   :  { %1765 = vmatpush1.bf16.msra.mxu0 %v19383_v39 }
 0x2ab   :  { %1832 = vmatprep.subr.bf16.mxu0 %v19389_v43  ;;  %v24522_v43 = vld [vmem:[#allocation30_spill] sm:$0xff] }
 0x2cd   :  { %v19511_v41 = vpop.f32.mrf.mxu1 }
 0x2cf   :  { %v19513_v45 = vpop.f32.mrf.mxu1 }
 0x2d1   :  { %v1257_v49 = vpop.f32.mrf.mxu1 }
 0x2d2   :  { %v19646_v49 = vld [vmem:[#allocation8 + $0x3c4] ss:$24 sps:$4 sm:$0xff]  }
 0x2d3   :  { %v1258_v53 = vpop.f32.mrf.mxu1 }
 0x2d4   :  { %v19648_v53 = vld [vmem:[#allocation8 + $0x3cc] ss:$24 sps:$4 sm:$0xff]  }
 0x2ed   :  { %v16843_v58 = vpop.f32.mrf.mxu0  ;;  %v19515_v59 = vpop.f32.mrf.mxu1 }
 0x2ee   :  { %v859_v61 = vadd.f32 %v16843_v58, %v19231_v6  ;;  %v19652_v58 = vld [vmem:[#allocation8 + $0x3c0] ss:$24 sps:$4 sm:$0xff]  }
 0x2ef   :  { %v853_v1 = vpop.f32.mrf.mxu0  ;;  %v19518_v3 = vpop.f32.mrf.mxu1 }
 0x2f0   :  { %v854_v7 = vadd.f32 %v19231_v6, %v853_v1  ;;  %v873_v11 = vmax.f32 %v859_v61, 0.0  ;;  %v19654_v61 = vld [vmem:[#allocation8 + $0x3c8] ss:$24 sps:$4 sm:$0xff]   ;;  %v19658_v1 = vld [vmem:[#allocation8 + $0x394] ss:$24 sps:$4 sm:$0xff]  }
 0x2f1   :  { %v1339_v9 = vpop.f32.mrf.mxu1 }
 0x2f2   :  { %v872_v29 = vmax.f32 %v854_v7, 0.0  ;;  %v19660_v7 = vld [vmem:[#allocation8 + $0x39c] ss:$24 sps:$4 sm:$0xff]   ;;  %v19664_v9 = vld [vmem:[#allocation8 + $0x390] ss:$24 sps:$4 sm:$0xff]  }
 0x2f3   :  { %v1340_v33 = vpop.f32.mrf.mxu1 }
 0x2f4   :  { %v19521_v36 = vpack.c.bf16 %v873_v11, %v872_v29  ;;  %v19666_v11 = vld [vmem:[#allocation8 + $0x398] ss:$24 sps:$4 sm:$0xff]   ;;  %v19670_v29 = vld [vmem:[#allocation8 + $0x364] ss:$24 sps:$4 sm:$0xff]  }
 0x2f5   :  { %v19544_v6 = vpop.f32.mrf.mxu0  ;;  %v19672_v33 = vld [vmem:[#allocation8 + $0x36c] ss:$24 sps:$4 sm:$0xff]  }
 0x2f6   :  { %v19524_v39 = vshrl.u32 %v19521_v36, 16  ;;  %24507 = vst [vmem:[#allocation41_spill] sm:$0xff] %v19544_v6  ;;  %v20047_v6 = vld [vmem:[#allocation8 + $0x704] ss:$24 sps:$4 sm:$0xff]  }
 0x2f8   :  { %1742 = vmatmul.mubr.bf16.vlgmr.msra.gmra.mxu1 %v19524_v39  ;;  %1783 = vmatmul.mubr.bf16.vlgmr.msra.gmra.mxu0 %v19524_v39 }
 0x2f9   :  { %1792 = vmatpush1.bf16.msra.mxu1 %v19235_v13  ;;  %1833 = vmatpush1.bf16.msra.mxu0 %v19393_v44  ;;  %v19550_v13 = vpop.f32.mrf.mxu0  ;;  %v24523_v44 = vld [vmem:[#allocation31_spill] sm:$0xff] }
 0x2fa   :  { %1793 = vmatprep.subr.bf16.mxu1 %v19239_v15  ;;  %1834 = vmatprep.subr.bf16.mxu0 %v19396_v47  ;;  %24508 = vst [vmem:[#allocation42_spill] sm:$0xff] %v19550_v13 }
 0x2fb   :  { %1823 = vmatprep.mubr.bf16.mxu1 %v24500_v40  ;;  %1864 = vmatprep.mubr.bf16.mxu0 %v24500_v40 }
 0x2fd   :  { %1794 = vmatpush1.bf16.msra.mxu1 %v19244_v17  ;;  %1835 = vmatpush1.bf16.msra.mxu0 %v19401_v51 }
 0x2fe   :  { %1795 = vmatprep.subr.bf16.mxu1 %v19248_v18  ;;  %1836 = vmatprep.subr.bf16.mxu0 %v19405_v52  ;;  %v24524_v52 = vld [vmem:[#allocation32_spill] sm:$0xff] }
 0x301   :  { %1796 = vmatpush1.bf16.msra.mxu1 %v19252_v19  ;;  %1837 = vmatpush1.bf16.msra.mxu0 %v19409_v57  ;;  %v24525_v57 = vld [vmem:[#allocation33_spill] sm:$0xff] }
 0x302   :  { %1797 = vmatprep.subr.bf16.mxu1 %v19256_v20  ;;  %1838 = vmatprep.subr.bf16.mxu0 %v19412_v60  ;;  %v19608_v60 = vld [vmem:[#allocation8 + $0x45c] ss:$24 sps:$4 sm:$0xff]  }
 0x305   :  { %1798 = vmatpush1.bf16.msra.mxu1 %v19258_v21  ;;  %1839 = vmatpush1.bf16.msra.mxu0 %v19415_v48 }
 0x306   :  { %1799 = vmatprep.subr.bf16.mxu1 %v19260_v22  ;;  %1840 = vmatprep.subr.bf16.mxu0 %v19418_v55  ;;  %v24526_v55 = vld [vmem:[#allocation34_spill] sm:$0xff] }
 0x309   :  { %1800 = vmatpush1.bf16.msra.mxu1 %v19264_v23  ;;  %1841 = vmatpush1.bf16.msra.mxu0 %v19421_v28  ;;  %v24511_v28 = vld [vmem:[#allocation24_spill] sm:$0xff] }
 0x30a   :  { %1801 = vmatprep.subr.bf16.mxu1 %v19266_v24  ;;  %1842 = vmatprep.subr.bf16.mxu0 %v19424_v63  ;;  %v19614_v63 = vld [vmem:[#allocation8 + $0x458] ss:$24 sps:$4 sm:$0xff]  }
 0x30d   :  { %v1294_v15 = vpop.f32.mrf.mxu0  ;;  %1802 = vmatpush1.bf16.msra.mxu1 %v19272_v26  ;;  %1843 = vmatpush1.bf16.msra.mxu0 %v19427_v16  ;;  %v1657_v17 = vpop.f32.mrf.mxu1  ;;  %v24509_v26 = vld [vmem:[#allocation23_spill] sm:$0xff] }
 0x30e   :  { %v19556_v18 = vadd.f32 %v1657_v17, %v1294_v15  ;;  %1803 = vmatprep.subr.bf16.mxu1 %v19274_v27  ;;  %1844 = vmatprep.subr.bf16.mxu0 %v19430_v56  ;;  %v24510_v27 = vld [vmem:[#allocation35_spill] sm:$0xff] }
 0x30f   :  { %v1296_v19 = vpop.f32.mrf.mxu0  ;;  %v1659_v20 = vpop.f32.mrf.mxu1  ;;  %v19618_v56 = vld [vmem:[#allocation8 + $0x424] ss:$24 sps:$4 sm:$0xff]   ;;  %v19676_v15 = vld [vmem:[#allocation8 + $0x360] ss:$24 sps:$4 sm:$0xff]  }
 0x310   :  { %v19560_v21 = vadd.f32 %v1659_v20, %v1296_v19  ;;  %v19678_v17 = vld [vmem:[#allocation8 + $0x368] ss:$24 sps:$4 sm:$0xff]   ;;  %v19682_v19 = vld [vmem:[#allocation8 + $0x334] ss:$24 sps:$4 sm:$0xff]  }
 0x311   :  { %v1298_v22 = vpop.f32.mrf.mxu0  ;;  %1804 = vmatpush1.bf16.msra.mxu1 %v19280_v30  ;;  %1845 = vmatpush1.bf16.msra.mxu0 %v19433_v38  ;;  %v1661_v23 = vpop.f32.mrf.mxu1  ;;  %v24512_v30 = vld [vmem:[#allocation36_spill] sm:$0xff]  ;;  %v19684_v20 = vld [vmem:[#allocation8 + $0x33c] ss:$24 sps:$4 sm:$0xff]  }
 0x312   :  { %1805 = vmatprep.subr.bf16.mxu1 %v19282_v31  ;;  %1846 = vmatprep.subr.bf16.mxu0 %v19436_v0  ;;  %v24513_v31 = vld [vmem:[#allocation25_spill] sm:$0xff]  ;;  %v19620_v0 = vld [vmem:[#allocation8 + $0x42c] ss:$24 sps:$4 sm:$0xff]  }
 0x313   :  { %v1299_v16 = vpop.f32.mrf.mxu0  ;;  %v1662_v24 = vpop.f32.mrf.mxu1  ;;  %v19690_v23 = vld [vmem:[#allocation8 + $0x330] ss:$24 sps:$4 sm:$0xff]  }
 0x314   :  { %v19692_v16 = vld [vmem:[#allocation8 + $0x338] ss:$24 sps:$4 sm:$0xff]   ;;  %v17048_v24 = vld [vmem:[#allocation8 + $0x304] ss:$24 sps:$4 sm:$0xff]  }
 0x315   :  { %1806 = vmatpush1.bf16.msra.mxu1 %v19286_v35  ;;  %1847 = vmatpush1.bf16.msra.mxu0 %v19439_v32  ;;  %v24514_v35 = vld [vmem:[#allocation37_spill] sm:$0xff] }
 0x316   :  { %1873 = vmatprep.subr.bf16.mxu1 %v19288_v37  ;;  %1914 = vmatprep.subr.bf16.mxu0 %v19442_v4  ;;  %v24515_v37 = vld [vmem:[#allocation26_spill] sm:$0xff]  ;;  %v24521_v32 = vld [vmem:[#allocation29_spill] sm:$0xff] }
 0x317   :  { %v19628_v4 = vld [vmem:[#allocation8 + $0x428] ss:$24 sps:$4 sm:$0xff]  }
 0x318   :  { %1824 = vmatmul.mubr.bf16.vlgmr.msra.gmra.mxu1 %v19524_v39  ;;  %1865 = vmatmul.mubr.bf16.vlgmr.msra.gmra.mxu0 %v19521_v36 }
 0x319   :  { %1874 = vmatpush1.bf16.msra.mxu1 %v19294_v42  ;;  %1915 = vmatpush1.bf16.msra.mxu0 %v19445_v10  ;;  %v24516_v42 = vld [vmem:[#allocation38_spill] sm:$0xff]  ;;  %v24520_v10 = vld [vmem:[#allocation40_spill] sm:$0xff] }
 0x31a   :  { %1875 = vmatprep.subr.bf16.mxu1 %v19299_v46  ;;  %1916 = vmatprep.subr.bf16.mxu0 %v19448_v25  ;;  %v24517_v46 = vld [vmem:[#allocation27_spill] sm:$0xff]  ;;  %v19632_v25 = vld [vmem:[#allocation8 + $0x3f4] ss:$24 sps:$4 sm:$0xff]  }
 0x31b   :  { %1905 = vmatprep.mubr.bf16.mxu1 %v24500_v40  ;;  %1946 = vmatprep.mubr.bf16.mxu0 %v24500_v40 }
 0x31d   :  { %1876 = vmatpush1.bf16.msra.mxu1 %v19305_v50  ;;  %1917 = vmatpush1.bf16.msra.mxu0 %v19452_v5  ;;  %v24518_v50 = vld [vmem:[#allocation39_spill] sm:$0xff]  ;;  %v24519_v5 = vld [vmem:[#allocation28_spill] sm:$0xff] }
 0x31e   :  { %1877 = vmatprep.subr.bf16.mxu1 %v24509_v26  ;;  %1918 = vmatprep.subr.bf16.mxu0 %v24510_v27  ;;  %v19696_v26 = vld [vmem:[#allocation8 + $0x30c] ss:$24 sps:$4 sm:$0xff]  }
 0x321   :  { %1878 = vmatpush1.bf16.msra.mxu1 %v24511_v28  ;;  %1919 = vmatpush1.bf16.msra.mxu0 %v24512_v30  ;;  %v17046_v30 = vld [vmem:[#allocation8 + $0x300] ss:$24 sps:$4 sm:$0xff]  }
 0x322   :  { %1879 = vmatprep.subr.bf16.mxu1 %v24513_v31  ;;  %1920 = vmatprep.subr.bf16.mxu0 %v24514_v35  ;;  %v19702_v31 = vld [vmem:[#allocation8 + $0x308] ss:$24 sps:$4 sm:$0xff]   ;;  %v17054_v35 = vld [vmem:[#allocation8 + $0x464] ss:$24 sps:$4 sm:$0xff]  }
 0x325   :  { %1880 = vmatpush1.bf16.msra.mxu1 %v24515_v37  ;;  %1921 = vmatpush1.bf16.msra.mxu0 %v24516_v42  ;;  %v17052_v42 = vld [vmem:[#allocation8 + $0x460] ss:$24 sps:$4 sm:$0xff]  }
 0x326   :  { %1881 = vmatprep.subr.bf16.mxu1 %v24517_v46  ;;  %1922 = vmatprep.subr.bf16.mxu0 %v24518_v50  ;;  %v2005_v46 = vrot.slane %v19237_v14, 1  ;;  %v17057_v50 = vld [vmem:[#allocation8 + $0x434] ss:$24 sps:$4 sm:$0xff]  }
 0x329   :  { %1882 = vmatpush1.bf16.msra.mxu1 %v24519_v5  ;;  %1923 = vmatpush1.bf16.msra.mxu0 %v24520_v10  ;;  %v17055_v5 = vld [vmem:[#allocation8 + $0x430] ss:$24 sps:$4 sm:$0xff]   ;;  %v17060_v10 = vld [vmem:[#allocation8 + $0x404] ss:$24 sps:$4 sm:$0xff]  }
 0x32a   :  { %1883 = vmatprep.subr.bf16.mxu1 %v24521_v32  ;;  %1924 = vmatprep.subr.bf16.mxu0 %v19474_v54  ;;  %v19606_v54 = vld [vmem:[#allocation8 + $0x454] ss:$24 sps:$4 sm:$0xff]   ;;  %v17058_v32 = vld [vmem:[#allocation8 + $0x400] ss:$24 sps:$4 sm:$0xff]  }
 0x32d   :  { %v19594_v38 = vpop.f32.mrf.mxu0  ;;  %1884 = vmatpush1.bf16.msra.mxu1 %v24522_v43  ;;  %1925 = vmatpush1.bf16.msra.mxu0 %v19477_v12  ;;  %v19634_v12 = vld [vmem:[#allocation8 + $0x3fc] ss:$24 sps:$4 sm:$0xff]  }
 0x32e   :  { %1885 = vmatprep.subr.bf16.mxu1 %v24523_v44  ;;  %1926 = vmatprep.subr.bf16.mxu0 %v19480_v2  ;;  %v19612_v2 = vld [vmem:[#allocation8 + $0x450] ss:$24 sps:$4 sm:$0xff]   ;;  %v17063_v43 = vld [vmem:[#allocation8 + $0x3d4] ss:$24 sps:$4 sm:$0xff]  }
 0x32f   :  { %v19600_v47 = vpop.f32.mrf.mxu0  ;;  %v17061_v44 = vld [vmem:[#allocation8 + $0x3d0] ss:$24 sps:$4 sm:$0xff]  }
 0x331   :  { %v1620_v51 = vpop.f32.mrf.mxu0  ;;  %1886 = vmatpush1.bf16.msra.mxu1 %v24524_v52  ;;  %1927 = vmatpush1.bf16.msra.mxu0 %v19483_v34  ;;  %v19640_v34 = vld [vmem:[#allocation8 + $0x3f0] ss:$24 sps:$4 sm:$0xff]   ;;  %v17064_v52 = vld [vmem:[#allocation8 + $0x3a0] ss:$24 sps:$4 sm:$0xff]  }
 0x332   :  { %1887 = vmatprep.subr.bf16.mxu1 %v24525_v57  ;;  %1928 = vmatprep.subr.bf16.mxu0 %v19486_v8  ;;  %v19642_v8 = vld [vmem:[#allocation8 + $0x3f8] ss:$24 sps:$4 sm:$0xff]   ;;  %v17066_v51 = vld [vmem:[#allocation8 + $0x3a4] ss:$24 sps:$4 sm:$0xff]   ;;  %v17069_v57 = vld [vmem:[#allocation8 + $0x374] ss:$24 sps:$4 sm:$0xff]  }
 0x333   :  { %v1621_v48 = vpop.f32.mrf.mxu0 }
 0x334   :  { %v17072_v48 = vld [vmem:[#allocation8 + $0x344] ss:$24 sps:$4 sm:$0xff]  }
 0x335   :  { %1888 = vmatpush1.bf16.msra.mxu1 %v24526_v55  ;;  %1929 = vmatpush1.bf16.msra.mxu0 %v19489_v62  ;;  %v19626_v62 = vld [vmem:[#allocation8 + $0x420] ss:$24 sps:$4 sm:$0xff]  }
 0x336   :  { %2247 = vmatprep.subr.bf16.mxu1 %v19606_v54  ;;  %2288 = vmatprep.subr.bf16.mxu0 %v19608_v60  ;;  %v17070_v55 = vld [vmem:[#allocation8 + $0x340] ss:$24 sps:$4 sm:$0xff]  }
 0x338   :  { %1906 = vmatmul.mubr.bf16.vlgmr.msra.gmra.mxu1 %v19521_v36  ;;  %1947 = vmatmul.mubr.bf16.vlgmr.msra.gmra.mxu0 %v19521_v36 }
 0x339   :  { %2248 = vmatpush1.bf16.msra.mxu1 %v19612_v2  ;;  %2289 = vmatpush1.bf16.msra.mxu0 %v19614_v63 }
 0x33a   :  { %2249 = vmatprep.subr.bf16.mxu1 %v19618_v56  ;;  %2290 = vmatprep.subr.bf16.mxu0 %v19620_v0 }
 0x33b   :  { %2279 = vmatprep.mubr.bf16.mxu1 %v24500_v40  ;;  %2320 = vmatprep.mubr.bf16.mxu0 %v24500_v40 }
 0x33d   :  { %2250 = vmatpush1.bf16.msra.mxu1 %v19626_v62  ;;  %2291 = vmatpush1.bf16.msra.mxu0 %v19628_v4 }
 0x33e   :  { %2251 = vmatprep.subr.bf16.mxu1 %v19632_v25  ;;  %2292 = vmatprep.subr.bf16.mxu0 %v19634_v12 }
 0x341   :  { %2252 = vmatpush1.bf16.msra.mxu1 %v19640_v34  ;;  %2293 = vmatpush1.bf16.msra.mxu0 %v19642_v8 }
 0x342   :  { %2253 = vmatprep.subr.bf16.mxu1 %v19646_v49  ;;  %2294 = vmatprep.subr.bf16.mxu0 %v19648_v53 }
 0x345   :  { %2254 = vmatpush1.bf16.msra.mxu1 %v19652_v58  ;;  %2295 = vmatpush1.bf16.msra.mxu0 %v19654_v61 }
 0x346   :  { %2255 = vmatprep.subr.bf16.mxu1 %v19658_v1  ;;  %2296 = vmatprep.subr.bf16.mxu0 %v19660_v7 }
 0x349   :  { %2256 = vmatpush1.bf16.msra.mxu1 %v19664_v9  ;;  %2297 = vmatpush1.bf16.msra.mxu0 %v19666_v11 }
 0x34a   :  { %2257 = vmatprep.subr.bf16.mxu1 %v19670_v29  ;;  %2298 = vmatprep.subr.bf16.mxu0 %v19672_v33 }
 0x34d   :  { %v19686_v22 = vpop.f32.mrf.mxu0  ;;  %2258 = vmatpush1.bf16.msra.mxu1 %v19676_v15  ;;  %2299 = vmatpush1.bf16.msra.mxu0 %v19678_v17 }
 0x34e   :  { %2259 = vmatprep.subr.bf16.mxu1 %v19682_v19  ;;  %2300 = vmatprep.subr.bf16.mxu0 %v19684_v20 }
 0x34f   :  { %v19698_v27 = vpop.f32.mrf.mxu0 }
 0x351   :  { %v1702_v28 = vpop.f32.mrf.mxu0  ;;  %2260 = vmatpush1.bf16.msra.mxu1 %v19690_v23  ;;  %2301 = vmatpush1.bf16.msra.mxu0 %v19692_v16 }
 0x352   :  { %2261 = vmatprep.subr.bf16.mxu1 %v17048_v24  ;;  %2302 = vmatprep.subr.bf16.mxu0 %v19696_v26  ;;  %v19820_v28 = vld [vmem:[#allocation8 + $0x4b0] ss:$24 sps:$4 sm:$0xff]  }
 0x353   :  { %v1703_v37 = vpop.f32.mrf.mxu0 }
 0x354   :  { %v19832_v37 = vld [vmem:[#allocation8 + $0x480] ss:$24 sps:$4 sm:$0xff]  }
 0x355   :  { %2262 = vmatpush1.bf16.msra.mxu1 %v17046_v30  ;;  %2303 = vmatpush1.bf16.msra.mxu0 %v19702_v31 }
 0x356   :  { %2329 = vmatprep.subr.bf16.mxu1 %v17054_v35  ;;  %2379 = vmatprep.subr.bf16.mxu0 %v19606_v54  ;;  %v17067_v54 = vld [vmem:[#allocation8 + $0x370] ss:$24 sps:$4 sm:$0xff]  }
 0x358   :  { %2280 = vmatmul.mubr.bf16.vlgmr.msra.gmra.mxu1 %v2005_v46  ;;  %2321 = vmatmul.mubr.bf16.vlgmr.msra.gmra.mxu0 %v2005_v46 }
 0x359   :  { %2330 = vmatpush1.bf16.msra.mxu1 %v17052_v42  ;;  %2380 = vmatpush1.bf16.msra.mxu0 %v19612_v2  ;;  %v17075_v2 = vld [vmem:[#allocation8 + $0x314] ss:$24 sps:$4 sm:$0xff]  }
 0x35a   :  { %2331 = vmatprep.subr.bf16.mxu1 %v17057_v50  ;;  %2381 = vmatprep.subr.bf16.mxu0 %v19618_v56  ;;  %v17073_v56 = vld [vmem:[#allocation8 + $0x310] ss:$24 sps:$4 sm:$0xff]  }
 0x35b   :  { %2361 = vmatprep.mubr.bf16.mxu1 %v24500_v40  ;;  %2411 = vmatprep.mubr.bf16.mxu0 %v24500_v40 }
 0x35d   :  { %2332 = vmatpush1.bf16.msra.mxu1 %v17055_v5  ;;  %2382 = vmatpush1.bf16.msra.mxu0 %v19626_v62  ;;  %v2377_v62 = vrot.slane %v19521_v36, 1 }
 0x35e   :  { %2333 = vmatprep.subr.bf16.mxu1 %v17060_v10  ;;  %2383 = vmatprep.subr.bf16.mxu0 %v19632_v25  ;;  %v19752_v25 = vld [vmem:[#allocation8 + $0x5a4] ss:$24 sps:$4 sm:$0xff]  }
 0x361   :  { %2334 = vmatpush1.bf16.msra.mxu1 %v17058_v32  ;;  %2384 = vmatpush1.bf16.msra.mxu0 %v19640_v34  ;;  %v19758_v34 = vld [vmem:[#allocation8 + $0x5a0] ss:$24 sps:$4 sm:$0xff]  }
 0x362   :  { %2335 = vmatprep.subr.bf16.mxu1 %v17063_v43  ;;  %2385 = vmatprep.subr.bf16.mxu0 %v19646_v49  ;;  %v19764_v49 = vld [vmem:[#allocation8 + $0x574] ss:$24 sps:$4 sm:$0xff]  }
 0x365   :  { %2336 = vmatpush1.bf16.msra.mxu1 %v17061_v44  ;;  %2386 = vmatpush1.bf16.msra.mxu0 %v19652_v58  ;;  %v19772_v58 = vld [vmem:[#allocation8 + $0x570] ss:$24 sps:$4 sm:$0xff]  }
 0x366   :  { %2337 = vmatprep.subr.bf16.mxu1 %v17066_v51  ;;  %2387 = vmatprep.subr.bf16.mxu0 %v19658_v1  ;;  %v19778_v1 = vld [vmem:[#allocation8 + $0x544] ss:$24 sps:$4 sm:$0xff]  }
 0x369   :  { %2338 = vmatpush1.bf16.msra.mxu1 %v17064_v52  ;;  %2388 = vmatpush1.bf16.msra.mxu0 %v19664_v9  ;;  %v19784_v9 = vld [vmem:[#allocation8 + $0x540] ss:$24 sps:$4 sm:$0xff]  }
 0x36a   :  { %2339 = vmatprep.subr.bf16.mxu1 %v17069_v57  ;;  %2389 = vmatprep.subr.bf16.mxu0 %v19670_v29  ;;  %v19790_v29 = vld [vmem:[#allocation8 + $0x514] ss:$24 sps:$4 sm:$0xff]  }
 0x36d   :  { %2340 = vmatpush1.bf16.msra.mxu1 %v17067_v54  ;;  %2390 = vmatpush1.bf16.msra.mxu0 %v19676_v15  ;;  %v19796_v15 = vld [vmem:[#allocation8 + $0x510] ss:$24 sps:$4 sm:$0xff]  }
 0x36e   :  { %2341 = vmatprep.subr.bf16.mxu1 %v17072_v48  ;;  %2391 = vmatprep.subr.bf16.mxu0 %v19682_v19  ;;  %v19802_v19 = vld [vmem:[#allocation8 + $0x4e4] ss:$24 sps:$4 sm:$0xff]  }
 0x371   :  { %2342 = vmatpush1.bf16.msra.mxu1 %v17070_v55  ;;  %2392 = vmatpush1.bf16.msra.mxu0 %v19690_v23  ;;  %v19808_v23 = vld [vmem:[#allocation8 + $0x4e0] ss:$24 sps:$4 sm:$0xff]  }
 0x372   :  { %2343 = vmatprep.subr.bf16.mxu1 %v17075_v2  ;;  %2393 = vmatprep.subr.bf16.mxu0 %v17048_v24  ;;  %v19814_v24 = vld [vmem:[#allocation8 + $0x4b4] ss:$24 sps:$4 sm:$0xff]  }
 0x375   :  { %2344 = vmatpush1.bf16.msra.mxu1 %v17073_v56  ;;  %2394 = vmatpush1.bf16.msra.mxu0 %v17046_v30  ;;  %v19822_v30 = vld [vmem:[#allocation8 + $0x4b8] ss:$24 sps:$4 sm:$0xff]  }
 0x376   :  { %2420 = vmatprep.subr.bf16.mxu1 %v19608_v60  ;;  %2461 = vmatprep.subr.bf16.mxu0 %v17054_v35  ;;  %v19741_v60 = vld [vmem:[#allocation8 + $0x5d4] ss:$24 sps:$4 sm:$0xff]  }
 0x377   :  { %v19828_v35 = vld [vmem:[#allocation8 + $0x48c] ss:$24 sps:$4 sm:$0xff]  }
 0x378   :  { %2362 = vmatmul.mubr.bf16.vlgmr.msra.gmra.mxu1 %v2005_v46  ;;  %2412 = vmatmul.mubr.bf16.vlgmr.msra.gmra.mxu0 %v2377_v62  ;;  %v19838_v46 = vld [vmem:[#allocation8 + $0x5e4] ss:$24 sps:$4 sm:$0xff]  }
 0x379   :  { %2421 = vmatpush1.bf16.msra.mxu1 %v19614_v63  ;;  %2462 = vmatpush1.bf16.msra.mxu0 %v17052_v42  ;;  %v19743_v63 = vld [vmem:[#allocation8 + $0x5dc] ss:$24 sps:$4 sm:$0xff]   ;;  %v19834_v42 = vld [vmem:[#allocation8 + $0x488] ss:$24 sps:$4 sm:$0xff]  }
 0x37a   :  { %2422 = vmatprep.subr.bf16.mxu1 %v19620_v0  ;;  %2463 = vmatprep.subr.bf16.mxu0 %v17057_v50  ;;  %v19746_v0 = vld [vmem:[#allocation8 + $0x5d0] ss:$24 sps:$4 sm:$0xff]   ;;  %v19842_v50 = vld [vmem:[#allocation8 + $0x5e0] ss:$24 sps:$4 sm:$0xff]  }
 0x37b   :  { %2452 = vmatprep.mubr.bf16.mxu1 %v24500_v40  ;;  %2493 = vmatprep.mubr.bf16.mxu0 %v24500_v40 }
 0x37d   :  { %2423 = vmatpush1.bf16.msra.mxu1 %v19628_v4  ;;  %2464 = vmatpush1.bf16.msra.mxu0 %v17055_v5  ;;  %v19748_v4 = vld [vmem:[#allocation8 + $0x5d8] ss:$24 sps:$4 sm:$0xff]  }
 0x37e   :  { %2424 = vmatprep.subr.bf16.mxu1 %v19634_v12  ;;  %2465 = vmatprep.subr.bf16.mxu0 %v17060_v10  ;;  %v19754_v12 = vld [vmem:[#allocation8 + $0x5ac] ss:$24 sps:$4 sm:$0xff]  }
 0x37f   :  { %v24527_v5 = vld [vmem:[#allocation20_spill] sm:$0xff] }
 0x380   :  { %v19845_v10 = vrot.slane %v24527_v5, 1 }
 0x381   :  { %2425 = vmatpush1.bf16.msra.mxu1 %v19642_v8  ;;  %2466 = vmatpush1.bf16.msra.mxu0 %v17058_v32  ;;  %v19760_v8 = vld [vmem:[#allocation8 + $0x5a8] ss:$24 sps:$4 sm:$0xff]   ;;  %v19849_v32 = vld [vmem:[#allocation8 + $0x5b4] ss:$24 sps:$4 sm:$0xff]  }
 0x382   :  { %2426 = vmatprep.subr.bf16.mxu1 %v19648_v53  ;;  %2467 = vmatprep.subr.bf16.mxu0 %v17063_v43  ;;  %v19766_v53 = vld [vmem:[#allocation8 + $0x57c] ss:$24 sps:$4 sm:$0xff]  }
 0x385   :  { %2427 = vmatpush1.bf16.msra.mxu1 %v19654_v61  ;;  %2468 = vmatpush1.bf16.msra.mxu0 %v17061_v44  ;;  %v19774_v61 = vld [vmem:[#allocation8 + $0x578] ss:$24 sps:$4 sm:$0xff]  }
 0x386   :  { %2428 = vmatprep.subr.bf16.mxu1 %v19660_v7  ;;  %2469 = vmatprep.subr.bf16.mxu0 %v17066_v51  ;;  %v19780_v7 = vld [vmem:[#allocation8 + $0x54c] ss:$24 sps:$4 sm:$0xff]   ;;  %v19857_v51 = vld [vmem:[#allocation8 + $0x5b0] ss:$24 sps:$4 sm:$0xff]  }
 0x389   :  { %2429 = vmatpush1.bf16.msra.mxu1 %v19666_v11  ;;  %2470 = vmatpush1.bf16.msra.mxu0 %v17064_v52  ;;  %v19786_v11 = vld [vmem:[#allocation8 + $0x548] ss:$24 sps:$4 sm:$0xff]  }
 0x38a   :  { %2430 = vmatprep.subr.bf16.mxu1 %v19672_v33  ;;  %2471 = vmatprep.subr.bf16.mxu0 %v17069_v57  ;;  %v19792_v33 = vld [vmem:[#allocation8 + $0x51c] ss:$24 sps:$4 sm:$0xff]  }
 0x38d   :  { %2431 = vmatpush1.bf16.msra.mxu1 %v19678_v17  ;;  %2472 = vmatpush1.bf16.msra.mxu0 %v17067_v54  ;;  %v19798_v17 = vld [vmem:[#allocation8 + $0x518] ss:$24 sps:$4 sm:$0xff]   ;;  %v19863_v54 = vld [vmem:[#allocation8 + $0x584] ss:$24 sps:$4 sm:$0xff]  }
 0x38e   :  { %2432 = vmatprep.subr.bf16.mxu1 %v19684_v20  ;;  %2473 = vmatprep.subr.bf16.mxu0 %v17072_v48  ;;  %v19804_v20 = vld [vmem:[#allocation8 + $0x4ec] ss:$24 sps:$4 sm:$0xff]  }
 0x391   :  { %2433 = vmatpush1.bf16.msra.mxu1 %v19692_v16  ;;  %2474 = vmatpush1.bf16.msra.mxu0 %v17070_v55  ;;  %v19810_v16 = vld [vmem:[#allocation8 + $0x4e8] ss:$24 sps:$4 sm:$0xff]  }
 0x392   :  { %2434 = vmatprep.subr.bf16.mxu1 %v19696_v26  ;;  %2475 = vmatprep.subr.bf16.mxu0 %v17075_v2  ;;  %v19816_v26 = vld [vmem:[#allocation8 + $0x4bc] ss:$24 sps:$4 sm:$0xff]   ;;  %v17130_v2 = vld [vmem:[#allocation8 + $0x580] ss:$24 sps:$4 sm:$0xff]  }
 0x395   :  { %2435 = vmatpush1.bf16.msra.mxu1 %v19702_v31  ;;  %2476 = vmatpush1.bf16.msra.mxu0 %v17073_v56  ;;  %v19826_v31 = vld [vmem:[#allocation8 + $0x484] ss:$24 sps:$4 sm:$0xff]  }
 0x396   :  { %2799 = vmatprep.subr.bf16.mxu1 %v19741_v60  ;;  %2840 = vmatprep.subr.bf16.mxu0 %v19743_v63 }
 0x398   :  { %2453 = vmatmul.mubr.bf16.vlgmr.msra.gmra.mxu1 %v2377_v62  ;;  %2494 = vmatmul.mubr.bf16.vlgmr.msra.gmra.mxu0 %v2377_v62 }
 0x399   :  { %2800 = vmatpush1.bf16.msra.mxu1 %v19746_v0  ;;  %2841 = vmatpush1.bf16.msra.mxu0 %v19748_v4 }
 0x39a   :  { %2801 = vmatprep.subr.bf16.mxu1 %v19752_v25  ;;  %2842 = vmatprep.subr.bf16.mxu0 %v19754_v12 }
 0x39b   :  { %2831 = vmatprep.mubr.bf16.mxu1 %v24500_v40  ;;  %2872 = vmatprep.mubr.bf16.mxu0 %v24500_v40 }
 0x39d   :  { %2802 = vmatpush1.bf16.msra.mxu1 %v19758_v34  ;;  %2843 = vmatpush1.bf16.msra.mxu0 %v19760_v8 }
 0x39e   :  { %2803 = vmatprep.subr.bf16.mxu1 %v19764_v49  ;;  %2844 = vmatprep.subr.bf16.mxu0 %v19766_v53 }
 0x3a1   :  { %2804 = vmatpush1.bf16.msra.mxu1 %v19772_v58  ;;  %2845 = vmatpush1.bf16.msra.mxu0 %v19774_v61 }
 0x3a2   :  { %2805 = vmatprep.subr.bf16.mxu1 %v19778_v1  ;;  %2846 = vmatprep.subr.bf16.mxu0 %v19780_v7 }
 0x3a5   :  { %2806 = vmatpush1.bf16.msra.mxu1 %v19784_v9  ;;  %2847 = vmatpush1.bf16.msra.mxu0 %v19786_v11 }
 0x3a6   :  { %2807 = vmatprep.subr.bf16.mxu1 %v19790_v29  ;;  %2848 = vmatprep.subr.bf16.mxu0 %v19792_v33 }
 0x3a9   :  { %2808 = vmatpush1.bf16.msra.mxu1 %v19796_v15  ;;  %2849 = vmatpush1.bf16.msra.mxu0 %v19798_v17 }
 0x3aa   :  { %2809 = vmatprep.subr.bf16.mxu1 %v19802_v19  ;;  %2850 = vmatprep.subr.bf16.mxu0 %v19804_v20 }
 0x3ad   :  { %2810 = vmatpush1.bf16.msra.mxu1 %v19808_v23  ;;  %2851 = vmatpush1.bf16.msra.mxu0 %v19810_v16 }
 0x3ae   :  { %2811 = vmatprep.subr.bf16.mxu1 %v19814_v24  ;;  %2852 = vmatprep.subr.bf16.mxu0 %v19816_v26 }
 0x3b1   :  { %2812 = vmatpush1.bf16.msra.mxu1 %v19820_v28  ;;  %2853 = vmatpush1.bf16.msra.mxu0 %v19822_v30 }
 0x3b2   :  { %2813 = vmatprep.subr.bf16.mxu1 %v19826_v31  ;;  %2854 = vmatprep.subr.bf16.mxu0 %v19828_v35 }
 0x3b5   :  { %2814 = vmatpush1.bf16.msra.mxu1 %v19832_v37  ;;  %2855 = vmatpush1.bf16.msra.mxu0 %v19834_v42 }
 0x3b6   :  { %2881 = vmatprep.subr.bf16.mxu1 %v19838_v46  ;;  %2930 = vmatprep.subr.bf16.mxu0 %v19741_v60  ;;  %v17135_v60 = vld [vmem:[#allocation8 + $0x554] ss:$24 sps:$4 sm:$0xff]  }
 0x3b8   :  { %2832 = vmatmul.mubr.bf16.vlgmr.msra.gmra.mxu1 %v19845_v10  ;;  %2873 = vmatmul.mubr.bf16.vlgmr.msra.gmra.mxu0 %v19845_v10  ;;  %v1743_v43 = vpop.f32.mrf.mxu1  ;;  %v19853_v44 = vpop.f32.mrf.mxu0 }
 0x3b9   :  { %2882 = vmatpush1.bf16.msra.mxu1 %v19842_v50  ;;  %2931 = vmatpush1.bf16.msra.mxu0 %v19746_v0  ;;  %v17133_v0 = vld [vmem:[#allocation8 + $0x550] ss:$24 sps:$4 sm:$0xff]  }
 0x3ba   :  { %v1745_v52 = vpop.f32.mrf.mxu1  ;;  %v19859_v57 = vpop.f32.mrf.mxu0  ;;  %2883 = vmatprep.subr.bf16.mxu1 %v19849_v32  ;;  %2932 = vmatprep.subr.bf16.mxu0 %v19752_v25  ;;  %v17138_v25 = vld [vmem:[#allocation8 + $0x524] ss:$24 sps:$4 sm:$0xff]  }
 0x3bb   :  { %2913 = vmatprep.mubr.bf16.mxu1 %v24500_v40  ;;  %2962 = vmatprep.mubr.bf16.mxu0 %v24500_v40 }
 0x3bc   :  { %v1747_v48 = vpop.f32.mrf.mxu1  ;;  %v1788_v55 = vpop.f32.mrf.mxu0 }
 0x3bd   :  { %2884 = vmatpush1.bf16.msra.mxu1 %v19857_v51  ;;  %2933 = vmatpush1.bf16.msra.mxu0 %v19758_v34  ;;  %v17136_v34 = vld [vmem:[#allocation8 + $0x520] ss:$24 sps:$4 sm:$0xff]   ;;  %v17141_v48 = vld [vmem:[#allocation8 + $0x4f4] ss:$24 sps:$4 sm:$0xff]  }
 0x3be   :  { %v1748_v56 = vpop.f32.mrf.mxu1  ;;  %v1789_v62 = vpop.f32.mrf.mxu0  ;;  %2885 = vmatprep.subr.bf16.mxu1 %v19863_v54  ;;  %2934 = vmatprep.subr.bf16.mxu0 %v19764_v49  ;;  %v17139_v49 = vld [vmem:[#allocation8 + $0x4f0] ss:$24 sps:$4 sm:$0xff]  }
 0x3bf   :  { %v19953_v55 = vld [vmem:[#allocation8 + $0x6f8] ss:$24 sps:$4 sm:$0xff]   ;;  %v19959_v62 = vld [vmem:[#allocation8 + $0x6cc] ss:$24 sps:$4 sm:$0xff]  }
 0x3c1   :  { %2886 = vmatpush1.bf16.msra.mxu1 %v17130_v2  ;;  %2935 = vmatpush1.bf16.msra.mxu0 %v19772_v58  ;;  %v17144_v58 = vld [vmem:[#allocation8 + $0x4c4] ss:$24 sps:$4 sm:$0xff]  }
 0x3c2   :  { %2887 = vmatprep.subr.bf16.mxu1 %v17135_v60  ;;  %2936 = vmatprep.subr.bf16.mxu0 %v19778_v1  ;;  %v17142_v1 = vld [vmem:[#allocation8 + $0x4c0] ss:$24 sps:$4 sm:$0xff]  }
 0x3c5   :  { %2888 = vmatpush1.bf16.msra.mxu1 %v17133_v0  ;;  %2937 = vmatpush1.bf16.msra.mxu0 %v19784_v9  ;;  %v17147_v9 = vld [vmem:[#allocation8 + $0x494] ss:$24 sps:$4 sm:$0xff]  }
 0x3c6   :  { %2889 = vmatprep.subr.bf16.mxu1 %v17138_v25  ;;  %2938 = vmatprep.subr.bf16.mxu0 %v19790_v29  ;;  %v17145_v29 = vld [vmem:[#allocation8 + $0x490] ss:$24 sps:$4 sm:$0xff]  }
 0x3c9   :  { %2890 = vmatpush1.bf16.msra.mxu1 %v17136_v34  ;;  %2939 = vmatpush1.bf16.msra.mxu0 %v19796_v15  ;;  %v2928_v15 = vrot.slane %v19524_v39, 1 }
 0x3ca   :  { %2891 = vmatprep.subr.bf16.mxu1 %v17141_v48  ;;  %2940 = vmatprep.subr.bf16.mxu0 %v19802_v19 }
 0x3cd   :  { %2892 = vmatpush1.bf16.msra.mxu1 %v17139_v49  ;;  %2941 = vmatpush1.bf16.msra.mxu0 %v19808_v23 }
 0x3ce   :  { %2893 = vmatprep.subr.bf16.mxu1 %v17144_v58  ;;  %2942 = vmatprep.subr.bf16.mxu0 %v19814_v24 }
 0x3d1   :  { %2894 = vmatpush1.bf16.msra.mxu1 %v17142_v1  ;;  %2943 = vmatpush1.bf16.msra.mxu0 %v19820_v28 }
 0x3d2   :  { %2895 = vmatprep.subr.bf16.mxu1 %v17147_v9  ;;  %2944 = vmatprep.subr.bf16.mxu0 %v19826_v31 }
 0x3d5   :  { %2896 = vmatpush1.bf16.msra.mxu1 %v17145_v29  ;;  %2945 = vmatpush1.bf16.msra.mxu0 %v19832_v37 }
 0x3d6   :  { %2971 = vmatprep.subr.bf16.mxu1 %v19743_v63  ;;  %3012 = vmatprep.subr.bf16.mxu0 %v19838_v46 }
 0x3d8   :  { %v1825_v19 = vpop.f32.mrf.mxu1  ;;  %v1866_v23 = vpop.f32.mrf.mxu0  ;;  %2914 = vmatmul.mubr.bf16.vlgmr.msra.gmra.mxu1 %v19845_v10  ;;  %2963 = vmatmul.mubr.bf16.vlgmr.msra.gmra.mxu0 %v2928_v15  ;;  %v19938_v10 = vld [vmem:[#allocation8 + $0x6f4] ss:$24 sps:$4 sm:$0xff]  }
 0x3d9   :  { %v19886_v24 = vadd.f32 %v1866_v23, %v1743_v43  ;;  %2972 = vmatpush1.bf16.msra.mxu1 %v19748_v4  ;;  %3013 = vmatpush1.bf16.msra.mxu0 %v19842_v50  ;;  %v19999_v23 = vld [vmem:[#allocation8 + $0x630] ss:$24 sps:$4 sm:$0xff]  }
 0x3da   :  { %v1827_v28 = vpop.f32.mrf.mxu1  ;;  %v1868_v31 = vpop.f32.mrf.mxu0  ;;  %2973 = vmatprep.subr.bf16.mxu1 %v19754_v12  ;;  %3014 = vmatprep.subr.bf16.mxu0 %v19849_v32  ;;  %v19910_v12 = vld [vmem:[#allocation8 + $0x754] ss:$24 sps:$4 sm:$0xff]  }
 0x3db   :  { %v19892_v63 = vadd.f32 %v1868_v31, %v1745_v52  ;;  %3003 = vmatprep.mubr.bf16.mxu1 %v24500_v40  ;;  %3044 = vmatprep.mubr.bf16.mxu0 %v24500_v40  ;;  %v19940_v32 = vld [vmem:[#allocation8 + $0x6fc] ss:$24 sps:$4 sm:$0xff]  }
 0x3dc   :  { %v1829_v37 = vpop.f32.mrf.mxu1  ;;  %v1870_v46 = vpop.f32.mrf.mxu0  ;;  %v20005_v31 = vld [vmem:[#allocation8 + $0x604] ss:$24 sps:$4 sm:$0xff]  }
 0x3dd   :  { %2974 = vmatpush1.bf16.msra.mxu1 %v19760_v8  ;;  %3015 = vmatpush1.bf16.msra.mxu0 %v19857_v51  ;;  %v19912_v8 = vld [vmem:[#allocation8 + $0x75c] ss:$24 sps:$4 sm:$0xff]   ;;  %v20007_v37 = vld [vmem:[#allocation8 + $0x60c] ss:$24 sps:$4 sm:$0xff]   ;;  %v20011_v46 = vld [vmem:[#allocation8 + $0x600] ss:$24 sps:$4 sm:$0xff]  }
 0x3de   :  { %v1830_v4 = vpop.f32.mrf.mxu1  ;;  %v1871_v50 = vpop.f32.mrf.mxu0  ;;  %2975 = vmatprep.subr.bf16.mxu1 %v19766_v53  ;;  %3016 = vmatprep.subr.bf16.mxu0 %v19863_v54  ;;  %v19915_v53 = vld [vmem:[#allocation8 + $0x750] ss:$24 sps:$4 sm:$0xff]  }
 0x3df   :  { %v19951_v54 = vld [vmem:[#allocation8 + $0x6f0] ss:$24 sps:$4 sm:$0xff]   ;;  %v20017_v50 = vld [vmem:[#allocation8 + $0x764] ss:$24 sps:$4 sm:$0xff]  }
 0x3e0   :  { %v20013_v4 = vld [vmem:[#allocation8 + $0x608] ss:$24 sps:$4 sm:$0xff]  }
 0x3e1   :  { %2976 = vmatpush1.bf16.msra.mxu1 %v19774_v61  ;;  %3017 = vmatpush1.bf16.msra.mxu0 %v17130_v2  ;;  %v19917_v61 = vld [vmem:[#allocation8 + $0x758] ss:$24 sps:$4 sm:$0xff]  }
 0x3e2   :  { %2977 = vmatprep.subr.bf16.mxu1 %v19780_v7  ;;  %3018 = vmatprep.subr.bf16.mxu0 %v17135_v60  ;;  %v19921_v7 = vld [vmem:[#allocation8 + $0x724] ss:$24 sps:$4 sm:$0xff]   ;;  %v19963_v60 = vld [vmem:[#allocation8 + $0x6c0] ss:$24 sps:$4 sm:$0xff]  }
 0x3e5   :  { %2978 = vmatpush1.bf16.msra.mxu1 %v19786_v11  ;;  %3019 = vmatpush1.bf16.msra.mxu0 %v17133_v0  ;;  %v19923_v11 = vld [vmem:[#allocation8 + $0x72c] ss:$24 sps:$4 sm:$0xff]   ;;  %v19965_v0 = vld [vmem:[#allocation8 + $0x6c8] ss:$24 sps:$4 sm:$0xff]  }
 0x3e6   :  { %2979 = vmatprep.subr.bf16.mxu1 %v19792_v33  ;;  %3020 = vmatprep.subr.bf16.mxu0 %v17138_v25  ;;  %v19969_v25 = vld [vmem:[#allocation8 + $0x694] ss:$24 sps:$4 sm:$0xff]  }
 0x3e9   :  { %2980 = vmatpush1.bf16.msra.mxu1 %v19798_v17  ;;  %3021 = vmatpush1.bf16.msra.mxu0 %v17136_v34  ;;  %v19971_v34 = vld [vmem:[#allocation8 + $0x69c] ss:$24 sps:$4 sm:$0xff]  }
 0x3ea   :  { %2981 = vmatprep.subr.bf16.mxu1 %v19804_v20  ;;  %3022 = vmatprep.subr.bf16.mxu0 %v17141_v48  ;;  %v19975_v48 = vld [vmem:[#allocation8 + $0x690] ss:$24 sps:$4 sm:$0xff]  }
 0x3ed   :  { %2982 = vmatpush1.bf16.msra.mxu1 %v19810_v16  ;;  %3023 = vmatpush1.bf16.msra.mxu0 %v17139_v49  ;;  %v19977_v49 = vld [vmem:[#allocation8 + $0x698] ss:$24 sps:$4 sm:$0xff]  }
 0x3ee   :  { %2983 = vmatprep.subr.bf16.mxu1 %v19816_v26  ;;  %3024 = vmatprep.subr.bf16.mxu0 %v17144_v58  ;;  %v19932_v26 = vld [vmem:[#allocation8 + $0x720] ss:$24 sps:$4 sm:$0xff]   ;;  %v19981_v58 = vld [vmem:[#allocation8 + $0x664] ss:$24 sps:$4 sm:$0xff]  }
 0x3f1   :  { %2984 = vmatpush1.bf16.msra.mxu1 %v19822_v30  ;;  %3025 = vmatpush1.bf16.msra.mxu0 %v17142_v1  ;;  %v19934_v30 = vld [vmem:[#allocation8 + $0x728] ss:$24 sps:$4 sm:$0xff]   ;;  %v19983_v1 = vld [vmem:[#allocation8 + $0x66c] ss:$24 sps:$4 sm:$0xff]  }
 0x3f2   :  { %2985 = vmatprep.subr.bf16.mxu1 %v19828_v35  ;;  %3026 = vmatprep.subr.bf16.mxu0 %v17147_v9  ;;  %v19987_v9 = vld [vmem:[#allocation8 + $0x660] ss:$24 sps:$4 sm:$0xff]  }
 0x3f5   :  { %2986 = vmatpush1.bf16.msra.mxu1 %v19834_v42  ;;  %3027 = vmatpush1.bf16.msra.mxu0 %v17145_v29  ;;  %v19989_v29 = vld [vmem:[#allocation8 + $0x668] ss:$24 sps:$4 sm:$0xff]  }
 0x3f6   :  { %3350 = vmatprep.subr.bf16.mxu1 %v19910_v12  ;;  %3391 = vmatprep.subr.bf16.mxu0 %v19912_v8 }
 0x3f8   :  { %v1907_v33 = vpop.f32.mrf.mxu1  ;;  %v1948_v17 = vpop.f32.mrf.mxu0  ;;  %3004 = vmatmul.mubr.bf16.vlgmr.msra.gmra.mxu1 %v2928_v15  ;;  %3045 = vmatmul.mubr.bf16.vlgmr.msra.gmra.mxu0 %v2928_v15  ;;  %v19993_v15 = vld [vmem:[#allocation8 + $0x634] ss:$24 sps:$4 sm:$0xff]  }
 0x3f9   :  { %v19926_v20 = vadd.f32 %v1907_v33, %v19853_v44  ;;  %v19928_v16 = vadd.f32 %v1948_v17, %v1825_v19  ;;  %3351 = vmatpush1.bf16.msra.mxu1 %v19915_v53  ;;  %3392 = vmatpush1.bf16.msra.mxu0 %v19917_v61  ;;  %v19995_v19 = vld [vmem:[#allocation8 + $0x63c] ss:$24 sps:$4 sm:$0xff]   ;;  %v20021_v33 = vld [vmem:[#allocation8 + $0x760] ss:$24 sps:$4 sm:$0xff]   ;;  %v20024_v17 = vrot.slane %v19237_v14, 2 }
 0x3fa   :  { %v1909_v35 = vpop.f32.mrf.mxu1  ;;  %v1950_v42 = vpop.f32.mrf.mxu0  ;;  %3352 = vmatprep.subr.bf16.mxu1 %v19921_v7  ;;  %3393 = vmatprep.subr.bf16.mxu0 %v19923_v11 }
 0x3fb   :  { %v19943_v43 = vadd.f32 %v1909_v35, %v19859_v57  ;;  %v19945_v44 = vadd.f32 %v1950_v42, %v1827_v28  ;;  %3382 = vmatprep.mubr.bf16.mxu1 %v24500_v40  ;;  %3423 = vmatprep.mubr.bf16.mxu0 %v24500_v40  ;;  %v19957_v57 = vld [vmem:[#allocation8 + $0x6c4] ss:$24 sps:$4 sm:$0xff]   ;;  %v20001_v28 = vld [vmem:[#allocation8 + $0x638] ss:$24 sps:$4 sm:$0xff]   ;;  %v20028_v35 = vld [vmem:[#allocation8 + $0x734] ss:$24 sps:$4 sm:$0xff]   ;;  %v1617_v42 = vadd.f32 %v19594_v38, %v19511_v41 }
 0x3fc   :  { %v1911_v51 = vpop.f32.mrf.mxu1  ;;  %v1952_v52 = vpop.f32.mrf.mxu0 }
 0x3fd   :  { %3353 = vmatpush1.bf16.msra.mxu1 %v19932_v26  ;;  %3394 = vmatpush1.bf16.msra.mxu0 %v19934_v30 }
 0x3fe   :  { %v1912_v2 = vpop.f32.mrf.mxu1  ;;  %v1953_v56 = vpop.f32.mrf.mxu0  ;;  %3354 = vmatprep.subr.bf16.mxu1 %v19938_v10  ;;  %3395 = vmatprep.subr.bf16.mxu0 %v19940_v32 }
 0x3ff   :  { %v1619_v2 = vadd.f32 %v19600_v47, %v19513_v45 }
 0x401   :  { %3355 = vmatpush1.bf16.msra.mxu1 %v19951_v54  ;;  %3396 = vmatpush1.bf16.msra.mxu0 %v19953_v55 }
 0x402   :  { %3356 = vmatprep.subr.bf16.mxu1 %v19957_v57  ;;  %3397 = vmatprep.subr.bf16.mxu0 %v19959_v62 }
 0x405   :  { %3357 = vmatpush1.bf16.msra.mxu1 %v19963_v60  ;;  %3398 = vmatpush1.bf16.msra.mxu0 %v19965_v0 }
 0x406   :  { %3358 = vmatprep.subr.bf16.mxu1 %v19969_v25  ;;  %3399 = vmatprep.subr.bf16.mxu0 %v19971_v34 }
 0x409   :  { %3359 = vmatpush1.bf16.msra.mxu1 %v19975_v48  ;;  %3400 = vmatpush1.bf16.msra.mxu0 %v19977_v49 }
 0x40a   :  { %3360 = vmatprep.subr.bf16.mxu1 %v19981_v58  ;;  %3401 = vmatprep.subr.bf16.mxu0 %v19983_v1 }
 0x40d   :  { %3361 = vmatpush1.bf16.msra.mxu1 %v19987_v9  ;;  %3402 = vmatpush1.bf16.msra.mxu0 %v19989_v29 }
 0x40e   :  { %3362 = vmatprep.subr.bf16.mxu1 %v19993_v15  ;;  %3403 = vmatprep.subr.bf16.mxu0 %v19995_v19 }
 0x411   :  { %3363 = vmatpush1.bf16.msra.mxu1 %v19999_v23  ;;  %3404 = vmatpush1.bf16.msra.mxu0 %v20001_v28 }
 0x412   :  { %3364 = vmatprep.subr.bf16.mxu1 %v20005_v31  ;;  %3405 = vmatprep.subr.bf16.mxu0 %v20007_v37 }
 0x415   :  { %3365 = vmatpush1.bf16.msra.mxu1 %v20011_v46  ;;  %3406 = vmatpush1.bf16.msra.mxu0 %v20013_v4 }
 0x416   :  { %3432 = vmatprep.subr.bf16.mxu1 %v20017_v50  ;;  %3481 = vmatprep.subr.bf16.mxu0 %v19910_v12  ;;  %v20043_v12 = vld [vmem:[#allocation8 + $0x730] ss:$24 sps:$4 sm:$0xff]  }
 0x418   :  { %v2281_v51 = vpop.f32.mrf.mxu1  ;;  %v2322_v52 = vpop.f32.mrf.mxu0  ;;  %3383 = vmatmul.mubr.bf16.vlgmr.msra.gmra.mxu1 %v20024_v17  ;;  %3424 = vmatmul.mubr.bf16.vlgmr.msra.gmra.mxu0 %v20024_v17 }
 0x419   :  { %v20036_v56 = vadd.f32 %v2281_v51, %v1617_v42  ;;  %v20039_v13 = vadd.f32 %v2322_v52, %v19556_v18  ;;  %3433 = vmatpush1.bf16.msra.mxu1 %v20021_v33  ;;  %3482 = vmatpush1.bf16.msra.mxu0 %v19915_v53  ;;  %v20058_v42 = vld [vmem:[#allocation8 + $0x700] ss:$24 sps:$4 sm:$0xff]   ;;  %v17205_v52 = vld [vmem:[#allocation8 + $0x6d0] ss:$24 sps:$4 sm:$0xff]  }
 0x41a   :  { %v2283_v41 = vpop.f32.mrf.mxu1  ;;  %v2324_v38 = vpop.f32.mrf.mxu0  ;;  %3434 = vmatprep.subr.bf16.mxu1 %v20028_v35  ;;  %3483 = vmatprep.subr.bf16.mxu0 %v19921_v7 }
 0x41b   :  { %v20049_v45 = vadd.f32 %v2283_v41, %v1619_v2  ;;  %v20052_v47 = vadd.f32 %v2324_v38, %v19560_v21  ;;  %3464 = vmatprep.mubr.bf16.mxu1 %v24500_v40  ;;  %3513 = vmatprep.mubr.bf16.mxu0 %v24500_v40  ;;  %v20062_v21 = vld [vmem:[#allocation8 + $0x6d4] ss:$24 sps:$4 sm:$0xff]   ;;  %v17208_v2 = vld [vmem:[#allocation8 + $0x6a0] ss:$24 sps:$4 sm:$0xff]   ;;  %v17211_v41 = vld [vmem:[#allocation8 + $0x670] ss:$24 sps:$4 sm:$0xff]  }
 0x41c   :  { %v2285_v18 = vpop.f32.mrf.mxu1  ;;  %v2326_v53 = vpop.f32.mrf.mxu0 }
 0x41d   :  { %3435 = vmatpush1.bf16.msra.mxu1 %v20043_v12  ;;  %3484 = vmatpush1.bf16.msra.mxu0 %v19932_v26  ;;  %v17210_v26 = vld [vmem:[#allocation8 + $0x6a4] ss:$24 sps:$4 sm:$0xff]   ;;  %v20172_v53 = vld [vmem:[#allocation8 + $0x840] ss:$24 sps:$4 sm:$0xff]  }
 0x41e   :  { %v2286_v7 = vpop.f32.mrf.mxu1  ;;  %v2327_v51 = vpop.f32.mrf.mxu0  ;;  %3436 = vmatprep.subr.bf16.mxu1 %v20047_v6  ;;  %3485 = vmatprep.subr.bf16.mxu0 %v19938_v10  ;;  %v17213_v10 = vld [vmem:[#allocation8 + $0x674] ss:$24 sps:$4 sm:$0xff]  }
 0x41f   :  { %v20168_v18 = vld [vmem:[#allocation8 + $0x84c] ss:$24 sps:$4 sm:$0xff]   ;;  %v20180_v51 = vld [vmem:[#allocation8 + $0x81c] ss:$24 sps:$4 sm:$0xff]  }
 0x420   :  { %v20178_v7 = vld [vmem:[#allocation8 + $0x814] ss:$24 sps:$4 sm:$0xff]  }
 0x421   :  { %3437 = vmatpush1.bf16.msra.mxu1 %v20058_v42  ;;  %3486 = vmatpush1.bf16.msra.mxu0 %v19951_v54  ;;  %v17216_v54 = vld [vmem:[#allocation8 + $0x644] ss:$24 sps:$4 sm:$0xff]  }
 0x422   :  { %3438 = vmatprep.subr.bf16.mxu1 %v20062_v21  ;;  %3487 = vmatprep.subr.bf16.mxu0 %v19957_v57  ;;  %v17214_v57 = vld [vmem:[#allocation8 + $0x640] ss:$24 sps:$4 sm:$0xff]  }
 0x425   :  { %3439 = vmatpush1.bf16.msra.mxu1 %v17205_v52  ;;  %3488 = vmatpush1.bf16.msra.mxu0 %v19963_v60  ;;  %v17219_v60 = vld [vmem:[#allocation8 + $0x614] ss:$24 sps:$4 sm:$0xff]  }
 0x426   :  { %3440 = vmatprep.subr.bf16.mxu1 %v17210_v26  ;;  %3489 = vmatprep.subr.bf16.mxu0 %v19969_v25  ;;  %v17217_v25 = vld [vmem:[#allocation8 + $0x610] ss:$24 sps:$4 sm:$0xff]  }
 0x429   :  { %3441 = vmatpush1.bf16.msra.mxu1 %v17208_v2  ;;  %3490 = vmatpush1.bf16.msra.mxu0 %v19975_v48  ;;  %v3479_v48 = vrot.slane %v19521_v36, 2 }
 0x42a   :  { %3442 = vmatprep.subr.bf16.mxu1 %v17213_v10  ;;  %3491 = vmatprep.subr.bf16.mxu0 %v19981_v58  ;;  %v1699_v58 = vadd.f32 %v19686_v22, %v19515_v59 }
 0x42d   :  { %3443 = vmatpush1.bf16.msra.mxu1 %v17211_v41  ;;  %3492 = vmatpush1.bf16.msra.mxu0 %v19987_v9 }
 0x42e   :  { %3444 = vmatprep.subr.bf16.mxu1 %v17216_v54  ;;  %3493 = vmatprep.subr.bf16.mxu0 %v19993_v15 }
 0x431   :  { %3445 = vmatpush1.bf16.msra.mxu1 %v17214_v57  ;;  %3494 = vmatpush1.bf16.msra.mxu0 %v19999_v23  ;;  %v1701_v23 = vadd.f32 %v19698_v27, %v19518_v3 }
 0x432   :  { %3446 = vmatprep.subr.bf16.mxu1 %v17219_v60  ;;  %3495 = vmatprep.subr.bf16.mxu0 %v20005_v31 }
 0x435   :  { %3447 = vmatpush1.bf16.msra.mxu1 %v17217_v25  ;;  %3496 = vmatpush1.bf16.msra.mxu0 %v20011_v46 }
 0x436   :  { %3522 = vmatprep.subr.bf16.mxu1 %v19912_v8  ;;  %3563 = vmatprep.subr.bf16.mxu0 %v20017_v50 }
 0x438   :  { %v2363_v9 = vpop.f32.mrf.mxu1  ;;  %v2413_v15 = vpop.f32.mrf.mxu0  ;;  %3465 = vmatmul.mubr.bf16.vlgmr.msra.gmra.mxu1 %v20024_v17  ;;  %3514 = vmatmul.mubr.bf16.vlgmr.msra.gmra.mxu0 %v3479_v48 }
 0x439   :  { %v20085_v31 = vadd.f32 %v2363_v9, %v1699_v58  ;;  %v20088_v46 = vadd.f32 %v2413_v15, %v19886_v24  ;;  %3523 = vmatpush1.bf16.msra.mxu1 %v19917_v61  ;;  %3564 = vmatpush1.bf16.msra.mxu0 %v20021_v33  ;;  %v20216_v58 = vld [vmem:[#allocation8 + $0x78c] ss:$24 sps:$4 sm:$0xff]   ;;  %v20220_v9 = vld [vmem:[#allocation8 + $0x780] ss:$24 sps:$4 sm:$0xff]  }
 0x43a   :  { %v2365_v8 = vpop.f32.mrf.mxu1  ;;  %v2415_v50 = vpop.f32.mrf.mxu0  ;;  %3524 = vmatprep.subr.bf16.mxu1 %v19923_v11  ;;  %3565 = vmatprep.subr.bf16.mxu0 %v20028_v35  ;;  %v20122_v11 = vld [vmem:[#allocation8 + $0x8d0] ss:$24 sps:$4 sm:$0xff]  }
 0x43b   :  { %v20094_v59 = vadd.f32 %v2365_v8, %v1701_v23  ;;  %v20097_v22 = vadd.f32 %v2415_v50, %v19892_v63  ;;  %3554 = vmatprep.mubr.bf16.mxu1 %v24500_v40  ;;  %3595 = vmatprep.mubr.bf16.mxu0 %v24500_v40  ;;  %v20119_v63 = vld [vmem:[#allocation8 + $0x8dc] ss:$24 sps:$4 sm:$0xff]   ;;  %v20160_v35 = vld [vmem:[#allocation8 + $0x870] ss:$24 sps:$4 sm:$0xff]   ;;  %v20230_v8 = vld [vmem:[#allocation8 + $0x8e0] ss:$24 sps:$4 sm:$0xff]  }
 0x43c   :  { %v2367_v3 = vpop.f32.mrf.mxu1  ;;  %v2417_v27 = vpop.f32.mrf.mxu0  ;;  %v20222_v15 = vld [vmem:[#allocation8 + $0x788] ss:$24 sps:$4 sm:$0xff]   ;;  %v20226_v23 = vld [vmem:[#allocation8 + $0x8e4] ss:$24 sps:$4 sm:$0xff]   ;;  %v20233_v50 = vrot.slane %v24527_v5, 2 }
 0x43d   :  { %3525 = vmatpush1.bf16.msra.mxu1 %v19934_v30  ;;  %3566 = vmatpush1.bf16.msra.mxu0 %v20043_v12  ;;  %v20124_v30 = vld [vmem:[#allocation8 + $0x8d8] ss:$24 sps:$4 sm:$0xff]   ;;  %v20237_v3 = vld [vmem:[#allocation8 + $0x8b4] ss:$24 sps:$4 sm:$0xff]  }
 0x43e   :  { %v2368_v24 = vpop.f32.mrf.mxu1  ;;  %v2418_v61 = vpop.f32.mrf.mxu0  ;;  %3526 = vmatprep.subr.bf16.mxu1 %v19940_v32  ;;  %3567 = vmatprep.subr.bf16.mxu0 %v20047_v6  ;;  %v20117_v6 = vld [vmem:[#allocation8 + $0x8d4] ss:$24 sps:$4 sm:$0xff]   ;;  %v20128_v32 = vld [vmem:[#allocation8 + $0x8a4] ss:$24 sps:$4 sm:$0xff]   ;;  %v20162_v12 = vld [vmem:[#allocation8 + $0x878] ss:$24 sps:$4 sm:$0xff]  }
 0x441   :  { %3527 = vmatpush1.bf16.msra.mxu1 %v19953_v55  ;;  %3568 = vmatpush1.bf16.msra.mxu0 %v20058_v42  ;;  %v20130_v55 = vld [vmem:[#allocation8 + $0x8ac] ss:$24 sps:$4 sm:$0xff]   ;;  %v20174_v42 = vld [vmem:[#allocation8 + $0x848] ss:$24 sps:$4 sm:$0xff]  }
 0x442   :  { %3528 = vmatprep.subr.bf16.mxu1 %v19959_v62  ;;  %3569 = vmatprep.subr.bf16.mxu0 %v20062_v21  ;;  %v20184_v21 = vld [vmem:[#allocation8 + $0x810] ss:$24 sps:$4 sm:$0xff]  }
 0x445   :  { %3529 = vmatpush1.bf16.msra.mxu1 %v19965_v0  ;;  %3570 = vmatpush1.bf16.msra.mxu0 %v17205_v52  ;;  %v20186_v52 = vld [vmem:[#allocation8 + $0x818] ss:$24 sps:$4 sm:$0xff]  }
 0x446   :  { %3530 = vmatprep.subr.bf16.mxu1 %v19971_v34  ;;  %3571 = vmatprep.subr.bf16.mxu0 %v17210_v26  ;;  %v20190_v26 = vld [vmem:[#allocation8 + $0x7e4] ss:$24 sps:$4 sm:$0xff]  }
 0x449   :  { %3531 = vmatpush1.bf16.msra.mxu1 %v19977_v49  ;;  %3572 = vmatpush1.bf16.msra.mxu0 %v17208_v2  ;;  %v20192_v2 = vld [vmem:[#allocation8 + $0x7ec] ss:$24 sps:$4 sm:$0xff]  }
 0x44a   :  { %3532 = vmatprep.subr.bf16.mxu1 %v19983_v1  ;;  %3573 = vmatprep.subr.bf16.mxu0 %v17213_v10  ;;  %v20140_v1 = vld [vmem:[#allocation8 + $0x8a0] ss:$24 sps:$4 sm:$0xff]  }
 0x44b   :  { %v20196_v10 = vld [vmem:[#allocation8 + $0x7e0] ss:$24 sps:$4 sm:$0xff]  }
 0x44d   :  { %3533 = vmatpush1.bf16.msra.mxu1 %v19989_v29  ;;  %3574 = vmatpush1.bf16.msra.mxu0 %v17211_v41  ;;  %v20142_v29 = vld [vmem:[#allocation8 + $0x8a8] ss:$24 sps:$4 sm:$0xff]  }
 0x44e   :  { %3534 = vmatprep.subr.bf16.mxu1 %v19995_v19  ;;  %3575 = vmatprep.subr.bf16.mxu0 %v17216_v54  ;;  %v20198_v41 = vld [vmem:[#allocation8 + $0x7e8] ss:$24 sps:$4 sm:$0xff]   ;;  %v20202_v54 = vld [vmem:[#allocation8 + $0x7b4] ss:$24 sps:$4 sm:$0xff]  }
 0x451   :  { %3535 = vmatpush1.bf16.msra.mxu1 %v20001_v28  ;;  %3576 = vmatpush1.bf16.msra.mxu0 %v17214_v57  ;;  %v20204_v57 = vld [vmem:[#allocation8 + $0x7bc] ss:$24 sps:$4 sm:$0xff]  }
 0x452   :  { %3536 = vmatprep.subr.bf16.mxu1 %v20007_v37  ;;  %3577 = vmatprep.subr.bf16.mxu0 %v17219_v60  ;;  %v20146_v37 = vld [vmem:[#allocation8 + $0x874] ss:$24 sps:$4 sm:$0xff]   ;;  %v20208_v60 = vld [vmem:[#allocation8 + $0x7b0] ss:$24 sps:$4 sm:$0xff]  }
 0x455   :  { %3537 = vmatpush1.bf16.msra.mxu1 %v20013_v4  ;;  %3578 = vmatpush1.bf16.msra.mxu0 %v17217_v25  ;;  %v20210_v25 = vld [vmem:[#allocation8 + $0x7b8] ss:$24 sps:$4 sm:$0xff]  }
 0x456   :  { %3901 = vmatprep.subr.bf16.mxu1 %v20117_v6  ;;  %3942 = vmatprep.subr.bf16.mxu0 %v20119_v63 }
 0x458   :  { %v2454_v62 = vpop.f32.mrf.mxu1  ;;  %v2495_v0 = vpop.f32.mrf.mxu0  ;;  %3555 = vmatmul.mubr.bf16.vlgmr.msra.gmra.mxu1 %v3479_v48  ;;  %3596 = vmatmul.mubr.bf16.vlgmr.msra.gmra.mxu0 %v3479_v48  ;;  %v20214_v48 = vld [vmem:[#allocation8 + $0x784] ss:$24 sps:$4 sm:$0xff]  }
 0x459   :  { %v20133_v34 = vadd.f32 %v2454_v62, %v19926_v20  ;;  %v20136_v49 = vadd.f32 %v2495_v0, %v19928_v16  ;;  %3902 = vmatpush1.bf16.msra.mxu1 %v20122_v11  ;;  %3943 = vmatpush1.bf16.msra.mxu0 %v20124_v30  ;;  %v20148_v20 = vld [vmem:[#allocation8 + $0x87c] ss:$24 sps:$4 sm:$0xff]   ;;  %v20249_v0 = vld [vmem:[#allocation8 + $0x8b0] ss:$24 sps:$4 sm:$0xff]  }
 0x45a   :  { %v2456_v19 = vpop.f32.mrf.mxu1  ;;  %v2497_v28 = vpop.f32.mrf.mxu0  ;;  %3903 = vmatprep.subr.bf16.mxu1 %v20128_v32  ;;  %3944 = vmatprep.subr.bf16.mxu0 %v20130_v55 }
 0x45b   :  { %v20151_v16 = vadd.f32 %v2456_v19, %v19943_v43  ;;  %v20154_v4 = vadd.f32 %v2497_v28, %v19945_v44  ;;  %3933 = vmatprep.mubr.bf16.mxu1 %v24500_v40  ;;  %3974 = vmatprep.mubr.bf16.mxu0 %v24500_v40  ;;  %v20166_v44 = vld [vmem:[#allocation8 + $0x844] ss:$24 sps:$4 sm:$0xff]  }
 0x45c   :  { %v2458_v33 = vpop.f32.mrf.mxu1  ;;  %v2499_v17 = vpop.f32.mrf.mxu0  ;;  %v20253_v28 = vld [vmem:[#allocation8 + $0x884] ss:$24 sps:$4 sm:$0xff]  }
 0x45d   :  { %3904 = vmatpush1.bf16.msra.mxu1 %v20140_v1  ;;  %3945 = vmatpush1.bf16.msra.mxu0 %v20142_v29  ;;  %v20265_v17 = vld [vmem:[#allocation8 + $0x880] ss:$24 sps:$4 sm:$0xff]  }
 0x45e   :  { %v2459_v38 = vpop.f32.mrf.mxu1  ;;  %v2500_v43 = vpop.f32.mrf.mxu0  ;;  %3905 = vmatprep.subr.bf16.mxu1 %v20146_v37  ;;  %3946 = vmatprep.subr.bf16.mxu0 %v20148_v20 }
 0x45f   :  { %v17282_v43 = vld [vmem:[#allocation8 + $0x824] ss:$24 sps:$4 sm:$0xff]  }
 0x461   :  { %3906 = vmatpush1.bf16.msra.mxu1 %v20160_v35  ;;  %3947 = vmatpush1.bf16.msra.mxu0 %v20162_v12 }
 0x462   :  { %3907 = vmatprep.subr.bf16.mxu1 %v20166_v44  ;;  %3948 = vmatprep.subr.bf16.mxu0 %v20168_v18 }
 0x465   :  { %3908 = vmatpush1.bf16.msra.mxu1 %v20172_v53  ;;  %3949 = vmatpush1.bf16.msra.mxu0 %v20174_v42 }
 0x466   :  { %3909 = vmatprep.subr.bf16.mxu1 %v20178_v7  ;;  %3950 = vmatprep.subr.bf16.mxu0 %v20180_v51 }
 0x469   :  { %3910 = vmatpush1.bf16.msra.mxu1 %v20184_v21  ;;  %3951 = vmatpush1.bf16.msra.mxu0 %v20186_v52 }
 0x46a   :  { %3911 = vmatprep.subr.bf16.mxu1 %v20190_v26  ;;  %3952 = vmatprep.subr.bf16.mxu0 %v20192_v2 }
 0x46d   :  { %3912 = vmatpush1.bf16.msra.mxu1 %v20196_v10  ;;  %3953 = vmatpush1.bf16.msra.mxu0 %v20198_v41 }
 0x46e   :  { %3913 = vmatprep.subr.bf16.mxu1 %v20202_v54  ;;  %3954 = vmatprep.subr.bf16.mxu0 %v20204_v57 }
 0x471   :  { %3914 = vmatpush1.bf16.msra.mxu1 %v20208_v60  ;;  %3955 = vmatpush1.bf16.msra.mxu0 %v20210_v25 }
 0x472   :  { %3915 = vmatprep.subr.bf16.mxu1 %v20214_v48  ;;  %3956 = vmatprep.subr.bf16.mxu0 %v20216_v58 }
 0x475   :  { %3916 = vmatpush1.bf16.msra.mxu1 %v20220_v9  ;;  %3957 = vmatpush1.bf16.msra.mxu0 %v20222_v15 }
 0x476   :  { %3983 = vmatprep.subr.bf16.mxu1 %v20226_v23  ;;  %4032 = vmatprep.subr.bf16.mxu0 %v20117_v6 }
 0x478   :  { %v2833_v27 = vpop.f32.mrf.mxu1  ;;  %v2874_v24 = vpop.f32.mrf.mxu0  ;;  %3934 = vmatmul.mubr.bf16.vlgmr.msra.gmra.mxu1 %v20233_v50  ;;  %3975 = vmatmul.mubr.bf16.vlgmr.msra.gmra.mxu0 %v20233_v50 }
 0x479   :  { %v20242_v61 = vadd.f32 %v2833_v27, %v20036_v56  ;;  %v20245_v62 = vadd.f32 %v2874_v24, %v20039_v13  ;;  %3984 = vmatpush1.bf16.msra.mxu1 %v20230_v8  ;;  %4033 = vmatpush1.bf16.msra.mxu0 %v20122_v11  ;;  %v17285_v27 = vld [vmem:[#allocation8 + $0x7f4] ss:$24 sps:$4 sm:$0xff]   ;;  %v20361_v24 = vld [vmem:[#allocation8 + $0x9f0] ss:$24 sps:$4 sm:$0xff]  }
 0x47a   :  { %v2835_v6 = vpop.f32.mrf.mxu1  ;;  %v2876_v19 = vpop.f32.mrf.mxu0  ;;  %3985 = vmatprep.subr.bf16.mxu1 %v20237_v3  ;;  %4034 = vmatprep.subr.bf16.mxu0 %v20128_v32 }
 0x47b   :  { %v20256_v56 = vadd.f32 %v2835_v6, %v20049_v45  ;;  %v20259_v13 = vadd.f32 %v2876_v19, %v20052_v47  ;;  %4015 = vmatprep.mubr.bf16.mxu1 %v24500_v40  ;;  %4064 = vmatprep.mubr.bf16.mxu0 %v24500_v40  ;;  %v17279_v45 = vld [vmem:[#allocation8 + $0x854] ss:$24 sps:$4 sm:$0xff]   ;;  %v17277_v47 = vld [vmem:[#allocation8 + $0x850] ss:$24 sps:$4 sm:$0xff]  }
 0x47c   :  { %v2837_v11 = vpop.f32.mrf.mxu1  ;;  %v2878_v33 = vpop.f32.mrf.mxu0  ;;  %v20369_v19 = vld [vmem:[#allocation8 + $0x9cc] ss:$24 sps:$4 sm:$0xff]  }
 0x47d   :  { %3986 = vmatpush1.bf16.msra.mxu1 %v20249_v0  ;;  %4035 = vmatpush1.bf16.msra.mxu0 %v20140_v1  ;;  %v17280_v1 = vld [vmem:[#allocation8 + $0x820] ss:$24 sps:$4 sm:$0xff]   ;;  %v20379_v33 = vld [vmem:[#allocation8 + $0x994] ss:$24 sps:$4 sm:$0xff]  }
 0x47e   :  { %v2838_v32 = vpop.f32.mrf.mxu1  ;;  %v2879_v38 = vpop.f32.mrf.mxu0  ;;  %3987 = vmatprep.subr.bf16.mxu1 %v20253_v28  ;;  %4036 = vmatprep.subr.bf16.mxu0 %v20146_v37  ;;  %v17283_v37 = vld [vmem:[#allocation8 + $0x7f0] ss:$24 sps:$4 sm:$0xff]  }
 0x47f   :  { %v20375_v11 = vld [vmem:[#allocation8 + $0x9c8] ss:$24 sps:$4 sm:$0xff]   ;;  %v20387_v38 = vld [vmem:[#allocation8 + $0x998] ss:$24 sps:$4 sm:$0xff]  }
 0x480   :  { %v20385_v32 = vld [vmem:[#allocation8 + $0x990] ss:$24 sps:$4 sm:$0xff]  }
 0x481   :  { %3988 = vmatpush1.bf16.msra.mxu1 %v20265_v17  ;;  %4037 = vmatpush1.bf16.msra.mxu0 %v20160_v35  ;;  %v17288_v35 = vld [vmem:[#allocation8 + $0x7c4] ss:$24 sps:$4 sm:$0xff]  }
 0x482   :  { %3989 = vmatprep.subr.bf16.mxu1 %v17279_v45  ;;  %4038 = vmatprep.subr.bf16.mxu0 %v20166_v44  ;;  %v17286_v44 = vld [vmem:[#allocation8 + $0x7c0] ss:$24 sps:$4 sm:$0xff]  }
 0x485   :  { %3990 = vmatpush1.bf16.msra.mxu1 %v17277_v47  ;;  %4039 = vmatpush1.bf16.msra.mxu0 %v20172_v53  ;;  %v17291_v53 = vld [vmem:[#allocation8 + $0x794] ss:$24 sps:$4 sm:$0xff]  }
 0x486   :  { %3991 = vmatprep.subr.bf16.mxu1 %v17282_v43  ;;  %4040 = vmatprep.subr.bf16.mxu0 %v20178_v7  ;;  %v17289_v7 = vld [vmem:[#allocation8 + $0x790] ss:$24 sps:$4 sm:$0xff]  }
 0x489   :  { %3992 = vmatpush1.bf16.msra.mxu1 %v17280_v1  ;;  %4041 = vmatpush1.bf16.msra.mxu0 %v20184_v21  ;;  %v4030_v21 = vrot.slane %v19524_v39, 2 }
 0x48a   :  { %3993 = vmatprep.subr.bf16.mxu1 %v17285_v27  ;;  %4042 = vmatprep.subr.bf16.mxu0 %v20190_v26 }
 0x48d   :  { %3994 = vmatpush1.bf16.msra.mxu1 %v17283_v37  ;;  %4043 = vmatpush1.bf16.msra.mxu0 %v20196_v10 }
 0x48e   :  { %3995 = vmatprep.subr.bf16.mxu1 %v17288_v35  ;;  %4044 = vmatprep.subr.bf16.mxu0 %v20202_v54 }
 0x491   :  { %3996 = vmatpush1.bf16.msra.mxu1 %v17286_v44  ;;  %4045 = vmatpush1.bf16.msra.mxu0 %v20208_v60 }
 0x492   :  { %3997 = vmatprep.subr.bf16.mxu1 %v17291_v53  ;;  %4046 = vmatprep.subr.bf16.mxu0 %v20214_v48 }
 0x495   :  { %3998 = vmatpush1.bf16.msra.mxu1 %v17289_v7  ;;  %4047 = vmatpush1.bf16.msra.mxu0 %v20220_v9 }
 0x496   :  { %4073 = vmatprep.subr.bf16.mxu1 %v20119_v63  ;;  %4114 = vmatprep.subr.bf16.mxu0 %v20226_v23 }
 0x498   :  { %v2915_v26 = vpop.f32.mrf.mxu1  ;;  %v2964_v10 = vpop.f32.mrf.mxu0  ;;  %4016 = vmatmul.mubr.bf16.vlgmr.msra.gmra.mxu1 %v20233_v50  ;;  %4065 = vmatmul.mubr.bf16.vlgmr.msra.gmra.mxu0 %v4030_v21 }
 0x499   :  { %v20286_v54 = vadd.f32 %v2915_v26, %v20085_v31  ;;  %v20289_v60 = vadd.f32 %v2964_v10, %v20088_v46  ;;  %4074 = vmatpush1.bf16.msra.mxu1 %v20124_v30  ;;  %4115 = vmatpush1.bf16.msra.mxu0 %v20230_v8  ;;  %v20423_v26 = vld [vmem:[#allocation8 + $0x908] ss:$24 sps:$4 sm:$0xff]   ;;  %v20427_v10 = vld [vmem:[#allocation8 + $0xa64] ss:$24 sps:$4 sm:$0xff]  }
 0x49a   :  { %v2917_v48 = vpop.f32.mrf.mxu1  ;;  %v2966_v9 = vpop.f32.mrf.mxu0  ;;  %4075 = vmatprep.subr.bf16.mxu1 %v20130_v55  ;;  %4116 = vmatprep.subr.bf16.mxu0 %v20237_v3 }
 0x49b   :  { %v20296_v63 = vadd.f32 %v2917_v48, %v20094_v59  ;;  %v20299_v23 = vadd.f32 %v2966_v9, %v20097_v22  ;;  %4105 = vmatprep.mubr.bf16.mxu1 %v24500_v40  ;;  %4146 = vmatprep.mubr.bf16.mxu0 %v24500_v40  ;;  %v20318_v59 = vld [vmem:[#allocation8 + $0xa54] ss:$24 sps:$4 sm:$0xff]   ;;  %v20431_v48 = vld [vmem:[#allocation8 + $0xa60] ss:$24 sps:$4 sm:$0xff]   ;;  %v20434_v9 = vrot.slane %v19237_v14, 3 }
 0x49c   :  { %v2919_v31 = vpop.f32.mrf.mxu1  ;;  %v2968_v46 = vpop.f32.mrf.mxu0  ;;  %v20320_v22 = vld [vmem:[#allocation8 + $0xa5c] ss:$24 sps:$4 sm:$0xff]  }
 0x49d   :  { %4076 = vmatpush1.bf16.msra.mxu1 %v20142_v29  ;;  %4117 = vmatpush1.bf16.msra.mxu0 %v20249_v0  ;;  %v20323_v29 = vld [vmem:[#allocation8 + $0xa50] ss:$24 sps:$4 sm:$0xff]   ;;  %v20438_v31 = vld [vmem:[#allocation8 + $0xa34] ss:$24 sps:$4 sm:$0xff]  }
 0x49e   :  { %v2920_v30 = vpop.f32.mrf.mxu1  ;;  %v2969_v55 = vpop.f32.mrf.mxu0  ;;  %4077 = vmatprep.subr.bf16.mxu1 %v20148_v20  ;;  %4118 = vmatprep.subr.bf16.mxu0 %v20253_v28  ;;  %v20325_v20 = vld [vmem:[#allocation8 + $0xa58] ss:$24 sps:$4 sm:$0xff]  }
 0x49f   :  { %v20363_v0 = vld [vmem:[#allocation8 + $0x9f8] ss:$24 sps:$4 sm:$0xff]  }
 0x4a0   :  { %v20373_v28 = vld [vmem:[#allocation8 + $0x9c0] ss:$24 sps:$4 sm:$0xff]  }
 0x4a1   :  { %4078 = vmatpush1.bf16.msra.mxu1 %v20162_v12  ;;  %4119 = vmatpush1.bf16.msra.mxu0 %v20265_v17  ;;  %v20329_v12 = vld [vmem:[#allocation8 + $0xa24] ss:$24 sps:$4 sm:$0xff]  }
 0x4a2   :  { %4079 = vmatprep.subr.bf16.mxu1 %v20168_v18  ;;  %4120 = vmatprep.subr.bf16.mxu0 %v17279_v45  ;;  %v20331_v18 = vld [vmem:[#allocation8 + $0xa2c] ss:$24 sps:$4 sm:$0xff]   ;;  %v20381_v17 = vld [vmem:[#allocation8 + $0x99c] ss:$24 sps:$4 sm:$0xff]  }
 0x4a3   :  { %v20391_v45 = vld [vmem:[#allocation8 + $0x964] ss:$24 sps:$4 sm:$0xff]  }
 0x4a5   :  { %4080 = vmatpush1.bf16.msra.mxu1 %v20174_v42  ;;  %4121 = vmatpush1.bf16.msra.mxu0 %v17277_v47  ;;  %v20393_v47 = vld [vmem:[#allocation8 + $0x96c] ss:$24 sps:$4 sm:$0xff]  }
 0x4a6   :  { %4081 = vmatprep.subr.bf16.mxu1 %v20180_v51  ;;  %4122 = vmatprep.subr.bf16.mxu0 %v17282_v43  ;;  %v20397_v43 = vld [vmem:[#allocation8 + $0x960] ss:$24 sps:$4 sm:$0xff]  }
 0x4a9   :  { %4082 = vmatpush1.bf16.msra.mxu1 %v20186_v52  ;;  %4123 = vmatpush1.bf16.msra.mxu0 %v17280_v1  ;;  %v20399_v1 = vld [vmem:[#allocation8 + $0x968] ss:$24 sps:$4 sm:$0xff]  }
 0x4aa   :  { %4083 = vmatprep.subr.bf16.mxu1 %v20192_v2  ;;  %4124 = vmatprep.subr.bf16.mxu0 %v17285_v27  ;;  %v20403_v27 = vld [vmem:[#allocation8 + $0x934] ss:$24 sps:$4 sm:$0xff]  }
 0x4ad   :  { %4084 = vmatpush1.bf16.msra.mxu1 %v20198_v41  ;;  %4125 = vmatpush1.bf16.msra.mxu0 %v17283_v37  ;;  %v20341_v41 = vld [vmem:[#allocation8 + $0xa20] ss:$24 sps:$4 sm:$0xff]   ;;  %v20405_v37 = vld [vmem:[#allocation8 + $0x93c] ss:$24 sps:$4 sm:$0xff]  }
 0x4ae   :  { %4085 = vmatprep.subr.bf16.mxu1 %v20204_v57  ;;  %4126 = vmatprep.subr.bf16.mxu0 %v17288_v35  ;;  %v20343_v57 = vld [vmem:[#allocation8 + $0xa28] ss:$24 sps:$4 sm:$0xff]  }
 0x4af   :  { %v20409_v35 = vld [vmem:[#allocation8 + $0x930] ss:$24 sps:$4 sm:$0xff]  }
 0x4b1   :  { %4086 = vmatpush1.bf16.msra.mxu1 %v20210_v25  ;;  %4127 = vmatpush1.bf16.msra.mxu0 %v17286_v44  ;;  %v20411_v44 = vld [vmem:[#allocation8 + $0x938] ss:$24 sps:$4 sm:$0xff]  }
 0x4b2   :  { %4087 = vmatprep.subr.bf16.mxu1 %v20216_v58  ;;  %4128 = vmatprep.subr.bf16.mxu0 %v17291_v53  ;;  %v20415_v53 = vld [vmem:[#allocation8 + $0x904] ss:$24 sps:$4 sm:$0xff]  }
 0x4b5   :  { %4088 = vmatpush1.bf16.msra.mxu1 %v20222_v15  ;;  %4129 = vmatpush1.bf16.msra.mxu0 %v17289_v7  ;;  %v20347_v15 = vld [vmem:[#allocation8 + $0x9f4] ss:$24 sps:$4 sm:$0xff]  }
 0x4b6   :  { %4452 = vmatprep.subr.bf16.mxu1 %v20318_v59  ;;  %4493 = vmatprep.subr.bf16.mxu0 %v20320_v22  ;;  %v20417_v7 = vld [vmem:[#allocation8 + $0x90c] ss:$24 sps:$4 sm:$0xff]  }
 0x4b8   :  { %v3005_v42 = vpop.f32.mrf.mxu1  ;;  %v3046_v51 = vpop.f32.mrf.mxu0  ;;  %4106 = vmatmul.mubr.bf16.vlgmr.msra.gmra.mxu1 %v4030_v21  ;;  %4147 = vmatmul.mubr.bf16.vlgmr.msra.gmra.mxu0 %v4030_v21  ;;  %v20421_v21 = vld [vmem:[#allocation8 + $0x900] ss:$24 sps:$4 sm:$0xff]  }
 0x4b9   :  { %v20334_v52 = vadd.f32 %v3005_v42, %v20133_v34  ;;  %v20337_v2 = vadd.f32 %v3046_v51, %v20136_v49  ;;  %4453 = vmatpush1.bf16.msra.mxu1 %v20323_v29  ;;  %4494 = vmatpush1.bf16.msra.mxu0 %v20325_v20  ;;  %v20349_v34 = vld [vmem:[#allocation8 + $0x9fc] ss:$24 sps:$4 sm:$0xff]   ;;  %v20450_v51 = vld [vmem:[#allocation8 + $0xa30] ss:$24 sps:$4 sm:$0xff]  }
 0x4ba   :  { %v3007_v25 = vpop.f32.mrf.mxu1  ;;  %v3048_v58 = vpop.f32.mrf.mxu0  ;;  %4454 = vmatprep.subr.bf16.mxu1 %v20329_v12  ;;  %4495 = vmatprep.subr.bf16.mxu0 %v20331_v18 }
 0x4bb   :  { %v20352_v49 = vadd.f32 %v3007_v25, %v20151_v16  ;;  %v20355_v8 = vadd.f32 %v3048_v58, %v20154_v4  ;;  %4484 = vmatprep.mubr.bf16.mxu1 %v24500_v40  ;;  %4525 = vmatprep.mubr.bf16.mxu0 %v24500_v40  ;;  %v20367_v4 = vld [vmem:[#allocation8 + $0x9c4] ss:$24 sps:$4 sm:$0xff]  }
 0x4bc   :  { %v3009_v50 = vpop.f32.mrf.mxu1  ;;  %v3050_v3 = vpop.f32.mrf.mxu0  ;;  %v20454_v58 = vld [vmem:[#allocation8 + $0xa04] ss:$24 sps:$4 sm:$0xff]  }
 0x4bd   :  { %4455 = vmatpush1.bf16.msra.mxu1 %v20341_v41  ;;  %4496 = vmatpush1.bf16.msra.mxu0 %v20343_v57  ;;  %v20466_v3 = vld [vmem:[#allocation8 + $0xa00] ss:$24 sps:$4 sm:$0xff]  }
 0x4be   :  { %v3010_v6 = vpop.f32.mrf.mxu1  ;;  %v3051_v16 = vpop.f32.mrf.mxu0  ;;  %4456 = vmatprep.subr.bf16.mxu1 %v20347_v15  ;;  %4497 = vmatprep.subr.bf16.mxu0 %v20349_v34 }
 0x4bf   :  { %v17354_v16 = vld [vmem:[#allocation8 + $0x9a4] ss:$24 sps:$4 sm:$0xff]  }
 0x4c1   :  { %4457 = vmatpush1.bf16.msra.mxu1 %v20361_v24  ;;  %4498 = vmatpush1.bf16.msra.mxu0 %v20363_v0 }
 0x4c2   :  { %4458 = vmatprep.subr.bf16.mxu1 %v20367_v4  ;;  %4499 = vmatprep.subr.bf16.mxu0 %v20369_v19 }
 0x4c5   :  { %4459 = vmatpush1.bf16.msra.mxu1 %v20373_v28  ;;  %4500 = vmatpush1.bf16.msra.mxu0 %v20375_v11 }
 0x4c6   :  { %4460 = vmatprep.subr.bf16.mxu1 %v20379_v33  ;;  %4501 = vmatprep.subr.bf16.mxu0 %v20381_v17 }
 0x4c9   :  { %4461 = vmatpush1.bf16.msra.mxu1 %v20385_v32  ;;  %4502 = vmatpush1.bf16.msra.mxu0 %v20387_v38 }
 0x4ca   :  { %4462 = vmatprep.subr.bf16.mxu1 %v20391_v45  ;;  %4503 = vmatprep.subr.bf16.mxu0 %v20393_v47 }
 0x4cd   :  { %4463 = vmatpush1.bf16.msra.mxu1 %v20397_v43  ;;  %4504 = vmatpush1.bf16.msra.mxu0 %v20399_v1 }
 0x4ce   :  { %4464 = vmatprep.subr.bf16.mxu1 %v20403_v27  ;;  %4505 = vmatprep.subr.bf16.mxu0 %v20405_v37 }
 0x4d1   :  { %4465 = vmatpush1.bf16.msra.mxu1 %v20409_v35  ;;  %4506 = vmatpush1.bf16.msra.mxu0 %v20411_v44 }
 0x4d2   :  { %4466 = vmatprep.subr.bf16.mxu1 %v20415_v53  ;;  %4507 = vmatprep.subr.bf16.mxu0 %v20417_v7 }
 0x4d5   :  { %4467 = vmatpush1.bf16.msra.mxu1 %v20421_v21  ;;  %4508 = vmatpush1.bf16.msra.mxu0 %v20423_v26 }
 0x4d6   :  { %4534 = vmatprep.subr.bf16.mxu1 %v20427_v10  ;;  %4583 = vmatprep.subr.bf16.mxu0 %v20318_v59 }
 0x4d8   :  { %v3384_v46 = vpop.f32.mrf.mxu1  ;;  %v3425_v30 = vpop.f32.mrf.mxu0  ;;  %4485 = vmatmul.mubr.bf16.vlgmr.msra.gmra.mxu1 %v20434_v9  ;;  %4526 = vmatmul.mubr.bf16.vlgmr.msra.gmra.mxu0 %v20434_v9 }
 0x4d9   :  { %v20443_v55 = vadd.f32 %v3384_v46, %v20242_v61  ;;  %v20446_v42 = vadd.f32 %v3425_v30, %v20245_v62  ;;  %4535 = vmatpush1.bf16.msra.mxu1 %v20431_v48  ;;  %4584 = vmatpush1.bf16.msra.mxu0 %v20323_v29  ;;  %v17357_v46 = vld [vmem:[#allocation8 + $0x974] ss:$24 sps:$4 sm:$0xff]   ;;  %v20562_v30 = vld [vmem:[#allocation8 + $0xb70] ss:$24 sps:$4 sm:$0xff]  }
 0x4da   :  { %v3386_v59 = vpop.f32.mrf.mxu1  ;;  %v3427_v25 = vpop.f32.mrf.mxu0  ;;  %4536 = vmatprep.subr.bf16.mxu1 %v20438_v31  ;;  %4585 = vmatprep.subr.bf16.mxu0 %v20329_v12 }
 0x4db   :  { %v20457_v61 = vadd.f32 %v3386_v59, %v20256_v56  ;;  %v20460_v62 = vadd.f32 %v3427_v25, %v20259_v13  ;;  %4566 = vmatprep.mubr.bf16.mxu1 %v24500_v40  ;;  %4615 = vmatprep.mubr.bf16.mxu0 %v24500_v40  ;;  %v17351_v56 = vld [vmem:[#allocation8 + $0x9d4] ss:$24 sps:$4 sm:$0xff]   ;;  %v17349_v13 = vld [vmem:[#allocation8 + $0x9d0] ss:$24 sps:$4 sm:$0xff]  }
 0x4dc   :  { %v3388_v29 = vpop.f32.mrf.mxu1  ;;  %v3429_v50 = vpop.f32.mrf.mxu0  ;;  %v20570_v25 = vld [vmem:[#allocation8 + $0xb4c] ss:$24 sps:$4 sm:$0xff]  }
 0x4dd   :  { %4537 = vmatpush1.bf16.msra.mxu1 %v20450_v51  ;;  %4586 = vmatpush1.bf16.msra.mxu0 %v20341_v41  ;;  %v17352_v41 = vld [vmem:[#allocation8 + $0x9a0] ss:$24 sps:$4 sm:$0xff]   ;;  %v20580_v50 = vld [vmem:[#allocation8 + $0xb14] ss:$24 sps:$4 sm:$0xff]  }
 0x4de   :  { %v3389_v12 = vpop.f32.mrf.mxu1  ;;  %v3430_v6 = vpop.f32.mrf.mxu0  ;;  %4538 = vmatprep.subr.bf16.mxu1 %v20454_v58  ;;  %4587 = vmatprep.subr.bf16.mxu0 %v20347_v15  ;;  %v17355_v15 = vld [vmem:[#allocation8 + $0x970] ss:$24 sps:$4 sm:$0xff]  }
 0x4df   :  { %v20576_v29 = vld [vmem:[#allocation8 + $0xb48] ss:$24 sps:$4 sm:$0xff]   ;;  %v20588_v6 = vld [vmem:[#allocation8 + $0xb18] ss:$24 sps:$4 sm:$0xff]  }
 0x4e0   :  { %v20586_v12 = vld [vmem:[#allocation8 + $0xb10] ss:$24 sps:$4 sm:$0xff]  }
 0x4e1   :  { %4539 = vmatpush1.bf16.msra.mxu1 %v20466_v3  ;;  %4588 = vmatpush1.bf16.msra.mxu0 %v20361_v24  ;;  %v17360_v24 = vld [vmem:[#allocation8 + $0x944] ss:$24 sps:$4 sm:$0xff]  }
 0x4e2   :  { %4540 = vmatprep.subr.bf16.mxu1 %v17351_v56  ;;  %4589 = vmatprep.subr.bf16.mxu0 %v20367_v4  ;;  %v17358_v4 = vld [vmem:[#allocation8 + $0x940] ss:$24 sps:$4 sm:$0xff]  }
 0x4e5   :  { %4541 = vmatpush1.bf16.msra.mxu1 %v17349_v13  ;;  %4590 = vmatpush1.bf16.msra.mxu0 %v20373_v28  ;;  %v17363_v28 = vld [vmem:[#allocation8 + $0x914] ss:$24 sps:$4 sm:$0xff]  }
 0x4e6   :  { %4542 = vmatprep.subr.bf16.mxu1 %v17354_v16  ;;  %4591 = vmatprep.subr.bf16.mxu0 %v20379_v33  ;;  %v17361_v33 = vld [vmem:[#allocation8 + $0x910] ss:$24 sps:$4 sm:$0xff]  }
 0x4e9   :  { %4543 = vmatpush1.bf16.msra.mxu1 %v17352_v41  ;;  %4592 = vmatpush1.bf16.msra.mxu0 %v20385_v32  ;;  %v4581_v32 = vrot.slane %v19521_v36, 3 }
 0x4ea   :  { %4544 = vmatprep.subr.bf16.mxu1 %v17357_v46  ;;  %4593 = vmatprep.subr.bf16.mxu0 %v20391_v45 }
 0x4ed   :  { %4545 = vmatpush1.bf16.msra.mxu1 %v17355_v15  ;;  %4594 = vmatpush1.bf16.msra.mxu0 %v20397_v43 }
 0x4ee   :  { %4546 = vmatprep.subr.bf16.mxu1 %v17360_v24  ;;  %4595 = vmatprep.subr.bf16.mxu0 %v20403_v27 }
 0x4f1   :  { %4547 = vmatpush1.bf16.msra.mxu1 %v17358_v4  ;;  %4596 = vmatpush1.bf16.msra.mxu0 %v20409_v35 }
 0x4f2   :  { %4548 = vmatprep.subr.bf16.mxu1 %v17363_v28  ;;  %4597 = vmatprep.subr.bf16.mxu0 %v20415_v53 }
 0x4f5   :  { %4549 = vmatpush1.bf16.msra.mxu1 %v17361_v33  ;;  %4598 = vmatpush1.bf16.msra.mxu0 %v20421_v21 }
 0x4f6   :  { %4624 = vmatprep.subr.bf16.mxu1 %v20320_v22  ;;  %4665 = vmatprep.subr.bf16.mxu0 %v20427_v10 }
 0x4f8   :  { %v3466_v45 = vpop.f32.mrf.mxu1  ;;  %v3515_v43 = vpop.f32.mrf.mxu0  ;;  %4567 = vmatmul.mubr.bf16.vlgmr.msra.gmra.mxu1 %v20434_v9  ;;  %4616 = vmatmul.mubr.bf16.vlgmr.msra.gmra.mxu0 %v4581_v32 }
 0x4f9   :  { %v20487_v27 = vadd.f32 %v3466_v45, %v20286_v54  ;;  %v20490_v35 = vadd.f32 %v3515_v43, %v20289_v60  ;;  %4625 = vmatpush1.bf16.msra.mxu1 %v20325_v20  ;;  %4666 = vmatpush1.bf16.msra.mxu0 %v20431_v48  ;;  %v20624_v45 = vld [vmem:[#allocation8 + $0xa88] ss:$24 sps:$4 sm:$0xff]   ;;  %v20628_v43 = vld [vmem:[#allocation8 + $0xbe4] ss:$24 sps:$4 sm:$0xff]  }
 0x4fa   :  { %v3468_v53 = vpop.f32.mrf.mxu1  ;;  %v3517_v21 = vpop.f32.mrf.mxu0  ;;  %4626 = vmatprep.subr.bf16.mxu1 %v20331_v18  ;;  %4667 = vmatprep.subr.bf16.mxu0 %v20438_v31 }
 0x4fb   :  { %v20497_v22 = vadd.f32 %v3468_v53, %v20296_v63  ;;  %v20500_v10 = vadd.f32 %v3517_v21, %v20299_v23  ;;  %4656 = vmatprep.mubr.bf16.mxu1 %v24500_v40  ;;  %4697 = vmatprep.mubr.bf16.mxu0 %v24500_v40  ;;  %v20519_v63 = vld [vmem:[#allocation8 + $0xbd4] ss:$24 sps:$4 sm:$0xff]   ;;  %v20632_v53 = vld [vmem:[#allocation8 + $0xbe0] ss:$24 sps:$4 sm:$0xff]   ;;  %v20635_v21 = vrot.slane %v24527_v5, 3 }
 0x4fc   :  { %v3470_v54 = vpop.f32.mrf.mxu1  ;;  %v3519_v60 = vpop.f32.mrf.mxu0  ;;  %v20521_v23 = vld [vmem:[#allocation8 + $0xbdc] ss:$24 sps:$4 sm:$0xff]  }
 0x4fd   :  { %4627 = vmatpush1.bf16.msra.mxu1 %v20343_v57  ;;  %4668 = vmatpush1.bf16.msra.mxu0 %v20450_v51  ;;  %v20524_v57 = vld [vmem:[#allocation8 + $0xbd0] ss:$24 sps:$4 sm:$0xff]   ;;  %v20639_v54 = vld [vmem:[#allocation8 + $0xbb4] ss:$24 sps:$4 sm:$0xff]  }
 0x4fe   :  { %v3471_v20 = vpop.f32.mrf.mxu1  ;;  %v3520_v18 = vpop.f32.mrf.mxu0  ;;  %4628 = vmatprep.subr.bf16.mxu1 %v20349_v34  ;;  %4669 = vmatprep.subr.bf16.mxu0 %v20454_v58  ;;  %v20526_v34 = vld [vmem:[#allocation8 + $0xbd8] ss:$24 sps:$4 sm:$0xff]  }
 0x4ff   :  { %v20564_v51 = vld [vmem:[#allocation8 + $0xb78] ss:$24 sps:$4 sm:$0xff]  }
 0x500   :  { %v20574_v58 = vld [vmem:[#allocation8 + $0xb40] ss:$24 sps:$4 sm:$0xff]  }
 0x501   :  { %4629 = vmatpush1.bf16.msra.mxu1 %v20363_v0  ;;  %4670 = vmatpush1.bf16.msra.mxu0 %v20466_v3  ;;  %v20530_v0 = vld [vmem:[#allocation8 + $0xba4] ss:$24 sps:$4 sm:$0xff]  }
 0x502   :  { %4630 = vmatprep.subr.bf16.mxu1 %v20369_v19  ;;  %4671 = vmatprep.subr.bf16.mxu0 %v17351_v56  ;;  %v20532_v19 = vld [vmem:[#allocation8 + $0xbac] ss:$24 sps:$4 sm:$0xff]   ;;  %v20582_v3 = vld [vmem:[#allocation8 + $0xb1c] ss:$24 sps:$4 sm:$0xff]  }
 0x503   :  { %v20592_v56 = vld [vmem:[#allocation8 + $0xae4] ss:$24 sps:$4 sm:$0xff]  }
 0x505   :  { %4631 = vmatpush1.bf16.msra.mxu1 %v20375_v11  ;;  %4672 = vmatpush1.bf16.msra.mxu0 %v17349_v13  ;;  %v20594_v13 = vld [vmem:[#allocation8 + $0xaec] ss:$24 sps:$4 sm:$0xff]  }
 0x506   :  { %4632 = vmatprep.subr.bf16.mxu1 %v20381_v17  ;;  %4673 = vmatprep.subr.bf16.mxu0 %v17354_v16  ;;  %v20598_v16 = vld [vmem:[#allocation8 + $0xae0] ss:$24 sps:$4 sm:$0xff]  }
 0x509   :  { %4633 = vmatpush1.bf16.msra.mxu1 %v20387_v38  ;;  %4674 = vmatpush1.bf16.msra.mxu0 %v17352_v41  ;;  %v20600_v41 = vld [vmem:[#allocation8 + $0xae8] ss:$24 sps:$4 sm:$0xff]  }
 0x50a   :  { %4634 = vmatprep.subr.bf16.mxu1 %v20393_v47  ;;  %4675 = vmatprep.subr.bf16.mxu0 %v17357_v46  ;;  %v20604_v46 = vld [vmem:[#allocation8 + $0xab4] ss:$24 sps:$4 sm:$0xff]  }
 0x50d   :  { %4635 = vmatpush1.bf16.msra.mxu1 %v20399_v1  ;;  %4676 = vmatpush1.bf16.msra.mxu0 %v17355_v15  ;;  %v20542_v1 = vld [vmem:[#allocation8 + $0xba0] ss:$24 sps:$4 sm:$0xff]   ;;  %v20606_v15 = vld [vmem:[#allocation8 + $0xabc] ss:$24 sps:$4 sm:$0xff]  }
 0x50e   :  { %4636 = vmatprep.subr.bf16.mxu1 %v20405_v37  ;;  %4677 = vmatprep.subr.bf16.mxu0 %v17360_v24  ;;  %v20544_v37 = vld [vmem:[#allocation8 + $0xba8] ss:$24 sps:$4 sm:$0xff]  }
 0x50f   :  { %v20610_v24 = vld [vmem:[#allocation8 + $0xab0] ss:$24 sps:$4 sm:$0xff]  }
 0x511   :  { %4637 = vmatpush1.bf16.msra.mxu1 %v20411_v44  ;;  %4678 = vmatpush1.bf16.msra.mxu0 %v17358_v4  ;;  %v20612_v4 = vld [vmem:[#allocation8 + $0xab8] ss:$24 sps:$4 sm:$0xff]  }
 0x512   :  { %4638 = vmatprep.subr.bf16.mxu1 %v20417_v7  ;;  %4679 = vmatprep.subr.bf16.mxu0 %v17363_v28  ;;  %v20616_v28 = vld [vmem:[#allocation8 + $0xa84] ss:$24 sps:$4 sm:$0xff]  }
 0x515   :  { %4639 = vmatpush1.bf16.msra.mxu1 %v20423_v26  ;;  %4680 = vmatpush1.bf16.msra.mxu0 %v17361_v33  ;;  %v20548_v26 = vld [vmem:[#allocation8 + $0xb74] ss:$24 sps:$4 sm:$0xff]  }
 0x516   :  { %5003 = vmatprep.subr.bf16.mxu1 %v20519_v63  ;;  %5044 = vmatprep.subr.bf16.mxu0 %v20521_v23  ;;  %v20618_v33 = vld [vmem:[#allocation8 + $0xa8c] ss:$24 sps:$4 sm:$0xff]  }
 0x518   :  { %v3556_v11 = vpop.f32.mrf.mxu1  ;;  %v3597_v17 = vpop.f32.mrf.mxu0  ;;  %4657 = vmatmul.mubr.bf16.vlgmr.msra.gmra.mxu1 %v4581_v32  ;;  %4698 = vmatmul.mubr.bf16.vlgmr.msra.gmra.mxu0 %v4581_v32  ;;  %v20622_v32 = vld [vmem:[#allocation8 + $0xa80] ss:$24 sps:$4 sm:$0xff]  }
 0x519   :  { %v20535_v38 = vadd.f32 %v3556_v11, %v20334_v52  ;;  %v20538_v47 = vadd.f32 %v3597_v17, %v20337_v2  ;;  %5004 = vmatpush1.bf16.msra.mxu1 %v20524_v57  ;;  %5045 = vmatpush1.bf16.msra.mxu0 %v20526_v34  ;;  %v20550_v52 = vld [vmem:[#allocation8 + $0xb7c] ss:$24 sps:$4 sm:$0xff]   ;;  %v20651_v17 = vld [vmem:[#allocation8 + $0xbb0] ss:$24 sps:$4 sm:$0xff]  }
 0x51a   :  { %v3558_v44 = vpop.f32.mrf.mxu1  ;;  %v3599_v7 = vpop.f32.mrf.mxu0  ;;  %5005 = vmatprep.subr.bf16.mxu1 %v20530_v0  ;;  %5046 = vmatprep.subr.bf16.mxu0 %v20532_v19 }
 0x51b   :  { %v20553_v2 = vadd.f32 %v3558_v44, %v20352_v49  ;;  %v20556_v48 = vadd.f32 %v3599_v7, %v20355_v8  ;;  %5035 = vmatprep.mubr.bf16.mxu1 %v24500_v40  ;;  %5076 = vmatprep.mubr.bf16.mxu0 %v24500_v40  ;;  %v20568_v8 = vld [vmem:[#allocation8 + $0xb44] ss:$24 sps:$4 sm:$0xff]  }
 0x51c   :  { %v3560_v9 = vpop.f32.mrf.mxu1  ;;  %v3601_v31 = vpop.f32.mrf.mxu0  ;;  %v20655_v7 = vld [vmem:[#allocation8 + $0xb84] ss:$24 sps:$4 sm:$0xff]  }
 0x51d   :  { %5006 = vmatpush1.bf16.msra.mxu1 %v20542_v1  ;;  %5047 = vmatpush1.bf16.msra.mxu0 %v20544_v37  ;;  %v20667_v31 = vld [vmem:[#allocation8 + $0xb80] ss:$24 sps:$4 sm:$0xff]  }
 0x51e   :  { %v3561_v59 = vpop.f32.mrf.mxu1  ;;  %v3602_v49 = vpop.f32.mrf.mxu0  ;;  %5007 = vmatprep.subr.bf16.mxu1 %v20548_v26  ;;  %5048 = vmatprep.subr.bf16.mxu0 %v20550_v52 }
 0x51f   :  { %v17426_v49 = vld [vmem:[#allocation8 + $0xb24] ss:$24 sps:$4 sm:$0xff]  }
 0x521   :  { %5008 = vmatpush1.bf16.msra.mxu1 %v20562_v30  ;;  %5049 = vmatpush1.bf16.msra.mxu0 %v20564_v51 }
 0x522   :  { %5009 = vmatprep.subr.bf16.mxu1 %v20568_v8  ;;  %5050 = vmatprep.subr.bf16.mxu0 %v20570_v25 }
 0x525   :  { %5010 = vmatpush1.bf16.msra.mxu1 %v20574_v58  ;;  %5051 = vmatpush1.bf16.msra.mxu0 %v20576_v29 }
 0x526   :  { %5011 = vmatprep.subr.bf16.mxu1 %v20580_v50  ;;  %5052 = vmatprep.subr.bf16.mxu0 %v20582_v3 }
 0x529   :  { %5012 = vmatpush1.bf16.msra.mxu1 %v20586_v12  ;;  %5053 = vmatpush1.bf16.msra.mxu0 %v20588_v6 }
 0x52a   :  { %5013 = vmatprep.subr.bf16.mxu1 %v20592_v56  ;;  %5054 = vmatprep.subr.bf16.mxu0 %v20594_v13 }
 0x52d   :  { %5014 = vmatpush1.bf16.msra.mxu1 %v20598_v16  ;;  %5055 = vmatpush1.bf16.msra.mxu0 %v20600_v41 }
 0x52e   :  { %5015 = vmatprep.subr.bf16.mxu1 %v20604_v46  ;;  %5056 = vmatprep.subr.bf16.mxu0 %v20606_v15 }
 0x531   :  { %5016 = vmatpush1.bf16.msra.mxu1 %v20610_v24  ;;  %5057 = vmatpush1.bf16.msra.mxu0 %v20612_v4 }
 0x532   :  { %5017 = vmatprep.subr.bf16.mxu1 %v20616_v28  ;;  %5058 = vmatprep.subr.bf16.mxu0 %v20618_v33 }
 0x535   :  { %5018 = vmatpush1.bf16.msra.mxu1 %v20622_v32  ;;  %5059 = vmatpush1.bf16.msra.mxu0 %v20624_v45 }
 0x536   :  { %5085 = vmatprep.subr.bf16.mxu1 %v20628_v43  ;;  %5134 = vmatprep.subr.bf16.mxu0 %v20519_v63 }
 0x538   :  { %v3935_v60 = vpop.f32.mrf.mxu1  ;;  %v3976_v20 = vpop.f32.mrf.mxu0  ;;  %5036 = vmatmul.mubr.bf16.vlgmr.msra.gmra.mxu1 %v20635_v21  ;;  %5077 = vmatmul.mubr.bf16.vlgmr.msra.gmra.mxu0 %v20635_v21 }
 0x539   :  { %v20644_v18 = vadd.f32 %v3935_v60, %v20443_v55  ;;  %v20647_v11 = vadd.f32 %v3976_v20, %v20446_v42  ;;  %5086 = vmatpush1.bf16.msra.mxu1 %v20632_v53  ;;  %5135 = vmatpush1.bf16.msra.mxu0 %v20524_v57  ;;  %v17429_v60 = vld [vmem:[#allocation8 + $0xaf4] ss:$24 sps:$4 sm:$0xff]   ;;  %v20763_v20 = vld [vmem:[#allocation8 + $0xcf0] ss:$24 sps:$4 sm:$0xff]  }
 0x53a   :  { %v3937_v63 = vpop.f32.mrf.mxu1  ;;  %v3978_v44 = vpop.f32.mrf.mxu0  ;;  %5087 = vmatprep.subr.bf16.mxu1 %v20639_v54  ;;  %5136 = vmatprep.subr.bf16.mxu0 %v20530_v0 }
 0x53b   :  { %v20658_v55 = vadd.f32 %v3937_v63, %v20457_v61  ;;  %v20661_v42 = vadd.f32 %v3978_v44, %v20460_v62  ;;  %5117 = vmatprep.mubr.bf16.mxu1 %v24500_v40  ;;  %5166 = vmatprep.mubr.bf16.mxu0 %v24500_v40  ;;  %v17423_v61 = vld [vmem:[#allocation8 + $0xb54] ss:$24 sps:$4 sm:$0xff]   ;;  %v17421_v62 = vld [vmem:[#allocation8 + $0xb50] ss:$24 sps:$4 sm:$0xff]  }
 0x53c   :  { %v3939_v57 = vpop.f32.mrf.mxu1  ;;  %v3980_v9 = vpop.f32.mrf.mxu0  ;;  %v20771_v44 = vld [vmem:[#allocation8 + $0xccc] ss:$24 sps:$4 sm:$0xff]  }
 0x53d   :  { %5088 = vmatpush1.bf16.msra.mxu1 %v20651_v17  ;;  %5137 = vmatpush1.bf16.msra.mxu0 %v20542_v1  ;;  %v17424_v1 = vld [vmem:[#allocation8 + $0xb20] ss:$24 sps:$4 sm:$0xff]   ;;  %v20781_v9 = vld [vmem:[#allocation8 + $0xc94] ss:$24 sps:$4 sm:$0xff]  }
 0x53e   :  { %v3940_v0 = vpop.f32.mrf.mxu1  ;;  %v3981_v59 = vpop.f32.mrf.mxu0  ;;  %5089 = vmatprep.subr.bf16.mxu1 %v20655_v7  ;;  %5138 = vmatprep.subr.bf16.mxu0 %v20548_v26  ;;  %v17427_v26 = vld [vmem:[#allocation8 + $0xaf0] ss:$24 sps:$4 sm:$0xff]  }
 0x53f   :  { %v20777_v57 = vld [vmem:[#allocation8 + $0xcc8] ss:$24 sps:$4 sm:$0xff]   ;;  %v20789_v59 = vld [vmem:[#allocation8 + $0xc98] ss:$24 sps:$4 sm:$0xff]  }
 0x540   :  { %v20787_v0 = vld [vmem:[#allocation8 + $0xc90] ss:$24 sps:$4 sm:$0xff]  }
 0x541   :  { %5090 = vmatpush1.bf16.msra.mxu1 %v20667_v31  ;;  %5139 = vmatpush1.bf16.msra.mxu0 %v20562_v30  ;;  %v17432_v30 = vld [vmem:[#allocation8 + $0xac4] ss:$24 sps:$4 sm:$0xff]  }
 0x542   :  { %5091 = vmatprep.subr.bf16.mxu1 %v17423_v61  ;;  %5140 = vmatprep.subr.bf16.mxu0 %v20568_v8  ;;  %v17430_v8 = vld [vmem:[#allocation8 + $0xac0] ss:$24 sps:$4 sm:$0xff]  }
 0x545   :  { %5092 = vmatpush1.bf16.msra.mxu1 %v17421_v62  ;;  %5141 = vmatpush1.bf16.msra.mxu0 %v20574_v58  ;;  %v17435_v58 = vld [vmem:[#allocation8 + $0xa94] ss:$24 sps:$4 sm:$0xff]  }
 0x546   :  { %5093 = vmatprep.subr.bf16.mxu1 %v17426_v49  ;;  %5142 = vmatprep.subr.bf16.mxu0 %v20580_v50  ;;  %v17433_v50 = vld [vmem:[#allocation8 + $0xa90] ss:$24 sps:$4 sm:$0xff]  }
 0x549   :  { %5094 = vmatpush1.bf16.msra.mxu1 %v17424_v1  ;;  %5143 = vmatpush1.bf16.msra.mxu0 %v20586_v12  ;;  %v5132_v12 = vrot.slane %v19524_v39, 3 }
 0x54a   :  { %5095 = vmatprep.subr.bf16.mxu1 %v17429_v60  ;;  %5144 = vmatprep.subr.bf16.mxu0 %v20592_v56 }
 0x54d   :  { %5096 = vmatpush1.bf16.msra.mxu1 %v17427_v26  ;;  %5145 = vmatpush1.bf16.msra.mxu0 %v20598_v16 }
 0x54e   :  { %5097 = vmatprep.subr.bf16.mxu1 %v17432_v30  ;;  %5146 = vmatprep.subr.bf16.mxu0 %v20604_v46 }
 0x551   :  { %5098 = vmatpush1.bf16.msra.mxu1 %v17430_v8  ;;  %5147 = vmatpush1.bf16.msra.mxu0 %v20610_v24 }
 0x552   :  { %5099 = vmatprep.subr.bf16.mxu1 %v17435_v58  ;;  %5148 = vmatprep.subr.bf16.mxu0 %v20616_v28 }
 0x555   :  { %5100 = vmatpush1.bf16.msra.mxu1 %v17433_v50  ;;  %5149 = vmatpush1.bf16.msra.mxu0 %v20622_v32 }
 0x556   :  { %5175 = vmatprep.subr.bf16.mxu1 %v20521_v23  ;;  %5216 = vmatprep.subr.bf16.mxu0 %v20628_v43 }
 0x558   :  { %v4017_v56 = vpop.f32.mrf.mxu1  ;;  %v4066_v16 = vpop.f32.mrf.mxu0  ;;  %5118 = vmatmul.mubr.bf16.vlgmr.msra.gmra.mxu1 %v20635_v21  ;;  %5167 = vmatmul.mubr.bf16.vlgmr.msra.gmra.mxu0 %v5132_v12 }
 0x559   :  { %v20688_v46 = vadd.f32 %v4017_v56, %v20487_v27  ;;  %v20691_v24 = vadd.f32 %v4066_v16, %v20490_v35  ;;  %5176 = vmatpush1.bf16.msra.mxu1 %v20526_v34  ;;  %5217 = vmatpush1.bf16.msra.mxu0 %v20632_v53  ;;  %v20825_v56 = vld [vmem:[#allocation8 + $0xc08] ss:$24 sps:$4 sm:$0xff]   ;;  %v20829_v16 = vld [vmem:[#allocation8 + $0xd64] ss:$24 sps:$4 sm:$0xff]  }
 0x55a   :  { %v4019_v28 = vpop.f32.mrf.mxu1  ;;  %v4068_v32 = vpop.f32.mrf.mxu0  ;;  %5177 = vmatprep.subr.bf16.mxu1 %v20532_v19  ;;  %5218 = vmatprep.subr.bf16.mxu0 %v20639_v54 }
 0x55b   :  { %v20698_v23 = vadd.f32 %v4019_v28, %v20497_v22  ;;  %v20701_v43 = vadd.f32 %v4068_v32, %v20500_v10  ;;  %5207 = vmatprep.mubr.bf16.mxu1 %v24500_v40  ;;  %5248 = vmatprep.mubr.bf16.mxu0 %v24500_v40  ;;  %v20720_v22 = vld [vmem:[#allocation8 + $0xd54] ss:$24 sps:$4 sm:$0xff]   ;;  %v20833_v28 = vld [vmem:[#allocation8 + $0xd60] ss:$24 sps:$4 sm:$0xff]   ;;  %v20836_v32 = vrot.slane %v19237_v14, 4 }
 0x55c   :  { %v4021_v27 = vpop.f32.mrf.mxu1  ;;  %v4070_v35 = vpop.f32.mrf.mxu0  ;;  %v20722_v10 = vld [vmem:[#allocation8 + $0xd5c] ss:$24 sps:$4 sm:$0xff]  }
 0x55d   :  { %5178 = vmatpush1.bf16.msra.mxu1 %v20544_v37  ;;  %5219 = vmatpush1.bf16.msra.mxu0 %v20651_v17  ;;  %v20725_v37 = vld [vmem:[#allocation8 + $0xd50] ss:$24 sps:$4 sm:$0xff]   ;;  %v20840_v27 = vld [vmem:[#allocation8 + $0xd34] ss:$24 sps:$4 sm:$0xff]  }
 0x55e   :  { %v4022_v34 = vpop.f32.mrf.mxu1  ;;  %v4071_v19 = vpop.f32.mrf.mxu0  ;;  %5179 = vmatprep.subr.bf16.mxu1 %v20550_v52  ;;  %5220 = vmatprep.subr.bf16.mxu0 %v20655_v7  ;;  %v20727_v52 = vld [vmem:[#allocation8 + $0xd58] ss:$24 sps:$4 sm:$0xff]  }
 0x55f   :  { %v20765_v17 = vld [vmem:[#allocation8 + $0xcf8] ss:$24 sps:$4 sm:$0xff]  }
 0x560   :  { %v20775_v7 = vld [vmem:[#allocation8 + $0xcc0] ss:$24 sps:$4 sm:$0xff]  }
 0x561   :  { %5180 = vmatpush1.bf16.msra.mxu1 %v20564_v51  ;;  %5221 = vmatpush1.bf16.msra.mxu0 %v20667_v31  ;;  %v20731_v51 = vld [vmem:[#allocation8 + $0xd24] ss:$24 sps:$4 sm:$0xff]  }
 0x562   :  { %5181 = vmatprep.subr.bf16.mxu1 %v20570_v25  ;;  %5222 = vmatprep.subr.bf16.mxu0 %v17423_v61  ;;  %v20733_v25 = vld [vmem:[#allocation8 + $0xd2c] ss:$24 sps:$4 sm:$0xff]   ;;  %v20783_v31 = vld [vmem:[#allocation8 + $0xc9c] ss:$24 sps:$4 sm:$0xff]  }
 0x563   :  { %v20793_v61 = vld [vmem:[#allocation8 + $0xc64] ss:$24 sps:$4 sm:$0xff]  }
 0x565   :  { %5182 = vmatpush1.bf16.msra.mxu1 %v20576_v29  ;;  %5223 = vmatpush1.bf16.msra.mxu0 %v17421_v62  ;;  %v20795_v62 = vld [vmem:[#allocation8 + $0xc6c] ss:$24 sps:$4 sm:$0xff]  }
 0x566   :  { %5183 = vmatprep.subr.bf16.mxu1 %v20582_v3  ;;  %5224 = vmatprep.subr.bf16.mxu0 %v17426_v49  ;;  %v20799_v49 = vld [vmem:[#allocation8 + $0xc60] ss:$24 sps:$4 sm:$0xff]  }
 0x569   :  { %5184 = vmatpush1.bf16.msra.mxu1 %v20588_v6  ;;  %5225 = vmatpush1.bf16.msra.mxu0 %v17424_v1  ;;  %v20801_v1 = vld [vmem:[#allocation8 + $0xc68] ss:$24 sps:$4 sm:$0xff]  }
 0x56a   :  { %5185 = vmatprep.subr.bf16.mxu1 %v20594_v13  ;;  %5226 = vmatprep.subr.bf16.mxu0 %v17429_v60  ;;  %v20805_v60 = vld [vmem:[#allocation8 + $0xc34] ss:$24 sps:$4 sm:$0xff]  }
 0x56d   :  { %5186 = vmatpush1.bf16.msra.mxu1 %v20600_v41  ;;  %5227 = vmatpush1.bf16.msra.mxu0 %v17427_v26  ;;  %v20743_v41 = vld [vmem:[#allocation8 + $0xd20] ss:$24 sps:$4 sm:$0xff]   ;;  %v20807_v26 = vld [vmem:[#allocation8 + $0xc3c] ss:$24 sps:$4 sm:$0xff]  }
 0x56e   :  { %5187 = vmatprep.subr.bf16.mxu1 %v20606_v15  ;;  %5228 = vmatprep.subr.bf16.mxu0 %v17432_v30  ;;  %v20745_v15 = vld [vmem:[#allocation8 + $0xd28] ss:$24 sps:$4 sm:$0xff]  }
 0x56f   :  { %v20811_v30 = vld [vmem:[#allocation8 + $0xc30] ss:$24 sps:$4 sm:$0xff]  }
 0x571   :  { %5188 = vmatpush1.bf16.msra.mxu1 %v20612_v4  ;;  %5229 = vmatpush1.bf16.msra.mxu0 %v17430_v8  ;;  %v20813_v8 = vld [vmem:[#allocation8 + $0xc38] ss:$24 sps:$4 sm:$0xff]  }
 0x572   :  { %5189 = vmatprep.subr.bf16.mxu1 %v20618_v33  ;;  %5230 = vmatprep.subr.bf16.mxu0 %v17435_v58  ;;  %v20817_v58 = vld [vmem:[#allocation8 + $0xc04] ss:$24 sps:$4 sm:$0xff]  }
 0x575   :  { %5190 = vmatpush1.bf16.msra.mxu1 %v20624_v45  ;;  %5231 = vmatpush1.bf16.msra.mxu0 %v17433_v50  ;;  %v20749_v45 = vld [vmem:[#allocation8 + $0xcf4] ss:$24 sps:$4 sm:$0xff]  }
 0x576   :  { %5554 = vmatprep.subr.bf16.mxu1 %v20720_v22  ;;  %5595 = vmatprep.subr.bf16.mxu0 %v20722_v10  ;;  %v20819_v50 = vld [vmem:[#allocation8 + $0xc0c] ss:$24 sps:$4 sm:$0xff]  }
 0x578   :  { %v4107_v29 = vpop.f32.mrf.mxu1  ;;  %v4148_v3 = vpop.f32.mrf.mxu0  ;;  %5208 = vmatmul.mubr.bf16.vlgmr.msra.gmra.mxu1 %v5132_v12  ;;  %5249 = vmatmul.mubr.bf16.vlgmr.msra.gmra.mxu0 %v5132_v12  ;;  %v20823_v12 = vld [vmem:[#allocation8 + $0xc00] ss:$24 sps:$4 sm:$0xff]  }
 0x579   :  { %v20736_v6 = vadd.f32 %v4107_v29, %v20535_v38  ;;  %v20739_v13 = vadd.f32 %v4148_v3, %v20538_v47  ;;  %5555 = vmatpush1.bf16.msra.mxu1 %v20725_v37  ;;  %5596 = vmatpush1.bf16.msra.mxu0 %v20727_v52  ;;  %v20751_v38 = vld [vmem:[#allocation8 + $0xcfc] ss:$24 sps:$4 sm:$0xff]   ;;  %v20852_v3 = vld [vmem:[#allocation8 + $0xd30] ss:$24 sps:$4 sm:$0xff]  }
 0x57a   :  { %v4109_v4 = vpop.f32.mrf.mxu1  ;;  %v4150_v33 = vpop.f32.mrf.mxu0  ;;  %5556 = vmatprep.subr.bf16.mxu1 %v20731_v51  ;;  %5597 = vmatprep.subr.bf16.mxu0 %v20733_v25 }
 0x57b   :  { %v20754_v47 = vadd.f32 %v4109_v4, %v20553_v2  ;;  %v20757_v53 = vadd.f32 %v4150_v33, %v20556_v48  ;;  %5586 = vmatprep.mubr.bf16.mxu1 %v24500_v40  ;;  %5627 = vmatprep.mubr.bf16.mxu0 %v24500_v40  ;;  %v20769_v48 = vld [vmem:[#allocation8 + $0xcc4] ss:$24 sps:$4 sm:$0xff]  }
 0x57c   :  { %v4111_v21 = vpop.f32.mrf.mxu1  ;;  %v4152_v54 = vpop.f32.mrf.mxu0  ;;  %v20856_v33 = vld [vmem:[#allocation8 + $0xd04] ss:$24 sps:$4 sm:$0xff]  }
 0x57d   :  { %5557 = vmatpush1.bf16.msra.mxu1 %v20743_v41  ;;  %5598 = vmatpush1.bf16.msra.mxu0 %v20745_v15  ;;  %v20868_v54 = vld [vmem:[#allocation8 + $0xd00] ss:$24 sps:$4 sm:$0xff]  }
 0x57e   :  { %v4112_v63 = vpop.f32.mrf.mxu1  ;;  %v4153_v2 = vpop.f32.mrf.mxu0  ;;  %5558 = vmatprep.subr.bf16.mxu1 %v20749_v45  ;;  %5599 = vmatprep.subr.bf16.mxu0 %v20751_v38 }
 0x57f   :  { %v17498_v2 = vld [vmem:[#allocation8 + $0xca4] ss:$24 sps:$4 sm:$0xff]  }
 0x581   :  { %5559 = vmatpush1.bf16.msra.mxu1 %v20763_v20  ;;  %5600 = vmatpush1.bf16.msra.mxu0 %v20765_v17 }
 0x582   :  { %5560 = vmatprep.subr.bf16.mxu1 %v20769_v48  ;;  %5601 = vmatprep.subr.bf16.mxu0 %v20771_v44 }
 0x585   :  { %5561 = vmatpush1.bf16.msra.mxu1 %v20775_v7  ;;  %5602 = vmatpush1.bf16.msra.mxu0 %v20777_v57 }
 0x586   :  { %5562 = vmatprep.subr.bf16.mxu1 %v20781_v9  ;;  %5603 = vmatprep.subr.bf16.mxu0 %v20783_v31 }
 0x589   :  { %5563 = vmatpush1.bf16.msra.mxu1 %v20787_v0  ;;  %5604 = vmatpush1.bf16.msra.mxu0 %v20789_v59 }
 0x58a   :  { %5564 = vmatprep.subr.bf16.mxu1 %v20793_v61  ;;  %5605 = vmatprep.subr.bf16.mxu0 %v20795_v62 }
 0x58d   :  { %5565 = vmatpush1.bf16.msra.mxu1 %v20799_v49  ;;  %5606 = vmatpush1.bf16.msra.mxu0 %v20801_v1 }
 0x58e   :  { %5566 = vmatprep.subr.bf16.mxu1 %v20805_v60  ;;  %5607 = vmatprep.subr.bf16.mxu0 %v20807_v26 }
 0x591   :  { %5567 = vmatpush1.bf16.msra.mxu1 %v20811_v30  ;;  %5608 = vmatpush1.bf16.msra.mxu0 %v20813_v8 }
 0x592   :  { %5568 = vmatprep.subr.bf16.mxu1 %v20817_v58  ;;  %5609 = vmatprep.subr.bf16.mxu0 %v20819_v50 }
 0x595   :  { %5569 = vmatpush1.bf16.msra.mxu1 %v20823_v12  ;;  %5610 = vmatpush1.bf16.msra.mxu0 %v20825_v56 }
 0x596   :  { %5636 = vmatprep.subr.bf16.mxu1 %v20829_v16  ;;  %5685 = vmatprep.subr.bf16.mxu0 %v20720_v22 }
 0x598   :  { %v4486_v35 = vpop.f32.mrf.mxu1  ;;  %v4527_v34 = vpop.f32.mrf.mxu0  ;;  %5587 = vmatmul.mubr.bf16.vlgmr.msra.gmra.mxu1 %v20836_v32  ;;  %5628 = vmatmul.mubr.bf16.vlgmr.msra.gmra.mxu0 %v20836_v32 }
 0x599   :  { %v20845_v19 = vadd.f32 %v4486_v35, %v20644_v18  ;;  %v20848_v29 = vadd.f32 %v4527_v34, %v20647_v11  ;;  %5637 = vmatpush1.bf16.msra.mxu1 %v20833_v28  ;;  %5686 = vmatpush1.bf16.msra.mxu0 %v20725_v37  ;;  %v17501_v35 = vld [vmem:[#allocation8 + $0xc74] ss:$24 sps:$4 sm:$0xff]   ;;  %v20964_v34 = vld [vmem:[#allocation8 + $0xe70] ss:$24 sps:$4 sm:$0xff]  }
 0x59a   :  { %v4488_v22 = vpop.f32.mrf.mxu1  ;;  %v4529_v4 = vpop.f32.mrf.mxu0  ;;  %5638 = vmatprep.subr.bf16.mxu1 %v20840_v27  ;;  %5687 = vmatprep.subr.bf16.mxu0 %v20731_v51 }
 0x59b   :  { %v20859_v18 = vadd.f32 %v4488_v22, %v20658_v55  ;;  %v20862_v11 = vadd.f32 %v4529_v4, %v20661_v42  ;;  %5668 = vmatprep.mubr.bf16.mxu1 %v24500_v40  ;;  %5717 = vmatprep.mubr.bf16.mxu0 %v24500_v40  ;;  %v17495_v55 = vld [vmem:[#allocation8 + $0xcd4] ss:$24 sps:$4 sm:$0xff]   ;;  %v17493_v42 = vld [vmem:[#allocation8 + $0xcd0] ss:$24 sps:$4 sm:$0xff]  }
 0x59c   :  { %v4490_v37 = vpop.f32.mrf.mxu1  ;;  %v4531_v21 = vpop.f32.mrf.mxu0  ;;  %v20972_v4 = vld [vmem:[#allocation8 + $0xe4c] ss:$24 sps:$4 sm:$0xff]  }
 0x59d   :  { %5639 = vmatpush1.bf16.msra.mxu1 %v20852_v3  ;;  %5688 = vmatpush1.bf16.msra.mxu0 %v20743_v41  ;;  %v17496_v41 = vld [vmem:[#allocation8 + $0xca0] ss:$24 sps:$4 sm:$0xff]   ;;  %v20982_v21 = vld [vmem:[#allocation8 + $0xe14] ss:$24 sps:$4 sm:$0xff]  }
 0x59e   :  { %v4491_v51 = vpop.f32.mrf.mxu1  ;;  %v4532_v63 = vpop.f32.mrf.mxu0  ;;  %5640 = vmatprep.subr.bf16.mxu1 %v20856_v33  ;;  %5689 = vmatprep.subr.bf16.mxu0 %v20749_v45  ;;  %v17499_v45 = vld [vmem:[#allocation8 + $0xc70] ss:$24 sps:$4 sm:$0xff]  }
 0x59f   :  { %v20978_v37 = vld [vmem:[#allocation8 + $0xe48] ss:$24 sps:$4 sm:$0xff]   ;;  %v20990_v63 = vld [vmem:[#allocation8 + $0xe18] ss:$24 sps:$4 sm:$0xff]  }
 0x5a0   :  { %v20988_v51 = vld [vmem:[#allocation8 + $0xe10] ss:$24 sps:$4 sm:$0xff]  }
 0x5a1   :  { %5641 = vmatpush1.bf16.msra.mxu1 %v20868_v54  ;;  %5690 = vmatpush1.bf16.msra.mxu0 %v20763_v20  ;;  %v17504_v20 = vld [vmem:[#allocation8 + $0xc44] ss:$24 sps:$4 sm:$0xff]  }
 0x5a2   :  { %5642 = vmatprep.subr.bf16.mxu1 %v17495_v55  ;;  %5691 = vmatprep.subr.bf16.mxu0 %v20769_v48  ;;  %v17502_v48 = vld [vmem:[#allocation8 + $0xc40] ss:$24 sps:$4 sm:$0xff]  }
 0x5a5   :  { %5643 = vmatpush1.bf16.msra.mxu1 %v17493_v42  ;;  %5692 = vmatpush1.bf16.msra.mxu0 %v20775_v7  ;;  %v17507_v7 = vld [vmem:[#allocation8 + $0xc14] ss:$24 sps:$4 sm:$0xff]  }
 0x5a6   :  { %5644 = vmatprep.subr.bf16.mxu1 %v17498_v2  ;;  %5693 = vmatprep.subr.bf16.mxu0 %v20781_v9  ;;  %v17505_v9 = vld [vmem:[#allocation8 + $0xc10] ss:$24 sps:$4 sm:$0xff]  }
 0x5a9   :  { %5645 = vmatpush1.bf16.msra.mxu1 %v17496_v41  ;;  %5694 = vmatpush1.bf16.msra.mxu0 %v20787_v0  ;;  %v5683_v0 = vrot.slane %v19521_v36, 4 }
 0x5aa   :  { %5646 = vmatprep.subr.bf16.mxu1 %v17501_v35  ;;  %5695 = vmatprep.subr.bf16.mxu0 %v20793_v61 }
 0x5ad   :  { %5647 = vmatpush1.bf16.msra.mxu1 %v17499_v45  ;;  %5696 = vmatpush1.bf16.msra.mxu0 %v20799_v49 }
 0x5ae   :  { %5648 = vmatprep.subr.bf16.mxu1 %v17504_v20  ;;  %5697 = vmatprep.subr.bf16.mxu0 %v20805_v60 }
 0x5b1   :  { %5649 = vmatpush1.bf16.msra.mxu1 %v17502_v48  ;;  %5698 = vmatpush1.bf16.msra.mxu0 %v20811_v30 }
 0x5b2   :  { %5650 = vmatprep.subr.bf16.mxu1 %v17507_v7  ;;  %5699 = vmatprep.subr.bf16.mxu0 %v20817_v58 }
 0x5b5   :  { %5651 = vmatpush1.bf16.msra.mxu1 %v17505_v9  ;;  %5700 = vmatpush1.bf16.msra.mxu0 %v20823_v12 }
 0x5b6   :  { %5726 = vmatprep.subr.bf16.mxu1 %v20722_v10  ;;  %5767 = vmatprep.subr.bf16.mxu0 %v20829_v16 }
 0x5b8   :  { %v4568_v61 = vpop.f32.mrf.mxu1  ;;  %v4617_v49 = vpop.f32.mrf.mxu0  ;;  %5669 = vmatmul.mubr.bf16.vlgmr.msra.gmra.mxu1 %v20836_v32  ;;  %5718 = vmatmul.mubr.bf16.vlgmr.msra.gmra.mxu0 %v5683_v0 }
 0x5b9   :  { %v20889_v60 = vadd.f32 %v4568_v61, %v20688_v46  ;;  %v20892_v30 = vadd.f32 %v4617_v49, %v20691_v24  ;;  %5727 = vmatpush1.bf16.msra.mxu1 %v20727_v52  ;;  %5768 = vmatpush1.bf16.msra.mxu0 %v20833_v28  ;;  %v21026_v61 = vld [vmem:[#allocation8 + $0xd88] ss:$24 sps:$4 sm:$0xff]   ;;  %v21030_v49 = vld [vmem:[#allocation8 + $0xee4] ss:$24 sps:$4 sm:$0xff]  }
 0x5ba   :  { %v4570_v58 = vpop.f32.mrf.mxu1  ;;  %v4619_v12 = vpop.f32.mrf.mxu0  ;;  %5728 = vmatprep.subr.bf16.mxu1 %v20733_v25  ;;  %5769 = vmatprep.subr.bf16.mxu0 %v20840_v27 }
 0x5bb   :  { %v20899_v10 = vadd.f32 %v4570_v58, %v20698_v23  ;;  %v20902_v16 = vadd.f32 %v4619_v12, %v20701_v43  ;;  %5758 = vmatprep.mubr.bf16.mxu1 %v24500_v40  ;;  %5799 = vmatprep.mubr.bf16.mxu0 %v24500_v40  ;;  %v20921_v23 = vld [vmem:[#allocation8 + $0xed4] ss:$24 sps:$4 sm:$0xff]   ;;  %v21034_v58 = vld [vmem:[#allocation8 + $0xee0] ss:$24 sps:$4 sm:$0xff]   ;;  %v21037_v12 = vrot.slane %v24527_v5, 4 }
 0x5bc   :  { %v4572_v46 = vpop.f32.mrf.mxu1  ;;  %v4621_v24 = vpop.f32.mrf.mxu0  ;;  %v20923_v43 = vld [vmem:[#allocation8 + $0xedc] ss:$24 sps:$4 sm:$0xff]  }
 0x5bd   :  { %5729 = vmatpush1.bf16.msra.mxu1 %v20745_v15  ;;  %5770 = vmatpush1.bf16.msra.mxu0 %v20852_v3  ;;  %v20926_v15 = vld [vmem:[#allocation8 + $0xed0] ss:$24 sps:$4 sm:$0xff]   ;;  %v21041_v46 = vld [vmem:[#allocation8 + $0xeb4] ss:$24 sps:$4 sm:$0xff]  }
 0x5be   :  { %v4573_v52 = vpop.f32.mrf.mxu1  ;;  %v4622_v25 = vpop.f32.mrf.mxu0  ;;  %5730 = vmatprep.subr.bf16.mxu1 %v20751_v38  ;;  %5771 = vmatprep.subr.bf16.mxu0 %v20856_v33  ;;  %v20928_v38 = vld [vmem:[#allocation8 + $0xed8] ss:$24 sps:$4 sm:$0xff]  }
 0x5bf   :  { %v20966_v3 = vld [vmem:[#allocation8 + $0xe78] ss:$24 sps:$4 sm:$0xff]  }
 0x5c0   :  { %v20976_v33 = vld [vmem:[#allocation8 + $0xe40] ss:$24 sps:$4 sm:$0xff]  }
 0x5c1   :  { %5731 = vmatpush1.bf16.msra.mxu1 %v20765_v17  ;;  %5772 = vmatpush1.bf16.msra.mxu0 %v20868_v54  ;;  %v20932_v17 = vld [vmem:[#allocation8 + $0xea4] ss:$24 sps:$4 sm:$0xff]  }
 0x5c2   :  { %5732 = vmatprep.subr.bf16.mxu1 %v20771_v44  ;;  %5773 = vmatprep.subr.bf16.mxu0 %v17495_v55  ;;  %v20934_v44 = vld [vmem:[#allocation8 + $0xeac] ss:$24 sps:$4 sm:$0xff]   ;;  %v20984_v54 = vld [vmem:[#allocation8 + $0xe1c] ss:$24 sps:$4 sm:$0xff]  }
 0x5c3   :  { %v20994_v55 = vld [vmem:[#allocation8 + $0xde4] ss:$24 sps:$4 sm:$0xff]  }
 0x5c5   :  { %5733 = vmatpush1.bf16.msra.mxu1 %v20777_v57  ;;  %5774 = vmatpush1.bf16.msra.mxu0 %v17493_v42  ;;  %v20996_v42 = vld [vmem:[#allocation8 + $0xdec] ss:$24 sps:$4 sm:$0xff]  }
 0x5c6   :  { %5734 = vmatprep.subr.bf16.mxu1 %v20783_v31  ;;  %5775 = vmatprep.subr.bf16.mxu0 %v17498_v2  ;;  %v21000_v2 = vld [vmem:[#allocation8 + $0xde0] ss:$24 sps:$4 sm:$0xff]  }
 0x5c9   :  { %5735 = vmatpush1.bf16.msra.mxu1 %v20789_v59  ;;  %5776 = vmatpush1.bf16.msra.mxu0 %v17496_v41  ;;  %v21002_v41 = vld [vmem:[#allocation8 + $0xde8] ss:$24 sps:$4 sm:$0xff]  }
 0x5ca   :  { %5736 = vmatprep.subr.bf16.mxu1 %v20795_v62  ;;  %5777 = vmatprep.subr.bf16.mxu0 %v17501_v35  ;;  %v21006_v35 = vld [vmem:[#allocation8 + $0xdb4] ss:$24 sps:$4 sm:$0xff]  }
 0x5cd   :  { %5737 = vmatpush1.bf16.msra.mxu1 %v20801_v1  ;;  %5778 = vmatpush1.bf16.msra.mxu0 %v17499_v45  ;;  %v20944_v1 = vld [vmem:[#allocation8 + $0xea0] ss:$24 sps:$4 sm:$0xff]   ;;  %v21008_v45 = vld [vmem:[#allocation8 + $0xdbc] ss:$24 sps:$4 sm:$0xff]  }
 0x5ce   :  { %5738 = vmatprep.subr.bf16.mxu1 %v20807_v26  ;;  %5779 = vmatprep.subr.bf16.mxu0 %v17504_v20  ;;  %v20946_v26 = vld [vmem:[#allocation8 + $0xea8] ss:$24 sps:$4 sm:$0xff]  }
 0x5cf   :  { %v21012_v20 = vld [vmem:[#allocation8 + $0xdb0] ss:$24 sps:$4 sm:$0xff]  }
 0x5d1   :  { %5739 = vmatpush1.bf16.msra.mxu1 %v20813_v8  ;;  %5780 = vmatpush1.bf16.msra.mxu0 %v17502_v48  ;;  %v21014_v48 = vld [vmem:[#allocation8 + $0xdb8] ss:$24 sps:$4 sm:$0xff]  }
 0x5d2   :  { %5740 = vmatprep.subr.bf16.mxu1 %v20819_v50  ;;  %5781 = vmatprep.subr.bf16.mxu0 %v17507_v7  ;;  %v21018_v7 = vld [vmem:[#allocation8 + $0xd84] ss:$24 sps:$4 sm:$0xff]  }
 0x5d5   :  { %5741 = vmatpush1.bf16.msra.mxu1 %v20825_v56  ;;  %5782 = vmatpush1.bf16.msra.mxu0 %v17505_v9  ;;  %v20950_v56 = vld [vmem:[#allocation8 + $0xe74] ss:$24 sps:$4 sm:$0xff]  }
 0x5d6   :  { %6105 = vmatprep.subr.bf16.mxu1 %v20921_v23  ;;  %6146 = vmatprep.subr.bf16.mxu0 %v20923_v43  ;;  %v21020_v9 = vld [vmem:[#allocation8 + $0xd8c] ss:$24 sps:$4 sm:$0xff]  }
 0x5d8   :  { %v4658_v57 = vpop.f32.mrf.mxu1  ;;  %v4699_v31 = vpop.f32.mrf.mxu0  ;;  %5759 = vmatmul.mubr.bf16.vlgmr.msra.gmra.mxu1 %v5683_v0  ;;  %5800 = vmatmul.mubr.bf16.vlgmr.msra.gmra.mxu0 %v5683_v0  ;;  %v21024_v0 = vld [vmem:[#allocation8 + $0xd80] ss:$24 sps:$4 sm:$0xff]  }
 0x5d9   :  { %v20937_v59 = vadd.f32 %v4658_v57, %v20736_v6  ;;  %v20940_v62 = vadd.f32 %v4699_v31, %v20739_v13  ;;  %6106 = vmatpush1.bf16.msra.mxu1 %v20926_v15  ;;  %6147 = vmatpush1.bf16.msra.mxu0 %v20928_v38  ;;  %v20952_v6 = vld [vmem:[#allocation8 + $0xe7c] ss:$24 sps:$4 sm:$0xff]   ;;  %v21053_v31 = vld [vmem:[#allocation8 + $0xeb0] ss:$24 sps:$4 sm:$0xff]  }
 0x5da   :  { %v4660_v8 = vpop.f32.mrf.mxu1  ;;  %v4701_v50 = vpop.f32.mrf.mxu0  ;;  %6107 = vmatprep.subr.bf16.mxu1 %v20932_v17  ;;  %6148 = vmatprep.subr.bf16.mxu0 %v20934_v44 }
 0x5db   :  { %v20955_v13 = vadd.f32 %v4660_v8, %v20754_v47  ;;  %v20958_v28 = vadd.f32 %v4701_v50, %v20757_v53  ;;  %6137 = vmatprep.mubr.bf16.mxu1 %v24500_v40  ;;  %6178 = vmatprep.mubr.bf16.mxu0 %v24500_v40  ;;  %v20970_v53 = vld [vmem:[#allocation8 + $0xe44] ss:$24 sps:$4 sm:$0xff]  }
 0x5dc   :  { %v4662_v32 = vpop.f32.mrf.mxu1  ;;  %v4703_v27 = vpop.f32.mrf.mxu0  ;;  %v21057_v50 = vld [vmem:[#allocation8 + $0xe84] ss:$24 sps:$4 sm:$0xff]  }
 0x5dd   :  { %6108 = vmatpush1.bf16.msra.mxu1 %v20944_v1  ;;  %6149 = vmatpush1.bf16.msra.mxu0 %v20946_v26  ;;  %v21069_v27 = vld [vmem:[#allocation8 + $0xe80] ss:$24 sps:$4 sm:$0xff]  }
 0x5de   :  { %v4663_v22 = vpop.f32.mrf.mxu1  ;;  %v4704_v47 = vpop.f32.mrf.mxu0  ;;  %6109 = vmatprep.subr.bf16.mxu1 %v20950_v56  ;;  %6150 = vmatprep.subr.bf16.mxu0 %v20952_v6 }
 0x5df   :  { %v17570_v47 = vld [vmem:[#allocation8 + $0xe24] ss:$24 sps:$4 sm:$0xff]  }
 0x5e1   :  { %6110 = vmatpush1.bf16.msra.mxu1 %v20964_v34  ;;  %6151 = vmatpush1.bf16.msra.mxu0 %v20966_v3 }
 0x5e2   :  { %6111 = vmatprep.subr.bf16.mxu1 %v20970_v53  ;;  %6152 = vmatprep.subr.bf16.mxu0 %v20972_v4 }
 0x5e5   :  { %6112 = vmatpush1.bf16.msra.mxu1 %v20976_v33  ;;  %6153 = vmatpush1.bf16.msra.mxu0 %v20978_v37 }
 0x5e6   :  { %6113 = vmatprep.subr.bf16.mxu1 %v20982_v21  ;;  %6154 = vmatprep.subr.bf16.mxu0 %v20984_v54 }
 0x5e9   :  { %6114 = vmatpush1.bf16.msra.mxu1 %v20988_v51  ;;  %6155 = vmatpush1.bf16.msra.mxu0 %v20990_v63 }
 0x5ea   :  { %6115 = vmatprep.subr.bf16.mxu1 %v20994_v55  ;;  %6156 = vmatprep.subr.bf16.mxu0 %v20996_v42 }
 0x5ed   :  { %6116 = vmatpush1.bf16.msra.mxu1 %v21000_v2  ;;  %6157 = vmatpush1.bf16.msra.mxu0 %v21002_v41 }
 0x5ee   :  { %6117 = vmatprep.subr.bf16.mxu1 %v21006_v35  ;;  %6158 = vmatprep.subr.bf16.mxu0 %v21008_v45 }
 0x5f1   :  { %6118 = vmatpush1.bf16.msra.mxu1 %v21012_v20  ;;  %6159 = vmatpush1.bf16.msra.mxu0 %v21014_v48 }
 0x5f2   :  { %6119 = vmatprep.subr.bf16.mxu1 %v21018_v7  ;;  %6160 = vmatprep.subr.bf16.mxu0 %v21020_v9 }
 0x5f5   :  { %6120 = vmatpush1.bf16.msra.mxu1 %v21024_v0  ;;  %6161 = vmatpush1.bf16.msra.mxu0 %v21026_v61 }
 0x5f6   :  { %6187 = vmatprep.subr.bf16.mxu1 %v21030_v49  ;;  %6236 = vmatprep.subr.bf16.mxu0 %v20921_v23 }
 0x5f8   :  { %v5037_v24 = vpop.f32.mrf.mxu1  ;;  %v5078_v52 = vpop.f32.mrf.mxu0  ;;  %6138 = vmatmul.mubr.bf16.vlgmr.msra.gmra.mxu1 %v21037_v12  ;;  %6179 = vmatmul.mubr.bf16.vlgmr.msra.gmra.mxu0 %v21037_v12 }
 0x5f9   :  { %v21046_v25 = vadd.f32 %v5037_v24, %v20845_v19  ;;  %v21049_v57 = vadd.f32 %v5078_v52, %v20848_v29  ;;  %6188 = vmatpush1.bf16.msra.mxu1 %v21034_v58  ;;  %6237 = vmatpush1.bf16.msra.mxu0 %v20926_v15  ;;  %v17573_v24 = vld [vmem:[#allocation8 + $0xdf4] ss:$24 sps:$4 sm:$0xff]   ;;  %v21165_v52 = vld [vmem:[#allocation8 + $0xff0] ss:$24 sps:$4 sm:$0xff]  }
 0x5fa   :  { %v5039_v23 = vpop.f32.mrf.mxu1  ;;  %v5080_v8 = vpop.f32.mrf.mxu0  ;;  %6189 = vmatprep.subr.bf16.mxu1 %v21041_v46  ;;  %6238 = vmatprep.subr.bf16.mxu0 %v20932_v17 }
 0x5fb   :  { %v21060_v19 = vadd.f32 %v5039_v23, %v20859_v18  ;;  %v21063_v29 = vadd.f32 %v5080_v8, %v20862_v11  ;;  %6219 = vmatprep.mubr.bf16.mxu1 %v24500_v40  ;;  %6268 = vmatprep.mubr.bf16.mxu0 %v24500_v40  ;;  %v17567_v18 = vld [vmem:[#allocation8 + $0xe54] ss:$24 sps:$4 sm:$0xff]   ;;  %v17565_v11 = vld [vmem:[#allocation8 + $0xe50] ss:$24 sps:$4 sm:$0xff]  }
 0x5fc   :  { %v5041_v15 = vpop.f32.mrf.mxu1  ;;  %v5082_v32 = vpop.f32.mrf.mxu0  ;;  %v21173_v8 = vld [vmem:[#allocation8 + $0xfcc] ss:$24 sps:$4 sm:$0xff]  }
 0x5fd   :  { %6190 = vmatpush1.bf16.msra.mxu1 %v21053_v31  ;;  %6239 = vmatpush1.bf16.msra.mxu0 %v20944_v1  ;;  %v17568_v1 = vld [vmem:[#allocation8 + $0xe20] ss:$24 sps:$4 sm:$0xff]   ;;  %v21183_v32 = vld [vmem:[#allocation8 + $0xf94] ss:$24 sps:$4 sm:$0xff]  }
 0x5fe   :  { %v5042_v17 = vpop.f32.mrf.mxu1  ;;  %v5083_v22 = vpop.f32.mrf.mxu0  ;;  %6191 = vmatprep.subr.bf16.mxu1 %v21057_v50  ;;  %6240 = vmatprep.subr.bf16.mxu0 %v20950_v56  ;;  %v17571_v56 = vld [vmem:[#allocation8 + $0xdf0] ss:$24 sps:$4 sm:$0xff]  }
 0x5ff   :  { %v21179_v15 = vld [vmem:[#allocation8 + $0xfc8] ss:$24 sps:$4 sm:$0xff]   ;;  %v21191_v22 = vld [vmem:[#allocation8 + $0xf98] ss:$24 sps:$4 sm:$0xff]  }
 0x600   :  { %v21189_v17 = vld [vmem:[#allocation8 + $0xf90] ss:$24 sps:$4 sm:$0xff]  }
 0x601   :  { %6192 = vmatpush1.bf16.msra.mxu1 %v21069_v27  ;;  %6241 = vmatpush1.bf16.msra.mxu0 %v20964_v34  ;;  %v17576_v34 = vld [vmem:[#allocation8 + $0xdc4] ss:$24 sps:$4 sm:$0xff]  }
 0x602   :  { %6193 = vmatprep.subr.bf16.mxu1 %v17567_v18  ;;  %6242 = vmatprep.subr.bf16.mxu0 %v20970_v53  ;;  %v17574_v53 = vld [vmem:[#allocation8 + $0xdc0] ss:$24 sps:$4 sm:$0xff]  }
 0x605   :  { %6194 = vmatpush1.bf16.msra.mxu1 %v17565_v11  ;;  %6243 = vmatpush1.bf16.msra.mxu0 %v20976_v33  ;;  %v17579_v33 = vld [vmem:[#allocation8 + $0xd94] ss:$24 sps:$4 sm:$0xff]  }
 0x606   :  { %6195 = vmatprep.subr.bf16.mxu1 %v17570_v47  ;;  %6244 = vmatprep.subr.bf16.mxu0 %v20982_v21  ;;  %v17577_v21 = vld [vmem:[#allocation8 + $0xd90] ss:$24 sps:$4 sm:$0xff]  }
 0x609   :  { %6196 = vmatpush1.bf16.msra.mxu1 %v17568_v1  ;;  %6245 = vmatpush1.bf16.msra.mxu0 %v20988_v51  ;;  %v6234_v51 = vrot.slane %v19524_v39, 4 }
 0x60a   :  { %6197 = vmatprep.subr.bf16.mxu1 %v17573_v24  ;;  %6246 = vmatprep.subr.bf16.mxu0 %v20994_v55 }
 0x60d   :  { %6198 = vmatpush1.bf16.msra.mxu1 %v17571_v56  ;;  %6247 = vmatpush1.bf16.msra.mxu0 %v21000_v2 }
 0x60e   :  { %6199 = vmatprep.subr.bf16.mxu1 %v17576_v34  ;;  %6248 = vmatprep.subr.bf16.mxu0 %v21006_v35 }
 0x611   :  { %6200 = vmatpush1.bf16.msra.mxu1 %v17574_v53  ;;  %6249 = vmatpush1.bf16.msra.mxu0 %v21012_v20 }
 0x612   :  { %6201 = vmatprep.subr.bf16.mxu1 %v17579_v33  ;;  %6250 = vmatprep.subr.bf16.mxu0 %v21018_v7 }
 0x615   :  { %6202 = vmatpush1.bf16.msra.mxu1 %v17577_v21  ;;  %6251 = vmatpush1.bf16.msra.mxu0 %v21024_v0 }
 0x616   :  { %6277 = vmatprep.subr.bf16.mxu1 %v20923_v43  ;;  %6318 = vmatprep.subr.bf16.mxu0 %v21030_v49 }
 0x618   :  { %v5119_v55 = vpop.f32.mrf.mxu1  ;;  %v5168_v2 = vpop.f32.mrf.mxu0  ;;  %6220 = vmatmul.mubr.bf16.vlgmr.msra.gmra.mxu1 %v21037_v12  ;;  %6269 = vmatmul.mubr.bf16.vlgmr.msra.gmra.mxu0 %v6234_v51 }
 0x619   :  { %v21090_v35 = vadd.f32 %v5119_v55, %v20889_v60  ;;  %v21093_v20 = vadd.f32 %v5168_v2, %v20892_v30  ;;  %6278 = vmatpush1.bf16.msra.mxu1 %v20928_v38  ;;  %6319 = vmatpush1.bf16.msra.mxu0 %v21034_v58  ;;  %v21227_v55 = vld [vmem:[#allocation8 + $0xf08] ss:$24 sps:$4 sm:$0xff]   ;;  %v21231_v2 = vld [vmem:[#allocation8 + $0x1064] ss:$24 sps:$4 sm:$0xff]  }
 0x61a   :  { %v5121_v7 = vpop.f32.mrf.mxu1  ;;  %v5170_v0 = vpop.f32.mrf.mxu0  ;;  %6279 = vmatprep.subr.bf16.mxu1 %v20934_v44  ;;  %6320 = vmatprep.subr.bf16.mxu0 %v21041_v46 }
 0x61b   :  { %v21100_v43 = vadd.f32 %v5121_v7, %v20899_v10  ;;  %v21103_v49 = vadd.f32 %v5170_v0, %v20902_v16  ;;  %6309 = vmatprep.mubr.bf16.mxu1 %v24500_v40  ;;  %6350 = vmatprep.mubr.bf16.mxu0 %v24500_v40  ;;  %v21122_v10 = vld [vmem:[#allocation8 + $0x1054] ss:$24 sps:$4 sm:$0xff]   ;;  %v21235_v7 = vld [vmem:[#allocation8 + $0x1060] ss:$24 sps:$4 sm:$0xff]   ;;  %v21238_v0 = vrot.slane %v19237_v14, 5 }
 0x61c   :  { %v5123_v60 = vpop.f32.mrf.mxu1  ;;  %v5172_v30 = vpop.f32.mrf.mxu0  ;;  %v21124_v16 = vld [vmem:[#allocation8 + $0x105c] ss:$24 sps:$4 sm:$0xff]  }
 0x61d   :  { %6280 = vmatpush1.bf16.msra.mxu1 %v20946_v26  ;;  %6321 = vmatpush1.bf16.msra.mxu0 %v21053_v31  ;;  %v21127_v26 = vld [vmem:[#allocation8 + $0x1050] ss:$24 sps:$4 sm:$0xff]   ;;  %v21242_v60 = vld [vmem:[#allocation8 + $0x1034] ss:$24 sps:$4 sm:$0xff]  }
 0x61e   :  { %v5124_v38 = vpop.f32.mrf.mxu1  ;;  %v5173_v44 = vpop.f32.mrf.mxu0  ;;  %6281 = vmatprep.subr.bf16.mxu1 %v20952_v6  ;;  %6322 = vmatprep.subr.bf16.mxu0 %v21057_v50  ;;  %v21129_v6 = vld [vmem:[#allocation8 + $0x1058] ss:$24 sps:$4 sm:$0xff]  }
 0x61f   :  { %v21167_v31 = vld [vmem:[#allocation8 + $0xff8] ss:$24 sps:$4 sm:$0xff]  }
 0x620   :  { %v21177_v50 = vld [vmem:[#allocation8 + $0xfc0] ss:$24 sps:$4 sm:$0xff]  }
 0x621   :  { %6282 = vmatpush1.bf16.msra.mxu1 %v20966_v3  ;;  %6323 = vmatpush1.bf16.msra.mxu0 %v21069_v27  ;;  %v21133_v3 = vld [vmem:[#allocation8 + $0x1024] ss:$24 sps:$4 sm:$0xff]  }
 0x622   :  { %6283 = vmatprep.subr.bf16.mxu1 %v20972_v4  ;;  %6324 = vmatprep.subr.bf16.mxu0 %v17567_v18  ;;  %v21135_v4 = vld [vmem:[#allocation8 + $0x102c] ss:$24 sps:$4 sm:$0xff]   ;;  %v21185_v27 = vld [vmem:[#allocation8 + $0xf9c] ss:$24 sps:$4 sm:$0xff]  }
 0x623   :  { %v21195_v18 = vld [vmem:[#allocation8 + $0xf64] ss:$24 sps:$4 sm:$0xff]  }
 0x625   :  { %6284 = vmatpush1.bf16.msra.mxu1 %v20978_v37  ;;  %6325 = vmatpush1.bf16.msra.mxu0 %v17565_v11  ;;  %v21197_v11 = vld [vmem:[#allocation8 + $0xf6c] ss:$24 sps:$4 sm:$0xff]  }
 0x626   :  { %6285 = vmatprep.subr.bf16.mxu1 %v20984_v54  ;;  %6326 = vmatprep.subr.bf16.mxu0 %v17570_v47  ;;  %v21201_v47 = vld [vmem:[#allocation8 + $0xf60] ss:$24 sps:$4 sm:$0xff]  }
 0x629   :  { %6286 = vmatpush1.bf16.msra.mxu1 %v20990_v63  ;;  %6327 = vmatpush1.bf16.msra.mxu0 %v17568_v1  ;;  %v21203_v1 = vld [vmem:[#allocation8 + $0xf68] ss:$24 sps:$4 sm:$0xff]  }
 0x62a   :  { %6287 = vmatprep.subr.bf16.mxu1 %v20996_v42  ;;  %6328 = vmatprep.subr.bf16.mxu0 %v17573_v24  ;;  %v21207_v24 = vld [vmem:[#allocation8 + $0xf34] ss:$24 sps:$4 sm:$0xff]  }
 0x62d   :  { %6288 = vmatpush1.bf16.msra.mxu1 %v21002_v41  ;;  %6329 = vmatpush1.bf16.msra.mxu0 %v17571_v56  ;;  %v21145_v41 = vld [vmem:[#allocation8 + $0x1020] ss:$24 sps:$4 sm:$0xff]   ;;  %v21209_v56 = vld [vmem:[#allocation8 + $0xf3c] ss:$24 sps:$4 sm:$0xff]  }
 0x62e   :  { %6289 = vmatprep.subr.bf16.mxu1 %v21008_v45  ;;  %6330 = vmatprep.subr.bf16.mxu0 %v17576_v34  ;;  %v21147_v45 = vld [vmem:[#allocation8 + $0x1028] ss:$24 sps:$4 sm:$0xff]  }
 0x62f   :  { %v21213_v34 = vld [vmem:[#allocation8 + $0xf30] ss:$24 sps:$4 sm:$0xff]  }
 0x631   :  { %6290 = vmatpush1.bf16.msra.mxu1 %v21014_v48  ;;  %6331 = vmatpush1.bf16.msra.mxu0 %v17574_v53  ;;  %v21215_v53 = vld [vmem:[#allocation8 + $0xf38] ss:$24 sps:$4 sm:$0xff]  }
 0x632   :  { %6291 = vmatprep.subr.bf16.mxu1 %v21020_v9  ;;  %6332 = vmatprep.subr.bf16.mxu0 %v17579_v33  ;;  %v21219_v33 = vld [vmem:[#allocation8 + $0xf04] ss:$24 sps:$4 sm:$0xff]  }
 0x635   :  { %6292 = vmatpush1.bf16.msra.mxu1 %v21026_v61  ;;  %6333 = vmatpush1.bf16.msra.mxu0 %v17577_v21  ;;  %v21151_v61 = vld [vmem:[#allocation8 + $0xff4] ss:$24 sps:$4 sm:$0xff]  }
 0x636   :  { %6656 = vmatprep.subr.bf16.mxu1 %v21122_v10  ;;  %6697 = vmatprep.subr.bf16.mxu0 %v21124_v16  ;;  %v21221_v21 = vld [vmem:[#allocation8 + $0xf0c] ss:$24 sps:$4 sm:$0xff]  }
 0x638   :  { %v5209_v37 = vpop.f32.mrf.mxu1  ;;  %v5250_v54 = vpop.f32.mrf.mxu0  ;;  %6310 = vmatmul.mubr.bf16.vlgmr.msra.gmra.mxu1 %v6234_v51  ;;  %6351 = vmatmul.mubr.bf16.vlgmr.msra.gmra.mxu0 %v6234_v51  ;;  %v21225_v51 = vld [vmem:[#allocation8 + $0xf00] ss:$24 sps:$4 sm:$0xff]  }
 0x639   :  { %v21138_v63 = vadd.f32 %v5209_v37, %v20937_v59  ;;  %v21141_v42 = vadd.f32 %v5250_v54, %v20940_v62  ;;  %6657 = vmatpush1.bf16.msra.mxu1 %v21127_v26  ;;  %6698 = vmatpush1.bf16.msra.mxu0 %v21129_v6  ;;  %v21153_v59 = vld [vmem:[#allocation8 + $0xffc] ss:$24 sps:$4 sm:$0xff]   ;;  %v21254_v54 = vld [vmem:[#allocation8 + $0x1030] ss:$24 sps:$4 sm:$0xff]  }
 0x63a   :  { %v5211_v48 = vpop.f32.mrf.mxu1  ;;  %v5252_v9 = vpop.f32.mrf.mxu0  ;;  %6658 = vmatprep.subr.bf16.mxu1 %v21133_v3  ;;  %6699 = vmatprep.subr.bf16.mxu0 %v21135_v4 }
 0x63b   :  { %v21156_v62 = vadd.f32 %v5211_v48, %v20955_v13  ;;  %v21159_v58 = vadd.f32 %v5252_v9, %v20958_v28  ;;  %6688 = vmatprep.mubr.bf16.mxu1 %v24500_v40  ;;  %6729 = vmatprep.mubr.bf16.mxu0 %v24500_v40  ;;  %v21171_v28 = vld [vmem:[#allocation8 + $0xfc4] ss:$24 sps:$4 sm:$0xff]  }
 0x63c   :  { %v5213_v12 = vpop.f32.mrf.mxu1  ;;  %v5254_v46 = vpop.f32.mrf.mxu0  ;;  %v21258_v9 = vld [vmem:[#allocation8 + $0x1004] ss:$24 sps:$4 sm:$0xff]  }
 0x63d   :  { %6659 = vmatpush1.bf16.msra.mxu1 %v21145_v41  ;;  %6700 = vmatpush1.bf16.msra.mxu0 %v21147_v45  ;;  %v21270_v46 = vld [vmem:[#allocation8 + $0x1000] ss:$24 sps:$4 sm:$0xff]  }
 0x63e   :  { %v5214_v23 = vpop.f32.mrf.mxu1  ;;  %v5255_v13 = vpop.f32.mrf.mxu0  ;;  %6660 = vmatprep.subr.bf16.mxu1 %v21151_v61  ;;  %6701 = vmatprep.subr.bf16.mxu0 %v21153_v59 }
 0x63f   :  { %v17642_v13 = vld [vmem:[#allocation8 + $0xfa4] ss:$24 sps:$4 sm:$0xff]  }
 0x641   :  { %6661 = vmatpush1.bf16.msra.mxu1 %v21165_v52  ;;  %6702 = vmatpush1.bf16.msra.mxu0 %v21167_v31 }
 0x642   :  { %6662 = vmatprep.subr.bf16.mxu1 %v21171_v28  ;;  %6703 = vmatprep.subr.bf16.mxu0 %v21173_v8 }
 0x645   :  { %6663 = vmatpush1.bf16.msra.mxu1 %v21177_v50  ;;  %6704 = vmatpush1.bf16.msra.mxu0 %v21179_v15 }
 0x646   :  { %6664 = vmatprep.subr.bf16.mxu1 %v21183_v32  ;;  %6705 = vmatprep.subr.bf16.mxu0 %v21185_v27 }
 0x649   :  { %6665 = vmatpush1.bf16.msra.mxu1 %v21189_v17  ;;  %6706 = vmatpush1.bf16.msra.mxu0 %v21191_v22 }
 0x64a   :  { %6666 = vmatprep.subr.bf16.mxu1 %v21195_v18  ;;  %6707 = vmatprep.subr.bf16.mxu0 %v21197_v11 }
 0x64d   :  { %6667 = vmatpush1.bf16.msra.mxu1 %v21201_v47  ;;  %6708 = vmatpush1.bf16.msra.mxu0 %v21203_v1 }
 0x64e   :  { %6668 = vmatprep.subr.bf16.mxu1 %v21207_v24  ;;  %6709 = vmatprep.subr.bf16.mxu0 %v21209_v56 }
 0x651   :  { %6669 = vmatpush1.bf16.msra.mxu1 %v21213_v34  ;;  %6710 = vmatpush1.bf16.msra.mxu0 %v21215_v53 }
 0x652   :  { %6670 = vmatprep.subr.bf16.mxu1 %v21219_v33  ;;  %6711 = vmatprep.subr.bf16.mxu0 %v21221_v21 }
 0x655   :  { %6671 = vmatpush1.bf16.msra.mxu1 %v21225_v51  ;;  %6712 = vmatpush1.bf16.msra.mxu0 %v21227_v55 }
 0x656   :  { %6738 = vmatprep.subr.bf16.mxu1 %v21231_v2  ;;  %6787 = vmatprep.subr.bf16.mxu0 %v21122_v10 }
 0x658   :  { %v5588_v30 = vpop.f32.mrf.mxu1  ;;  %v5629_v38 = vpop.f32.mrf.mxu0  ;;  %6689 = vmatmul.mubr.bf16.vlgmr.msra.gmra.mxu1 %v21238_v0  ;;  %6730 = vmatmul.mubr.bf16.vlgmr.msra.gmra.mxu0 %v21238_v0 }
 0x659   :  { %v21247_v44 = vadd.f32 %v5588_v30, %v21046_v25  ;;  %v21250_v37 = vadd.f32 %v5629_v38, %v21049_v57  ;;  %6739 = vmatpush1.bf16.msra.mxu1 %v21235_v7  ;;  %6788 = vmatpush1.bf16.msra.mxu0 %v21127_v26  ;;  %v17645_v30 = vld [vmem:[#allocation8 + $0xf74] ss:$24 sps:$4 sm:$0xff]   ;;  %v21366_v38 = vld [vmem:[#allocation8 + $0x1170] ss:$24 sps:$4 sm:$0xff]  }
 0x65a   :  { %v5590_v10 = vpop.f32.mrf.mxu1  ;;  %v5631_v48 = vpop.f32.mrf.mxu0  ;;  %6740 = vmatprep.subr.bf16.mxu1 %v21242_v60  ;;  %6789 = vmatprep.subr.bf16.mxu0 %v21133_v3 }
 0x65b   :  { %v21261_v25 = vadd.f32 %v5590_v10, %v21060_v19  ;;  %v21264_v57 = vadd.f32 %v5631_v48, %v21063_v29  ;;  %6770 = vmatprep.mubr.bf16.mxu1 %v24500_v40  ;;  %6819 = vmatprep.mubr.bf16.mxu0 %v24500_v40  ;;  %v17639_v19 = vld [vmem:[#allocation8 + $0xfd4] ss:$24 sps:$4 sm:$0xff]   ;;  %v17637_v29 = vld [vmem:[#allocation8 + $0xfd0] ss:$24 sps:$4 sm:$0xff]  }
 0x65c   :  { %v5592_v26 = vpop.f32.mrf.mxu1  ;;  %v5633_v12 = vpop.f32.mrf.mxu0  ;;  %v21374_v48 = vld [vmem:[#allocation8 + $0x114c] ss:$24 sps:$4 sm:$0xff]  }
 0x65d   :  { %6741 = vmatpush1.bf16.msra.mxu1 %v21254_v54  ;;  %6790 = vmatpush1.bf16.msra.mxu0 %v21145_v41  ;;  %v17640_v41 = vld [vmem:[#allocation8 + $0xfa0] ss:$24 sps:$4 sm:$0xff]   ;;  %v21384_v12 = vld [vmem:[#allocation8 + $0x1114] ss:$24 sps:$4 sm:$0xff]  }
 0x65e   :  { %v5593_v3 = vpop.f32.mrf.mxu1  ;;  %v5634_v23 = vpop.f32.mrf.mxu0  ;;  %6742 = vmatprep.subr.bf16.mxu1 %v21258_v9  ;;  %6791 = vmatprep.subr.bf16.mxu0 %v21151_v61  ;;  %v17643_v61 = vld [vmem:[#allocation8 + $0xf70] ss:$24 sps:$4 sm:$0xff]  }
 0x65f   :  { %v21380_v26 = vld [vmem:[#allocation8 + $0x1148] ss:$24 sps:$4 sm:$0xff]   ;;  %v21392_v23 = vld [vmem:[#allocation8 + $0x1118] ss:$24 sps:$4 sm:$0xff]  }
 0x660   :  { %v21390_v3 = vld [vmem:[#allocation8 + $0x1110] ss:$24 sps:$4 sm:$0xff]  }
 0x661   :  { %6743 = vmatpush1.bf16.msra.mxu1 %v21270_v46  ;;  %6792 = vmatpush1.bf16.msra.mxu0 %v21165_v52  ;;  %v17648_v52 = vld [vmem:[#allocation8 + $0xf44] ss:$24 sps:$4 sm:$0xff]  }
 0x662   :  { %6744 = vmatprep.subr.bf16.mxu1 %v17639_v19  ;;  %6793 = vmatprep.subr.bf16.mxu0 %v21171_v28  ;;  %v17646_v28 = vld [vmem:[#allocation8 + $0xf40] ss:$24 sps:$4 sm:$0xff]  }
 0x665   :  { %6745 = vmatpush1.bf16.msra.mxu1 %v17637_v29  ;;  %6794 = vmatpush1.bf16.msra.mxu0 %v21177_v50  ;;  %v17651_v50 = vld [vmem:[#allocation8 + $0xf14] ss:$24 sps:$4 sm:$0xff]  }
 0x666   :  { %6746 = vmatprep.subr.bf16.mxu1 %v17642_v13  ;;  %6795 = vmatprep.subr.bf16.mxu0 %v21183_v32  ;;  %v17649_v32 = vld [vmem:[#allocation8 + $0xf10] ss:$24 sps:$4 sm:$0xff]  }
 0x669   :  { %6747 = vmatpush1.bf16.msra.mxu1 %v17640_v41  ;;  %6796 = vmatpush1.bf16.msra.mxu0 %v21189_v17  ;;  %v6785_v17 = vrot.slane %v19521_v36, 5 }
 0x66a   :  { %6748 = vmatprep.subr.bf16.mxu1 %v17645_v30  ;;  %6797 = vmatprep.subr.bf16.mxu0 %v21195_v18 }
 0x66d   :  { %6749 = vmatpush1.bf16.msra.mxu1 %v17643_v61  ;;  %6798 = vmatpush1.bf16.msra.mxu0 %v21201_v47 }
 0x66e   :  { %6750 = vmatprep.subr.bf16.mxu1 %v17648_v52  ;;  %6799 = vmatprep.subr.bf16.mxu0 %v21207_v24 }
 0x671   :  { %6751 = vmatpush1.bf16.msra.mxu1 %v17646_v28  ;;  %6800 = vmatpush1.bf16.msra.mxu0 %v21213_v34 }
 0x672   :  { %6752 = vmatprep.subr.bf16.mxu1 %v17651_v50  ;;  %6801 = vmatprep.subr.bf16.mxu0 %v21219_v33 }
 0x675   :  { %6753 = vmatpush1.bf16.msra.mxu1 %v17649_v32  ;;  %6802 = vmatpush1.bf16.msra.mxu0 %v21225_v51 }
 0x676   :  { %6828 = vmatprep.subr.bf16.mxu1 %v21124_v16  ;;  %6869 = vmatprep.subr.bf16.mxu0 %v21231_v2 }
 0x678   :  { %v5670_v18 = vpop.f32.mrf.mxu1  ;;  %v5719_v47 = vpop.f32.mrf.mxu0  ;;  %6771 = vmatmul.mubr.bf16.vlgmr.msra.gmra.mxu1 %v21238_v0  ;;  %6820 = vmatmul.mubr.bf16.vlgmr.msra.gmra.mxu0 %v6785_v17 }
 0x679   :  { %v21291_v24 = vadd.f32 %v5670_v18, %v21090_v35  ;;  %v21294_v34 = vadd.f32 %v5719_v47, %v21093_v20  ;;  %6829 = vmatpush1.bf16.msra.mxu1 %v21129_v6  ;;  %6870 = vmatpush1.bf16.msra.mxu0 %v21235_v7  ;;  %v21428_v18 = vld [vmem:[#allocation8 + $0x1088] ss:$24 sps:$4 sm:$0xff]   ;;  %v21432_v47 = vld [vmem:[#allocation8 + $0x11e4] ss:$24 sps:$4 sm:$0xff]  }
 0x67a   :  { %v5672_v33 = vpop.f32.mrf.mxu1  ;;  %v5721_v51 = vpop.f32.mrf.mxu0  ;;  %6830 = vmatprep.subr.bf16.mxu1 %v21135_v4  ;;  %6871 = vmatprep.subr.bf16.mxu0 %v21242_v60 }
 0x67b   :  { %v21301_v16 = vadd.f32 %v5672_v33, %v21100_v43  ;;  %v21304_v2 = vadd.f32 %v5721_v51, %v21103_v49  ;;  %6860 = vmatprep.mubr.bf16.mxu1 %v24500_v40  ;;  %6901 = vmatprep.mubr.bf16.mxu0 %v24500_v40  ;;  %v21323_v43 = vld [vmem:[#allocation8 + $0x11d4] ss:$24 sps:$4 sm:$0xff]   ;;  %v21436_v33 = vld [vmem:[#allocation8 + $0x11e0] ss:$24 sps:$4 sm:$0xff]   ;;  %v21439_v51 = vrot.slane %v24527_v5, 5 }
 0x67c   :  { %v5674_v35 = vpop.f32.mrf.mxu1  ;;  %v5723_v20 = vpop.f32.mrf.mxu0  ;;  %v21325_v49 = vld [vmem:[#allocation8 + $0x11dc] ss:$24 sps:$4 sm:$0xff]  }
 0x67d   :  { %6831 = vmatpush1.bf16.msra.mxu1 %v21147_v45  ;;  %6872 = vmatpush1.bf16.msra.mxu0 %v21254_v54  ;;  %v21328_v45 = vld [vmem:[#allocation8 + $0x11d0] ss:$24 sps:$4 sm:$0xff]   ;;  %v21443_v35 = vld [vmem:[#allocation8 + $0x11b4] ss:$24 sps:$4 sm:$0xff]  }
 0x67e   :  { %v5675_v6 = vpop.f32.mrf.mxu1  ;;  %v5724_v4 = vpop.f32.mrf.mxu0  ;;  %6832 = vmatprep.subr.bf16.mxu1 %v21153_v59  ;;  %6873 = vmatprep.subr.bf16.mxu0 %v21258_v9  ;;  %v21330_v59 = vld [vmem:[#allocation8 + $0x11d8] ss:$24 sps:$4 sm:$0xff]  }
 0x67f   :  { %v21368_v54 = vld [vmem:[#allocation8 + $0x1178] ss:$24 sps:$4 sm:$0xff]  }
 0x680   :  { %v21378_v9 = vld [vmem:[#allocation8 + $0x1140] ss:$24 sps:$4 sm:$0xff]  }
 0x681   :  { %6833 = vmatpush1.bf16.msra.mxu1 %v21167_v31  ;;  %6874 = vmatpush1.bf16.msra.mxu0 %v21270_v46  ;;  %v21334_v31 = vld [vmem:[#allocation8 + $0x11a4] ss:$24 sps:$4 sm:$0xff]  }
 0x682   :  { %6834 = vmatprep.subr.bf16.mxu1 %v21173_v8  ;;  %6875 = vmatprep.subr.bf16.mxu0 %v17639_v19  ;;  %v21336_v8 = vld [vmem:[#allocation8 + $0x11ac] ss:$24 sps:$4 sm:$0xff]   ;;  %v21386_v46 = vld [vmem:[#allocation8 + $0x111c] ss:$24 sps:$4 sm:$0xff]  }
 0x683   :  { %v21396_v19 = vld [vmem:[#allocation8 + $0x10e4] ss:$24 sps:$4 sm:$0xff]  }
 0x685   :  { %6835 = vmatpush1.bf16.msra.mxu1 %v21179_v15  ;;  %6876 = vmatpush1.bf16.msra.mxu0 %v17637_v29  ;;  %v21398_v29 = vld [vmem:[#allocation8 + $0x10ec] ss:$24 sps:$4 sm:$0xff]  }
 0x686   :  { %6836 = vmatprep.subr.bf16.mxu1 %v21185_v27  ;;  %6877 = vmatprep.subr.bf16.mxu0 %v17642_v13  ;;  %v21402_v13 = vld [vmem:[#allocation8 + $0x10e0] ss:$24 sps:$4 sm:$0xff]  }
 0x689   :  { %6837 = vmatpush1.bf16.msra.mxu1 %v21191_v22  ;;  %6878 = vmatpush1.bf16.msra.mxu0 %v17640_v41  ;;  %v21404_v41 = vld [vmem:[#allocation8 + $0x10e8] ss:$24 sps:$4 sm:$0xff]  }
 0x68a   :  { %6838 = vmatprep.subr.bf16.mxu1 %v21197_v11  ;;  %6879 = vmatprep.subr.bf16.mxu0 %v17645_v30  ;;  %v21408_v30 = vld [vmem:[#allocation8 + $0x10b4] ss:$24 sps:$4 sm:$0xff]  }
 0x68d   :  { %6839 = vmatpush1.bf16.msra.mxu1 %v21203_v1  ;;  %6880 = vmatpush1.bf16.msra.mxu0 %v17643_v61  ;;  %v21346_v1 = vld [vmem:[#allocation8 + $0x11a0] ss:$24 sps:$4 sm:$0xff]   ;;  %v21410_v61 = vld [vmem:[#allocation8 + $0x10bc] ss:$24 sps:$4 sm:$0xff]  }
 0x68e   :  { %6840 = vmatprep.subr.bf16.mxu1 %v21209_v56  ;;  %6881 = vmatprep.subr.bf16.mxu0 %v17648_v52  ;;  %v21348_v56 = vld [vmem:[#allocation8 + $0x11a8] ss:$24 sps:$4 sm:$0xff]  }
 0x68f   :  { %v21414_v52 = vld [vmem:[#allocation8 + $0x10b0] ss:$24 sps:$4 sm:$0xff]  }
 0x691   :  { %6841 = vmatpush1.bf16.msra.mxu1 %v21215_v53  ;;  %6882 = vmatpush1.bf16.msra.mxu0 %v17646_v28  ;;  %v21416_v28 = vld [vmem:[#allocation8 + $0x10b8] ss:$24 sps:$4 sm:$0xff]  }
 0x692   :  { %6842 = vmatprep.subr.bf16.mxu1 %v21221_v21  ;;  %6883 = vmatprep.subr.bf16.mxu0 %v17651_v50  ;;  %v21420_v50 = vld [vmem:[#allocation8 + $0x1084] ss:$24 sps:$4 sm:$0xff]  }
 0x695   :  { %6843 = vmatpush1.bf16.msra.mxu1 %v21227_v55  ;;  %6884 = vmatpush1.bf16.msra.mxu0 %v17649_v32  ;;  %v21352_v55 = vld [vmem:[#allocation8 + $0x1174] ss:$24 sps:$4 sm:$0xff]  }
 0x696   :  { %7207 = vmatprep.subr.bf16.mxu1 %v21323_v43  ;;  %7248 = vmatprep.subr.bf16.mxu0 %v21325_v49  ;;  %v21422_v32 = vld [vmem:[#allocation8 + $0x108c] ss:$24 sps:$4 sm:$0xff]  }
 0x698   :  { %v5760_v15 = vpop.f32.mrf.mxu1  ;;  %v5801_v27 = vpop.f32.mrf.mxu0  ;;  %6861 = vmatmul.mubr.bf16.vlgmr.msra.gmra.mxu1 %v6785_v17  ;;  %6902 = vmatmul.mubr.bf16.vlgmr.msra.gmra.mxu0 %v6785_v17  ;;  %v21426_v17 = vld [vmem:[#allocation8 + $0x1080] ss:$24 sps:$4 sm:$0xff]  }
 0x699   :  { %v21339_v22 = vadd.f32 %v5760_v15, %v21138_v63  ;;  %v21342_v11 = vadd.f32 %v5801_v27, %v21141_v42  ;;  %7208 = vmatpush1.bf16.msra.mxu1 %v21328_v45  ;;  %7249 = vmatpush1.bf16.msra.mxu0 %v21330_v59  ;;  %v21354_v63 = vld [vmem:[#allocation8 + $0x117c] ss:$24 sps:$4 sm:$0xff]   ;;  %v21455_v27 = vld [vmem:[#allocation8 + $0x11b0] ss:$24 sps:$4 sm:$0xff]  }
 0x69a   :  { %v5762_v53 = vpop.f32.mrf.mxu1  ;;  %v5803_v21 = vpop.f32.mrf.mxu0  ;;  %7209 = vmatprep.subr.bf16.mxu1 %v21334_v31  ;;  %7250 = vmatprep.subr.bf16.mxu0 %v21336_v8 }
 0x69b   :  { %v21357_v42 = vadd.f32 %v5762_v53, %v21156_v62  ;;  %v21360_v7 = vadd.f32 %v5803_v21, %v21159_v58  ;;  %7239 = vmatprep.mubr.bf16.mxu1 %v24500_v40  ;;  %7280 = vmatprep.mubr.bf16.mxu0 %v24500_v40  ;;  %v21372_v58 = vld [vmem:[#allocation8 + $0x1144] ss:$24 sps:$4 sm:$0xff]  }
 0x69c   :  { %v5764_v0 = vpop.f32.mrf.mxu1  ;;  %v5805_v60 = vpop.f32.mrf.mxu0  ;;  %v21459_v21 = vld [vmem:[#allocation8 + $0x1184] ss:$24 sps:$4 sm:$0xff]  }
 0x69d   :  { %7210 = vmatpush1.bf16.msra.mxu1 %v21346_v1  ;;  %7251 = vmatpush1.bf16.msra.mxu0 %v21348_v56  ;;  %v21471_v60 = vld [vmem:[#allocation8 + $0x1180] ss:$24 sps:$4 sm:$0xff]  }
 0x69e   :  { %v5765_v10 = vpop.f32.mrf.mxu1  ;;  %v5806_v62 = vpop.f32.mrf.mxu0  ;;  %7211 = vmatprep.subr.bf16.mxu1 %v21352_v55  ;;  %7252 = vmatprep.subr.bf16.mxu0 %v21354_v63 }
 0x69f   :  { %v17714_v62 = vld [vmem:[#allocation8 + $0x1124] ss:$24 sps:$4 sm:$0xff]  }
 0x6a1   :  { %7212 = vmatpush1.bf16.msra.mxu1 %v21366_v38  ;;  %7253 = vmatpush1.bf16.msra.mxu0 %v21368_v54 }
 0x6a2   :  { %7213 = vmatprep.subr.bf16.mxu1 %v21372_v58  ;;  %7254 = vmatprep.subr.bf16.mxu0 %v21374_v48 }
 0x6a5   :  { %7214 = vmatpush1.bf16.msra.mxu1 %v21378_v9  ;;  %7255 = vmatpush1.bf16.msra.mxu0 %v21380_v26 }
 0x6a6   :  { %7215 = vmatprep.subr.bf16.mxu1 %v21384_v12  ;;  %7256 = vmatprep.subr.bf16.mxu0 %v21386_v46 }
 0x6a9   :  { %7216 = vmatpush1.bf16.msra.mxu1 %v21390_v3  ;;  %7257 = vmatpush1.bf16.msra.mxu0 %v21392_v23 }
 0x6aa   :  { %7217 = vmatprep.subr.bf16.mxu1 %v21396_v19  ;;  %7258 = vmatprep.subr.bf16.mxu0 %v21398_v29 }
 0x6ad   :  { %7218 = vmatpush1.bf16.msra.mxu1 %v21402_v13  ;;  %7259 = vmatpush1.bf16.msra.mxu0 %v21404_v41 }
 0x6ae   :  { %7219 = vmatprep.subr.bf16.mxu1 %v21408_v30  ;;  %7260 = vmatprep.subr.bf16.mxu0 %v21410_v61 }
 0x6b1   :  { %7220 = vmatpush1.bf16.msra.mxu1 %v21414_v52  ;;  %7261 = vmatpush1.bf16.msra.mxu0 %v21416_v28 }
 0x6b2   :  { %7221 = vmatprep.subr.bf16.mxu1 %v21420_v50  ;;  %7262 = vmatprep.subr.bf16.mxu0 %v21422_v32 }
 0x6b5   :  { %7222 = vmatpush1.bf16.msra.mxu1 %v21426_v17  ;;  %7263 = vmatpush1.bf16.msra.mxu0 %v21428_v18 }
 0x6b6   :  { %7289 = vmatprep.subr.bf16.mxu1 %v21432_v47  ;;  %7338 = vmatprep.subr.bf16.mxu0 %v21323_v43 }
 0x6b8   :  { %v6139_v20 = vpop.f32.mrf.mxu1  ;;  %v6180_v6 = vpop.f32.mrf.mxu0  ;;  %7240 = vmatmul.mubr.bf16.vlgmr.msra.gmra.mxu1 %v21439_v51  ;;  %7281 = vmatmul.mubr.bf16.vlgmr.msra.gmra.mxu0 %v21439_v51 }
 0x6b9   :  { %v21448_v4 = vadd.f32 %v6139_v20, %v21247_v44  ;;  %v21451_v15 = vadd.f32 %v6180_v6, %v21250_v37  ;;  %7290 = vmatpush1.bf16.msra.mxu1 %v21436_v33  ;;  %7339 = vmatpush1.bf16.msra.mxu0 %v21328_v45  ;;  %v17717_v20 = vld [vmem:[#allocation8 + $0x10f4] ss:$24 sps:$4 sm:$0xff]   ;;  %v21567_v6 = vld [vmem:[#allocation8 + $0x12f0] ss:$24 sps:$4 sm:$0xff]  }
 0x6ba   :  { %v6141_v43 = vpop.f32.mrf.mxu1  ;;  %v6182_v53 = vpop.f32.mrf.mxu0  ;;  %7291 = vmatprep.subr.bf16.mxu1 %v21443_v35  ;;  %7340 = vmatprep.subr.bf16.mxu0 %v21334_v31 }
 0x6bb   :  { %v21462_v44 = vadd.f32 %v6141_v43, %v21261_v25  ;;  %v21465_v37 = vadd.f32 %v6182_v53, %v21264_v57  ;;  %7321 = vmatprep.mubr.bf16.mxu1 %v24500_v40  ;;  %7370 = vmatprep.mubr.bf16.mxu0 %v24500_v40  ;;  %v17711_v25 = vld [vmem:[#allocation8 + $0x1154] ss:$24 sps:$4 sm:$0xff]   ;;  %v17709_v57 = vld [vmem:[#allocation8 + $0x1150] ss:$24 sps:$4 sm:$0xff]  }
 0x6bc   :  { %v6143_v45 = vpop.f32.mrf.mxu1  ;;  %v6184_v0 = vpop.f32.mrf.mxu0  ;;  %v21575_v53 = vld [vmem:[#allocation8 + $0x12cc] ss:$24 sps:$4 sm:$0xff]  }
 0x6bd   :  { %7292 = vmatpush1.bf16.msra.mxu1 %v21455_v27  ;;  %7341 = vmatpush1.bf16.msra.mxu0 %v21346_v1  ;;  %v17712_v1 = vld [vmem:[#allocation8 + $0x1120] ss:$24 sps:$4 sm:$0xff]   ;;  %v21585_v0 = vld [vmem:[#allocation8 + $0x1294] ss:$24 sps:$4 sm:$0xff]  }
 0x6be   :  { %v6144_v31 = vpop.f32.mrf.mxu1  ;;  %v6185_v10 = vpop.f32.mrf.mxu0  ;;  %7293 = vmatprep.subr.bf16.mxu1 %v21459_v21  ;;  %7342 = vmatprep.subr.bf16.mxu0 %v21352_v55  ;;  %v17715_v55 = vld [vmem:[#allocation8 + $0x10f0] ss:$24 sps:$4 sm:$0xff]  }
 0x6bf   :  { %v21581_v45 = vld [vmem:[#allocation8 + $0x12c8] ss:$24 sps:$4 sm:$0xff]   ;;  %v21593_v10 = vld [vmem:[#allocation8 + $0x1298] ss:$24 sps:$4 sm:$0xff]  }
 0x6c0   :  { %v21591_v31 = vld [vmem:[#allocation8 + $0x1290] ss:$24 sps:$4 sm:$0xff]  }
 0x6c1   :  { %7294 = vmatpush1.bf16.msra.mxu1 %v21471_v60  ;;  %7343 = vmatpush1.bf16.msra.mxu0 %v21366_v38  ;;  %v17720_v38 = vld [vmem:[#allocation8 + $0x10c4] ss:$24 sps:$4 sm:$0xff]  }
 0x6c2   :  { %7295 = vmatprep.subr.bf16.mxu1 %v17711_v25  ;;  %7344 = vmatprep.subr.bf16.mxu0 %v21372_v58  ;;  %v17718_v58 = vld [vmem:[#allocation8 + $0x10c0] ss:$24 sps:$4 sm:$0xff]  }
 0x6c5   :  { %7296 = vmatpush1.bf16.msra.mxu1 %v17709_v57  ;;  %7345 = vmatpush1.bf16.msra.mxu0 %v21378_v9  ;;  %v17723_v9 = vld [vmem:[#allocation8 + $0x1094] ss:$24 sps:$4 sm:$0xff]  }
 0x6c6   :  { %7297 = vmatprep.subr.bf16.mxu1 %v17714_v62  ;;  %7346 = vmatprep.subr.bf16.mxu0 %v21384_v12  ;;  %v17721_v12 = vld [vmem:[#allocation8 + $0x1090] ss:$24 sps:$4 sm:$0xff]  }
 0x6c9   :  { %7298 = vmatpush1.bf16.msra.mxu1 %v17712_v1  ;;  %7347 = vmatpush1.bf16.msra.mxu0 %v21390_v3  ;;  %v7336_v3 = vrot.slane %v19524_v39, 5 }
 0x6ca   :  { %7299 = vmatprep.subr.bf16.mxu1 %v17717_v20  ;;  %7348 = vmatprep.subr.bf16.mxu0 %v21396_v19 }
 0x6cd   :  { %7300 = vmatpush1.bf16.msra.mxu1 %v17715_v55  ;;  %7349 = vmatpush1.bf16.msra.mxu0 %v21402_v13 }
 0x6ce   :  { %7301 = vmatprep.subr.bf16.mxu1 %v17720_v38  ;;  %7350 = vmatprep.subr.bf16.mxu0 %v21408_v30 }
 0x6d1   :  { %7302 = vmatpush1.bf16.msra.mxu1 %v17718_v58  ;;  %7351 = vmatpush1.bf16.msra.mxu0 %v21414_v52 }
 0x6d2   :  { %7303 = vmatprep.subr.bf16.mxu1 %v17723_v9  ;;  %7352 = vmatprep.subr.bf16.mxu0 %v21420_v50 }
 0x6d5   :  { %7304 = vmatpush1.bf16.msra.mxu1 %v17721_v12  ;;  %7353 = vmatpush1.bf16.msra.mxu0 %v21426_v17 }
 0x6d6   :  { %7379 = vmatprep.subr.bf16.mxu1 %v21325_v49  ;;  %7420 = vmatprep.subr.bf16.mxu0 %v21432_v47 }
 0x6d8   :  { %v6221_v19 = vpop.f32.mrf.mxu1  ;;  %v6270_v13 = vpop.f32.mrf.mxu0  ;;  %7322 = vmatmul.mubr.bf16.vlgmr.msra.gmra.mxu1 %v21439_v51  ;;  %7371 = vmatmul.mubr.bf16.vlgmr.msra.gmra.mxu0 %v7336_v3 }
 0x6d9   :  { %v21492_v30 = vadd.f32 %v6221_v19, %v21291_v24  ;;  %v21495_v52 = vadd.f32 %v6270_v13, %v21294_v34  ;;  %7380 = vmatpush1.bf16.msra.mxu1 %v21330_v59  ;;  %7421 = vmatpush1.bf16.msra.mxu0 %v21436_v33  ;;  %v21629_v19 = vld [vmem:[#allocation8 + $0x1208] ss:$24 sps:$4 sm:$0xff]   ;;  %v21633_v13 = vld [vmem:[#allocation8 + $0x1364] ss:$24 sps:$4 sm:$0xff]  }
 0x6da   :  { %v6223_v50 = vpop.f32.mrf.mxu1  ;;  %v6272_v17 = vpop.f32.mrf.mxu0  ;;  %7381 = vmatprep.subr.bf16.mxu1 %v21336_v8  ;;  %7422 = vmatprep.subr.bf16.mxu0 %v21443_v35 }
 0x6db   :  { %v21502_v49 = vadd.f32 %v6223_v50, %v21301_v16  ;;  %v21505_v47 = vadd.f32 %v6272_v17, %v21304_v2  ;;  %7411 = vmatprep.mubr.bf16.mxu1 %v24500_v40  ;;  %7452 = vmatprep.mubr.bf16.mxu0 %v24500_v40  ;;  %v21524_v16 = vld [vmem:[#allocation8 + $0x1354] ss:$24 sps:$4 sm:$0xff]   ;;  %v21637_v50 = vld [vmem:[#allocation8 + $0x1360] ss:$24 sps:$4 sm:$0xff]   ;;  %v21640_v17 = vrot.slane %v19237_v14, 6 }
 0x6dc   :  { %v6225_v24 = vpop.f32.mrf.mxu1  ;;  %v6274_v34 = vpop.f32.mrf.mxu0  ;;  %v21526_v2 = vld [vmem:[#allocation8 + $0x135c] ss:$24 sps:$4 sm:$0xff]  }
 0x6dd   :  { %7382 = vmatpush1.bf16.msra.mxu1 %v21348_v56  ;;  %7423 = vmatpush1.bf16.msra.mxu0 %v21455_v27  ;;  %v21529_v56 = vld [vmem:[#allocation8 + $0x1350] ss:$24 sps:$4 sm:$0xff]   ;;  %v21644_v24 = vld [vmem:[#allocation8 + $0x1334] ss:$24 sps:$4 sm:$0xff]  }
 0x6de   :  { %v6226_v59 = vpop.f32.mrf.mxu1  ;;  %v6275_v8 = vpop.f32.mrf.mxu0  ;;  %7383 = vmatprep.subr.bf16.mxu1 %v21354_v63  ;;  %7424 = vmatprep.subr.bf16.mxu0 %v21459_v21  ;;  %v21531_v63 = vld [vmem:[#allocation8 + $0x1358] ss:$24 sps:$4 sm:$0xff]  }
 0x6df   :  { %v21569_v27 = vld [vmem:[#allocation8 + $0x12f8] ss:$24 sps:$4 sm:$0xff]  }
 0x6e0   :  { %v21579_v21 = vld [vmem:[#allocation8 + $0x12c0] ss:$24 sps:$4 sm:$0xff]  }
 0x6e1   :  { %7384 = vmatpush1.bf16.msra.mxu1 %v21368_v54  ;;  %7425 = vmatpush1.bf16.msra.mxu0 %v21471_v60  ;;  %v21535_v54 = vld [vmem:[#allocation8 + $0x1324] ss:$24 sps:$4 sm:$0xff]  }
 0x6e2   :  { %7385 = vmatprep.subr.bf16.mxu1 %v21374_v48  ;;  %7426 = vmatprep.subr.bf16.mxu0 %v17711_v25  ;;  %v21537_v48 = vld [vmem:[#allocation8 + $0x132c] ss:$24 sps:$4 sm:$0xff]   ;;  %v21587_v60 = vld [vmem:[#allocation8 + $0x129c] ss:$24 sps:$4 sm:$0xff]  }
 0x6e3   :  { %v21597_v25 = vld [vmem:[#allocation8 + $0x1264] ss:$24 sps:$4 sm:$0xff]  }
 0x6e5   :  { %7386 = vmatpush1.bf16.msra.mxu1 %v21380_v26  ;;  %7427 = vmatpush1.bf16.msra.mxu0 %v17709_v57  ;;  %v21599_v57 = vld [vmem:[#allocation8 + $0x126c] ss:$24 sps:$4 sm:$0xff]  }
 0x6e6   :  { %7387 = vmatprep.subr.bf16.mxu1 %v21386_v46  ;;  %7428 = vmatprep.subr.bf16.mxu0 %v17714_v62  ;;  %v21603_v62 = vld [vmem:[#allocation8 + $0x1260] ss:$24 sps:$4 sm:$0xff]  }
 0x6e9   :  { %7388 = vmatpush1.bf16.msra.mxu1 %v21392_v23  ;;  %7429 = vmatpush1.bf16.msra.mxu0 %v17712_v1  ;;  %v21605_v1 = vld [vmem:[#allocation8 + $0x1268] ss:$24 sps:$4 sm:$0xff]  }
 0x6ea   :  { %7389 = vmatprep.subr.bf16.mxu1 %v21398_v29  ;;  %7430 = vmatprep.subr.bf16.mxu0 %v17717_v20  ;;  %v21609_v20 = vld [vmem:[#allocation8 + $0x1234] ss:$24 sps:$4 sm:$0xff]  }
 0x6ed   :  { %7390 = vmatpush1.bf16.msra.mxu1 %v21404_v41  ;;  %7431 = vmatpush1.bf16.msra.mxu0 %v17715_v55  ;;  %v21547_v41 = vld [vmem:[#allocation8 + $0x1320] ss:$24 sps:$4 sm:$0xff]   ;;  %v21611_v55 = vld [vmem:[#allocation8 + $0x123c] ss:$24 sps:$4 sm:$0xff]  }
 0x6ee   :  { %7391 = vmatprep.subr.bf16.mxu1 %v21410_v61  ;;  %7432 = vmatprep.subr.bf16.mxu0 %v17720_v38  ;;  %v21549_v61 = vld [vmem:[#allocation8 + $0x1328] ss:$24 sps:$4 sm:$0xff]  }
 0x6ef   :  { %v21615_v38 = vld [vmem:[#allocation8 + $0x1230] ss:$24 sps:$4 sm:$0xff]  }
 0x6f1   :  { %7392 = vmatpush1.bf16.msra.mxu1 %v21416_v28  ;;  %7433 = vmatpush1.bf16.msra.mxu0 %v17718_v58  ;;  %v21617_v58 = vld [vmem:[#allocation8 + $0x1238] ss:$24 sps:$4 sm:$0xff]  }
 0x6f2   :  { %7393 = vmatprep.subr.bf16.mxu1 %v21422_v32  ;;  %7434 = vmatprep.subr.bf16.mxu0 %v17723_v9  ;;  %v21621_v9 = vld [vmem:[#allocation8 + $0x1204] ss:$24 sps:$4 sm:$0xff]  }
 0x6f5   :  { %7394 = vmatpush1.bf16.msra.mxu1 %v21428_v18  ;;  %7435 = vmatpush1.bf16.msra.mxu0 %v17721_v12  ;;  %v21553_v18 = vld [vmem:[#allocation8 + $0x12f4] ss:$24 sps:$4 sm:$0xff]  }
 0x6f6   :  { %7758 = vmatprep.subr.bf16.mxu1 %v21524_v16  ;;  %7799 = vmatprep.subr.bf16.mxu0 %v21526_v2  ;;  %v21623_v12 = vld [vmem:[#allocation8 + $0x120c] ss:$24 sps:$4 sm:$0xff]  }
 0x6f8   :  { %v6311_v26 = vpop.f32.mrf.mxu1  ;;  %v6352_v46 = vpop.f32.mrf.mxu0  ;;  %7412 = vmatmul.mubr.bf16.vlgmr.msra.gmra.mxu1 %v7336_v3  ;;  %7453 = vmatmul.mubr.bf16.vlgmr.msra.gmra.mxu0 %v7336_v3  ;;  %v21627_v3 = vld [vmem:[#allocation8 + $0x1200] ss:$24 sps:$4 sm:$0xff]  }
 0x6f9   :  { %v21540_v23 = vadd.f32 %v6311_v26, %v21339_v22  ;;  %v21543_v29 = vadd.f32 %v6352_v46, %v21342_v11  ;;  %7759 = vmatpush1.bf16.msra.mxu1 %v21529_v56  ;;  %7800 = vmatpush1.bf16.msra.mxu0 %v21531_v63  ;;  %v21555_v22 = vld [vmem:[#allocation8 + $0x12fc] ss:$24 sps:$4 sm:$0xff]   ;;  %v21656_v46 = vld [vmem:[#allocation8 + $0x1330] ss:$24 sps:$4 sm:$0xff]  }
 0x6fa   :  { %v6313_v28 = vpop.f32.mrf.mxu1  ;;  %v6354_v32 = vpop.f32.mrf.mxu0  ;;  %7760 = vmatprep.subr.bf16.mxu1 %v21535_v54  ;;  %7801 = vmatprep.subr.bf16.mxu0 %v21537_v48 }
 0x6fb   :  { %v21558_v11 = vadd.f32 %v6313_v28, %v21357_v42  ;;  %v21561_v33 = vadd.f32 %v6354_v32, %v21360_v7  ;;  %7790 = vmatprep.mubr.bf16.mxu1 %v24500_v40  ;;  %7831 = vmatprep.mubr.bf16.mxu0 %v24500_v40  ;;  %v21573_v7 = vld [vmem:[#allocation8 + $0x12c4] ss:$24 sps:$4 sm:$0xff]  }
 0x6fc   :  { %v6315_v51 = vpop.f32.mrf.mxu1  ;;  %v6356_v35 = vpop.f32.mrf.mxu0  ;;  %v21660_v32 = vld [vmem:[#allocation8 + $0x1304] ss:$24 sps:$4 sm:$0xff]  }
 0x6fd   :  { %7761 = vmatpush1.bf16.msra.mxu1 %v21547_v41  ;;  %7802 = vmatpush1.bf16.msra.mxu0 %v21549_v61  ;;  %v21672_v35 = vld [vmem:[#allocation8 + $0x1300] ss:$24 sps:$4 sm:$0xff]  }
 0x6fe   :  { %v6316_v43 = vpop.f32.mrf.mxu1  ;;  %v6357_v42 = vpop.f32.mrf.mxu0  ;;  %7762 = vmatprep.subr.bf16.mxu1 %v21553_v18  ;;  %7803 = vmatprep.subr.bf16.mxu0 %v21555_v22 }
 0x6ff   :  { %v17786_v42 = vld [vmem:[#allocation8 + $0x12a4] ss:$24 sps:$4 sm:$0xff]  }
 0x701   :  { %7763 = vmatpush1.bf16.msra.mxu1 %v21567_v6  ;;  %7804 = vmatpush1.bf16.msra.mxu0 %v21569_v27 }
 0x702   :  { %7764 = vmatprep.subr.bf16.mxu1 %v21573_v7  ;;  %7805 = vmatprep.subr.bf16.mxu0 %v21575_v53 }
 0x705   :  { %7765 = vmatpush1.bf16.msra.mxu1 %v21579_v21  ;;  %7806 = vmatpush1.bf16.msra.mxu0 %v21581_v45 }
 0x706   :  { %7766 = vmatprep.subr.bf16.mxu1 %v21585_v0  ;;  %7807 = vmatprep.subr.bf16.mxu0 %v21587_v60 }
 0x709   :  { %7767 = vmatpush1.bf16.msra.mxu1 %v21591_v31  ;;  %7808 = vmatpush1.bf16.msra.mxu0 %v21593_v10 }
 0x70a   :  { %7768 = vmatprep.subr.bf16.mxu1 %v21597_v25  ;;  %7809 = vmatprep.subr.bf16.mxu0 %v21599_v57 }
 0x70d   :  { %7769 = vmatpush1.bf16.msra.mxu1 %v21603_v62  ;;  %7810 = vmatpush1.bf16.msra.mxu0 %v21605_v1 }
 0x70e   :  { %7770 = vmatprep.subr.bf16.mxu1 %v21609_v20  ;;  %7811 = vmatprep.subr.bf16.mxu0 %v21611_v55 }
 0x711   :  { %7771 = vmatpush1.bf16.msra.mxu1 %v21615_v38  ;;  %7812 = vmatpush1.bf16.msra.mxu0 %v21617_v58 }
 0x712   :  { %7772 = vmatprep.subr.bf16.mxu1 %v21621_v9  ;;  %7813 = vmatprep.subr.bf16.mxu0 %v21623_v12 }
 0x715   :  { %7773 = vmatpush1.bf16.msra.mxu1 %v21627_v3  ;;  %7814 = vmatpush1.bf16.msra.mxu0 %v21629_v19 }
 0x716   :  { %7840 = vmatprep.subr.bf16.mxu1 %v21633_v13  ;;  %7889 = vmatprep.subr.bf16.mxu0 %v21524_v16 }
 0x718   :  { %v6690_v34 = vpop.f32.mrf.mxu1  ;;  %v6731_v59 = vpop.f32.mrf.mxu0  ;;  %7791 = vmatmul.mubr.bf16.vlgmr.msra.gmra.mxu1 %v21640_v17  ;;  %7832 = vmatmul.mubr.bf16.vlgmr.msra.gmra.mxu0 %v21640_v17 }
 0x719   :  { %v21649_v8 = vadd.f32 %v6690_v34, %v21448_v4  ;;  %v21652_v26 = vadd.f32 %v6731_v59, %v21451_v15  ;;  %7841 = vmatpush1.bf16.msra.mxu1 %v21637_v50  ;;  %7890 = vmatpush1.bf16.msra.mxu0 %v21529_v56  ;;  %v17789_v34 = vld [vmem:[#allocation8 + $0x1274] ss:$24 sps:$4 sm:$0xff]   ;;  %v21768_v59 = vld [vmem:[#allocation8 + $0x1470] ss:$24 sps:$4 sm:$0xff]  }
 0x71a   :  { %v6692_v16 = vpop.f32.mrf.mxu1  ;;  %v6733_v28 = vpop.f32.mrf.mxu0  ;;  %7842 = vmatprep.subr.bf16.mxu1 %v21644_v24  ;;  %7891 = vmatprep.subr.bf16.mxu0 %v21535_v54 }
 0x71b   :  { %v21663_v4 = vadd.f32 %v6692_v16, %v21462_v44  ;;  %v21666_v15 = vadd.f32 %v6733_v28, %v21465_v37  ;;  %7872 = vmatprep.mubr.bf16.mxu1 %v24500_v40  ;;  %7921 = vmatprep.mubr.bf16.mxu0 %v24500_v40  ;;  %v17783_v44 = vld [vmem:[#allocation8 + $0x12d4] ss:$24 sps:$4 sm:$0xff]   ;;  %v17781_v37 = vld [vmem:[#allocation8 + $0x12d0] ss:$24 sps:$4 sm:$0xff]  }
 0x71c   :  { %v6694_v56 = vpop.f32.mrf.mxu1  ;;  %v6735_v51 = vpop.f32.mrf.mxu0  ;;  %v21776_v28 = vld [vmem:[#allocation8 + $0x144c] ss:$24 sps:$4 sm:$0xff]  }
 0x71d   :  { %7843 = vmatpush1.bf16.msra.mxu1 %v21656_v46  ;;  %7892 = vmatpush1.bf16.msra.mxu0 %v21547_v41  ;;  %v17784_v41 = vld [vmem:[#allocation8 + $0x12a0] ss:$24 sps:$4 sm:$0xff]   ;;  %v21786_v51 = vld [vmem:[#allocation8 + $0x1414] ss:$24 sps:$4 sm:$0xff]  }
 0x71e   :  { %v6695_v54 = vpop.f32.mrf.mxu1  ;;  %v6736_v43 = vpop.f32.mrf.mxu0  ;;  %7844 = vmatprep.subr.bf16.mxu1 %v21660_v32  ;;  %7893 = vmatprep.subr.bf16.mxu0 %v21553_v18  ;;  %v17787_v18 = vld [vmem:[#allocation8 + $0x1270] ss:$24 sps:$4 sm:$0xff]  }
 0x71f   :  { %v21782_v56 = vld [vmem:[#allocation8 + $0x1448] ss:$24 sps:$4 sm:$0xff]   ;;  %v21794_v43 = vld [vmem:[#allocation8 + $0x1418] ss:$24 sps:$4 sm:$0xff]  }
 0x720   :  { %v21792_v54 = vld [vmem:[#allocation8 + $0x1410] ss:$24 sps:$4 sm:$0xff]  }
 0x721   :  { %7845 = vmatpush1.bf16.msra.mxu1 %v21672_v35  ;;  %7894 = vmatpush1.bf16.msra.mxu0 %v21567_v6  ;;  %v17792_v6 = vld [vmem:[#allocation8 + $0x1244] ss:$24 sps:$4 sm:$0xff]  }
 0x722   :  { %7846 = vmatprep.subr.bf16.mxu1 %v17783_v44  ;;  %7895 = vmatprep.subr.bf16.mxu0 %v21573_v7  ;;  %v17790_v7 = vld [vmem:[#allocation8 + $0x1240] ss:$24 sps:$4 sm:$0xff]  }
 0x725   :  { %7847 = vmatpush1.bf16.msra.mxu1 %v17781_v37  ;;  %7896 = vmatpush1.bf16.msra.mxu0 %v21579_v21  ;;  %v17795_v21 = vld [vmem:[#allocation8 + $0x1214] ss:$24 sps:$4 sm:$0xff]  }
 0x726   :  { %7848 = vmatprep.subr.bf16.mxu1 %v17786_v42  ;;  %7897 = vmatprep.subr.bf16.mxu0 %v21585_v0  ;;  %v17793_v0 = vld [vmem:[#allocation8 + $0x1210] ss:$24 sps:$4 sm:$0xff]  }
 0x729   :  { %7849 = vmatpush1.bf16.msra.mxu1 %v17784_v41  ;;  %7898 = vmatpush1.bf16.msra.mxu0 %v21591_v31  ;;  %v7887_v31 = vrot.slane %v19521_v36, 6 }
 0x72a   :  { %7850 = vmatprep.subr.bf16.mxu1 %v17789_v34  ;;  %7899 = vmatprep.subr.bf16.mxu0 %v21597_v25 }
 0x72d   :  { %7851 = vmatpush1.bf16.msra.mxu1 %v17787_v18  ;;  %7900 = vmatpush1.bf16.msra.mxu0 %v21603_v62 }
 0x72e   :  { %7852 = vmatprep.subr.bf16.mxu1 %v17792_v6  ;;  %7901 = vmatprep.subr.bf16.mxu0 %v21609_v20 }
 0x731   :  { %7853 = vmatpush1.bf16.msra.mxu1 %v17790_v7  ;;  %7902 = vmatpush1.bf16.msra.mxu0 %v21615_v38 }
 0x732   :  { %7854 = vmatprep.subr.bf16.mxu1 %v17795_v21  ;;  %7903 = vmatprep.subr.bf16.mxu0 %v21621_v9 }
 0x735   :  { %7855 = vmatpush1.bf16.msra.mxu1 %v17793_v0  ;;  %7904 = vmatpush1.bf16.msra.mxu0 %v21627_v3 }
 0x736   :  { %7930 = vmatprep.subr.bf16.mxu1 %v21526_v2  ;;  %7971 = vmatprep.subr.bf16.mxu0 %v21633_v13 }
 0x738   :  { %v6772_v25 = vpop.f32.mrf.mxu1  ;;  %v6821_v62 = vpop.f32.mrf.mxu0  ;;  %7873 = vmatmul.mubr.bf16.vlgmr.msra.gmra.mxu1 %v21640_v17  ;;  %7922 = vmatmul.mubr.bf16.vlgmr.msra.gmra.mxu0 %v7887_v31 }
 0x739   :  { %v21693_v20 = vadd.f32 %v6772_v25, %v21492_v30  ;;  %v21696_v38 = vadd.f32 %v6821_v62, %v21495_v52  ;;  %7931 = vmatpush1.bf16.msra.mxu1 %v21531_v63  ;;  %7972 = vmatpush1.bf16.msra.mxu0 %v21637_v50  ;;  %v21830_v25 = vld [vmem:[#allocation8 + $0x1388] ss:$24 sps:$4 sm:$0xff]   ;;  %v21834_v62 = vld [vmem:[#allocation8 + $0x14e4] ss:$24 sps:$4 sm:$0xff]  }
 0x73a   :  { %v6774_v9 = vpop.f32.mrf.mxu1  ;;  %v6823_v3 = vpop.f32.mrf.mxu0  ;;  %7932 = vmatprep.subr.bf16.mxu1 %v21537_v48  ;;  %7973 = vmatprep.subr.bf16.mxu0 %v21644_v24 }
 0x73b   :  { %v21703_v2 = vadd.f32 %v6774_v9, %v21502_v49  ;;  %v21706_v13 = vadd.f32 %v6823_v3, %v21505_v47  ;;  %7962 = vmatprep.mubr.bf16.mxu1 %v24500_v40  ;;  %8003 = vmatprep.mubr.bf16.mxu0 %v24500_v40  ;;  %v21725_v49 = vld [vmem:[#allocation8 + $0x14d4] ss:$24 sps:$4 sm:$0xff]   ;;  %v21838_v9 = vld [vmem:[#allocation8 + $0x14e0] ss:$24 sps:$4 sm:$0xff]   ;;  %v21841_v3 = vrot.slane %v24527_v5, 6 }
 0x73c   :  { %v6776_v30 = vpop.f32.mrf.mxu1  ;;  %v6825_v52 = vpop.f32.mrf.mxu0  ;;  %v21727_v47 = vld [vmem:[#allocation8 + $0x14dc] ss:$24 sps:$4 sm:$0xff]  }
 0x73d   :  { %7933 = vmatpush1.bf16.msra.mxu1 %v21549_v61  ;;  %7974 = vmatpush1.bf16.msra.mxu0 %v21656_v46  ;;  %v21730_v61 = vld [vmem:[#allocation8 + $0x14d0] ss:$24 sps:$4 sm:$0xff]   ;;  %v21845_v30 = vld [vmem:[#allocation8 + $0x14b4] ss:$24 sps:$4 sm:$0xff]  }
 0x73e   :  { %v6777_v63 = vpop.f32.mrf.mxu1  ;;  %v6826_v48 = vpop.f32.mrf.mxu0  ;;  %7934 = vmatprep.subr.bf16.mxu1 %v21555_v22  ;;  %7975 = vmatprep.subr.bf16.mxu0 %v21660_v32  ;;  %v21732_v22 = vld [vmem:[#allocation8 + $0x14d8] ss:$24 sps:$4 sm:$0xff]  }
 0x73f   :  { %v21770_v46 = vld [vmem:[#allocation8 + $0x1478] ss:$24 sps:$4 sm:$0xff]  }
 0x740   :  { %v21780_v32 = vld [vmem:[#allocation8 + $0x1440] ss:$24 sps:$4 sm:$0xff]  }
 0x741   :  { %7935 = vmatpush1.bf16.msra.mxu1 %v21569_v27  ;;  %7976 = vmatpush1.bf16.msra.mxu0 %v21672_v35  ;;  %v21736_v27 = vld [vmem:[#allocation8 + $0x14a4] ss:$24 sps:$4 sm:$0xff]  }
 0x742   :  { %7936 = vmatprep.subr.bf16.mxu1 %v21575_v53  ;;  %7977 = vmatprep.subr.bf16.mxu0 %v17783_v44  ;;  %v21738_v53 = vld [vmem:[#allocation8 + $0x14ac] ss:$24 sps:$4 sm:$0xff]   ;;  %v21788_v35 = vld [vmem:[#allocation8 + $0x141c] ss:$24 sps:$4 sm:$0xff]  }
 0x743   :  { %v21798_v44 = vld [vmem:[#allocation8 + $0x13e4] ss:$24 sps:$4 sm:$0xff]  }
 0x745   :  { %7937 = vmatpush1.bf16.msra.mxu1 %v21581_v45  ;;  %7978 = vmatpush1.bf16.msra.mxu0 %v17781_v37  ;;  %v21800_v37 = vld [vmem:[#allocation8 + $0x13ec] ss:$24 sps:$4 sm:$0xff]  }
 0x746   :  { %7938 = vmatprep.subr.bf16.mxu1 %v21587_v60  ;;  %7979 = vmatprep.subr.bf16.mxu0 %v17786_v42  ;;  %v21804_v42 = vld [vmem:[#allocation8 + $0x13e0] ss:$24 sps:$4 sm:$0xff]  }
 0x749   :  { %7939 = vmatpush1.bf16.msra.mxu1 %v21593_v10  ;;  %7980 = vmatpush1.bf16.msra.mxu0 %v17784_v41  ;;  %v21806_v41 = vld [vmem:[#allocation8 + $0x13e8] ss:$24 sps:$4 sm:$0xff]  }
 0x74a   :  { %7940 = vmatprep.subr.bf16.mxu1 %v21599_v57  ;;  %7981 = vmatprep.subr.bf16.mxu0 %v17789_v34  ;;  %v21810_v34 = vld [vmem:[#allocation8 + $0x13b4] ss:$24 sps:$4 sm:$0xff]  }
 0x74d   :  { %7941 = vmatpush1.bf16.msra.mxu1 %v21605_v1  ;;  %7982 = vmatpush1.bf16.msra.mxu0 %v17787_v18  ;;  %v21748_v1 = vld [vmem:[#allocation8 + $0x14a0] ss:$24 sps:$4 sm:$0xff]   ;;  %v21812_v18 = vld [vmem:[#allocation8 + $0x13bc] ss:$24 sps:$4 sm:$0xff]  }
 0x74e   :  { %7942 = vmatprep.subr.bf16.mxu1 %v21611_v55  ;;  %7983 = vmatprep.subr.bf16.mxu0 %v17792_v6  ;;  %v21750_v55 = vld [vmem:[#allocation8 + $0x14a8] ss:$24 sps:$4 sm:$0xff]  }
 0x74f   :  { %v21816_v6 = vld [vmem:[#allocation8 + $0x13b0] ss:$24 sps:$4 sm:$0xff]  }
 0x751   :  { %7943 = vmatpush1.bf16.msra.mxu1 %v21617_v58  ;;  %7984 = vmatpush1.bf16.msra.mxu0 %v17790_v7  ;;  %v21818_v7 = vld [vmem:[#allocation8 + $0x13b8] ss:$24 sps:$4 sm:$0xff]  }
 0x752   :  { %7944 = vmatprep.subr.bf16.mxu1 %v21623_v12  ;;  %7985 = vmatprep.subr.bf16.mxu0 %v17795_v21  ;;  %v21822_v21 = vld [vmem:[#allocation8 + $0x1384] ss:$24 sps:$4 sm:$0xff]  }
 0x755   :  { %7945 = vmatpush1.bf16.msra.mxu1 %v21629_v19  ;;  %7986 = vmatpush1.bf16.msra.mxu0 %v17793_v0  ;;  %v21754_v19 = vld [vmem:[#allocation8 + $0x1474] ss:$24 sps:$4 sm:$0xff]  }
 0x756   :  { %8309 = vmatprep.subr.bf16.mxu1 %v21725_v49  ;;  %8350 = vmatprep.subr.bf16.mxu0 %v21727_v47  ;;  %v21824_v0 = vld [vmem:[#allocation8 + $0x138c] ss:$24 sps:$4 sm:$0xff]  }
 0x758   :  { %v6862_v45 = vpop.f32.mrf.mxu1  ;;  %v6903_v60 = vpop.f32.mrf.mxu0  ;;  %7963 = vmatmul.mubr.bf16.vlgmr.msra.gmra.mxu1 %v7887_v31  ;;  %8004 = vmatmul.mubr.bf16.vlgmr.msra.gmra.mxu0 %v7887_v31  ;;  %v21828_v31 = vld [vmem:[#allocation8 + $0x1380] ss:$24 sps:$4 sm:$0xff]  }
 0x759   :  { %v21741_v10 = vadd.f32 %v6862_v45, %v21540_v23  ;;  %v21744_v57 = vadd.f32 %v6903_v60, %v21543_v29  ;;  %8310 = vmatpush1.bf16.msra.mxu1 %v21730_v61  ;;  %8351 = vmatpush1.bf16.msra.mxu0 %v21732_v22  ;;  %v21756_v23 = vld [vmem:[#allocation8 + $0x147c] ss:$24 sps:$4 sm:$0xff]   ;;  %v21857_v60 = vld [vmem:[#allocation8 + $0x14b0] ss:$24 sps:$4 sm:$0xff]  }
 0x75a   :  { %v6864_v58 = vpop.f32.mrf.mxu1  ;;  %v6905_v12 = vpop.f32.mrf.mxu0  ;;  %8311 = vmatprep.subr.bf16.mxu1 %v21736_v27  ;;  %8352 = vmatprep.subr.bf16.mxu0 %v21738_v53 }
 0x75b   :  { %v21759_v29 = vadd.f32 %v6864_v58, %v21558_v11  ;;  %v21762_v50 = vadd.f32 %v6905_v12, %v21561_v33  ;;  %8341 = vmatprep.mubr.bf16.mxu1 %v24500_v40  ;;  %8382 = vmatprep.mubr.bf16.mxu0 %v24500_v40  ;;  %v21774_v33 = vld [vmem:[#allocation8 + $0x1444] ss:$24 sps:$4 sm:$0xff]  }
 0x75c   :  { %v6866_v17 = vpop.f32.mrf.mxu1  ;;  %v6907_v24 = vpop.f32.mrf.mxu0  ;;  %v21861_v12 = vld [vmem:[#allocation8 + $0x1484] ss:$24 sps:$4 sm:$0xff]  }
 0x75d   :  { %8312 = vmatpush1.bf16.msra.mxu1 %v21748_v1  ;;  %8353 = vmatpush1.bf16.msra.mxu0 %v21750_v55  ;;  %v21873_v24 = vld [vmem:[#allocation8 + $0x1480] ss:$24 sps:$4 sm:$0xff]  }
 0x75e   :  { %v6867_v16 = vpop.f32.mrf.mxu1  ;;  %v6908_v11 = vpop.f32.mrf.mxu0  ;;  %8313 = vmatprep.subr.bf16.mxu1 %v21754_v19  ;;  %8354 = vmatprep.subr.bf16.mxu0 %v21756_v23 }
 0x75f   :  { %v17858_v11 = vld [vmem:[#allocation8 + $0x1424] ss:$24 sps:$4 sm:$0xff]  }
 0x761   :  { %8314 = vmatpush1.bf16.msra.mxu1 %v21768_v59  ;;  %8355 = vmatpush1.bf16.msra.mxu0 %v21770_v46 }
 0x762   :  { %8315 = vmatprep.subr.bf16.mxu1 %v21774_v33  ;;  %8356 = vmatprep.subr.bf16.mxu0 %v21776_v28 }
 0x765   :  { %8316 = vmatpush1.bf16.msra.mxu1 %v21780_v32  ;;  %8357 = vmatpush1.bf16.msra.mxu0 %v21782_v56 }
 0x766   :  { %8317 = vmatprep.subr.bf16.mxu1 %v21786_v51  ;;  %8358 = vmatprep.subr.bf16.mxu0 %v21788_v35 }
 0x769   :  { %8318 = vmatpush1.bf16.msra.mxu1 %v21792_v54  ;;  %8359 = vmatpush1.bf16.msra.mxu0 %v21794_v43 }
 0x76a   :  { %8319 = vmatprep.subr.bf16.mxu1 %v21798_v44  ;;  %8360 = vmatprep.subr.bf16.mxu0 %v21800_v37 }
 0x76d   :  { %8320 = vmatpush1.bf16.msra.mxu1 %v21804_v42  ;;  %8361 = vmatpush1.bf16.msra.mxu0 %v21806_v41 }
 0x76e   :  { %8321 = vmatprep.subr.bf16.mxu1 %v21810_v34  ;;  %8362 = vmatprep.subr.bf16.mxu0 %v21812_v18 }
 0x771   :  { %8322 = vmatpush1.bf16.msra.mxu1 %v21816_v6  ;;  %8363 = vmatpush1.bf16.msra.mxu0 %v21818_v7 }
 0x772   :  { %8323 = vmatprep.subr.bf16.mxu1 %v21822_v21  ;;  %8364 = vmatprep.subr.bf16.mxu0 %v21824_v0 }
 0x775   :  { %8324 = vmatpush1.bf16.msra.mxu1 %v21828_v31  ;;  %8365 = vmatpush1.bf16.msra.mxu0 %v21830_v25 }
 0x776   :  { %8391 = vmatprep.subr.bf16.mxu1 %v21834_v62  ;;  %8440 = vmatprep.subr.bf16.mxu0 %v21725_v49 }
 0x778   :  { %v7241_v52 = vpop.f32.mrf.mxu1  ;;  %v7282_v63 = vpop.f32.mrf.mxu0  ;;  %8342 = vmatmul.mubr.bf16.vlgmr.msra.gmra.mxu1 %v21841_v3  ;;  %8383 = vmatmul.mubr.bf16.vlgmr.msra.gmra.mxu0 %v21841_v3 }
 0x779   :  { %v21850_v48 = vadd.f32 %v7241_v52, %v21649_v8  ;;  %v21853_v45 = vadd.f32 %v7282_v63, %v21652_v26  ;;  %8392 = vmatpush1.bf16.msra.mxu1 %v21838_v9  ;;  %8441 = vmatpush1.bf16.msra.mxu0 %v21730_v61  ;;  %v17861_v52 = vld [vmem:[#allocation8 + $0x13f4] ss:$24 sps:$4 sm:$0xff]   ;;  %v21969_v63 = vld [vmem:[#allocation8 + $0x15f0] ss:$24 sps:$4 sm:$0xff]  }
 0x77a   :  { %v7243_v49 = vpop.f32.mrf.mxu1  ;;  %v7284_v58 = vpop.f32.mrf.mxu0  ;;  %8393 = vmatprep.subr.bf16.mxu1 %v21845_v30  ;;  %8442 = vmatprep.subr.bf16.mxu0 %v21736_v27 }
 0x77b   :  { %v21864_v8 = vadd.f32 %v7243_v49, %v21663_v4  ;;  %v21867_v26 = vadd.f32 %v7284_v58, %v21666_v15  ;;  %8423 = vmatprep.mubr.bf16.mxu1 %v24500_v40  ;;  %8472 = vmatprep.mubr.bf16.mxu0 %v24500_v40  ;;  %v17855_v4 = vld [vmem:[#allocation8 + $0x1454] ss:$24 sps:$4 sm:$0xff]   ;;  %v17853_v15 = vld [vmem:[#allocation8 + $0x1450] ss:$24 sps:$4 sm:$0xff]  }
 0x77c   :  { %v7245_v61 = vpop.f32.mrf.mxu1  ;;  %v7286_v17 = vpop.f32.mrf.mxu0  ;;  %v21977_v58 = vld [vmem:[#allocation8 + $0x15cc] ss:$24 sps:$4 sm:$0xff]  }
 0x77d   :  { %8394 = vmatpush1.bf16.msra.mxu1 %v21857_v60  ;;  %8443 = vmatpush1.bf16.msra.mxu0 %v21748_v1  ;;  %v17856_v1 = vld [vmem:[#allocation8 + $0x1420] ss:$24 sps:$4 sm:$0xff]   ;;  %v21987_v17 = vld [vmem:[#allocation8 + $0x1594] ss:$24 sps:$4 sm:$0xff]  }
 0x77e   :  { %v7246_v27 = vpop.f32.mrf.mxu1  ;;  %v7287_v16 = vpop.f32.mrf.mxu0  ;;  %8395 = vmatprep.subr.bf16.mxu1 %v21861_v12  ;;  %8444 = vmatprep.subr.bf16.mxu0 %v21754_v19  ;;  %v17859_v19 = vld [vmem:[#allocation8 + $0x13f0] ss:$24 sps:$4 sm:$0xff]  }
 0x77f   :  { %v21983_v61 = vld [vmem:[#allocation8 + $0x15c8] ss:$24 sps:$4 sm:$0xff]   ;;  %v21995_v16 = vld [vmem:[#allocation8 + $0x1598] ss:$24 sps:$4 sm:$0xff]  }
 0x780   :  { %v21993_v27 = vld [vmem:[#allocation8 + $0x1590] ss:$24 sps:$4 sm:$0xff]  }
 0x781   :  { %8396 = vmatpush1.bf16.msra.mxu1 %v21873_v24  ;;  %8445 = vmatpush1.bf16.msra.mxu0 %v21768_v59  ;;  %v17864_v59 = vld [vmem:[#allocation8 + $0x13c4] ss:$24 sps:$4 sm:$0xff]  }
 0x782   :  { %8397 = vmatprep.subr.bf16.mxu1 %v17855_v4  ;;  %8446 = vmatprep.subr.bf16.mxu0 %v21774_v33  ;;  %v17862_v33 = vld [vmem:[#allocation8 + $0x13c0] ss:$24 sps:$4 sm:$0xff]  }
 0x785   :  { %8398 = vmatpush1.bf16.msra.mxu1 %v17853_v15  ;;  %8447 = vmatpush1.bf16.msra.mxu0 %v21780_v32  ;;  %v17867_v32 = vld [vmem:[#allocation8 + $0x1394] ss:$24 sps:$4 sm:$0xff]  }
 0x786   :  { %8399 = vmatprep.subr.bf16.mxu1 %v17858_v11  ;;  %8448 = vmatprep.subr.bf16.mxu0 %v21786_v51  ;;  %v17865_v51 = vld [vmem:[#allocation8 + $0x1390] ss:$24 sps:$4 sm:$0xff]  }
 0x789   :  { %8400 = vmatpush1.bf16.msra.mxu1 %v17856_v1  ;;  %8449 = vmatpush1.bf16.msra.mxu0 %v21792_v54  ;;  %v8438_v54 = vrot.slane %v19524_v39, 6 }
 0x78a   :  { %8401 = vmatprep.subr.bf16.mxu1 %v17861_v52  ;;  %8450 = vmatprep.subr.bf16.mxu0 %v21798_v44 }
 0x78d   :  { %8402 = vmatpush1.bf16.msra.mxu1 %v17859_v19  ;;  %8451 = vmatpush1.bf16.msra.mxu0 %v21804_v42 }
 0x78e   :  { %8403 = vmatprep.subr.bf16.mxu1 %v17864_v59  ;;  %8452 = vmatprep.subr.bf16.mxu0 %v21810_v34 }
 0x791   :  { %8404 = vmatpush1.bf16.msra.mxu1 %v17862_v33  ;;  %8453 = vmatpush1.bf16.msra.mxu0 %v21816_v6 }
 0x792   :  { %8405 = vmatprep.subr.bf16.mxu1 %v17867_v32  ;;  %8454 = vmatprep.subr.bf16.mxu0 %v21822_v21 }
 0x795   :  { %8406 = vmatpush1.bf16.msra.mxu1 %v17865_v51  ;;  %8455 = vmatpush1.bf16.msra.mxu0 %v21828_v31 }
 0x796   :  { %8481 = vmatprep.subr.bf16.mxu1 %v21727_v47  ;;  %8522 = vmatprep.subr.bf16.mxu0 %v21834_v62 }
 0x798   :  { %v7323_v44 = vpop.f32.mrf.mxu1  ;;  %v7372_v42 = vpop.f32.mrf.mxu0  ;;  %8424 = vmatmul.mubr.bf16.vlgmr.msra.gmra.mxu1 %v21841_v3  ;;  %8473 = vmatmul.mubr.bf16.vlgmr.msra.gmra.mxu0 %v8438_v54 }
 0x799   :  { %v21894_v34 = vadd.f32 %v7323_v44, %v21693_v20  ;;  %v21897_v6 = vadd.f32 %v7372_v42, %v21696_v38  ;;  %8482 = vmatpush1.bf16.msra.mxu1 %v21732_v22  ;;  %8523 = vmatpush1.bf16.msra.mxu0 %v21838_v9  ;;  %v22031_v44 = vld [vmem:[#allocation8 + $0x1508] ss:$24 sps:$4 sm:$0xff]   ;;  %v22035_v42 = vld [vmem:[#allocation8 + $0x1664] ss:$24 sps:$4 sm:$0xff]  }
 0x79a   :  { %v7325_v21 = vpop.f32.mrf.mxu1  ;;  %v7374_v31 = vpop.f32.mrf.mxu0  ;;  %8483 = vmatprep.subr.bf16.mxu1 %v21738_v53  ;;  %8524 = vmatprep.subr.bf16.mxu0 %v21845_v30 }
 0x79b   :  { %v21904_v47 = vadd.f32 %v7325_v21, %v21703_v2  ;;  %v21907_v62 = vadd.f32 %v7374_v31, %v21706_v13  ;;  %8513 = vmatprep.mubr.bf16.mxu1 %v24500_v40  ;;  %8554 = vmatprep.mubr.bf16.mxu0 %v24500_v40  ;;  %v21926_v2 = vld [vmem:[#allocation8 + $0x1654] ss:$24 sps:$4 sm:$0xff]   ;;  %v22039_v21 = vld [vmem:[#allocation8 + $0x1660] ss:$24 sps:$4 sm:$0xff]   ;;  %v22042_v31 = vrot.slane %v19237_v14, 7 }
 0x79c   :  { %v7327_v20 = vpop.f32.mrf.mxu1  ;;  %v7376_v38 = vpop.f32.mrf.mxu0  ;;  %v21928_v13 = vld [vmem:[#allocation8 + $0x165c] ss:$24 sps:$4 sm:$0xff]   ;;  %v22058_v14 = vld [vmem:[#allocation8 + $0x1630] ss:$24 sps:$4 sm:$0xff]  }
 0x79d   :  { %8484 = vmatpush1.bf16.msra.mxu1 %v21750_v55  ;;  %8525 = vmatpush1.bf16.msra.mxu0 %v21857_v60  ;;  %v21931_v55 = vld [vmem:[#allocation8 + $0x1650] ss:$24 sps:$4 sm:$0xff]   ;;  %v22046_v20 = vld [vmem:[#allocation8 + $0x1634] ss:$24 sps:$4 sm:$0xff]  }
 0x79e   :  { %v7328_v22 = vpop.f32.mrf.mxu1  ;;  %v7377_v53 = vpop.f32.mrf.mxu0  ;;  %8485 = vmatprep.subr.bf16.mxu1 %v21756_v23  ;;  %8526 = vmatprep.subr.bf16.mxu0 %v21861_v12  ;;  %v21933_v23 = vld [vmem:[#allocation8 + $0x1658] ss:$24 sps:$4 sm:$0xff]  }
 0x79f   :  { %v21971_v60 = vld [vmem:[#allocation8 + $0x15f8] ss:$24 sps:$4 sm:$0xff]  }
 0x7a0   :  { %v21981_v12 = vld [vmem:[#allocation8 + $0x15c0] ss:$24 sps:$4 sm:$0xff]  }
 0x7a1   :  { %8486 = vmatpush1.bf16.msra.mxu1 %v21770_v46  ;;  %8527 = vmatpush1.bf16.msra.mxu0 %v21873_v24  ;;  %v21937_v46 = vld [vmem:[#allocation8 + $0x1624] ss:$24 sps:$4 sm:$0xff]  }
 0x7a2   :  { %8487 = vmatprep.subr.bf16.mxu1 %v21776_v28  ;;  %8528 = vmatprep.subr.bf16.mxu0 %v17855_v4  ;;  %v21939_v28 = vld [vmem:[#allocation8 + $0x162c] ss:$24 sps:$4 sm:$0xff]   ;;  %v21989_v24 = vld [vmem:[#allocation8 + $0x159c] ss:$24 sps:$4 sm:$0xff]  }
 0x7a3   :  { %v21999_v4 = vld [vmem:[#allocation8 + $0x1564] ss:$24 sps:$4 sm:$0xff]  }
 0x7a5   :  { %8488 = vmatpush1.bf16.msra.mxu1 %v21782_v56  ;;  %8529 = vmatpush1.bf16.msra.mxu0 %v17853_v15  ;;  %v22001_v15 = vld [vmem:[#allocation8 + $0x156c] ss:$24 sps:$4 sm:$0xff]  }
 0x7a6   :  { %8489 = vmatprep.subr.bf16.mxu1 %v21788_v35  ;;  %8530 = vmatprep.subr.bf16.mxu0 %v17858_v11  ;;  %v22005_v11 = vld [vmem:[#allocation8 + $0x1560] ss:$24 sps:$4 sm:$0xff]  }
 0x7a9   :  { %8490 = vmatpush1.bf16.msra.mxu1 %v21794_v43  ;;  %8531 = vmatpush1.bf16.msra.mxu0 %v17856_v1  ;;  %v22007_v1 = vld [vmem:[#allocation8 + $0x1568] ss:$24 sps:$4 sm:$0xff]  }
 0x7aa   :  { %8491 = vmatprep.subr.bf16.mxu1 %v21800_v37  ;;  %8532 = vmatprep.subr.bf16.mxu0 %v17861_v52  ;;  %v22011_v52 = vld [vmem:[#allocation8 + $0x1534] ss:$24 sps:$4 sm:$0xff]  }
 0x7ad   :  { %8492 = vmatpush1.bf16.msra.mxu1 %v21806_v41  ;;  %8533 = vmatpush1.bf16.msra.mxu0 %v17859_v19  ;;  %v21949_v41 = vld [vmem:[#allocation8 + $0x1620] ss:$24 sps:$4 sm:$0xff]   ;;  %v22013_v19 = vld [vmem:[#allocation8 + $0x153c] ss:$24 sps:$4 sm:$0xff]  }
 0x7ae   :  { %8493 = vmatprep.subr.bf16.mxu1 %v21812_v18  ;;  %8534 = vmatprep.subr.bf16.mxu0 %v17864_v59  ;;  %v21951_v18 = vld [vmem:[#allocation8 + $0x1628] ss:$24 sps:$4 sm:$0xff]  }
 0x7af   :  { %v22017_v59 = vld [vmem:[#allocation8 + $0x1530] ss:$24 sps:$4 sm:$0xff]  }
 0x7b1   :  { %8494 = vmatpush1.bf16.msra.mxu1 %v21818_v7  ;;  %8535 = vmatpush1.bf16.msra.mxu0 %v17862_v33  ;;  %v22019_v33 = vld [vmem:[#allocation8 + $0x1538] ss:$24 sps:$4 sm:$0xff]  }
 0x7b2   :  { %8495 = vmatprep.subr.bf16.mxu1 %v21824_v0  ;;  %8536 = vmatprep.subr.bf16.mxu0 %v17867_v32  ;;  %v22023_v32 = vld [vmem:[#allocation8 + $0x1504] ss:$24 sps:$4 sm:$0xff]  }
 0x7b5   :  { %8496 = vmatpush1.bf16.msra.mxu1 %v21830_v25  ;;  %8537 = vmatpush1.bf16.msra.mxu0 %v17865_v51  ;;  %v21955_v25 = vld [vmem:[#allocation8 + $0x15f4] ss:$24 sps:$4 sm:$0xff]  }
 0x7b6   :  { %8860 = vmatprep.subr.bf16.mxu1 %v21926_v2  ;;  %8901 = vmatprep.subr.bf16.mxu0 %v21928_v13  ;;  %v22025_v51 = vld [vmem:[#allocation8 + $0x150c] ss:$24 sps:$4 sm:$0xff]  }
 0x7b8   :  { %v7413_v56 = vpop.f32.mrf.mxu1  ;;  %v7454_v35 = vpop.f32.mrf.mxu0  ;;  %8514 = vmatmul.mubr.bf16.vlgmr.msra.gmra.mxu1 %v8438_v54  ;;  %8555 = vmatmul.mubr.bf16.vlgmr.msra.gmra.mxu0 %v8438_v54  ;;  %v22029_v54 = vld [vmem:[#allocation8 + $0x1500] ss:$24 sps:$4 sm:$0xff]  }
 0x7b9   :  { %v21942_v43 = vadd.f32 %v7413_v56, %v21741_v10  ;;  %v21945_v37 = vadd.f32 %v7454_v35, %v21744_v57  ;;  %8861 = vmatpush1.bf16.msra.mxu1 %v21931_v55  ;;  %8902 = vmatpush1.bf16.msra.mxu0 %v21933_v23  ;;  %v21957_v10 = vld [vmem:[#allocation8 + $0x15fc] ss:$24 sps:$4 sm:$0xff]  }
 0x7ba   :  { %v7415_v7 = vpop.f32.mrf.mxu1  ;;  %v7456_v0 = vpop.f32.mrf.mxu0  ;;  %8862 = vmatprep.subr.bf16.mxu1 %v21937_v46  ;;  %8903 = vmatprep.subr.bf16.mxu0 %v21939_v28 }
 0x7bb   :  { %v21960_v57 = vadd.f32 %v7415_v7, %v21759_v29  ;;  %v21963_v9 = vadd.f32 %v7456_v0, %v21762_v50  ;;  %8892 = vmatprep.mubr.bf16.mxu1 %v24500_v40  ;;  %8933 = vmatprep.mubr.bf16.mxu0 %v24500_v40  ;;  %v21975_v50 = vld [vmem:[#allocation8 + $0x15c4] ss:$24 sps:$4 sm:$0xff]  }
 0x7bc   :  { %v7417_v3 = vpop.f32.mrf.mxu1  ;;  %v7458_v30 = vpop.f32.mrf.mxu0  ;;  %v22062_v7 = vld [vmem:[#allocation8 + $0x1604] ss:$24 sps:$4 sm:$0xff]  }
 0x7bd   :  { %8863 = vmatpush1.bf16.msra.mxu1 %v21949_v41  ;;  %8904 = vmatpush1.bf16.msra.mxu0 %v21951_v18  ;;  %v22074_v3 = vld [vmem:[#allocation8 + $0x1600] ss:$24 sps:$4 sm:$0xff]  }
 0x7be   :  { %v7418_v49 = vpop.f32.mrf.mxu1  ;;  %v7459_v29 = vpop.f32.mrf.mxu0  ;;  %8864 = vmatprep.subr.bf16.mxu1 %v21955_v25  ;;  %8905 = vmatprep.subr.bf16.mxu0 %v21957_v10 }
 0x7bf   :  { %v17930_v49 = vld [vmem:[#allocation8 + $0x15a4] ss:$24 sps:$4 sm:$0xff]   ;;  %v17933_v29 = vld [vmem:[#allocation8 + $0x1574] ss:$24 sps:$4 sm:$0xff]  }
 0x7c1   :  { %8865 = vmatpush1.bf16.msra.mxu1 %v21969_v63  ;;  %8906 = vmatpush1.bf16.msra.mxu0 %v21971_v60 }
 0x7c2   :  { %8866 = vmatprep.subr.bf16.mxu1 %v21975_v50  ;;  %8907 = vmatprep.subr.bf16.mxu0 %v21977_v58 }
 0x7c5   :  { %8867 = vmatpush1.bf16.msra.mxu1 %v21981_v12  ;;  %8908 = vmatpush1.bf16.msra.mxu0 %v21983_v61 }
 0x7c6   :  { %8868 = vmatprep.subr.bf16.mxu1 %v21987_v17  ;;  %8909 = vmatprep.subr.bf16.mxu0 %v21989_v24 }
 0x7c9   :  { %8869 = vmatpush1.bf16.msra.mxu1 %v21993_v27  ;;  %8910 = vmatpush1.bf16.msra.mxu0 %v21995_v16 }
 0x7ca   :  { %8870 = vmatprep.subr.bf16.mxu1 %v21999_v4  ;;  %8911 = vmatprep.subr.bf16.mxu0 %v22001_v15 }
 0x7cd   :  { %8871 = vmatpush1.bf16.msra.mxu1 %v22005_v11  ;;  %8912 = vmatpush1.bf16.msra.mxu0 %v22007_v1 }
 0x7ce   :  { %8872 = vmatprep.subr.bf16.mxu1 %v22011_v52  ;;  %8913 = vmatprep.subr.bf16.mxu0 %v22013_v19 }
 0x7d1   :  { %8873 = vmatpush1.bf16.msra.mxu1 %v22017_v59  ;;  %8914 = vmatpush1.bf16.msra.mxu0 %v22019_v33 }
 0x7d2   :  { %8874 = vmatprep.subr.bf16.mxu1 %v22023_v32  ;;  %8915 = vmatprep.subr.bf16.mxu0 %v22025_v51 }
 0x7d5   :  { %8875 = vmatpush1.bf16.msra.mxu1 %v22029_v54  ;;  %8916 = vmatpush1.bf16.msra.mxu0 %v22031_v44 }
 0x7d6   :  { %8942 = vmatprep.subr.bf16.mxu1 %v22035_v42  ;;  %8991 = vmatprep.subr.bf16.mxu0 %v21926_v2 }
 0x7d8   :  { %v7792_v38 = vpop.f32.mrf.mxu1  ;;  %v7833_v22 = vpop.f32.mrf.mxu0  ;;  %8893 = vmatmul.mubr.bf16.vlgmr.msra.gmra.mxu1 %v22042_v31  ;;  %8934 = vmatmul.mubr.bf16.vlgmr.msra.gmra.mxu0 %v22042_v31 }
 0x7d9   :  { %v22051_v53 = vadd.f32 %v7792_v38, %v21850_v48  ;;  %v22054_v56 = vadd.f32 %v7833_v22, %v21853_v45  ;;  %8943 = vmatpush1.bf16.msra.mxu1 %v22039_v21  ;;  %8992 = vmatpush1.bf16.msra.mxu0 %v21931_v55  ;;  %v22172_v38 = vld [vmem:[#allocation8 + $0x1778] ss:$24 sps:$4 sm:$0xff]  }
 0x7da   :  { %v7794_v2 = vpop.f32.mrf.mxu1  ;;  %v7835_v35 = vpop.f32.mrf.mxu0  ;;  %8944 = vmatprep.subr.bf16.mxu1 %v22046_v20  ;;  %8993 = vmatprep.subr.bf16.mxu0 %v21937_v46 }
 0x7db   :  { %v22065_v48 = vadd.f32 %v7794_v2, %v21864_v8  ;;  %v22068_v45 = vadd.f32 %v7835_v35, %v21867_v26  ;;  %8974 = vmatprep.mubr.bf16.mxu1 %v24500_v40  ;;  %9023 = vmatprep.mubr.bf16.mxu0 %v24500_v40  ;;  %v17927_v8 = vld [vmem:[#allocation8 + $0x15d4] ss:$24 sps:$4 sm:$0xff]   ;;  %v17925_v26 = vld [vmem:[#allocation8 + $0x15d0] ss:$24 sps:$4 sm:$0xff]   ;;  %v22182_v2 = vld [vmem:[#allocation8 + $0x1740] ss:$24 sps:$4 sm:$0xff]  }
 0x7dc   :  { %v7796_v55 = vpop.f32.mrf.mxu1  ;;  %v7837_v0 = vpop.f32.mrf.mxu0  ;;  %v22184_v35 = vld [vmem:[#allocation8 + $0x1748] ss:$24 sps:$4 sm:$0xff]  }
 0x7dd   :  { %8945 = vmatpush1.bf16.msra.mxu1 %v22058_v14  ;;  %8994 = vmatpush1.bf16.msra.mxu0 %v21949_v41  ;;  %v17928_v41 = vld [vmem:[#allocation8 + $0x15a0] ss:$24 sps:$4 sm:$0xff]   ;;  %v22190_v55 = vld [vmem:[#allocation8 + $0x171c] ss:$24 sps:$4 sm:$0xff]   ;;  %v22194_v0 = vld [vmem:[#allocation8 + $0x1710] ss:$24 sps:$4 sm:$0xff]  }
 0x7de   :  { %v7797_v46 = vpop.f32.mrf.mxu1  ;;  %v7838_v30 = vpop.f32.mrf.mxu0  ;;  %8946 = vmatprep.subr.bf16.mxu1 %v22062_v7  ;;  %8995 = vmatprep.subr.bf16.mxu0 %v21955_v25  ;;  %v17931_v25 = vld [vmem:[#allocation8 + $0x1570] ss:$24 sps:$4 sm:$0xff]  }
 0x7df   :  { %v22200_v46 = vld [vmem:[#allocation8 + $0x16e4] ss:$24 sps:$4 sm:$0xff]  }
 0x7e0   :  { %v22202_v30 = vld [vmem:[#allocation8 + $0x16ec] ss:$24 sps:$4 sm:$0xff]  }
 0x7e1   :  { %8947 = vmatpush1.bf16.msra.mxu1 %v22074_v3  ;;  %8996 = vmatpush1.bf16.msra.mxu0 %v21969_v63  ;;  %v17936_v63 = vld [vmem:[#allocation8 + $0x1544] ss:$24 sps:$4 sm:$0xff]  }
 0x7e2   :  { %8948 = vmatprep.subr.bf16.mxu1 %v17927_v8  ;;  %8997 = vmatprep.subr.bf16.mxu0 %v21975_v50  ;;  %v17934_v50 = vld [vmem:[#allocation8 + $0x1540] ss:$24 sps:$4 sm:$0xff]  }
 0x7e5   :  { %8949 = vmatpush1.bf16.msra.mxu1 %v17925_v26  ;;  %8998 = vmatpush1.bf16.msra.mxu0 %v21981_v12  ;;  %v17939_v12 = vld [vmem:[#allocation8 + $0x1514] ss:$24 sps:$4 sm:$0xff]  }
 0x7e6   :  { %8950 = vmatprep.subr.bf16.mxu1 %v17930_v49  ;;  %8999 = vmatprep.subr.bf16.mxu0 %v21987_v17  ;;  %v17937_v17 = vld [vmem:[#allocation8 + $0x1510] ss:$24 sps:$4 sm:$0xff]  }
 0x7e9   :  { %8951 = vmatpush1.bf16.msra.mxu1 %v17928_v41  ;;  %9000 = vmatpush1.bf16.msra.mxu0 %v21993_v27  ;;  %v8989_v27 = vrot.slane %v19521_v36, 7 }
 0x7ea   :  { %8952 = vmatprep.subr.bf16.mxu1 %v17933_v29  ;;  %9001 = vmatprep.subr.bf16.mxu0 %v21999_v4 }
 0x7ed   :  { %8953 = vmatpush1.bf16.msra.mxu1 %v17931_v25  ;;  %9002 = vmatpush1.bf16.msra.mxu0 %v22005_v11 }
 0x7ee   :  { %8954 = vmatprep.subr.bf16.mxu1 %v17936_v63  ;;  %9003 = vmatprep.subr.bf16.mxu0 %v22011_v52 }
 0x7f1   :  { %8955 = vmatpush1.bf16.msra.mxu1 %v17934_v50  ;;  %9004 = vmatpush1.bf16.msra.mxu0 %v22017_v59 }
 0x7f2   :  { %8956 = vmatprep.subr.bf16.mxu1 %v17939_v12  ;;  %9005 = vmatprep.subr.bf16.mxu0 %v22023_v32 }
 0x7f5   :  { %8957 = vmatpush1.bf16.msra.mxu1 %v17937_v17  ;;  %9006 = vmatpush1.bf16.msra.mxu0 %v22029_v54 }
 0x7f6   :  { %9032 = vmatprep.subr.bf16.mxu1 %v21928_v13  ;;  %9073 = vmatprep.subr.bf16.mxu0 %v22035_v42 }
 0x7f8   :  { %v7874_v4 = vpop.f32.mrf.mxu1  ;;  %v7923_v11 = vpop.f32.mrf.mxu0  ;;  %8975 = vmatmul.mubr.bf16.vlgmr.msra.gmra.mxu1 %v22042_v31  ;;  %9024 = vmatmul.mubr.bf16.vlgmr.msra.gmra.mxu0 %v8989_v27 }
 0x7f9   :  { %v22095_v52 = vadd.f32 %v7874_v4, %v21894_v34  ;;  %v22098_v59 = vadd.f32 %v7923_v11, %v21897_v6  ;;  %9033 = vmatpush1.bf16.msra.mxu1 %v21933_v23  ;;  %9074 = vmatpush1.bf16.msra.mxu0 %v22039_v21  ;;  %v22240_v4 = vld [vmem:[#allocation8 + $0x17e0] ss:$24 sps:$4 sm:$0xff]   ;;  %v22243_v11 = vrot.slane %v24527_v5, 7  ;;  %v22259_v5 = vld [vmem:[#allocation8 + $0x17b0] ss:$24 sps:$4 sm:$0xff]  }
 0x7fa   :  { %v7876_v36 = vpop.f32.mrf.mxu1  ;;  %v7925_v32 = vpop.f32.mrf.mxu0  ;;  %9034 = vmatprep.subr.bf16.mxu1 %v21939_v28  ;;  %9075 = vmatprep.subr.bf16.mxu0 %v22046_v20  ;;  %v22170_v20 = vld [vmem:[#allocation8 + $0x1770] ss:$24 sps:$4 sm:$0xff]  }
 0x7fb   :  { %v22105_v13 = vadd.f32 %v7876_v36, %v21904_v47  ;;  %v22108_v54 = vadd.f32 %v7925_v32, %v21907_v62  ;;  %9064 = vmatprep.mubr.bf16.mxu1 %v24500_v40  ;;  %9105 = vmatprep.mubr.bf16.mxu0 %v24500_v40  ;;  %v22127_v47 = vld [vmem:[#allocation8 + $0x17d4] ss:$24 sps:$4 sm:$0xff]  }
 0x7fc   :  { %v7878_v34 = vpop.f32.mrf.mxu1  ;;  %v7927_v6 = vpop.f32.mrf.mxu0  ;;  %v22129_v62 = vld [vmem:[#allocation8 + $0x17dc] ss:$24 sps:$4 sm:$0xff]  }
 0x7fd   :  { %9035 = vmatpush1.bf16.msra.mxu1 %v21951_v18  ;;  %9076 = vmatpush1.bf16.msra.mxu0 %v22058_v14  ;;  %v22132_v18 = vld [vmem:[#allocation8 + $0x17d0] ss:$24 sps:$4 sm:$0xff]   ;;  %v22178_v14 = vld [vmem:[#allocation8 + $0x174c] ss:$24 sps:$4 sm:$0xff]  }
 0x7fe   :  { %v7879_v23 = vpop.f32.mrf.mxu1  ;;  %v7928_v28 = vpop.f32.mrf.mxu0  ;;  %9036 = vmatprep.subr.bf16.mxu1 %v21957_v10  ;;  %9077 = vmatprep.subr.bf16.mxu0 %v22062_v7  ;;  %v22134_v10 = vld [vmem:[#allocation8 + $0x17d8] ss:$24 sps:$4 sm:$0xff]   ;;  %v22188_v7 = vld [vmem:[#allocation8 + $0x1714] ss:$24 sps:$4 sm:$0xff]  }
 0x7ff   :  { %v22247_v36 = vld [vmem:[#allocation8 + $0x17b4] ss:$24 sps:$4 sm:$0xff]  }
 0x801   :  { %9037 = vmatpush1.bf16.msra.mxu1 %v21971_v60  ;;  %9078 = vmatpush1.bf16.msra.mxu0 %v22074_v3  ;;  %v22138_v60 = vld [vmem:[#allocation8 + $0x17a4] ss:$24 sps:$4 sm:$0xff]   ;;  %v22196_v3 = vld [vmem:[#allocation8 + $0x1718] ss:$24 sps:$4 sm:$0xff]  }
 0x802   :  { %9038 = vmatprep.subr.bf16.mxu1 %v21977_v58  ;;  %9079 = vmatprep.subr.bf16.mxu0 %v17927_v8  ;;  %v22140_v58 = vld [vmem:[#allocation8 + $0x17ac] ss:$24 sps:$4 sm:$0xff]   ;;  %v22206_v8 = vld [vmem:[#allocation8 + $0x16e0] ss:$24 sps:$4 sm:$0xff]  }
 0x805   :  { %9039 = vmatpush1.bf16.msra.mxu1 %v21983_v61  ;;  %9080 = vmatpush1.bf16.msra.mxu0 %v17925_v26  ;;  %v22208_v26 = vld [vmem:[#allocation8 + $0x16e8] ss:$24 sps:$4 sm:$0xff]  }
 0x806   :  { %9040 = vmatprep.subr.bf16.mxu1 %v21989_v24  ;;  %9081 = vmatprep.subr.bf16.mxu0 %v17930_v49  ;;  %v22212_v49 = vld [vmem:[#allocation8 + $0x16b4] ss:$24 sps:$4 sm:$0xff]  }
 0x809   :  { %9041 = vmatpush1.bf16.msra.mxu1 %v21995_v16  ;;  %9082 = vmatpush1.bf16.msra.mxu0 %v17928_v41  ;;  %v22214_v41 = vld [vmem:[#allocation8 + $0x16bc] ss:$24 sps:$4 sm:$0xff]  }
 0x80a   :  { %9042 = vmatprep.subr.bf16.mxu1 %v22001_v15  ;;  %9083 = vmatprep.subr.bf16.mxu0 %v17933_v29  ;;  %v22218_v29 = vld [vmem:[#allocation8 + $0x16b0] ss:$24 sps:$4 sm:$0xff]  }
 0x80d   :  { %9043 = vmatpush1.bf16.msra.mxu1 %v22007_v1  ;;  %9084 = vmatpush1.bf16.msra.mxu0 %v17931_v25  ;;  %v22150_v1 = vld [vmem:[#allocation8 + $0x17a0] ss:$24 sps:$4 sm:$0xff]  }
 0x80e   :  { %9044 = vmatprep.subr.bf16.mxu1 %v22013_v19  ;;  %9085 = vmatprep.subr.bf16.mxu0 %v17936_v63  ;;  %v22152_v19 = vld [vmem:[#allocation8 + $0x17a8] ss:$24 sps:$4 sm:$0xff]   ;;  %v22220_v25 = vld [vmem:[#allocation8 + $0x16b8] ss:$24 sps:$4 sm:$0xff]   ;;  %v22224_v63 = vld [vmem:[#allocation8 + $0x1684] ss:$24 sps:$4 sm:$0xff]  }
 0x811   :  { %9045 = vmatpush1.bf16.msra.mxu1 %v22019_v33  ;;  %9086 = vmatpush1.bf16.msra.mxu0 %v17934_v50  ;;  %v22226_v50 = vld [vmem:[#allocation8 + $0x168c] ss:$24 sps:$4 sm:$0xff]  }
 0x812   :  { %9046 = vmatprep.subr.bf16.mxu1 %v22025_v51  ;;  %9087 = vmatprep.subr.bf16.mxu0 %v17939_v12  ;;  %v22230_v12 = vld [vmem:[#allocation8 + $0x1680] ss:$24 sps:$4 sm:$0xff]  }
 0x815   :  { %9047 = vmatpush1.bf16.msra.mxu1 %v22031_v44  ;;  %9088 = vmatpush1.bf16.msra.mxu0 %v17937_v17  ;;  %v22156_v44 = vld [vmem:[#allocation8 + $0x1774] ss:$24 sps:$4 sm:$0xff]   ;;  %v22232_v17 = vld [vmem:[#allocation8 + $0x1688] ss:$24 sps:$4 sm:$0xff]  }
 0x816   :  { %9411 = vmatprep.subr.bf16.mxu1 %v22127_v47  ;;  %9452 = vmatprep.subr.bf16.mxu0 %v22129_v62 }
 0x818   :  { %v7964_v61 = vpop.f32.mrf.mxu1  ;;  %v8005_v24 = vpop.f32.mrf.mxu0  ;;  %9065 = vmatmul.mubr.bf16.vlgmr.msra.gmra.mxu1 %v8989_v27  ;;  %9106 = vmatmul.mubr.bf16.vlgmr.msra.gmra.mxu0 %v8989_v27  ;;  %v22236_v27 = vld [vmem:[#allocation8 + $0x17e4] ss:$24 sps:$4 sm:$0xff]  }
 0x819   :  { %v22143_v16 = vadd.f32 %v7964_v61, %v21942_v43  ;;  %v22146_v15 = vadd.f32 %v8005_v24, %v21945_v37  ;;  %9412 = vmatpush1.bf16.msra.mxu1 %v22132_v18  ;;  %9453 = vmatpush1.bf16.msra.mxu0 %v22134_v10  ;;  %v22158_v43 = vld [vmem:[#allocation8 + $0x177c] ss:$24 sps:$4 sm:$0xff]  }
 0x81a   :  { %v7966_v33 = vpop.f32.mrf.mxu1  ;;  %v8007_v51 = vpop.f32.mrf.mxu0  ;;  %9413 = vmatprep.subr.bf16.mxu1 %v22138_v60  ;;  %9454 = vmatprep.subr.bf16.mxu0 %v22140_v58  ;;  %v22263_v61 = vld [vmem:[#allocation8 + $0x1784] ss:$24 sps:$4 sm:$0xff]  }
 0x81b   :  { %v22161_v37 = vadd.f32 %v7966_v33, %v21960_v57  ;;  %v22164_v42 = vadd.f32 %v8007_v51, %v21963_v9  ;;  %9443 = vmatprep.mubr.bf16.mxu1 %v24500_v40  ;;  %9484 = vmatprep.mubr.bf16.mxu0 %v24500_v40  ;;  %v22176_v9 = vld [vmem:[#allocation8 + $0x1744] ss:$24 sps:$4 sm:$0xff]   ;;  %v22275_v33 = vld [vmem:[#allocation8 + $0x1780] ss:$24 sps:$4 sm:$0xff]  }
 0x81c   :  { %v7968_v21 = vpop.f32.mrf.mxu1  ;;  %v8009_v31 = vpop.f32.mrf.mxu0 }
 0x81d   :  { %9414 = vmatpush1.bf16.msra.mxu1 %v22150_v1  ;;  %9455 = vmatpush1.bf16.msra.mxu0 %v22152_v19  ;;  %v18002_v21 = vld [vmem:[#allocation8 + $0x1724] ss:$24 sps:$4 sm:$0xff]   ;;  %v18005_v31 = vld [vmem:[#allocation8 + $0x16f4] ss:$24 sps:$4 sm:$0xff]  }
 0x81e   :  { %v7969_v22 = vpop.f32.mrf.mxu1  ;;  %v8010_v57 = vpop.f32.mrf.mxu0  ;;  %9415 = vmatprep.subr.bf16.mxu1 %v22156_v44  ;;  %9456 = vmatprep.subr.bf16.mxu0 %v22158_v43 }
 0x81f   :  { %v18006_v22 = vld [vmem:[#allocation8 + $0x16c0] ss:$24 sps:$4 sm:$0xff]   ;;  %v18011_v57 = vld [vmem:[#allocation8 + $0x1694] ss:$24 sps:$4 sm:$0xff]  }
 0x821   :  { %9416 = vmatpush1.bf16.msra.mxu1 %v22170_v20  ;;  %9457 = vmatpush1.bf16.msra.mxu0 %v22172_v38 }
 0x822   :  { %9417 = vmatprep.subr.bf16.mxu1 %v22176_v9  ;;  %9458 = vmatprep.subr.bf16.mxu0 %v22178_v14 }
 0x825   :  { %9418 = vmatpush1.bf16.msra.mxu1 %v22182_v2  ;;  %9459 = vmatpush1.bf16.msra.mxu0 %v22184_v35 }
 0x826   :  { %9419 = vmatprep.subr.bf16.mxu1 %v22188_v7  ;;  %9460 = vmatprep.subr.bf16.mxu0 %v22190_v55 }
 0x829   :  { %9420 = vmatpush1.bf16.msra.mxu1 %v22194_v0  ;;  %9461 = vmatpush1.bf16.msra.mxu0 %v22196_v3 }
 0x82a   :  { %9421 = vmatprep.subr.bf16.mxu1 %v22200_v46  ;;  %9462 = vmatprep.subr.bf16.mxu0 %v22202_v30 }
 0x82d   :  { %9422 = vmatpush1.bf16.msra.mxu1 %v22206_v8  ;;  %9463 = vmatpush1.bf16.msra.mxu0 %v22208_v26 }
 0x82e   :  { %9423 = vmatprep.subr.bf16.mxu1 %v22212_v49  ;;  %9464 = vmatprep.subr.bf16.mxu0 %v22214_v41 }
 0x831   :  { %9424 = vmatpush1.bf16.msra.mxu1 %v22218_v29  ;;  %9465 = vmatpush1.bf16.msra.mxu0 %v22220_v25 }
 0x832   :  { %9425 = vmatprep.subr.bf16.mxu1 %v22224_v63  ;;  %9466 = vmatprep.subr.bf16.mxu0 %v22226_v50 }
 0x835   :  { %9426 = vmatpush1.bf16.msra.mxu1 %v22230_v12  ;;  %9467 = vmatpush1.bf16.msra.mxu0 %v22232_v17 }
 0x836   :  { %9493 = vmatprep.subr.bf16.mxu1 %v22236_v27  ;;  %9542 = vmatprep.subr.bf16.mxu0 %v22127_v47 }
 0x838   :  { %v8343_v32 = vpop.f32.mrf.mxu1  ;;  %v8384_v34 = vpop.f32.mrf.mxu0  ;;  %9444 = vmatmul.mubr.bf16.vlgmr.msra.gmra.mxu1 %v22243_v11  ;;  %9485 = vmatmul.mubr.bf16.vlgmr.msra.gmra.mxu0 %v22243_v11 }
 0x839   :  { %v22252_v6 = vadd.f32 %v8343_v32, %v22051_v53  ;;  %v22255_v23 = vadd.f32 %v8384_v34, %v22054_v56  ;;  %9494 = vmatpush1.bf16.msra.mxu1 %v22240_v4  ;;  %9543 = vmatpush1.bf16.msra.mxu0 %v22132_v18  ;;  %v22379_v32 = vld [vmem:[#allocation8 + $0x18cc] ss:$24 sps:$4 sm:$0xff]   ;;  %v22383_v34 = vld [vmem:[#allocation8 + $0x18c0] ss:$24 sps:$4 sm:$0xff]  }
 0x83a   :  { %v8345_v28 = vpop.f32.mrf.mxu1  ;;  %v8386_v47 = vpop.f32.mrf.mxu0  ;;  %9495 = vmatprep.subr.bf16.mxu1 %v22247_v36  ;;  %9544 = vmatprep.subr.bf16.mxu0 %v22138_v60 }
 0x83b   :  { %v22266_v53 = vadd.f32 %v8345_v28, %v22065_v48  ;;  %v22269_v56 = vadd.f32 %v8386_v47, %v22068_v45  ;;  %9525 = vmatprep.mubr.bf16.mxu1 %v24500_v40  ;;  %9574 = vmatprep.mubr.bf16.mxu0 %v24500_v40  ;;  %v17999_v48 = vld [vmem:[#allocation8 + $0x1754] ss:$24 sps:$4 sm:$0xff]   ;;  %v17997_v45 = vld [vmem:[#allocation8 + $0x1750] ss:$24 sps:$4 sm:$0xff]  }
 0x83c   :  { %v8347_v18 = vpop.f32.mrf.mxu1  ;;  %v8388_v24 = vpop.f32.mrf.mxu0  ;;  %v22389_v28 = vld [vmem:[#allocation8 + $0x1894] ss:$24 sps:$4 sm:$0xff]  }
 0x83d   :  { %9496 = vmatpush1.bf16.msra.mxu1 %v22259_v5  ;;  %9545 = vmatpush1.bf16.msra.mxu0 %v22150_v1  ;;  %v18000_v1 = vld [vmem:[#allocation8 + $0x1720] ss:$24 sps:$4 sm:$0xff]   ;;  %v22391_v47 = vld [vmem:[#allocation8 + $0x189c] ss:$24 sps:$4 sm:$0xff]  }
 0x83e   :  { %v8348_v60 = vpop.f32.mrf.mxu1  ;;  %v8389_v51 = vpop.f32.mrf.mxu0  ;;  %9497 = vmatprep.subr.bf16.mxu1 %v22263_v61  ;;  %9546 = vmatprep.subr.bf16.mxu0 %v22156_v44  ;;  %v18003_v44 = vld [vmem:[#allocation8 + $0x16f0] ss:$24 sps:$4 sm:$0xff]   ;;  %v22401_v24 = vld [vmem:[#allocation8 + $0x1864] ss:$24 sps:$4 sm:$0xff]  }
 0x83f   :  { %v22397_v18 = vld [vmem:[#allocation8 + $0x1898] ss:$24 sps:$4 sm:$0xff]   ;;  %v22409_v51 = vld [vmem:[#allocation8 + $0x1868] ss:$24 sps:$4 sm:$0xff]  }
 0x840   :  { %v22407_v60 = vld [vmem:[#allocation8 + $0x1860] ss:$24 sps:$4 sm:$0xff]  }
 0x841   :  { %9498 = vmatpush1.bf16.msra.mxu1 %v22275_v33  ;;  %9547 = vmatpush1.bf16.msra.mxu0 %v22170_v20  ;;  %v18008_v20 = vld [vmem:[#allocation8 + $0x16c4] ss:$24 sps:$4 sm:$0xff]  }
 0x842   :  { %9499 = vmatprep.subr.bf16.mxu1 %v17999_v48  ;;  %9548 = vmatprep.subr.bf16.mxu0 %v22176_v9  ;;  %v18009_v9 = vld [vmem:[#allocation8 + $0x1690] ss:$24 sps:$4 sm:$0xff]  }
 0x845   :  { %9500 = vmatpush1.bf16.msra.mxu1 %v17997_v45  ;;  %9549 = vmatpush1.bf16.msra.mxu0 %v22182_v2  ;;  %v9540_v2 = vrot.slane %v19524_v39, 7 }
 0x846   :  { %9501 = vmatprep.subr.bf16.mxu1 %v18002_v21  ;;  %9550 = vmatprep.subr.bf16.mxu0 %v22188_v7 }
 0x849   :  { %9502 = vmatpush1.bf16.msra.mxu1 %v18000_v1  ;;  %9551 = vmatpush1.bf16.msra.mxu0 %v22194_v0 }
 0x84a   :  { %9503 = vmatprep.subr.bf16.mxu1 %v18005_v31  ;;  %9552 = vmatprep.subr.bf16.mxu0 %v22200_v46 }
 0x84d   :  { %9504 = vmatpush1.bf16.msra.mxu1 %v18003_v44  ;;  %9553 = vmatpush1.bf16.msra.mxu0 %v22206_v8 }
 0x84e   :  { %9505 = vmatprep.subr.bf16.mxu1 %v18008_v20  ;;  %9554 = vmatprep.subr.bf16.mxu0 %v22212_v49 }
 0x851   :  { %9506 = vmatpush1.bf16.msra.mxu1 %v18006_v22  ;;  %9555 = vmatpush1.bf16.msra.mxu0 %v22218_v29 }
 0x852   :  { %9507 = vmatprep.subr.bf16.mxu1 %v18011_v57  ;;  %9556 = vmatprep.subr.bf16.mxu0 %v22224_v63 }
 0x855   :  { %9508 = vmatpush1.bf16.msra.mxu1 %v18009_v9  ;;  %9557 = vmatpush1.bf16.msra.mxu0 %v22230_v12 }
 0x856   :  { %9583 = vmatprep.subr.bf16.mxu1 %v22129_v62  ;;  %9624 = vmatprep.subr.bf16.mxu0 %v22236_v27 }
 0x858   :  { %v8425_v7 = vpop.f32.mrf.mxu1  ;;  %v8474_v0 = vpop.f32.mrf.mxu0  ;;  %9526 = vmatmul.mubr.bf16.vlgmr.msra.gmra.mxu1 %v22243_v11  ;;  %9575 = vmatmul.mubr.bf16.vlgmr.msra.gmra.mxu0 %v9540_v2  ;;  %v22373_v11 = vld [vmem:[#allocation8 + $0x18f8] ss:$24 sps:$4 sm:$0xff]  }
 0x859   :  { %v22296_v46 = vadd.f32 %v8425_v7, %v22095_v52  ;;  %v22299_v8 = vadd.f32 %v8474_v0, %v22098_v59  ;;  %9584 = vmatpush1.bf16.msra.mxu1 %v22134_v10  ;;  %9625 = vmatpush1.bf16.msra.mxu0 %v22240_v4  ;;  %v22371_v4 = vld [vmem:[#allocation8 + $0x18f0] ss:$24 sps:$4 sm:$0xff]   ;;  %v22437_v7 = vld [vmem:[#allocation8 + $0x1800] ss:$24 sps:$4 sm:$0xff]  }
 0x85a   :  { %v8427_v39 = vpop.f32.mrf.mxu1  ;;  %v8476_v49 = vpop.f32.mrf.mxu0  ;;  %9585 = vmatprep.subr.bf16.mxu1 %v22140_v58  ;;  %9626 = vmatprep.subr.bf16.mxu0 %v22247_v36  ;;  %v22439_v0 = vld [vmem:[#allocation8 + $0x1808] ss:$24 sps:$4 sm:$0xff]  }
 0x85b   :  { %v22306_v62 = vadd.f32 %v8427_v39, %v22105_v13  ;;  %v22309_v29 = vadd.f32 %v8476_v49, %v22108_v54  ;;  %9615 = vmatprep.mubr.bf16.mxu1 %v24500_v40  ;;  %9656 = vmatprep.mubr.bf16.mxu0 %v24500_v40  ;;  %v22328_v13 = vld [vmem:[#allocation8 + $0x1954] ss:$24 sps:$4 sm:$0xff]  }
 0x85c   :  { %v8429_v52 = vpop.f32.mrf.mxu1  ;;  %v8478_v59 = vpop.f32.mrf.mxu0  ;;  %v22330_v54 = vld [vmem:[#allocation8 + $0x195c] ss:$24 sps:$4 sm:$0xff]  }
 0x85d   :  { %9586 = vmatpush1.bf16.msra.mxu1 %v22152_v19  ;;  %9627 = vmatpush1.bf16.msra.mxu0 %v22259_v5  ;;  %v22333_v19 = vld [vmem:[#allocation8 + $0x1950] ss:$24 sps:$4 sm:$0xff]   ;;  %v22443_v52 = vld [vmem:[#allocation8 + $0x1964] ss:$24 sps:$4 sm:$0xff]   ;;  %v22447_v59 = vld [vmem:[#allocation8 + $0x1960] ss:$24 sps:$4 sm:$0xff]  }
 0x85e   :  { %v8430_v10 = vpop.f32.mrf.mxu1  ;;  %v8479_v58 = vpop.f32.mrf.mxu0  ;;  %9587 = vmatprep.subr.bf16.mxu1 %v22158_v43  ;;  %9628 = vmatprep.subr.bf16.mxu0 %v22263_v61  ;;  %v22335_v43 = vld [vmem:[#allocation8 + $0x1958] ss:$24 sps:$4 sm:$0xff]   ;;  %v22385_v5 = vld [vmem:[#allocation8 + $0x18c8] ss:$24 sps:$4 sm:$0xff]  }
 0x85f   :  { %v22395_v61 = vld [vmem:[#allocation8 + $0x1890] ss:$24 sps:$4 sm:$0xff]   ;;  %v22453_v58 = vld [vmem:[#allocation8 + $0x1934] ss:$24 sps:$4 sm:$0xff]  }
 0x861   :  { %9588 = vmatpush1.bf16.msra.mxu1 %v22172_v38  ;;  %9629 = vmatpush1.bf16.msra.mxu0 %v22275_v33  ;;  %v22339_v38 = vld [vmem:[#allocation8 + $0x1924] ss:$24 sps:$4 sm:$0xff]  }
 0x862   :  { %9589 = vmatprep.subr.bf16.mxu1 %v22178_v14  ;;  %9630 = vmatprep.subr.bf16.mxu0 %v17999_v48  ;;  %v22341_v14 = vld [vmem:[#allocation8 + $0x192c] ss:$24 sps:$4 sm:$0xff]  }
 0x863   :  { %v22403_v33 = vld [vmem:[#allocation8 + $0x186c] ss:$24 sps:$4 sm:$0xff]  }
 0x864   :  { %v22413_v48 = vld [vmem:[#allocation8 + $0x1834] ss:$24 sps:$4 sm:$0xff]  }
 0x865   :  { %9590 = vmatpush1.bf16.msra.mxu1 %v22184_v35  ;;  %9631 = vmatpush1.bf16.msra.mxu0 %v17997_v45  ;;  %v22415_v45 = vld [vmem:[#allocation8 + $0x183c] ss:$24 sps:$4 sm:$0xff]  }
 0x866   :  { %9591 = vmatprep.subr.bf16.mxu1 %v22190_v55  ;;  %9632 = vmatprep.subr.bf16.mxu0 %v18002_v21  ;;  %v22419_v21 = vld [vmem:[#allocation8 + $0x1830] ss:$24 sps:$4 sm:$0xff]  }
 0x869   :  { %9592 = vmatpush1.bf16.msra.mxu1 %v22196_v3  ;;  %9633 = vmatpush1.bf16.msra.mxu0 %v18000_v1  ;;  %v22421_v1 = vld [vmem:[#allocation8 + $0x1838] ss:$24 sps:$4 sm:$0xff]  }
 0x86a   :  { %9593 = vmatprep.subr.bf16.mxu1 %v22202_v30  ;;  %9634 = vmatprep.subr.bf16.mxu0 %v18005_v31  ;;  %v22423_v31 = vld [vmem:[#allocation7] ss:$0 sm:$0xff] }
 0x86d   :  { %9594 = vmatpush1.bf16.msra.mxu1 %v22208_v26  ;;  %9635 = vmatpush1.bf16.msra.mxu0 %v18003_v44  ;;  %v22351_v26 = vld [vmem:[#allocation8 + $0x1920] ss:$24 sps:$4 sm:$0xff]  }
 0x86e   :  { %9595 = vmatprep.subr.bf16.mxu1 %v22214_v41  ;;  %9636 = vmatprep.subr.bf16.mxu0 %v18008_v20  ;;  %v22353_v41 = vld [vmem:[#allocation8 + $0x1928] ss:$24 sps:$4 sm:$0xff]   ;;  %v24528_v44 = vld [vmem:[#allocation21_spill] sm:$0xff] }
 0x86f   :  { %v555_v20 = vadd.f32 %v22423_v31, %v24528_v44  ;;  %v22481_v44 = vld [vmem:[#allocation8 + $0x1900] ss:$24 sps:$4 sm:$0xff]  }
 0x871   :  { %9596 = vmatpush1.bf16.msra.mxu1 %v22220_v25  ;;  %9637 = vmatpush1.bf16.msra.mxu0 %v18006_v22  ;;  %v24529_v22 = vld [vmem:[#allocation22_spill] sm:$0xff]  ;;  %v561_v39 = vmax.f32 %v555_v20, 0.0 }
 0x872   :  { %9597 = vmatprep.subr.bf16.mxu1 %v22226_v50  ;;  %9638 = vmatprep.subr.bf16.mxu0 %v18011_v57  ;;  %v22357_v50 = vld [vmem:[#allocation8 + $0x18f4] ss:$24 sps:$4 sm:$0xff]   ;;  %v550_v57 = vadd.f32 %v22423_v31, %v24529_v22  ;;  %v18072_v22 = vld [vmem:[#allocation8 + $0x18a0] ss:$24 sps:$4 sm:$0xff]  }
 0x874   :  { %v560_v49 = vmax.f32 %v550_v57, 0.0  ;;  %v18078_v57 = vld [vmem:[#allocation8 + $0x1840] ss:$24 sps:$4 sm:$0xff]  }
 0x875   :  { %9598 = vmatpush1.bf16.msra.mxu1 %v22232_v17  ;;  %9639 = vmatpush1.bf16.msra.mxu0 %v18009_v9  ;;  %v22431_v9 = vld [vmem:[#allocation8 + $0x1804] ss:$24 sps:$4 sm:$0xff]  }
 0x876   :  { %9960 = vmatprep.subr.bf16.mxu1 %v22328_v13  ;;  %10001 = vmatprep.subr.bf16.mxu0 %v22330_v54  ;;  %v22449_v10 = vpack.c.bf16 %v561_v39, %v560_v49  ;;  %v24530_v39 = vld [vmem:[#allocation41_spill] sm:$0xff]  ;;  %v24531_v49 = vld [vmem:[#allocation42_spill] sm:$0xff] }
 0x878   :  { %v8515_v35 = vpop.f32.mrf.mxu1  ;;  %v8556_v55 = vpop.f32.mrf.mxu0  ;;  %9616 = vmatmul.mubr.bf16.vlgmr.msra.gmra.mxu1 %v9540_v2  ;;  %9657 = vmatmul.mubr.bf16.vlgmr.msra.gmra.mxu0 %v9540_v2  ;;  %v22433_v2 = vld [vmem:[#allocation8 + $0x180c] ss:$24 sps:$4 sm:$0xff]  }
 0x879   :  { %v22344_v3 = vadd.f32 %v8515_v35, %v22143_v16  ;;  %v22347_v30 = vadd.f32 %v8556_v55, %v22146_v15  ;;  %9961 = vmatpush1.bf16.msra.mxu1 %v22333_v19  ;;  %10002 = vmatpush1.bf16.msra.mxu0 %v22335_v43  ;;  %v22359_v16 = vld [vmem:[#allocation8 + $0x18fc] ss:$24 sps:$4 sm:$0xff]  }
 0x87a   :  { %v8517_v25 = vpop.f32.mrf.mxu1  ;;  %v8558_v63 = vpop.f32.mrf.mxu0  ;;  %9962 = vmatprep.subr.bf16.mxu1 %v22339_v38  ;;  %10003 = vmatprep.subr.bf16.mxu0 %v22341_v14 }
 0x87b   :  { %v22362_v15 = vadd.f32 %v8517_v25, %v22161_v37  ;;  %v22365_v12 = vadd.f32 %v8558_v63, %v22164_v42  ;;  %9992 = vmatprep.mubr.bf16.mxu1 %v24500_v40  ;;  %10033 = vmatprep.mubr.bf16.mxu0 %v24500_v40  ;;  %v22377_v42 = vld [vmem:[#allocation8 + $0x18c4] ss:$24 sps:$4 sm:$0xff]  }
 0x87c   :  { %v8519_v17 = vpop.f32.mrf.mxu1  ;;  %v8560_v27 = vpop.f32.mrf.mxu0 }
 0x87d   :  { %9963 = vmatpush1.bf16.msra.mxu1 %v22351_v26  ;;  %10004 = vmatpush1.bf16.msra.mxu0 %v22353_v41  ;;  %v22465_v17 = vld [vmem:[#allocation8 + $0x1930] ss:$24 sps:$4 sm:$0xff]  }
 0x87e   :  { %v8520_v36 = vpop.f32.mrf.mxu1  ;;  %v8561_v37 = vpop.f32.mrf.mxu0  ;;  %9964 = vmatprep.subr.bf16.mxu1 %v22357_v50  ;;  %10005 = vmatprep.subr.bf16.mxu0 %v22359_v16 }
 0x87f   :  { %v22469_v36 = vld [vmem:[#allocation8 + $0x1904] ss:$24 sps:$4 sm:$0xff]  }
 0x881   :  { %9965 = vmatpush1.bf16.msra.mxu1 %v22371_v4  ;;  %10006 = vmatpush1.bf16.msra.mxu0 %v22373_v11 }
 0x882   :  { %9966 = vmatprep.subr.bf16.mxu1 %v22377_v42  ;;  %10007 = vmatprep.subr.bf16.mxu0 %v22379_v32 }
 0x885   :  { %9967 = vmatpush1.bf16.msra.mxu1 %v22383_v34  ;;  %10008 = vmatpush1.bf16.msra.mxu0 %v22385_v5 }
 0x886   :  { %9968 = vmatprep.subr.bf16.mxu1 %v22389_v28  ;;  %10009 = vmatprep.subr.bf16.mxu0 %v22391_v47 }
 0x889   :  { %9969 = vmatpush1.bf16.msra.mxu1 %v22395_v61  ;;  %10010 = vmatpush1.bf16.msra.mxu0 %v22397_v18 }
 0x88a   :  { %9970 = vmatprep.subr.bf16.mxu1 %v22401_v24  ;;  %10011 = vmatprep.subr.bf16.mxu0 %v22403_v33 }
 0x88d   :  { %9971 = vmatpush1.bf16.msra.mxu1 %v22407_v60  ;;  %10012 = vmatpush1.bf16.msra.mxu0 %v22409_v51 }
 0x88e   :  { %9972 = vmatprep.subr.bf16.mxu1 %v22413_v48  ;;  %10013 = vmatprep.subr.bf16.mxu0 %v22415_v45 }
 0x891   :  { %9973 = vmatpush1.bf16.msra.mxu1 %v22419_v21  ;;  %10014 = vmatpush1.bf16.msra.mxu0 %v22421_v1 }
 0x892   :  { %9974 = vmatprep.subr.bf16.mxu1 %v22431_v9  ;;  %10015 = vmatprep.subr.bf16.mxu0 %v22433_v2 }
 0x895   :  { %9975 = vmatpush1.bf16.msra.mxu1 %v22437_v7  ;;  %10016 = vmatpush1.bf16.msra.mxu0 %v22439_v0 }
 0x896   :  { %10042 = vmatprep.subr.bf16.mxu1 %v22443_v52  ;;  %10089 = vmatprep.subr.bf16.mxu0 %v22328_v13 }
 0x898   :  { %v8894_v35 = vpop.f32.mrf.mxu1  ;;  %v8935_v55 = vpop.f32.mrf.mxu0  ;;  %9993 = vmatmul.mubr.bf16.vlgmr.msra.gmra.mxu1 %v22449_v10  ;;  %10034 = vmatmul.mubr.bf16.vlgmr.msra.gmra.mxu0 %v22449_v10 }
 0x899   :  { %v22458_v25 = vadd.f32 %v8894_v35, %v22252_v6  ;;  %v22461_v63 = vadd.f32 %v8935_v55, %v22255_v23  ;;  %10043 = vmatpush1.bf16.msra.mxu1 %v22447_v59  ;;  %10090 = vmatpush1.bf16.msra.mxu0 %v22333_v19  ;;  %v864_v35 = vadd.f32 %v22423_v31, %v24531_v49  ;;  %v22647_v49 = vld [vmem:[#allocation8 + $0x19b8] ss:$24 sps:$4 sm:$0xff]  }
 0x89a   :  { %v8896_v13 = vpop.f32.mrf.mxu1  ;;  %v8937_v27 = vpop.f32.mrf.mxu0  ;;  %10044 = vmatprep.subr.bf16.mxu1 %v22453_v58  ;;  %10091 = vmatprep.subr.bf16.mxu0 %v22339_v38 }
 0x89b   :  { %v22472_v6 = vadd.f32 %v8896_v13, %v22266_v53  ;;  %v22475_v23 = vadd.f32 %v8937_v27, %v22269_v56  ;;  %10074 = vmatprep.mubr.bf16.mxu1 %v24500_v40  ;;  %10121 = vmatprep.mubr.bf16.mxu0 %v24500_v40  ;;  %v22485_v53 = vld [vmem:[#allocation8 + $0x18d4] ss:$24 sps:$4 sm:$0xff]   ;;  %v22489_v56 = vld [vmem:[#allocation8 + $0x18d0] ss:$24 sps:$4 sm:$0xff]   ;;  %v874_v55 = vmax.f32 %v864_v35, 0.0 }
 0x89c   :  { %v8898_v19 = vpop.f32.mrf.mxu1  ;;  %v8939_v37 = vpop.f32.mrf.mxu0  ;;  %v22597_v27 = vld [vmem:[#allocation8 + $0x1a70] ss:$24 sps:$4 sm:$0xff]   ;;  %v22651_v35 = vld [vmem:[#allocation8 + $0x1984] ss:$24 sps:$4 sm:$0xff]  }
 0x89d   :  { %10045 = vmatpush1.bf16.msra.mxu1 %v22465_v17  ;;  %10092 = vmatpush1.bf16.msra.mxu0 %v22351_v26  ;;  %v22493_v26 = vld [vmem:[#allocation8 + $0x18a4] ss:$24 sps:$4 sm:$0xff]  }
 0x89e   :  { %v8899_v38 = vpop.f32.mrf.mxu1  ;;  %v8940_v20 = vpop.f32.mrf.mxu0  ;;  %10046 = vmatprep.subr.bf16.mxu1 %v22469_v36  ;;  %10093 = vmatprep.subr.bf16.mxu0 %v22357_v50  ;;  %v18077_v50 = vld [vmem:[#allocation8 + $0x1874] ss:$24 sps:$4 sm:$0xff]  }
 0x89f   :  { %v22605_v37 = vld [vmem:[#allocation8 + $0x1a4c] ss:$24 sps:$4 sm:$0xff]   ;;  %v22611_v38 = vld [vmem:[#allocation8 + $0x1a48] ss:$24 sps:$4 sm:$0xff]  }
 0x8a0   :  { %v22615_v20 = vld [vmem:[#allocation8 + $0x1a14] ss:$24 sps:$4 sm:$0xff]  }
 0x8a1   :  { %10047 = vmatpush1.bf16.msra.mxu1 %v22481_v44  ;;  %10094 = vmatpush1.bf16.msra.mxu0 %v22371_v4  ;;  %v18075_v4 = vld [vmem:[#allocation8 + $0x1870] ss:$24 sps:$4 sm:$0xff]  }
 0x8a2   :  { %10048 = vmatprep.subr.bf16.mxu1 %v22485_v53  ;;  %10095 = vmatprep.subr.bf16.mxu0 %v22377_v42  ;;  %v18080_v42 = vld [vmem:[#allocation8 + $0x1844] ss:$24 sps:$4 sm:$0xff]  }
 0x8a5   :  { %10049 = vmatpush1.bf16.msra.mxu1 %v22489_v56  ;;  %10096 = vmatpush1.bf16.msra.mxu0 %v22383_v34  ;;  %v869_v34 = vadd.f32 %v22423_v31, %v24530_v39  ;;  %v22641_v39 = vld [vmem:[#allocation8 + $0x19bc] ss:$24 sps:$4 sm:$0xff]  }
 0x8a6   :  { %10050 = vmatprep.subr.bf16.mxu1 %v22493_v26  ;;  %10097 = vmatprep.subr.bf16.mxu0 %v22389_v28  ;;  %v18083_v28 = vld [vmem:[#allocation8 + $0x1814] ss:$24 sps:$4 sm:$0xff]  }
 0x8a9   :  { %10051 = vmatpush1.bf16.msra.mxu1 %v18072_v22  ;;  %10098 = vmatpush1.bf16.msra.mxu0 %v22395_v61  ;;  %v18081_v61 = vld [vmem:[#allocation8 + $0x1810] ss:$24 sps:$4 sm:$0xff]  }
 0x8aa   :  { %10052 = vmatprep.subr.bf16.mxu1 %v18077_v50  ;;  %10099 = vmatprep.subr.bf16.mxu0 %v22401_v24  ;;  %v875_v24 = vmax.f32 %v869_v34, 0.0  ;;  %v22645_v34 = vld [vmem:[#allocation8 + $0x19b0] ss:$24 sps:$4 sm:$0xff]  }
 0x8ad   :  { %10053 = vmatpush1.bf16.msra.mxu1 %v18075_v4  ;;  %10100 = vmatpush1.bf16.msra.mxu0 %v22407_v60  ;;  %v22510_v60 = vpack.c.bf16 %v875_v24, %v874_v55  ;;  %v22659_v24 = vld [vmem:[#allocation8 + $0x1988] ss:$24 sps:$4 sm:$0xff]   ;;  %v22663_v55 = vld [vmem:[#allocation8 + $0x1ae4] ss:$24 sps:$4 sm:$0xff]  }
 0x8ae   :  { %10054 = vmatprep.subr.bf16.mxu1 %v18080_v42  ;;  %10101 = vmatprep.subr.bf16.mxu0 %v22413_v48 }
 0x8b1   :  { %10055 = vmatpush1.bf16.msra.mxu1 %v18078_v57  ;;  %10102 = vmatpush1.bf16.msra.mxu0 %v22419_v21 }
 0x8b2   :  { %10056 = vmatprep.subr.bf16.mxu1 %v18083_v28  ;;  %10103 = vmatprep.subr.bf16.mxu0 %v22431_v9 }
 0x8b5   :  { %10057 = vmatpush1.bf16.msra.mxu1 %v18081_v61  ;;  %10104 = vmatpush1.bf16.msra.mxu0 %v22437_v7 }
 0x8b6   :  { %10130 = vmatprep.subr.bf16.mxu1 %v22330_v54  ;;  %10171 = vmatprep.subr.bf16.mxu0 %v22443_v52 }
 0x8b8   :  { %v8976_v48 = vpop.f32.mrf.mxu1  ;;  %v9025_v31 = vpop.f32.mrf.mxu0  ;;  %10075 = vmatmul.mubr.bf16.vlgmr.msra.gmra.mxu1 %v22449_v10  ;;  %10122 = vmatmul.mubr.bf16.vlgmr.msra.gmra.mxu0 %v22510_v60 }
 0x8b9   :  { %v22517_v21 = vadd.f32 %v8976_v48, %v22296_v46  ;;  %v22520_v9 = vadd.f32 %v9025_v31, %v22299_v8  ;;  %10131 = vmatpush1.bf16.msra.mxu1 %v22335_v43  ;;  %10172 = vmatpush1.bf16.msra.mxu0 %v22447_v59  ;;  %v22667_v48 = vld [vmem:[#allocation8 + $0x1ae0] ss:$24 sps:$4 sm:$0xff]   ;;  %v22670_v31 = vshrl.u32 %v22449_v10, 16 }
 0x8ba   :  { %v8978_v7 = vpop.f32.mrf.mxu1  ;;  %v9027_v54 = vpop.f32.mrf.mxu0  ;;  %10132 = vmatprep.subr.bf16.mxu1 %v22341_v14  ;;  %10173 = vmatprep.subr.bf16.mxu0 %v22453_v58 }
 0x8bb   :  { %v22527_v52 = vadd.f32 %v8978_v7, %v22306_v62  ;;  %v22530_v13 = vadd.f32 %v9027_v54, %v22309_v29  ;;  %10162 = vmatprep.mubr.bf16.mxu1 %v24500_v40  ;;  %10203 = vmatprep.mubr.bf16.mxu0 %v24500_v40  ;;  %v22552_v62 = vld [vmem:[#allocation8 + $0x1ad4] ss:$24 sps:$4 sm:$0xff]  }
 0x8bc   :  { %v8980_v46 = vpop.f32.mrf.mxu1  ;;  %v9029_v8 = vpop.f32.mrf.mxu0  ;;  %v22554_v29 = vld [vmem:[#allocation8 + $0x1adc] ss:$24 sps:$4 sm:$0xff]  }
 0x8bd   :  { %10133 = vmatpush1.bf16.msra.mxu1 %v22353_v41  ;;  %10174 = vmatpush1.bf16.msra.mxu0 %v22465_v17  ;;  %v22557_v41 = vld [vmem:[#allocation8 + $0x1ad0] ss:$24 sps:$4 sm:$0xff]   ;;  %v22674_v7 = vld [vmem:[#allocation8 + $0x1ab4] ss:$24 sps:$4 sm:$0xff]  }
 0x8be   :  { %v8981_v43 = vpop.f32.mrf.mxu1  ;;  %v9030_v14 = vpop.f32.mrf.mxu0  ;;  %10134 = vmatprep.subr.bf16.mxu1 %v22359_v16  ;;  %10175 = vmatprep.subr.bf16.mxu0 %v22469_v36  ;;  %v22559_v16 = vld [vmem:[#allocation8 + $0x1ad8] ss:$24 sps:$4 sm:$0xff]  }
 0x8bf   :  { %v22599_v36 = vld [vmem:[#allocation8 + $0x1a78] ss:$24 sps:$4 sm:$0xff]  }
 0x8c0   :  { %v22686_v14 = vld [vmem:[#allocation8 + $0x1ab0] ss:$24 sps:$4 sm:$0xff]  }
 0x8c1   :  { %10135 = vmatpush1.bf16.msra.mxu1 %v22373_v11  ;;  %10176 = vmatpush1.bf16.msra.mxu0 %v22481_v44  ;;  %v22563_v11 = vld [vmem:[#allocation8 + $0x1aa4] ss:$24 sps:$4 sm:$0xff]   ;;  %v22609_v44 = vld [vmem:[#allocation8 + $0x1a40] ss:$24 sps:$4 sm:$0xff]  }
 0x8c2   :  { %10136 = vmatprep.subr.bf16.mxu1 %v22379_v32  ;;  %10177 = vmatprep.subr.bf16.mxu0 %v22485_v53  ;;  %v22565_v32 = vld [vmem:[#allocation8 + $0x1aac] ss:$24 sps:$4 sm:$0xff]   ;;  %v22617_v53 = vld [vmem:[#allocation8 + $0x1a1c] ss:$24 sps:$4 sm:$0xff]  }
 0x8c5   :  { %10137 = vmatpush1.bf16.msra.mxu1 %v22385_v5  ;;  %10178 = vmatpush1.bf16.msra.mxu0 %v22489_v56  ;;  %v22621_v56 = vld [vmem:[#allocation8 + $0x1a10] ss:$24 sps:$4 sm:$0xff]  }
 0x8c6   :  { %10138 = vmatprep.subr.bf16.mxu1 %v22391_v47  ;;  %10179 = vmatprep.subr.bf16.mxu0 %v22493_v26  ;;  %v22623_v26 = vld [vmem:[#allocation8 + $0x1a18] ss:$24 sps:$4 sm:$0xff]  }
 0x8c9   :  { %10139 = vmatpush1.bf16.msra.mxu1 %v22397_v18  ;;  %10180 = vmatpush1.bf16.msra.mxu0 %v18072_v22  ;;  %v22627_v22 = vld [vmem:[#allocation8 + $0x19e4] ss:$24 sps:$4 sm:$0xff]  }
 0x8ca   :  { %10140 = vmatprep.subr.bf16.mxu1 %v22403_v33  ;;  %10181 = vmatprep.subr.bf16.mxu0 %v18077_v50  ;;  %v22629_v50 = vld [vmem:[#allocation8 + $0x19ec] ss:$24 sps:$4 sm:$0xff]  }
 0x8cd   :  { %10141 = vmatpush1.bf16.msra.mxu1 %v22409_v51  ;;  %10182 = vmatpush1.bf16.msra.mxu0 %v18075_v4  ;;  %v22577_v51 = vld [vmem:[#allocation8 + $0x1aa0] ss:$24 sps:$4 sm:$0xff]  }
 0x8ce   :  { %10142 = vmatprep.subr.bf16.mxu1 %v22415_v45  ;;  %10183 = vmatprep.subr.bf16.mxu0 %v18080_v42  ;;  %v22579_v45 = vld [vmem:[#allocation8 + $0x1aa8] ss:$24 sps:$4 sm:$0xff]  }
 0x8cf   :  { %v22633_v4 = vld [vmem:[#allocation8 + $0x19e0] ss:$24 sps:$4 sm:$0xff]  }
 0x8d0   :  { %v22635_v42 = vld [vmem:[#allocation8 + $0x19e8] ss:$24 sps:$4 sm:$0xff]  }
 0x8d1   :  { %10143 = vmatpush1.bf16.msra.mxu1 %v22421_v1  ;;  %10184 = vmatpush1.bf16.msra.mxu0 %v18078_v57  ;;  %v22639_v57 = vld [vmem:[#allocation8 + $0x19b4] ss:$24 sps:$4 sm:$0xff]  }
 0x8d2   :  { %10144 = vmatprep.subr.bf16.mxu1 %v22433_v2  ;;  %10185 = vmatprep.subr.bf16.mxu0 %v18083_v28  ;;  %v22653_v28 = vld [vmem:[#allocation8 + $0x198c] ss:$24 sps:$4 sm:$0xff]  }
 0x8d5   :  { %10145 = vmatpush1.bf16.msra.mxu1 %v22439_v0  ;;  %10186 = vmatpush1.bf16.msra.mxu0 %v18081_v61  ;;  %v22583_v0 = vld [vmem:[#allocation8 + $0x1a74] ss:$24 sps:$4 sm:$0xff]   ;;  %v22657_v61 = vld [vmem:[#allocation8 + $0x1980] ss:$24 sps:$4 sm:$0xff]  }
 0x8d6   :  { %10511 = vmatprep.subr.bf16.mxu1 %v22552_v62  ;;  %10552 = vmatprep.subr.bf16.mxu0 %v22554_v29 }
 0x8d8   :  { %v9066_v5 = vpop.f32.mrf.mxu1  ;;  %v9107_v47 = vpop.f32.mrf.mxu0  ;;  %10163 = vmatmul.mubr.bf16.vlgmr.msra.gmra.mxu1 %v22510_v60  ;;  %10204 = vmatmul.mubr.bf16.vlgmr.msra.gmra.mxu0 %v22510_v60 }
 0x8d9   :  { %v22570_v18 = vadd.f32 %v9066_v5, %v22344_v3  ;;  %v22573_v33 = vadd.f32 %v9107_v47, %v22347_v30  ;;  %10512 = vmatpush1.bf16.msra.mxu1 %v22557_v41  ;;  %10553 = vmatpush1.bf16.msra.mxu0 %v22559_v16  ;;  %v22585_v3 = vld [vmem:[#allocation8 + $0x1a7c] ss:$24 sps:$4 sm:$0xff]  }
 0x8da   :  { %v9068_v1 = vpop.f32.mrf.mxu1  ;;  %v9109_v2 = vpop.f32.mrf.mxu0  ;;  %10513 = vmatprep.subr.bf16.mxu1 %v22563_v11  ;;  %10554 = vmatprep.subr.bf16.mxu0 %v22565_v32  ;;  %v22690_v47 = vld [vmem:[#allocation8 + $0x1a84] ss:$24 sps:$4 sm:$0xff]  }
 0x8db   :  { %v22588_v30 = vadd.f32 %v9068_v1, %v22362_v15  ;;  %v22591_v59 = vadd.f32 %v9109_v2, %v22365_v12  ;;  %10543 = vmatprep.mubr.bf16.mxu1 %v24500_v40  ;;  %10584 = vmatprep.mubr.bf16.mxu0 %v24500_v40  ;;  %v22603_v12 = vld [vmem:[#allocation8 + $0x1a44] ss:$24 sps:$4 sm:$0xff]   ;;  %v22702_v2 = vld [vmem:[#allocation8 + $0x1a80] ss:$24 sps:$4 sm:$0xff]  }
 0x8dc   :  { %v9070_v58 = vpop.f32.mrf.mxu1  ;;  %v9111_v17 = vpop.f32.mrf.mxu0 }
 0x8dd   :  { %10514 = vmatpush1.bf16.msra.mxu1 %v22577_v51  ;;  %10555 = vmatpush1.bf16.msra.mxu0 %v22579_v45  ;;  %v18146_v17 = vld [vmem:[#allocation8 + $0x1a24] ss:$24 sps:$4 sm:$0xff]  }
 0x8de   :  { %v9071_v19 = vpop.f32.mrf.mxu1  ;;  %v9112_v15 = vpop.f32.mrf.mxu0  ;;  %10515 = vmatprep.subr.bf16.mxu1 %v22583_v0  ;;  %10556 = vmatprep.subr.bf16.mxu0 %v22585_v3 }
 0x8df   :  { %v18149_v19 = vld [vmem:[#allocation8 + $0x19f4] ss:$24 sps:$4 sm:$0xff]   ;;  %v18150_v15 = vld [vmem:[#allocation8 + $0x19c0] ss:$24 sps:$4 sm:$0xff]  }
 0x8e1   :  { %10516 = vmatpush1.bf16.msra.mxu1 %v22597_v27  ;;  %10557 = vmatpush1.bf16.msra.mxu0 %v22599_v36 }
 0x8e2   :  { %10517 = vmatprep.subr.bf16.mxu1 %v22603_v12  ;;  %10558 = vmatprep.subr.bf16.mxu0 %v22605_v37 }
 0x8e5   :  { %10518 = vmatpush1.bf16.msra.mxu1 %v22609_v44  ;;  %10559 = vmatpush1.bf16.msra.mxu0 %v22611_v38 }
 0x8e6   :  { %10519 = vmatprep.subr.bf16.mxu1 %v22615_v20  ;;  %10560 = vmatprep.subr.bf16.mxu0 %v22617_v53 }
 0x8e9   :  { %10520 = vmatpush1.bf16.msra.mxu1 %v22621_v56  ;;  %10561 = vmatpush1.bf16.msra.mxu0 %v22623_v26 }
 0x8ea   :  { %10521 = vmatprep.subr.bf16.mxu1 %v22627_v22  ;;  %10562 = vmatprep.subr.bf16.mxu0 %v22629_v50 }
 0x8ed   :  { %10522 = vmatpush1.bf16.msra.mxu1 %v22633_v4  ;;  %10563 = vmatpush1.bf16.msra.mxu0 %v22635_v42 }
 0x8ee   :  { %10523 = vmatprep.subr.bf16.mxu1 %v22639_v57  ;;  %10564 = vmatprep.subr.bf16.mxu0 %v22641_v39 }
 0x8f1   :  { %10524 = vmatpush1.bf16.msra.mxu1 %v22645_v34  ;;  %10565 = vmatpush1.bf16.msra.mxu0 %v22647_v49 }
 0x8f2   :  { %10525 = vmatprep.subr.bf16.mxu1 %v22651_v35  ;;  %10566 = vmatprep.subr.bf16.mxu0 %v22653_v28 }
 0x8f5   :  { %10526 = vmatpush1.bf16.msra.mxu1 %v22657_v61  ;;  %10567 = vmatpush1.bf16.msra.mxu0 %v22659_v24 }
 0x8f6   :  { %10593 = vmatprep.subr.bf16.mxu1 %v22663_v55  ;;  %10644 = vmatprep.subr.bf16.mxu0 %v22552_v62 }
 0x8f8   :  { %v9445_v54 = vpop.f32.mrf.mxu1  ;;  %v9486_v46 = vpop.f32.mrf.mxu0  ;;  %10544 = vmatmul.mubr.bf16.vlgmr.msra.gmra.mxu1 %v22670_v31  ;;  %10585 = vmatmul.mubr.bf16.vlgmr.msra.gmra.mxu0 %v22670_v31 }
 0x8f9   :  { %v22679_v8 = vadd.f32 %v9445_v54, %v22458_v25  ;;  %v22682_v43 = vadd.f32 %v9486_v46, %v22461_v63  ;;  %10594 = vmatpush1.bf16.msra.mxu1 %v22667_v48  ;;  %10645 = vmatpush1.bf16.msra.mxu0 %v22557_v41  ;;  %v22803_v54 = vld [vmem:[#allocation8 + $0x1bf0] ss:$24 sps:$4 sm:$0xff]  }
 0x8fa   :  { %v9447_v62 = vpop.f32.mrf.mxu1  ;;  %v9488_v5 = vpop.f32.mrf.mxu0  ;;  %10595 = vmatprep.subr.bf16.mxu1 %v22674_v7  ;;  %10646 = vmatprep.subr.bf16.mxu0 %v22563_v11  ;;  %v22805_v46 = vld [vmem:[#allocation8 + $0x1bf8] ss:$24 sps:$4 sm:$0xff]  }
 0x8fb   :  { %v22693_v25 = vadd.f32 %v9447_v62, %v22472_v6  ;;  %v22696_v63 = vadd.f32 %v9488_v5, %v22475_v23  ;;  %10625 = vmatprep.mubr.bf16.mxu1 %v24500_v40  ;;  %10676 = vmatprep.mubr.bf16.mxu0 %v24500_v40  ;;  %v18143_v6 = vld [vmem:[#allocation8 + $0x1a54] ss:$24 sps:$4 sm:$0xff]   ;;  %v18141_v23 = vld [vmem:[#allocation8 + $0x1a50] ss:$24 sps:$4 sm:$0xff]   ;;  %v22815_v5 = vld [vmem:[#allocation8 + $0x1bc0] ss:$24 sps:$4 sm:$0xff]  }
 0x8fc   :  { %v9449_v41 = vpop.f32.mrf.mxu1  ;;  %v9490_v1 = vpop.f32.mrf.mxu0  ;;  %v22811_v62 = vld [vmem:[#allocation8 + $0x1bcc] ss:$24 sps:$4 sm:$0xff]  }
 0x8fd   :  { %10596 = vmatpush1.bf16.msra.mxu1 %v22686_v14  ;;  %10647 = vmatpush1.bf16.msra.mxu0 %v22577_v51  ;;  %v18144_v51 = vld [vmem:[#allocation8 + $0x1a20] ss:$24 sps:$4 sm:$0xff]   ;;  %v22821_v41 = vld [vmem:[#allocation8 + $0x1b94] ss:$24 sps:$4 sm:$0xff]  }
 0x8fe   :  { %v9450_v11 = vpop.f32.mrf.mxu1  ;;  %v9491_v58 = vpop.f32.mrf.mxu0  ;;  %10597 = vmatprep.subr.bf16.mxu1 %v22690_v47  ;;  %10648 = vmatprep.subr.bf16.mxu0 %v22583_v0  ;;  %v18147_v0 = vld [vmem:[#allocation8 + $0x19f0] ss:$24 sps:$4 sm:$0xff]   ;;  %v22823_v1 = vld [vmem:[#allocation8 + $0x1b9c] ss:$24 sps:$4 sm:$0xff]  }
 0x8ff   :  { %v22829_v11 = vld [vmem:[#allocation8 + $0x1b98] ss:$24 sps:$4 sm:$0xff]   ;;  %v22833_v58 = vld [vmem:[#allocation8 + $0x1b64] ss:$24 sps:$4 sm:$0xff]  }
 0x901   :  { %10598 = vmatpush1.bf16.msra.mxu1 %v22702_v2  ;;  %10649 = vmatpush1.bf16.msra.mxu0 %v22597_v27  ;;  %v18152_v27 = vld [vmem:[#allocation8 + $0x19c4] ss:$24 sps:$4 sm:$0xff]  }
 0x902   :  { %10599 = vmatprep.subr.bf16.mxu1 %v18143_v6  ;;  %10650 = vmatprep.subr.bf16.mxu0 %v22603_v12  ;;  %v18155_v12 = vld [vmem:[#allocation8 + $0x1994] ss:$24 sps:$4 sm:$0xff]  }
 0x905   :  { %10600 = vmatpush1.bf16.msra.mxu1 %v18141_v23  ;;  %10651 = vmatpush1.bf16.msra.mxu0 %v22609_v44  ;;  %v18153_v44 = vld [vmem:[#allocation8 + $0x1990] ss:$24 sps:$4 sm:$0xff]  }
 0x906   :  { %10601 = vmatprep.subr.bf16.mxu1 %v18146_v17  ;;  %10652 = vmatprep.subr.bf16.mxu0 %v22615_v20  ;;  %v22719_v20 = vshrl.u32 %v22510_v60, 16 }
 0x909   :  { %10602 = vmatpush1.bf16.msra.mxu1 %v18144_v51  ;;  %10653 = vmatpush1.bf16.msra.mxu0 %v22621_v56 }
 0x90a   :  { %10603 = vmatprep.subr.bf16.mxu1 %v18149_v19  ;;  %10654 = vmatprep.subr.bf16.mxu0 %v22627_v22 }
 0x90d   :  { %10604 = vmatpush1.bf16.msra.mxu1 %v18147_v0  ;;  %10655 = vmatpush1.bf16.msra.mxu0 %v22633_v4 }
 0x90e   :  { %10605 = vmatprep.subr.bf16.mxu1 %v18152_v27  ;;  %10656 = vmatprep.subr.bf16.mxu0 %v22639_v57 }
 0x911   :  { %10606 = vmatpush1.bf16.msra.mxu1 %v18150_v15  ;;  %10657 = vmatpush1.bf16.msra.mxu0 %v22645_v34 }
 0x912   :  { %10607 = vmatprep.subr.bf16.mxu1 %v18155_v12  ;;  %10658 = vmatprep.subr.bf16.mxu0 %v22651_v35 }
 0x915   :  { %10608 = vmatpush1.bf16.msra.mxu1 %v18153_v44  ;;  %10659 = vmatpush1.bf16.msra.mxu0 %v22657_v61 }
 0x916   :  { %10685 = vmatprep.subr.bf16.mxu1 %v22554_v29  ;;  %10726 = vmatprep.subr.bf16.mxu0 %v22663_v55 }
 0x918   :  { %v9527_v56 = vpop.f32.mrf.mxu1  ;;  %v9576_v22 = vpop.f32.mrf.mxu0  ;;  %10626 = vmatmul.mubr.bf16.vlgmr.msra.gmra.mxu1 %v22670_v31  ;;  %10677 = vmatmul.mubr.bf16.vlgmr.msra.gmra.mxu0 %v22719_v20 }
 0x919   :  { %v22726_v4 = vadd.f32 %v9527_v56, %v22517_v21  ;;  %v22729_v57 = vadd.f32 %v9576_v22, %v22520_v9  ;;  %10686 = vmatpush1.bf16.msra.mxu1 %v22559_v16  ;;  %10727 = vmatpush1.bf16.msra.mxu0 %v22667_v48  ;;  %v22865_v56 = vld [vmem:[#allocation8 + $0x1b08] ss:$24 sps:$4 sm:$0xff]   ;;  %v22869_v22 = vld [vmem:[#allocation8 + $0x1c64] ss:$24 sps:$4 sm:$0xff]  }
 0x91a   :  { %v9529_v34 = vpop.f32.mrf.mxu1  ;;  %v9578_v29 = vpop.f32.mrf.mxu0  ;;  %10687 = vmatprep.subr.bf16.mxu1 %v22565_v32  ;;  %10728 = vmatprep.subr.bf16.mxu0 %v22674_v7 }
 0x91b   :  { %v22736_v35 = vadd.f32 %v9529_v34, %v22527_v52  ;;  %v22739_v61 = vadd.f32 %v9578_v29, %v22530_v13  ;;  %10717 = vmatprep.mubr.bf16.mxu1 %v24500_v40  ;;  %10758 = vmatprep.mubr.bf16.mxu0 %v24500_v40  ;;  %v22758_v52 = vld [vmem:[#allocation8 + $0x1c54] ss:$24 sps:$4 sm:$0xff]   ;;  %v22873_v34 = vld [vmem:[#allocation8 + $0x1c60] ss:$24 sps:$4 sm:$0xff]   ;;  %v22876_v29 = vrot.slane %v22449_v10, 1 }
 0x91c   :  { %v9531_v21 = vpop.f32.mrf.mxu1  ;;  %v9580_v9 = vpop.f32.mrf.mxu0  ;;  %v22760_v13 = vld [vmem:[#allocation8 + $0x1c5c] ss:$24 sps:$4 sm:$0xff]  }
 0x91d   :  { %10688 = vmatpush1.bf16.msra.mxu1 %v22579_v45  ;;  %10729 = vmatpush1.bf16.msra.mxu0 %v22686_v14  ;;  %v22763_v45 = vld [vmem:[#allocation8 + $0x1c50] ss:$24 sps:$4 sm:$0xff]   ;;  %v22880_v21 = vld [vmem:[#allocation8 + $0x1c34] ss:$24 sps:$4 sm:$0xff]  }
 0x91e   :  { %v9532_v16 = vpop.f32.mrf.mxu1  ;;  %v9581_v32 = vpop.f32.mrf.mxu0  ;;  %10689 = vmatprep.subr.bf16.mxu1 %v22585_v3  ;;  %10730 = vmatprep.subr.bf16.mxu0 %v22690_v47  ;;  %v22765_v3 = vld [vmem:[#allocation8 + $0x1c58] ss:$24 sps:$4 sm:$0xff]   ;;  %v22817_v47 = vld [vmem:[#allocation8 + $0x1bc8] ss:$24 sps:$4 sm:$0xff]  }
 0x921   :  { %10690 = vmatpush1.bf16.msra.mxu1 %v22599_v36  ;;  %10731 = vmatpush1.bf16.msra.mxu0 %v22702_v2  ;;  %v22769_v36 = vld [vmem:[#allocation8 + $0x1c24] ss:$24 sps:$4 sm:$0xff]   ;;  %v22827_v2 = vld [vmem:[#allocation8 + $0x1b90] ss:$24 sps:$4 sm:$0xff]  }
 0x922   :  { %10691 = vmatprep.subr.bf16.mxu1 %v22605_v37  ;;  %10732 = vmatprep.subr.bf16.mxu0 %v18143_v6  ;;  %v22771_v37 = vld [vmem:[#allocation8 + $0x1c2c] ss:$24 sps:$4 sm:$0xff]  }
 0x923   :  { %v22835_v6 = vld [vmem:[#allocation8 + $0x1b6c] ss:$24 sps:$4 sm:$0xff]  }
 0x925   :  { %10692 = vmatpush1.bf16.msra.mxu1 %v22611_v38  ;;  %10733 = vmatpush1.bf16.msra.mxu0 %v18141_v23  ;;  %v22839_v23 = vld [vmem:[#allocation8 + $0x1b60] ss:$24 sps:$4 sm:$0xff]  }
 0x926   :  { %10693 = vmatprep.subr.bf16.mxu1 %v22617_v53  ;;  %10734 = vmatprep.subr.bf16.mxu0 %v18146_v17  ;;  %v22841_v17 = vld [vmem:[#allocation8 + $0x1b68] ss:$24 sps:$4 sm:$0xff]  }
 0x929   :  { %10694 = vmatpush1.bf16.msra.mxu1 %v22623_v26  ;;  %10735 = vmatpush1.bf16.msra.mxu0 %v18144_v51  ;;  %v22845_v51 = vld [vmem:[#allocation8 + $0x1b34] ss:$24 sps:$4 sm:$0xff]  }
 0x92a   :  { %10695 = vmatprep.subr.bf16.mxu1 %v22629_v50  ;;  %10736 = vmatprep.subr.bf16.mxu0 %v18149_v19  ;;  %v22847_v19 = vld [vmem:[#allocation8 + $0x1b3c] ss:$24 sps:$4 sm:$0xff]  }
 0x92d   :  { %10696 = vmatpush1.bf16.msra.mxu1 %v22635_v42  ;;  %10737 = vmatpush1.bf16.msra.mxu0 %v18147_v0  ;;  %v22783_v42 = vld [vmem:[#allocation8 + $0x1c20] ss:$24 sps:$4 sm:$0xff]   ;;  %v22851_v0 = vld [vmem:[#allocation8 + $0x1b30] ss:$24 sps:$4 sm:$0xff]  }
 0x92e   :  { %10697 = vmatprep.subr.bf16.mxu1 %v22641_v39  ;;  %10738 = vmatprep.subr.bf16.mxu0 %v18152_v27  ;;  %v22785_v39 = vld [vmem:[#allocation8 + $0x1c28] ss:$24 sps:$4 sm:$0xff]   ;;  %v22853_v27 = vld [vmem:[#allocation8 + $0x1b38] ss:$24 sps:$4 sm:$0xff]  }
 0x931   :  { %10698 = vmatpush1.bf16.msra.mxu1 %v22647_v49  ;;  %10739 = vmatpush1.bf16.msra.mxu0 %v18150_v15  ;;  %v22857_v15 = vld [vmem:[#allocation8 + $0x1b04] ss:$24 sps:$4 sm:$0xff]  }
 0x932   :  { %10699 = vmatprep.subr.bf16.mxu1 %v22653_v28  ;;  %10740 = vmatprep.subr.bf16.mxu0 %v18155_v12  ;;  %v22859_v12 = vld [vmem:[#allocation8 + $0x1b0c] ss:$24 sps:$4 sm:$0xff]  }
 0x935   :  { %10700 = vmatpush1.bf16.msra.mxu1 %v22659_v24  ;;  %10741 = vmatpush1.bf16.msra.mxu0 %v18153_v44  ;;  %v22789_v24 = vld [vmem:[#allocation8 + $0x1bf4] ss:$24 sps:$4 sm:$0xff]   ;;  %v22863_v44 = vld [vmem:[#allocation8 + $0x1b00] ss:$24 sps:$4 sm:$0xff]  }
 0x936   :  { %11065 = vmatprep.subr.bf16.mxu1 %v22758_v52  ;;  %11106 = vmatprep.subr.bf16.mxu0 %v22760_v13 }
 0x938   :  { %v9617_v38 = vpop.f32.mrf.mxu1  ;;  %v9658_v53 = vpop.f32.mrf.mxu0  ;;  %10718 = vmatmul.mubr.bf16.vlgmr.msra.gmra.mxu1 %v22719_v20  ;;  %10759 = vmatmul.mubr.bf16.vlgmr.msra.gmra.mxu0 %v22719_v20 }
 0x939   :  { %v22776_v26 = vadd.f32 %v9617_v38, %v22570_v18  ;;  %v22779_v50 = vadd.f32 %v9658_v53, %v22573_v33  ;;  %11066 = vmatpush1.bf16.msra.mxu1 %v22763_v45  ;;  %11107 = vmatpush1.bf16.msra.mxu0 %v22765_v3  ;;  %v22791_v18 = vld [vmem:[#allocation8 + $0x1bfc] ss:$24 sps:$4 sm:$0xff]   ;;  %v22892_v53 = vld [vmem:[#allocation8 + $0x1c30] ss:$24 sps:$4 sm:$0xff]  }
 0x93a   :  { %v9619_v49 = vpop.f32.mrf.mxu1  ;;  %v9660_v28 = vpop.f32.mrf.mxu0  ;;  %11067 = vmatprep.subr.bf16.mxu1 %v22769_v36  ;;  %11108 = vmatprep.subr.bf16.mxu0 %v22771_v37 }
 0x93b   :  { %v22794_v33 = vadd.f32 %v9619_v49, %v22588_v30  ;;  %v22797_v55 = vadd.f32 %v9660_v28, %v22591_v59  ;;  %11097 = vmatprep.mubr.bf16.mxu1 %v24500_v40  ;;  %11138 = vmatprep.mubr.bf16.mxu0 %v24500_v40  ;;  %v22809_v59 = vld [vmem:[#allocation8 + $0x1bc4] ss:$24 sps:$4 sm:$0xff]  }
 0x93c   :  { %v9621_v48 = vpop.f32.mrf.mxu1  ;;  %v9662_v7 = vpop.f32.mrf.mxu0  ;;  %v22896_v28 = vld [vmem:[#allocation8 + $0x1c04] ss:$24 sps:$4 sm:$0xff]  }
 0x93d   :  { %11068 = vmatpush1.bf16.msra.mxu1 %v22783_v42  ;;  %11109 = vmatpush1.bf16.msra.mxu0 %v22785_v39  ;;  %v22908_v7 = vld [vmem:[#allocation8 + $0x1c00] ss:$24 sps:$4 sm:$0xff]  }
 0x93e   :  { %v9622_v14 = vpop.f32.mrf.mxu1  ;;  %v9663_v30 = vpop.f32.mrf.mxu0  ;;  %11069 = vmatprep.subr.bf16.mxu1 %v22789_v24  ;;  %11110 = vmatprep.subr.bf16.mxu0 %v22791_v18 }
 0x93f   :  { %v18218_v30 = vld [vmem:[#allocation8 + $0x1ba4] ss:$24 sps:$4 sm:$0xff]  }
 0x941   :  { %11070 = vmatpush1.bf16.msra.mxu1 %v22803_v54  ;;  %11111 = vmatpush1.bf16.msra.mxu0 %v22805_v46 }
 0x942   :  { %11071 = vmatprep.subr.bf16.mxu1 %v22809_v59  ;;  %11112 = vmatprep.subr.bf16.mxu0 %v22811_v62 }
 0x945   :  { %11072 = vmatpush1.bf16.msra.mxu1 %v22815_v5  ;;  %11113 = vmatpush1.bf16.msra.mxu0 %v22817_v47 }
 0x946   :  { %11073 = vmatprep.subr.bf16.mxu1 %v22821_v41  ;;  %11114 = vmatprep.subr.bf16.mxu0 %v22823_v1 }
 0x949   :  { %11074 = vmatpush1.bf16.msra.mxu1 %v22827_v2  ;;  %11115 = vmatpush1.bf16.msra.mxu0 %v22829_v11 }
 0x94a   :  { %11075 = vmatprep.subr.bf16.mxu1 %v22833_v58  ;;  %11116 = vmatprep.subr.bf16.mxu0 %v22835_v6 }
 0x94d   :  { %11076 = vmatpush1.bf16.msra.mxu1 %v22839_v23  ;;  %11117 = vmatpush1.bf16.msra.mxu0 %v22841_v17 }
 0x94e   :  { %11077 = vmatprep.subr.bf16.mxu1 %v22845_v51  ;;  %11118 = vmatprep.subr.bf16.mxu0 %v22847_v19 }
 0x951   :  { %11078 = vmatpush1.bf16.msra.mxu1 %v22851_v0  ;;  %11119 = vmatpush1.bf16.msra.mxu0 %v22853_v27 }
 0x952   :  { %11079 = vmatprep.subr.bf16.mxu1 %v22857_v15  ;;  %11120 = vmatprep.subr.bf16.mxu0 %v22859_v12 }
 0x955   :  { %11080 = vmatpush1.bf16.msra.mxu1 %v22863_v44  ;;  %11121 = vmatpush1.bf16.msra.mxu0 %v22865_v56 }
 0x956   :  { %11147 = vmatprep.subr.bf16.mxu1 %v22869_v22  ;;  %11197 = vmatprep.subr.bf16.mxu0 %v22758_v52 }
 0x958   :  { %v9994_v9 = vpop.f32.mrf.mxu1  ;;  %v10035_v16 = vpop.f32.mrf.mxu0  ;;  %11098 = vmatmul.mubr.bf16.vlgmr.msra.gmra.mxu1 %v22876_v29  ;;  %11139 = vmatmul.mubr.bf16.vlgmr.msra.gmra.mxu0 %v22876_v29 }
 0x959   :  { %v22885_v32 = vadd.f32 %v9994_v9, %v22679_v8  ;;  %v22888_v38 = vadd.f32 %v10035_v16, %v22682_v43  ;;  %11148 = vmatpush1.bf16.msra.mxu1 %v22873_v34  ;;  %11198 = vmatpush1.bf16.msra.mxu0 %v22763_v45  ;;  %v18221_v9 = vld [vmem:[#allocation8 + $0x1b74] ss:$24 sps:$4 sm:$0xff]   ;;  %v23004_v16 = vld [vmem:[#allocation8 + $0x1d70] ss:$24 sps:$4 sm:$0xff]  }
 0x95a   :  { %v9996_v52 = vpop.f32.mrf.mxu1  ;;  %v10037_v49 = vpop.f32.mrf.mxu0  ;;  %11149 = vmatprep.subr.bf16.mxu1 %v22880_v21  ;;  %11199 = vmatprep.subr.bf16.mxu0 %v22769_v36 }
 0x95b   :  { %v22899_v8 = vadd.f32 %v9996_v52, %v22693_v25  ;;  %v22902_v43 = vadd.f32 %v10037_v49, %v22696_v63  ;;  %11179 = vmatprep.mubr.bf16.mxu1 %v24500_v40  ;;  %11229 = vmatprep.mubr.bf16.mxu0 %v24500_v40  ;;  %v18215_v25 = vld [vmem:[#allocation8 + $0x1bd4] ss:$24 sps:$4 sm:$0xff]   ;;  %v18213_v63 = vld [vmem:[#allocation8 + $0x1bd0] ss:$24 sps:$4 sm:$0xff]  }
 0x95c   :  { %v9998_v45 = vpop.f32.mrf.mxu1  ;;  %v10039_v48 = vpop.f32.mrf.mxu0  ;;  %v23012_v49 = vld [vmem:[#allocation8 + $0x1d4c] ss:$24 sps:$4 sm:$0xff]  }
 0x95d   :  { %11150 = vmatpush1.bf16.msra.mxu1 %v22892_v53  ;;  %11200 = vmatpush1.bf16.msra.mxu0 %v22783_v42  ;;  %v18216_v42 = vld [vmem:[#allocation8 + $0x1ba0] ss:$24 sps:$4 sm:$0xff]   ;;  %v23022_v48 = vld [vmem:[#allocation8 + $0x1d14] ss:$24 sps:$4 sm:$0xff]  }
 0x95e   :  { %v9999_v36 = vpop.f32.mrf.mxu1  ;;  %v10040_v14 = vpop.f32.mrf.mxu0  ;;  %11151 = vmatprep.subr.bf16.mxu1 %v22896_v28  ;;  %11201 = vmatprep.subr.bf16.mxu0 %v22789_v24  ;;  %v18219_v24 = vld [vmem:[#allocation8 + $0x1b70] ss:$24 sps:$4 sm:$0xff]  }
 0x95f   :  { %v23018_v45 = vld [vmem:[#allocation8 + $0x1d48] ss:$24 sps:$4 sm:$0xff]   ;;  %v23030_v14 = vld [vmem:[#allocation8 + $0x1d18] ss:$24 sps:$4 sm:$0xff]  }
 0x960   :  { %v23028_v36 = vld [vmem:[#allocation8 + $0x1d10] ss:$24 sps:$4 sm:$0xff]  }
 0x961   :  { %11152 = vmatpush1.bf16.msra.mxu1 %v22908_v7  ;;  %11202 = vmatpush1.bf16.msra.mxu0 %v22803_v54  ;;  %v18224_v54 = vld [vmem:[#allocation8 + $0x1b44] ss:$24 sps:$4 sm:$0xff]  }
 0x962   :  { %11153 = vmatprep.subr.bf16.mxu1 %v18215_v25  ;;  %11203 = vmatprep.subr.bf16.mxu0 %v22809_v59  ;;  %v18222_v59 = vld [vmem:[#allocation8 + $0x1b40] ss:$24 sps:$4 sm:$0xff]  }
 0x965   :  { %11154 = vmatpush1.bf16.msra.mxu1 %v18213_v63  ;;  %11204 = vmatpush1.bf16.msra.mxu0 %v22815_v5  ;;  %v18227_v5 = vld [vmem:[#allocation8 + $0x1b14] ss:$24 sps:$4 sm:$0xff]  }
 0x966   :  { %11155 = vmatprep.subr.bf16.mxu1 %v18218_v30  ;;  %11205 = vmatprep.subr.bf16.mxu0 %v22821_v41  ;;  %v18225_v41 = vld [vmem:[#allocation8 + $0x1b10] ss:$24 sps:$4 sm:$0xff]  }
 0x969   :  { %11156 = vmatpush1.bf16.msra.mxu1 %v18216_v42  ;;  %11206 = vmatpush1.bf16.msra.mxu0 %v22827_v2  ;;  %v11195_v2 = vrot.slane %v22510_v60, 1 }
 0x96a   :  { %11157 = vmatprep.subr.bf16.mxu1 %v18221_v9  ;;  %11207 = vmatprep.subr.bf16.mxu0 %v22833_v58 }
 0x96d   :  { %11158 = vmatpush1.bf16.msra.mxu1 %v18219_v24  ;;  %11208 = vmatpush1.bf16.msra.mxu0 %v22839_v23 }
 0x96e   :  { %11159 = vmatprep.subr.bf16.mxu1 %v18224_v54  ;;  %11209 = vmatprep.subr.bf16.mxu0 %v22845_v51 }
 0x971   :  { %11160 = vmatpush1.bf16.msra.mxu1 %v18222_v59  ;;  %11210 = vmatpush1.bf16.msra.mxu0 %v22851_v0 }
 0x972   :  { %11161 = vmatprep.subr.bf16.mxu1 %v18227_v5  ;;  %11211 = vmatprep.subr.bf16.mxu0 %v22857_v15 }
 0x975   :  { %11162 = vmatpush1.bf16.msra.mxu1 %v18225_v41  ;;  %11212 = vmatpush1.bf16.msra.mxu0 %v22863_v44 }
 0x976   :  { %11238 = vmatprep.subr.bf16.mxu1 %v22760_v13  ;;  %11279 = vmatprep.subr.bf16.mxu0 %v22869_v22 }
 0x978   :  { %v10076_v58 = vpop.f32.mrf.mxu1  ;;  %v10123_v23 = vpop.f32.mrf.mxu0  ;;  %11180 = vmatmul.mubr.bf16.vlgmr.msra.gmra.mxu1 %v22876_v29  ;;  %11230 = vmatmul.mubr.bf16.vlgmr.msra.gmra.mxu0 %v11195_v2 }
 0x979   :  { %v22929_v51 = vadd.f32 %v10076_v58, %v22726_v4  ;;  %v22932_v0 = vadd.f32 %v10123_v23, %v22729_v57  ;;  %11239 = vmatpush1.bf16.msra.mxu1 %v22765_v3  ;;  %11280 = vmatpush1.bf16.msra.mxu0 %v22873_v34  ;;  %v23066_v58 = vld [vmem:[#allocation8 + $0x1c88] ss:$24 sps:$4 sm:$0xff]   ;;  %v23070_v23 = vld [vmem:[#allocation8 + $0x1de4] ss:$24 sps:$4 sm:$0xff]  }
 0x97a   :  { %v10078_v15 = vpop.f32.mrf.mxu1  ;;  %v10125_v44 = vpop.f32.mrf.mxu0  ;;  %11240 = vmatprep.subr.bf16.mxu1 %v22771_v37  ;;  %11281 = vmatprep.subr.bf16.mxu0 %v22880_v21 }
 0x97b   :  { %v22939_v13 = vadd.f32 %v10078_v15, %v22736_v35  ;;  %v22942_v22 = vadd.f32 %v10125_v44, %v22739_v61  ;;  %11270 = vmatprep.mubr.bf16.mxu1 %v24500_v40  ;;  %11311 = vmatprep.mubr.bf16.mxu0 %v24500_v40  ;;  %v22961_v35 = vld [vmem:[#allocation8 + $0x1dd4] ss:$24 sps:$4 sm:$0xff]   ;;  %v23074_v15 = vld [vmem:[#allocation8 + $0x1de0] ss:$24 sps:$4 sm:$0xff]   ;;  %v23077_v44 = vrot.slane %v22670_v31, 1 }
 0x97c   :  { %v10080_v4 = vpop.f32.mrf.mxu1  ;;  %v10127_v57 = vpop.f32.mrf.mxu0  ;;  %v22963_v61 = vld [vmem:[#allocation8 + $0x1ddc] ss:$24 sps:$4 sm:$0xff]  }
 0x97d   :  { %11241 = vmatpush1.bf16.msra.mxu1 %v22785_v39  ;;  %11282 = vmatpush1.bf16.msra.mxu0 %v22892_v53  ;;  %v22966_v39 = vld [vmem:[#allocation8 + $0x1dd0] ss:$24 sps:$4 sm:$0xff]   ;;  %v23081_v4 = vld [vmem:[#allocation8 + $0x1db4] ss:$24 sps:$4 sm:$0xff]  }
 0x97e   :  { %v10081_v3 = vpop.f32.mrf.mxu1  ;;  %v10128_v37 = vpop.f32.mrf.mxu0  ;;  %11242 = vmatprep.subr.bf16.mxu1 %v22791_v18  ;;  %11283 = vmatprep.subr.bf16.mxu0 %v22896_v28  ;;  %v22968_v18 = vld [vmem:[#allocation8 + $0x1dd8] ss:$24 sps:$4 sm:$0xff]  }
 0x97f   :  { %v23006_v53 = vld [vmem:[#allocation8 + $0x1d78] ss:$24 sps:$4 sm:$0xff]  }
 0x980   :  { %v23016_v28 = vld [vmem:[#allocation8 + $0x1d40] ss:$24 sps:$4 sm:$0xff]  }
 0x981   :  { %11243 = vmatpush1.bf16.msra.mxu1 %v22805_v46  ;;  %11284 = vmatpush1.bf16.msra.mxu0 %v22908_v7  ;;  %v22972_v46 = vld [vmem:[#allocation8 + $0x1da4] ss:$24 sps:$4 sm:$0xff]  }
 0x982   :  { %11244 = vmatprep.subr.bf16.mxu1 %v22811_v62  ;;  %11285 = vmatprep.subr.bf16.mxu0 %v18215_v25  ;;  %v22974_v62 = vld [vmem:[#allocation8 + $0x1dac] ss:$24 sps:$4 sm:$0xff]   ;;  %v23024_v7 = vld [vmem:[#allocation8 + $0x1d1c] ss:$24 sps:$4 sm:$0xff]  }
 0x983   :  { %v23034_v25 = vld [vmem:[#allocation8 + $0x1ce4] ss:$24 sps:$4 sm:$0xff]  }
 0x985   :  { %11245 = vmatpush1.bf16.msra.mxu1 %v22817_v47  ;;  %11286 = vmatpush1.bf16.msra.mxu0 %v18213_v63  ;;  %v23036_v63 = vld [vmem:[#allocation8 + $0x1cec] ss:$24 sps:$4 sm:$0xff]  }
 0x986   :  { %11246 = vmatprep.subr.bf16.mxu1 %v22823_v1  ;;  %11287 = vmatprep.subr.bf16.mxu0 %v18218_v30  ;;  %v23040_v30 = vld [vmem:[#allocation8 + $0x1ce0] ss:$24 sps:$4 sm:$0xff]  }
 0x989   :  { %11247 = vmatpush1.bf16.msra.mxu1 %v22829_v11  ;;  %11288 = vmatpush1.bf16.msra.mxu0 %v18216_v42  ;;  %v23042_v42 = vld [vmem:[#allocation8 + $0x1ce8] ss:$24 sps:$4 sm:$0xff]  }
 0x98a   :  { %11248 = vmatprep.subr.bf16.mxu1 %v22835_v6  ;;  %11289 = vmatprep.subr.bf16.mxu0 %v18221_v9  ;;  %v23046_v9 = vld [vmem:[#allocation8 + $0x1cb4] ss:$24 sps:$4 sm:$0xff]  }
 0x98d   :  { %11249 = vmatpush1.bf16.msra.mxu1 %v22841_v17  ;;  %11290 = vmatpush1.bf16.msra.mxu0 %v18219_v24  ;;  %v22984_v17 = vld [vmem:[#allocation8 + $0x1da0] ss:$24 sps:$4 sm:$0xff]   ;;  %v23048_v24 = vld [vmem:[#allocation8 + $0x1cbc] ss:$24 sps:$4 sm:$0xff]  }
 0x98e   :  { %11250 = vmatprep.subr.bf16.mxu1 %v22847_v19  ;;  %11291 = vmatprep.subr.bf16.mxu0 %v18224_v54  ;;  %v22986_v19 = vld [vmem:[#allocation8 + $0x1da8] ss:$24 sps:$4 sm:$0xff]  }
 0x98f   :  { %v23052_v54 = vld [vmem:[#allocation8 + $0x1cb0] ss:$24 sps:$4 sm:$0xff]  }
 0x991   :  { %11251 = vmatpush1.bf16.msra.mxu1 %v22853_v27  ;;  %11292 = vmatpush1.bf16.msra.mxu0 %v18222_v59  ;;  %v23054_v59 = vld [vmem:[#allocation8 + $0x1cb8] ss:$24 sps:$4 sm:$0xff]  }
 0x992   :  { %11252 = vmatprep.subr.bf16.mxu1 %v22859_v12  ;;  %11293 = vmatprep.subr.bf16.mxu0 %v18227_v5  ;;  %v23058_v5 = vld [vmem:[#allocation8 + $0x1c84] ss:$24 sps:$4 sm:$0xff]  }
 0x995   :  { %11253 = vmatpush1.bf16.msra.mxu1 %v22865_v56  ;;  %11294 = vmatpush1.bf16.msra.mxu0 %v18225_v41  ;;  %v22990_v56 = vld [vmem:[#allocation8 + $0x1d74] ss:$24 sps:$4 sm:$0xff]  }
 0x996   :  { %11617 = vmatprep.subr.bf16.mxu1 %v22961_v35  ;;  %11658 = vmatprep.subr.bf16.mxu0 %v22963_v61  ;;  %v23060_v41 = vld [vmem:[#allocation8 + $0x1c8c] ss:$24 sps:$4 sm:$0xff]  }
 0x998   :  { %v10164_v47 = vpop.f32.mrf.mxu1  ;;  %v10205_v1 = vpop.f32.mrf.mxu0  ;;  %11271 = vmatmul.mubr.bf16.vlgmr.msra.gmra.mxu1 %v11195_v2  ;;  %11312 = vmatmul.mubr.bf16.vlgmr.msra.gmra.mxu0 %v11195_v2  ;;  %v23064_v2 = vld [vmem:[#allocation8 + $0x1c80] ss:$24 sps:$4 sm:$0xff]  }
 0x999   :  { %v22977_v11 = vadd.f32 %v10164_v47, %v22776_v26  ;;  %v22980_v6 = vadd.f32 %v10205_v1, %v22779_v50  ;;  %11618 = vmatpush1.bf16.msra.mxu1 %v22966_v39  ;;  %11659 = vmatpush1.bf16.msra.mxu0 %v22968_v18  ;;  %v22992_v26 = vld [vmem:[#allocation8 + $0x1d7c] ss:$24 sps:$4 sm:$0xff]   ;;  %v23093_v1 = vld [vmem:[#allocation8 + $0x1db0] ss:$24 sps:$4 sm:$0xff]  }
 0x99a   :  { %v10166_v27 = vpop.f32.mrf.mxu1  ;;  %v10207_v12 = vpop.f32.mrf.mxu0  ;;  %11619 = vmatprep.subr.bf16.mxu1 %v22972_v46  ;;  %11660 = vmatprep.subr.bf16.mxu0 %v22974_v62 }
 0x99b   :  { %v22995_v50 = vadd.f32 %v10166_v27, %v22794_v33  ;;  %v22998_v34 = vadd.f32 %v10207_v12, %v22797_v55  ;;  %11649 = vmatprep.mubr.bf16.mxu1 %v24500_v40  ;;  %11690 = vmatprep.mubr.bf16.mxu0 %v24500_v40  ;;  %v23010_v55 = vld [vmem:[#allocation8 + $0x1d44] ss:$24 sps:$4 sm:$0xff]  }
 0x99c   :  { %v10168_v29 = vpop.f32.mrf.mxu1  ;;  %v10209_v21 = vpop.f32.mrf.mxu0  ;;  %v23097_v12 = vld [vmem:[#allocation8 + $0x1d84] ss:$24 sps:$4 sm:$0xff]  }
 0x99d   :  { %11620 = vmatpush1.bf16.msra.mxu1 %v22984_v17  ;;  %11661 = vmatpush1.bf16.msra.mxu0 %v22986_v19  ;;  %v23109_v21 = vld [vmem:[#allocation8 + $0x1d80] ss:$24 sps:$4 sm:$0xff]  }
 0x99e   :  { %v10169_v52 = vpop.f32.mrf.mxu1  ;;  %v10210_v33 = vpop.f32.mrf.mxu0  ;;  %11621 = vmatprep.subr.bf16.mxu1 %v22990_v56  ;;  %11662 = vmatprep.subr.bf16.mxu0 %v22992_v26 }
 0x99f   :  { %v18290_v33 = vld [vmem:[#allocation8 + $0x1d24] ss:$24 sps:$4 sm:$0xff]  }
 0x9a1   :  { %11622 = vmatpush1.bf16.msra.mxu1 %v23004_v16  ;;  %11663 = vmatpush1.bf16.msra.mxu0 %v23006_v53 }
 0x9a2   :  { %11623 = vmatprep.subr.bf16.mxu1 %v23010_v55  ;;  %11664 = vmatprep.subr.bf16.mxu0 %v23012_v49 }
 0x9a5   :  { %11624 = vmatpush1.bf16.msra.mxu1 %v23016_v28  ;;  %11665 = vmatpush1.bf16.msra.mxu0 %v23018_v45 }
 0x9a6   :  { %11625 = vmatprep.subr.bf16.mxu1 %v23022_v48  ;;  %11666 = vmatprep.subr.bf16.mxu0 %v23024_v7 }
 0x9a9   :  { %11626 = vmatpush1.bf16.msra.mxu1 %v23028_v36  ;;  %11667 = vmatpush1.bf16.msra.mxu0 %v23030_v14 }
 0x9aa   :  { %11627 = vmatprep.subr.bf16.mxu1 %v23034_v25  ;;  %11668 = vmatprep.subr.bf16.mxu0 %v23036_v63 }
 0x9ad   :  { %11628 = vmatpush1.bf16.msra.mxu1 %v23040_v30  ;;  %11669 = vmatpush1.bf16.msra.mxu0 %v23042_v42 }
 0x9ae   :  { %11629 = vmatprep.subr.bf16.mxu1 %v23046_v9  ;;  %11670 = vmatprep.subr.bf16.mxu0 %v23048_v24 }
 0x9b1   :  { %11630 = vmatpush1.bf16.msra.mxu1 %v23052_v54  ;;  %11671 = vmatpush1.bf16.msra.mxu0 %v23054_v59 }
 0x9b2   :  { %11631 = vmatprep.subr.bf16.mxu1 %v23058_v5  ;;  %11672 = vmatprep.subr.bf16.mxu0 %v23060_v41 }
 0x9b5   :  { %11632 = vmatpush1.bf16.msra.mxu1 %v23064_v2  ;;  %11673 = vmatpush1.bf16.msra.mxu0 %v23066_v58 }
 0x9b6   :  { %11699 = vmatprep.subr.bf16.mxu1 %v23070_v23  ;;  %11748 = vmatprep.subr.bf16.mxu0 %v22961_v35 }
 0x9b8   :  { %v10545_v57 = vpop.f32.mrf.mxu1  ;;  %v10586_v3 = vpop.f32.mrf.mxu0  ;;  %11650 = vmatmul.mubr.bf16.vlgmr.msra.gmra.mxu1 %v23077_v44  ;;  %11691 = vmatmul.mubr.bf16.vlgmr.msra.gmra.mxu0 %v23077_v44 }
 0x9b9   :  { %v23086_v37 = vadd.f32 %v10545_v57, %v22885_v32  ;;  %v23089_v47 = vadd.f32 %v10586_v3, %v22888_v38  ;;  %11700 = vmatpush1.bf16.msra.mxu1 %v23074_v15  ;;  %11749 = vmatpush1.bf16.msra.mxu0 %v22966_v39  ;;  %v18293_v57 = vld [vmem:[#allocation8 + $0x1cf4] ss:$24 sps:$4 sm:$0xff]   ;;  %v23205_v3 = vld [vmem:[#allocation8 + $0x1ef0] ss:$24 sps:$4 sm:$0xff]  }
 0x9ba   :  { %v10547_v35 = vpop.f32.mrf.mxu1  ;;  %v10588_v27 = vpop.f32.mrf.mxu0  ;;  %11701 = vmatprep.subr.bf16.mxu1 %v23081_v4  ;;  %11750 = vmatprep.subr.bf16.mxu0 %v22972_v46 }
 0x9bb   :  { %v23100_v32 = vadd.f32 %v10547_v35, %v22899_v8  ;;  %v23103_v38 = vadd.f32 %v10588_v27, %v22902_v43  ;;  %11731 = vmatprep.mubr.bf16.mxu1 %v24500_v40  ;;  %11780 = vmatprep.mubr.bf16.mxu0 %v24500_v40  ;;  %v18287_v8 = vld [vmem:[#allocation8 + $0x1d54] ss:$24 sps:$4 sm:$0xff]   ;;  %v18285_v43 = vld [vmem:[#allocation8 + $0x1d50] ss:$24 sps:$4 sm:$0xff]  }
 0x9bc   :  { %v10549_v39 = vpop.f32.mrf.mxu1  ;;  %v10590_v29 = vpop.f32.mrf.mxu0  ;;  %v23213_v27 = vld [vmem:[#allocation8 + $0x1ecc] ss:$24 sps:$4 sm:$0xff]  }
 0x9bd   :  { %11702 = vmatpush1.bf16.msra.mxu1 %v23093_v1  ;;  %11751 = vmatpush1.bf16.msra.mxu0 %v22984_v17  ;;  %v18288_v17 = vld [vmem:[#allocation8 + $0x1d20] ss:$24 sps:$4 sm:$0xff]   ;;  %v23223_v29 = vld [vmem:[#allocation8 + $0x1e94] ss:$24 sps:$4 sm:$0xff]  }
 0x9be   :  { %v10550_v46 = vpop.f32.mrf.mxu1  ;;  %v10591_v52 = vpop.f32.mrf.mxu0  ;;  %11703 = vmatprep.subr.bf16.mxu1 %v23097_v12  ;;  %11752 = vmatprep.subr.bf16.mxu0 %v22990_v56  ;;  %v18291_v56 = vld [vmem:[#allocation8 + $0x1cf0] ss:$24 sps:$4 sm:$0xff]  }
 0x9bf   :  { %v23219_v39 = vld [vmem:[#allocation8 + $0x1ec8] ss:$24 sps:$4 sm:$0xff]   ;;  %v23231_v52 = vld [vmem:[#allocation8 + $0x1e98] ss:$24 sps:$4 sm:$0xff]  }
 0x9c0   :  { %v23229_v46 = vld [vmem:[#allocation8 + $0x1e90] ss:$24 sps:$4 sm:$0xff]  }
 0x9c1   :  { %11704 = vmatpush1.bf16.msra.mxu1 %v23109_v21  ;;  %11753 = vmatpush1.bf16.msra.mxu0 %v23004_v16  ;;  %v18296_v16 = vld [vmem:[#allocation8 + $0x1cc4] ss:$24 sps:$4 sm:$0xff]  }
 0x9c2   :  { %11705 = vmatprep.subr.bf16.mxu1 %v18287_v8  ;;  %11754 = vmatprep.subr.bf16.mxu0 %v23010_v55  ;;  %v18294_v55 = vld [vmem:[#allocation8 + $0x1cc0] ss:$24 sps:$4 sm:$0xff]  }
 0x9c5   :  { %11706 = vmatpush1.bf16.msra.mxu1 %v18285_v43  ;;  %11755 = vmatpush1.bf16.msra.mxu0 %v23016_v28  ;;  %v18299_v28 = vld [vmem:[#allocation8 + $0x1c94] ss:$24 sps:$4 sm:$0xff]  }
 0x9c6   :  { %11707 = vmatprep.subr.bf16.mxu1 %v18290_v33  ;;  %11756 = vmatprep.subr.bf16.mxu0 %v23022_v48  ;;  %v18297_v48 = vld [vmem:[#allocation8 + $0x1c90] ss:$24 sps:$4 sm:$0xff]  }
 0x9c9   :  { %11708 = vmatpush1.bf16.msra.mxu1 %v18288_v17  ;;  %11757 = vmatpush1.bf16.msra.mxu0 %v23028_v36  ;;  %v11746_v36 = vrot.slane %v22719_v20, 1 }
 0x9ca   :  { %11709 = vmatprep.subr.bf16.mxu1 %v18293_v57  ;;  %11758 = vmatprep.subr.bf16.mxu0 %v23034_v25 }
 0x9cd   :  { %11710 = vmatpush1.bf16.msra.mxu1 %v18291_v56  ;;  %11759 = vmatpush1.bf16.msra.mxu0 %v23040_v30 }
 0x9ce   :  { %11711 = vmatprep.subr.bf16.mxu1 %v18296_v16  ;;  %11760 = vmatprep.subr.bf16.mxu0 %v23046_v9 }
 0x9d1   :  { %11712 = vmatpush1.bf16.msra.mxu1 %v18294_v55  ;;  %11761 = vmatpush1.bf16.msra.mxu0 %v23052_v54 }
 0x9d2   :  { %11713 = vmatprep.subr.bf16.mxu1 %v18299_v28  ;;  %11762 = vmatprep.subr.bf16.mxu0 %v23058_v5 }
 0x9d5   :  { %11714 = vmatpush1.bf16.msra.mxu1 %v18297_v48  ;;  %11763 = vmatpush1.bf16.msra.mxu0 %v23064_v2 }
 0x9d6   :  { %11789 = vmatprep.subr.bf16.mxu1 %v22963_v61  ;;  %11830 = vmatprep.subr.bf16.mxu0 %v23070_v23 }
 0x9d8   :  { %v10627_v25 = vpop.f32.mrf.mxu1  ;;  %v10678_v30 = vpop.f32.mrf.mxu0  ;;  %11732 = vmatmul.mubr.bf16.vlgmr.msra.gmra.mxu1 %v23077_v44  ;;  %11781 = vmatmul.mubr.bf16.vlgmr.msra.gmra.mxu0 %v11746_v36 }
 0x9d9   :  { %v23130_v9 = vadd.f32 %v10627_v25, %v22929_v51  ;;  %v23133_v54 = vadd.f32 %v10678_v30, %v22932_v0  ;;  %11790 = vmatpush1.bf16.msra.mxu1 %v22968_v18  ;;  %11831 = vmatpush1.bf16.msra.mxu0 %v23074_v15  ;;  %v23267_v25 = vld [vmem:[#allocation8 + $0x1e08] ss:$24 sps:$4 sm:$0xff]   ;;  %v23271_v30 = vld [vmem:[#allocation8 + $0x1f64] ss:$24 sps:$4 sm:$0xff]  }
 0x9da   :  { %v10629_v5 = vpop.f32.mrf.mxu1  ;;  %v10680_v2 = vpop.f32.mrf.mxu0  ;;  %11791 = vmatprep.subr.bf16.mxu1 %v22974_v62  ;;  %11832 = vmatprep.subr.bf16.mxu0 %v23081_v4 }
 0x9db   :  { %v23140_v61 = vadd.f32 %v10629_v5, %v22939_v13  ;;  %v23143_v23 = vadd.f32 %v10680_v2, %v22942_v22  ;;  %11821 = vmatprep.mubr.bf16.mxu1 %v24500_v40  ;;  %11862 = vmatprep.mubr.bf16.mxu0 %v24500_v40  ;;  %v23162_v13 = vld [vmem:[#allocation8 + $0x1f54] ss:$24 sps:$4 sm:$0xff]   ;;  %v23275_v5 = vld [vmem:[#allocation8 + $0x1f60] ss:$24 sps:$4 sm:$0xff]   ;;  %v23278_v2 = vrot.slane %v22449_v10, 2 }
 0x9dc   :  { %v10631_v51 = vpop.f32.mrf.mxu1  ;;  %v10682_v0 = vpop.f32.mrf.mxu0  ;;  %v23164_v22 = vld [vmem:[#allocation8 + $0x1f5c] ss:$24 sps:$4 sm:$0xff]  }
 0x9dd   :  { %11792 = vmatpush1.bf16.msra.mxu1 %v22986_v19  ;;  %11833 = vmatpush1.bf16.msra.mxu0 %v23093_v1  ;;  %v23167_v19 = vld [vmem:[#allocation8 + $0x1f50] ss:$24 sps:$4 sm:$0xff]   ;;  %v23282_v51 = vld [vmem:[#allocation8 + $0x1f34] ss:$24 sps:$4 sm:$0xff]  }
 0x9de   :  { %v10632_v18 = vpop.f32.mrf.mxu1  ;;  %v10683_v62 = vpop.f32.mrf.mxu0  ;;  %11793 = vmatprep.subr.bf16.mxu1 %v22992_v26  ;;  %11834 = vmatprep.subr.bf16.mxu0 %v23097_v12  ;;  %v23169_v26 = vld [vmem:[#allocation8 + $0x1f58] ss:$24 sps:$4 sm:$0xff]  }
 0x9df   :  { %v23207_v1 = vld [vmem:[#allocation8 + $0x1ef8] ss:$24 sps:$4 sm:$0xff]  }
 0x9e0   :  { %v23217_v12 = vld [vmem:[#allocation8 + $0x1ec0] ss:$24 sps:$4 sm:$0xff]  }
 0x9e1   :  { %11794 = vmatpush1.bf16.msra.mxu1 %v23006_v53  ;;  %11835 = vmatpush1.bf16.msra.mxu0 %v23109_v21  ;;  %v23173_v53 = vld [vmem:[#allocation8 + $0x1f24] ss:$24 sps:$4 sm:$0xff]  }
 0x9e2   :  { %11795 = vmatprep.subr.bf16.mxu1 %v23012_v49  ;;  %11836 = vmatprep.subr.bf16.mxu0 %v18287_v8  ;;  %v23175_v49 = vld [vmem:[#allocation8 + $0x1f2c] ss:$24 sps:$4 sm:$0xff]   ;;  %v23225_v21 = vld [vmem:[#allocation8 + $0x1e9c] ss:$24 sps:$4 sm:$0xff]  }
 0x9e3   :  { %v23235_v8 = vld [vmem:[#allocation8 + $0x1e64] ss:$24 sps:$4 sm:$0xff]  }
 0x9e5   :  { %11796 = vmatpush1.bf16.msra.mxu1 %v23018_v45  ;;  %11837 = vmatpush1.bf16.msra.mxu0 %v18285_v43  ;;  %v23237_v43 = vld [vmem:[#allocation8 + $0x1e6c] ss:$24 sps:$4 sm:$0xff]  }
 0x9e6   :  { %11797 = vmatprep.subr.bf16.mxu1 %v23024_v7  ;;  %11838 = vmatprep.subr.bf16.mxu0 %v18290_v33  ;;  %v23241_v33 = vld [vmem:[#allocation8 + $0x1e60] ss:$24 sps:$4 sm:$0xff]  }
 0x9e9   :  { %11798 = vmatpush1.bf16.msra.mxu1 %v23030_v14  ;;  %11839 = vmatpush1.bf16.msra.mxu0 %v18288_v17  ;;  %v23243_v17 = vld [vmem:[#allocation8 + $0x1e68] ss:$24 sps:$4 sm:$0xff]  }
 0x9ea   :  { %11799 = vmatprep.subr.bf16.mxu1 %v23036_v63  ;;  %11840 = vmatprep.subr.bf16.mxu0 %v18293_v57  ;;  %v23247_v57 = vld [vmem:[#allocation8 + $0x1e34] ss:$24 sps:$4 sm:$0xff]  }
 0x9ed   :  { %11800 = vmatpush1.bf16.msra.mxu1 %v23042_v42  ;;  %11841 = vmatpush1.bf16.msra.mxu0 %v18291_v56  ;;  %v23185_v42 = vld [vmem:[#allocation8 + $0x1f20] ss:$24 sps:$4 sm:$0xff]   ;;  %v23249_v56 = vld [vmem:[#allocation8 + $0x1e3c] ss:$24 sps:$4 sm:$0xff]  }
 0x9ee   :  { %11801 = vmatprep.subr.bf16.mxu1 %v23048_v24  ;;  %11842 = vmatprep.subr.bf16.mxu0 %v18296_v16  ;;  %v23187_v24 = vld [vmem:[#allocation8 + $0x1f28] ss:$24 sps:$4 sm:$0xff]  }
 0x9ef   :  { %v23253_v16 = vld [vmem:[#allocation8 + $0x1e30] ss:$24 sps:$4 sm:$0xff]  }
 0x9f1   :  { %11802 = vmatpush1.bf16.msra.mxu1 %v23054_v59  ;;  %11843 = vmatpush1.bf16.msra.mxu0 %v18294_v55  ;;  %v23255_v55 = vld [vmem:[#allocation8 + $0x1e38] ss:$24 sps:$4 sm:$0xff]  }
 0x9f2   :  { %11803 = vmatprep.subr.bf16.mxu1 %v23060_v41  ;;  %11844 = vmatprep.subr.bf16.mxu0 %v18299_v28  ;;  %v23259_v28 = vld [vmem:[#allocation8 + $0x1e04] ss:$24 sps:$4 sm:$0xff]  }
 0x9f5   :  { %11804 = vmatpush1.bf16.msra.mxu1 %v23066_v58  ;;  %11845 = vmatpush1.bf16.msra.mxu0 %v18297_v48  ;;  %v23191_v58 = vld [vmem:[#allocation8 + $0x1ef4] ss:$24 sps:$4 sm:$0xff]  }
 0x9f6   :  { %12168 = vmatprep.subr.bf16.mxu1 %v23162_v13  ;;  %12209 = vmatprep.subr.bf16.mxu0 %v23164_v22  ;;  %v23261_v48 = vld [vmem:[#allocation8 + $0x1e0c] ss:$24 sps:$4 sm:$0xff]  }
 0x9f8   :  { %v10719_v45 = vpop.f32.mrf.mxu1  ;;  %v10760_v7 = vpop.f32.mrf.mxu0  ;;  %11822 = vmatmul.mubr.bf16.vlgmr.msra.gmra.mxu1 %v11746_v36  ;;  %11863 = vmatmul.mubr.bf16.vlgmr.msra.gmra.mxu0 %v11746_v36  ;;  %v23265_v36 = vld [vmem:[#allocation8 + $0x1e00] ss:$24 sps:$4 sm:$0xff]  }
 0x9f9   :  { %v23178_v14 = vadd.f32 %v10719_v45, %v22977_v11  ;;  %v23181_v63 = vadd.f32 %v10760_v7, %v22980_v6  ;;  %12169 = vmatpush1.bf16.msra.mxu1 %v23167_v19  ;;  %12210 = vmatpush1.bf16.msra.mxu0 %v23169_v26  ;;  %v23193_v11 = vld [vmem:[#allocation8 + $0x1efc] ss:$24 sps:$4 sm:$0xff]   ;;  %v23294_v7 = vld [vmem:[#allocation8 + $0x1f30] ss:$24 sps:$4 sm:$0xff]  }
 0x9fa   :  { %v10721_v59 = vpop.f32.mrf.mxu1  ;;  %v10762_v41 = vpop.f32.mrf.mxu0  ;;  %12170 = vmatprep.subr.bf16.mxu1 %v23173_v53  ;;  %12211 = vmatprep.subr.bf16.mxu0 %v23175_v49 }
 0x9fb   :  { %v23196_v6 = vadd.f32 %v10721_v59, %v22995_v50  ;;  %v23199_v15 = vadd.f32 %v10762_v41, %v22998_v34  ;;  %12200 = vmatprep.mubr.bf16.mxu1 %v24500_v40  ;;  %12241 = vmatprep.mubr.bf16.mxu0 %v24500_v40  ;;  %v23211_v34 = vld [vmem:[#allocation8 + $0x1ec4] ss:$24 sps:$4 sm:$0xff]  }
 0x9fc   :  { %v10723_v44 = vpop.f32.mrf.mxu1  ;;  %v10764_v4 = vpop.f32.mrf.mxu0  ;;  %v23298_v41 = vld [vmem:[#allocation8 + $0x1f04] ss:$24 sps:$4 sm:$0xff]  }
 0x9fd   :  { %12171 = vmatpush1.bf16.msra.mxu1 %v23185_v42  ;;  %12212 = vmatpush1.bf16.msra.mxu0 %v23187_v24  ;;  %v23310_v4 = vld [vmem:[#allocation8 + $0x1f00] ss:$24 sps:$4 sm:$0xff]  }
 0x9fe   :  { %v10724_v35 = vpop.f32.mrf.mxu1  ;;  %v10765_v50 = vpop.f32.mrf.mxu0  ;;  %12172 = vmatprep.subr.bf16.mxu1 %v23191_v58  ;;  %12213 = vmatprep.subr.bf16.mxu0 %v23193_v11 }
 0x9ff   :  { %v18362_v50 = vld [vmem:[#allocation8 + $0x1ea4] ss:$24 sps:$4 sm:$0xff]  }
 0xa01   :  { %12173 = vmatpush1.bf16.msra.mxu1 %v23205_v3  ;;  %12214 = vmatpush1.bf16.msra.mxu0 %v23207_v1 }
 0xa02   :  { %12174 = vmatprep.subr.bf16.mxu1 %v23211_v34  ;;  %12215 = vmatprep.subr.bf16.mxu0 %v23213_v27 }
 0xa05   :  { %12175 = vmatpush1.bf16.msra.mxu1 %v23217_v12  ;;  %12216 = vmatpush1.bf16.msra.mxu0 %v23219_v39 }
 0xa06   :  { %12176 = vmatprep.subr.bf16.mxu1 %v23223_v29  ;;  %12217 = vmatprep.subr.bf16.mxu0 %v23225_v21 }
 0xa09   :  { %12177 = vmatpush1.bf16.msra.mxu1 %v23229_v46  ;;  %12218 = vmatpush1.bf16.msra.mxu0 %v23231_v52 }
 0xa0a   :  { %12178 = vmatprep.subr.bf16.mxu1 %v23235_v8  ;;  %12219 = vmatprep.subr.bf16.mxu0 %v23237_v43 }
 0xa0d   :  { %12179 = vmatpush1.bf16.msra.mxu1 %v23241_v33  ;;  %12220 = vmatpush1.bf16.msra.mxu0 %v23243_v17 }
 0xa0e   :  { %12180 = vmatprep.subr.bf16.mxu1 %v23247_v57  ;;  %12221 = vmatprep.subr.bf16.mxu0 %v23249_v56 }
 0xa11   :  { %12181 = vmatpush1.bf16.msra.mxu1 %v23253_v16  ;;  %12222 = vmatpush1.bf16.msra.mxu0 %v23255_v55 }
 0xa12   :  { %12182 = vmatprep.subr.bf16.mxu1 %v23259_v28  ;;  %12223 = vmatprep.subr.bf16.mxu0 %v23261_v48 }
 0xa15   :  { %12183 = vmatpush1.bf16.msra.mxu1 %v23265_v36  ;;  %12224 = vmatpush1.bf16.msra.mxu0 %v23267_v25 }
 0xa16   :  { %12250 = vmatprep.subr.bf16.mxu1 %v23271_v30  ;;  %12299 = vmatprep.subr.bf16.mxu0 %v23162_v13 }
 0xa18   :  { %v11099_v0 = vpop.f32.mrf.mxu1  ;;  %v11140_v18 = vpop.f32.mrf.mxu0  ;;  %12201 = vmatmul.mubr.bf16.vlgmr.msra.gmra.mxu1 %v23278_v2  ;;  %12242 = vmatmul.mubr.bf16.vlgmr.msra.gmra.mxu0 %v23278_v2 }
 0xa19   :  { %v23287_v62 = vadd.f32 %v11099_v0, %v23086_v37  ;;  %v23290_v45 = vadd.f32 %v11140_v18, %v23089_v47  ;;  %12251 = vmatpush1.bf16.msra.mxu1 %v23275_v5  ;;  %12300 = vmatpush1.bf16.msra.mxu0 %v23167_v19  ;;  %v18365_v0 = vld [vmem:[#allocation8 + $0x1e74] ss:$24 sps:$4 sm:$0xff]   ;;  %v23406_v18 = vld [vmem:[#allocation8 + $0x2070] ss:$24 sps:$4 sm:$0xff]  }
 0xa1a   :  { %v11101_v13 = vpop.f32.mrf.mxu1  ;;  %v11142_v59 = vpop.f32.mrf.mxu0  ;;  %12252 = vmatprep.subr.bf16.mxu1 %v23282_v51  ;;  %12301 = vmatprep.subr.bf16.mxu0 %v23173_v53 }
 0xa1b   :  { %v23301_v37 = vadd.f32 %v11101_v13, %v23100_v32  ;;  %v23304_v47 = vadd.f32 %v11142_v59, %v23103_v38  ;;  %12282 = vmatprep.mubr.bf16.mxu1 %v24500_v40  ;;  %12331 = vmatprep.mubr.bf16.mxu0 %v24500_v40  ;;  %v18359_v32 = vld [vmem:[#allocation8 + $0x1ed4] ss:$24 sps:$4 sm:$0xff]   ;;  %v18357_v38 = vld [vmem:[#allocation8 + $0x1ed0] ss:$24 sps:$4 sm:$0xff]  }
 0xa1c   :  { %v11103_v19 = vpop.f32.mrf.mxu1  ;;  %v11144_v44 = vpop.f32.mrf.mxu0  ;;  %v23414_v59 = vld [vmem:[#allocation8 + $0x204c] ss:$24 sps:$4 sm:$0xff]  }
 0xa1d   :  { %12253 = vmatpush1.bf16.msra.mxu1 %v23294_v7  ;;  %12302 = vmatpush1.bf16.msra.mxu0 %v23185_v42  ;;  %v18360_v42 = vld [vmem:[#allocation8 + $0x1ea0] ss:$24 sps:$4 sm:$0xff]   ;;  %v23424_v44 = vld [vmem:[#allocation8 + $0x2014] ss:$24 sps:$4 sm:$0xff]  }
 0xa1e   :  { %v11104_v53 = vpop.f32.mrf.mxu1  ;;  %v11145_v35 = vpop.f32.mrf.mxu0  ;;  %12254 = vmatprep.subr.bf16.mxu1 %v23298_v41  ;;  %12303 = vmatprep.subr.bf16.mxu0 %v23191_v58  ;;  %v18363_v58 = vld [vmem:[#allocation8 + $0x1e70] ss:$24 sps:$4 sm:$0xff]  }
 0xa1f   :  { %v23420_v19 = vld [vmem:[#allocation8 + $0x2048] ss:$24 sps:$4 sm:$0xff]   ;;  %v23432_v35 = vld [vmem:[#allocation8 + $0x2018] ss:$24 sps:$4 sm:$0xff]  }
 0xa20   :  { %v23430_v53 = vld [vmem:[#allocation8 + $0x2010] ss:$24 sps:$4 sm:$0xff]  }
 0xa21   :  { %12255 = vmatpush1.bf16.msra.mxu1 %v23310_v4  ;;  %12304 = vmatpush1.bf16.msra.mxu0 %v23205_v3  ;;  %v18368_v3 = vld [vmem:[#allocation8 + $0x1e44] ss:$24 sps:$4 sm:$0xff]  }
 0xa22   :  { %12256 = vmatprep.subr.bf16.mxu1 %v18359_v32  ;;  %12305 = vmatprep.subr.bf16.mxu0 %v23211_v34  ;;  %v18366_v34 = vld [vmem:[#allocation8 + $0x1e40] ss:$24 sps:$4 sm:$0xff]  }
 0xa25   :  { %12257 = vmatpush1.bf16.msra.mxu1 %v18357_v38  ;;  %12306 = vmatpush1.bf16.msra.mxu0 %v23217_v12  ;;  %v18371_v12 = vld [vmem:[#allocation8 + $0x1e14] ss:$24 sps:$4 sm:$0xff]  }
 0xa26   :  { %12258 = vmatprep.subr.bf16.mxu1 %v18362_v50  ;;  %12307 = vmatprep.subr.bf16.mxu0 %v23223_v29  ;;  %v18369_v29 = vld [vmem:[#allocation8 + $0x1e10] ss:$24 sps:$4 sm:$0xff]  }
 0xa29   :  { %12259 = vmatpush1.bf16.msra.mxu1 %v18360_v42  ;;  %12308 = vmatpush1.bf16.msra.mxu0 %v23229_v46  ;;  %v12297_v46 = vrot.slane %v22510_v60, 2 }
 0xa2a   :  { %12260 = vmatprep.subr.bf16.mxu1 %v18365_v0  ;;  %12309 = vmatprep.subr.bf16.mxu0 %v23235_v8 }
 0xa2d   :  { %12261 = vmatpush1.bf16.msra.mxu1 %v18363_v58  ;;  %12310 = vmatpush1.bf16.msra.mxu0 %v23241_v33 }
 0xa2e   :  { %12262 = vmatprep.subr.bf16.mxu1 %v18368_v3  ;;  %12311 = vmatprep.subr.bf16.mxu0 %v23247_v57 }
 0xa31   :  { %12263 = vmatpush1.bf16.msra.mxu1 %v18366_v34  ;;  %12312 = vmatpush1.bf16.msra.mxu0 %v23253_v16 }
 0xa32   :  { %12264 = vmatprep.subr.bf16.mxu1 %v18371_v12  ;;  %12313 = vmatprep.subr.bf16.mxu0 %v23259_v28 }
 0xa35   :  { %12265 = vmatpush1.bf16.msra.mxu1 %v18369_v29  ;;  %12314 = vmatpush1.bf16.msra.mxu0 %v23265_v36 }
 0xa36   :  { %12340 = vmatprep.subr.bf16.mxu1 %v23164_v22  ;;  %12381 = vmatprep.subr.bf16.mxu0 %v23271_v30 }
 0xa38   :  { %v11181_v8 = vpop.f32.mrf.mxu1  ;;  %v11231_v33 = vpop.f32.mrf.mxu0  ;;  %12283 = vmatmul.mubr.bf16.vlgmr.msra.gmra.mxu1 %v23278_v2  ;;  %12332 = vmatmul.mubr.bf16.vlgmr.msra.gmra.mxu0 %v12297_v46 }
 0xa39   :  { %v23331_v57 = vadd.f32 %v11181_v8, %v23130_v9  ;;  %v23334_v16 = vadd.f32 %v11231_v33, %v23133_v54  ;;  %12341 = vmatpush1.bf16.msra.mxu1 %v23169_v26  ;;  %12382 = vmatpush1.bf16.msra.mxu0 %v23275_v5  ;;  %v23468_v8 = vld [vmem:[#allocation8 + $0x1f88] ss:$24 sps:$4 sm:$0xff]   ;;  %v23472_v33 = vld [vmem:[#allocation8 + $0x20e4] ss:$24 sps:$4 sm:$0xff]  }
 0xa3a   :  { %v11183_v28 = vpop.f32.mrf.mxu1  ;;  %v11233_v36 = vpop.f32.mrf.mxu0  ;;  %12342 = vmatprep.subr.bf16.mxu1 %v23175_v49  ;;  %12383 = vmatprep.subr.bf16.mxu0 %v23282_v51 }
 0xa3b   :  { %v23341_v22 = vadd.f32 %v11183_v28, %v23140_v61  ;;  %v23344_v30 = vadd.f32 %v11233_v36, %v23143_v23  ;;  %12372 = vmatprep.mubr.bf16.mxu1 %v24500_v40  ;;  %12413 = vmatprep.mubr.bf16.mxu0 %v24500_v40  ;;  %v23363_v61 = vld [vmem:[#allocation8 + $0x20d4] ss:$24 sps:$4 sm:$0xff]   ;;  %v23476_v28 = vld [vmem:[#allocation8 + $0x20e0] ss:$24 sps:$4 sm:$0xff]   ;;  %v23479_v36 = vrot.slane %v22670_v31, 2 }
 0xa3c   :  { %v11185_v9 = vpop.f32.mrf.mxu1  ;;  %v11235_v54 = vpop.f32.mrf.mxu0  ;;  %v23365_v23 = vld [vmem:[#allocation8 + $0x20dc] ss:$24 sps:$4 sm:$0xff]  }
 0xa3d   :  { %12343 = vmatpush1.bf16.msra.mxu1 %v23187_v24  ;;  %12384 = vmatpush1.bf16.msra.mxu0 %v23294_v7  ;;  %v23368_v24 = vld [vmem:[#allocation8 + $0x20d0] ss:$24 sps:$4 sm:$0xff]   ;;  %v23483_v9 = vld [vmem:[#allocation8 + $0x20b4] ss:$24 sps:$4 sm:$0xff]  }
 0xa3e   :  { %v11186_v26 = vpop.f32.mrf.mxu1  ;;  %v11236_v49 = vpop.f32.mrf.mxu0  ;;  %12344 = vmatprep.subr.bf16.mxu1 %v23193_v11  ;;  %12385 = vmatprep.subr.bf16.mxu0 %v23298_v41  ;;  %v23370_v11 = vld [vmem:[#allocation8 + $0x20d8] ss:$24 sps:$4 sm:$0xff]  }
 0xa3f   :  { %v23408_v7 = vld [vmem:[#allocation8 + $0x2078] ss:$24 sps:$4 sm:$0xff]  }
 0xa40   :  { %v23418_v41 = vld [vmem:[#allocation8 + $0x2040] ss:$24 sps:$4 sm:$0xff]  }
 0xa41   :  { %12345 = vmatpush1.bf16.msra.mxu1 %v23207_v1  ;;  %12386 = vmatpush1.bf16.msra.mxu0 %v23310_v4  ;;  %v23374_v1 = vld [vmem:[#allocation8 + $0x20a4] ss:$24 sps:$4 sm:$0xff]  }
 0xa42   :  { %12346 = vmatprep.subr.bf16.mxu1 %v23213_v27  ;;  %12387 = vmatprep.subr.bf16.mxu0 %v18359_v32  ;;  %v23376_v27 = vld [vmem:[#allocation8 + $0x20ac] ss:$24 sps:$4 sm:$0xff]   ;;  %v23426_v4 = vld [vmem:[#allocation8 + $0x201c] ss:$24 sps:$4 sm:$0xff]  }
 0xa43   :  { %v23436_v32 = vld [vmem:[#allocation8 + $0x1fe4] ss:$24 sps:$4 sm:$0xff]  }
 0xa45   :  { %12347 = vmatpush1.bf16.msra.mxu1 %v23219_v39  ;;  %12388 = vmatpush1.bf16.msra.mxu0 %v18357_v38  ;;  %v23438_v38 = vld [vmem:[#allocation8 + $0x1fec] ss:$24 sps:$4 sm:$0xff]  }
 0xa46   :  { %12348 = vmatprep.subr.bf16.mxu1 %v23225_v21  ;;  %12389 = vmatprep.subr.bf16.mxu0 %v18362_v50  ;;  %v23442_v50 = vld [vmem:[#allocation8 + $0x1fe0] ss:$24 sps:$4 sm:$0xff]  }
 0xa49   :  { %12349 = vmatpush1.bf16.msra.mxu1 %v23231_v52  ;;  %12390 = vmatpush1.bf16.msra.mxu0 %v18360_v42  ;;  %v23444_v42 = vld [vmem:[#allocation8 + $0x1fe8] ss:$24 sps:$4 sm:$0xff]  }
 0xa4a   :  { %12350 = vmatprep.subr.bf16.mxu1 %v23237_v43  ;;  %12391 = vmatprep.subr.bf16.mxu0 %v18365_v0  ;;  %v23448_v0 = vld [vmem:[#allocation8 + $0x1fb4] ss:$24 sps:$4 sm:$0xff]  }
 0xa4d   :  { %12351 = vmatpush1.bf16.msra.mxu1 %v23243_v17  ;;  %12392 = vmatpush1.bf16.msra.mxu0 %v18363_v58  ;;  %v23386_v17 = vld [vmem:[#allocation8 + $0x20a0] ss:$24 sps:$4 sm:$0xff]   ;;  %v23450_v58 = vld [vmem:[#allocation8 + $0x1fbc] ss:$24 sps:$4 sm:$0xff]  }
 0xa4e   :  { %12352 = vmatprep.subr.bf16.mxu1 %v23249_v56  ;;  %12393 = vmatprep.subr.bf16.mxu0 %v18368_v3  ;;  %v23388_v56 = vld [vmem:[#allocation8 + $0x20a8] ss:$24 sps:$4 sm:$0xff]  }
 0xa4f   :  { %v23454_v3 = vld [vmem:[#allocation8 + $0x1fb0] ss:$24 sps:$4 sm:$0xff]  }
 0xa51   :  { %12353 = vmatpush1.bf16.msra.mxu1 %v23255_v55  ;;  %12394 = vmatpush1.bf16.msra.mxu0 %v18366_v34  ;;  %v23456_v34 = vld [vmem:[#allocation8 + $0x1fb8] ss:$24 sps:$4 sm:$0xff]  }
 0xa52   :  { %12354 = vmatprep.subr.bf16.mxu1 %v23261_v48  ;;  %12395 = vmatprep.subr.bf16.mxu0 %v18371_v12  ;;  %v23460_v12 = vld [vmem:[#allocation8 + $0x1f84] ss:$24 sps:$4 sm:$0xff]  }
 0xa55   :  { %12355 = vmatpush1.bf16.msra.mxu1 %v23267_v25  ;;  %12396 = vmatpush1.bf16.msra.mxu0 %v18369_v29  ;;  %v23392_v25 = vld [vmem:[#allocation8 + $0x2074] ss:$24 sps:$4 sm:$0xff]  }
 0xa56   :  { %12719 = vmatprep.subr.bf16.mxu1 %v23363_v61  ;;  %12760 = vmatprep.subr.bf16.mxu0 %v23365_v23  ;;  %v23462_v29 = vld [vmem:[#allocation8 + $0x1f8c] ss:$24 sps:$4 sm:$0xff]  }
 0xa58   :  { %v11272_v39 = vpop.f32.mrf.mxu1  ;;  %v11313_v21 = vpop.f32.mrf.mxu0  ;;  %12373 = vmatmul.mubr.bf16.vlgmr.msra.gmra.mxu1 %v12297_v46  ;;  %12414 = vmatmul.mubr.bf16.vlgmr.msra.gmra.mxu0 %v12297_v46  ;;  %v23466_v46 = vld [vmem:[#allocation8 + $0x1f80] ss:$24 sps:$4 sm:$0xff]  }
 0xa59   :  { %v23379_v52 = vadd.f32 %v11272_v39, %v23178_v14  ;;  %v23382_v43 = vadd.f32 %v11313_v21, %v23181_v63  ;;  %12720 = vmatpush1.bf16.msra.mxu1 %v23368_v24  ;;  %12761 = vmatpush1.bf16.msra.mxu0 %v23370_v11  ;;  %v23394_v14 = vld [vmem:[#allocation8 + $0x207c] ss:$24 sps:$4 sm:$0xff]   ;;  %v23495_v21 = vld [vmem:[#allocation8 + $0x20b0] ss:$24 sps:$4 sm:$0xff]  }
 0xa5a   :  { %v11274_v55 = vpop.f32.mrf.mxu1  ;;  %v11315_v48 = vpop.f32.mrf.mxu0  ;;  %12721 = vmatprep.subr.bf16.mxu1 %v23374_v1  ;;  %12762 = vmatprep.subr.bf16.mxu0 %v23376_v27 }
 0xa5b   :  { %v23397_v63 = vadd.f32 %v11274_v55, %v23196_v6  ;;  %v23400_v5 = vadd.f32 %v11315_v48, %v23199_v15  ;;  %12751 = vmatprep.mubr.bf16.mxu1 %v24500_v40  ;;  %12792 = vmatprep.mubr.bf16.mxu0 %v24500_v40  ;;  %v23412_v15 = vld [vmem:[#allocation8 + $0x2044] ss:$24 sps:$4 sm:$0xff]  }
 0xa5c   :  { %v11276_v2 = vpop.f32.mrf.mxu1  ;;  %v11317_v51 = vpop.f32.mrf.mxu0  ;;  %v23499_v48 = vld [vmem:[#allocation8 + $0x2084] ss:$24 sps:$4 sm:$0xff]  }
 0xa5d   :  { %12722 = vmatpush1.bf16.msra.mxu1 %v23386_v17  ;;  %12763 = vmatpush1.bf16.msra.mxu0 %v23388_v56  ;;  %v23511_v51 = vld [vmem:[#allocation8 + $0x2080] ss:$24 sps:$4 sm:$0xff]  }
 0xa5e   :  { %v11277_v13 = vpop.f32.mrf.mxu1  ;;  %v11318_v6 = vpop.f32.mrf.mxu0  ;;  %12723 = vmatprep.subr.bf16.mxu1 %v23392_v25  ;;  %12764 = vmatprep.subr.bf16.mxu0 %v23394_v14 }
 0xa5f   :  { %v18434_v6 = vld [vmem:[#allocation8 + $0x2024] ss:$24 sps:$4 sm:$0xff]  }
 0xa61   :  { %12724 = vmatpush1.bf16.msra.mxu1 %v23406_v18  ;;  %12765 = vmatpush1.bf16.msra.mxu0 %v23408_v7 }
 0xa62   :  { %12725 = vmatprep.subr.bf16.mxu1 %v23412_v15  ;;  %12766 = vmatprep.subr.bf16.mxu0 %v23414_v59 }
 0xa65   :  { %12726 = vmatpush1.bf16.msra.mxu1 %v23418_v41  ;;  %12767 = vmatpush1.bf16.msra.mxu0 %v23420_v19 }
 0xa66   :  { %12727 = vmatprep.subr.bf16.mxu1 %v23424_v44  ;;  %12768 = vmatprep.subr.bf16.mxu0 %v23426_v4 }
 0xa69   :  { %12728 = vmatpush1.bf16.msra.mxu1 %v23430_v53  ;;  %12769 = vmatpush1.bf16.msra.mxu0 %v23432_v35 }
 0xa6a   :  { %12729 = vmatprep.subr.bf16.mxu1 %v23436_v32  ;;  %12770 = vmatprep.subr.bf16.mxu0 %v23438_v38 }
 0xa6d   :  { %12730 = vmatpush1.bf16.msra.mxu1 %v23442_v50  ;;  %12771 = vmatpush1.bf16.msra.mxu0 %v23444_v42 }
 0xa6e   :  { %12731 = vmatprep.subr.bf16.mxu1 %v23448_v0  ;;  %12772 = vmatprep.subr.bf16.mxu0 %v23450_v58 }
 0xa71   :  { %12732 = vmatpush1.bf16.msra.mxu1 %v23454_v3  ;;  %12773 = vmatpush1.bf16.msra.mxu0 %v23456_v34 }
 0xa72   :  { %12733 = vmatprep.subr.bf16.mxu1 %v23460_v12  ;;  %12774 = vmatprep.subr.bf16.mxu0 %v23462_v29 }
 0xa75   :  { %12734 = vmatpush1.bf16.msra.mxu1 %v23466_v46  ;;  %12775 = vmatpush1.bf16.msra.mxu0 %v23468_v8 }
 0xa76   :  { %12801 = vmatprep.subr.bf16.mxu1 %v23472_v33  ;;  %12850 = vmatprep.subr.bf16.mxu0 %v23363_v61 }
 0xa78   :  { %v11651_v54 = vpop.f32.mrf.mxu1  ;;  %v11692_v26 = vpop.f32.mrf.mxu0  ;;  %12752 = vmatmul.mubr.bf16.vlgmr.msra.gmra.mxu1 %v23479_v36  ;;  %12793 = vmatmul.mubr.bf16.vlgmr.msra.gmra.mxu0 %v23479_v36 }
 0xa79   :  { %v23488_v49 = vadd.f32 %v11651_v54, %v23287_v62  ;;  %v23491_v39 = vadd.f32 %v11692_v26, %v23290_v45  ;;  %12802 = vmatpush1.bf16.msra.mxu1 %v23476_v28  ;;  %12851 = vmatpush1.bf16.msra.mxu0 %v23368_v24  ;;  %v18437_v54 = vld [vmem:[#allocation8 + $0x1ff4] ss:$24 sps:$4 sm:$0xff]   ;;  %v23607_v26 = vld [vmem:[#allocation8 + $0x21f0] ss:$24 sps:$4 sm:$0xff]  }
 0xa7a   :  { %v11653_v61 = vpop.f32.mrf.mxu1  ;;  %v11694_v55 = vpop.f32.mrf.mxu0  ;;  %12803 = vmatprep.subr.bf16.mxu1 %v23483_v9  ;;  %12852 = vmatprep.subr.bf16.mxu0 %v23374_v1 }
 0xa7b   :  { %v23502_v62 = vadd.f32 %v11653_v61, %v23301_v37  ;;  %v23505_v45 = vadd.f32 %v11694_v55, %v23304_v47  ;;  %12833 = vmatprep.mubr.bf16.mxu1 %v24500_v40  ;;  %12882 = vmatprep.mubr.bf16.mxu0 %v24500_v40  ;;  %v18431_v37 = vld [vmem:[#allocation8 + $0x2054] ss:$24 sps:$4 sm:$0xff]   ;;  %v18429_v47 = vld [vmem:[#allocation8 + $0x2050] ss:$24 sps:$4 sm:$0xff]  }
 0xa7c   :  { %v11655_v24 = vpop.f32.mrf.mxu1  ;;  %v11696_v2 = vpop.f32.mrf.mxu0  ;;  %v23615_v55 = vld [vmem:[#allocation8 + $0x21cc] ss:$24 sps:$4 sm:$0xff]  }
 0xa7d   :  { %12804 = vmatpush1.bf16.msra.mxu1 %v23495_v21  ;;  %12853 = vmatpush1.bf16.msra.mxu0 %v23386_v17  ;;  %v18432_v17 = vld [vmem:[#allocation8 + $0x2020] ss:$24 sps:$4 sm:$0xff]   ;;  %v23625_v2 = vld [vmem:[#allocation8 + $0x2194] ss:$24 sps:$4 sm:$0xff]  }
 0xa7e   :  { %v11656_v1 = vpop.f32.mrf.mxu1  ;;  %v11697_v13 = vpop.f32.mrf.mxu0  ;;  %12805 = vmatprep.subr.bf16.mxu1 %v23499_v48  ;;  %12854 = vmatprep.subr.bf16.mxu0 %v23392_v25  ;;  %v18435_v25 = vld [vmem:[#allocation8 + $0x1ff0] ss:$24 sps:$4 sm:$0xff]  }
 0xa7f   :  { %v23621_v24 = vld [vmem:[#allocation8 + $0x21c8] ss:$24 sps:$4 sm:$0xff]   ;;  %v23633_v13 = vld [vmem:[#allocation8 + $0x2198] ss:$24 sps:$4 sm:$0xff]  }
 0xa80   :  { %v23631_v1 = vld [vmem:[#allocation8 + $0x2190] ss:$24 sps:$4 sm:$0xff]  }
 0xa81   :  { %12806 = vmatpush1.bf16.msra.mxu1 %v23511_v51  ;;  %12855 = vmatpush1.bf16.msra.mxu0 %v23406_v18  ;;  %v18440_v18 = vld [vmem:[#allocation8 + $0x1fc4] ss:$24 sps:$4 sm:$0xff]  }
 0xa82   :  { %12807 = vmatprep.subr.bf16.mxu1 %v18431_v37  ;;  %12856 = vmatprep.subr.bf16.mxu0 %v23412_v15  ;;  %v18438_v15 = vld [vmem:[#allocation8 + $0x1fc0] ss:$24 sps:$4 sm:$0xff]  }
 0xa85   :  { %12808 = vmatpush1.bf16.msra.mxu1 %v18429_v47  ;;  %12857 = vmatpush1.bf16.msra.mxu0 %v23418_v41  ;;  %v18443_v41 = vld [vmem:[#allocation8 + $0x1f94] ss:$24 sps:$4 sm:$0xff]  }
 0xa86   :  { %12809 = vmatprep.subr.bf16.mxu1 %v18434_v6  ;;  %12858 = vmatprep.subr.bf16.mxu0 %v23424_v44  ;;  %v18441_v44 = vld [vmem:[#allocation8 + $0x1f90] ss:$24 sps:$4 sm:$0xff]  }
 0xa89   :  { %12810 = vmatpush1.bf16.msra.mxu1 %v18432_v17  ;;  %12859 = vmatpush1.bf16.msra.mxu0 %v23430_v53  ;;  %v12848_v53 = vrot.slane %v22719_v20, 2 }
 0xa8a   :  { %12811 = vmatprep.subr.bf16.mxu1 %v18437_v54  ;;  %12860 = vmatprep.subr.bf16.mxu0 %v23436_v32 }
 0xa8d   :  { %12812 = vmatpush1.bf16.msra.mxu1 %v18435_v25  ;;  %12861 = vmatpush1.bf16.msra.mxu0 %v23442_v50 }
 0xa8e   :  { %12813 = vmatprep.subr.bf16.mxu1 %v18440_v18  ;;  %12862 = vmatprep.subr.bf16.mxu0 %v23448_v0 }
 0xa91   :  { %12814 = vmatpush1.bf16.msra.mxu1 %v18438_v15  ;;  %12863 = vmatpush1.bf16.msra.mxu0 %v23454_v3 }
 0xa92   :  { %12815 = vmatprep.subr.bf16.mxu1 %v18443_v41  ;;  %12864 = vmatprep.subr.bf16.mxu0 %v23460_v12 }
 0xa95   :  { %12816 = vmatpush1.bf16.msra.mxu1 %v18441_v44  ;;  %12865 = vmatpush1.bf16.msra.mxu0 %v23466_v46 }
 0xa96   :  { %12891 = vmatprep.subr.bf16.mxu1 %v23365_v23  ;;  %12932 = vmatprep.subr.bf16.mxu0 %v23472_v33 }
 0xa98   :  { %v11733_v32 = vpop.f32.mrf.mxu1  ;;  %v11782_v50 = vpop.f32.mrf.mxu0  ;;  %12834 = vmatmul.mubr.bf16.vlgmr.msra.gmra.mxu1 %v23479_v36  ;;  %12883 = vmatmul.mubr.bf16.vlgmr.msra.gmra.mxu0 %v12848_v53 }
 0xa99   :  { %v23532_v0 = vadd.f32 %v11733_v32, %v23331_v57  ;;  %v23535_v3 = vadd.f32 %v11782_v50, %v23334_v16  ;;  %12892 = vmatpush1.bf16.msra.mxu1 %v23370_v11  ;;  %12933 = vmatpush1.bf16.msra.mxu0 %v23476_v28  ;;  %v23669_v32 = vld [vmem:[#allocation8 + $0x2108] ss:$24 sps:$4 sm:$0xff]   ;;  %v23673_v50 = vld [vmem:[#allocation8 + $0x2264] ss:$24 sps:$4 sm:$0xff]  }
 0xa9a   :  { %v11735_v12 = vpop.f32.mrf.mxu1  ;;  %v11784_v46 = vpop.f32.mrf.mxu0  ;;  %12893 = vmatprep.subr.bf16.mxu1 %v23376_v27  ;;  %12934 = vmatprep.subr.bf16.mxu0 %v23483_v9 }
 0xa9b   :  { %v23542_v23 = vadd.f32 %v11735_v12, %v23341_v22  ;;  %v23545_v33 = vadd.f32 %v11784_v46, %v23344_v30  ;;  %12923 = vmatprep.mubr.bf16.mxu1 %v24500_v40  ;;  %12964 = vmatprep.mubr.bf16.mxu0 %v24500_v40  ;;  %v23564_v22 = vld [vmem:[#allocation8 + $0x2254] ss:$24 sps:$4 sm:$0xff]   ;;  %v23677_v12 = vld [vmem:[#allocation8 + $0x2260] ss:$24 sps:$4 sm:$0xff]   ;;  %v23680_v46 = vrot.slane %v22449_v10, 3 }
 0xa9c   :  { %v11737_v57 = vpop.f32.mrf.mxu1  ;;  %v11786_v16 = vpop.f32.mrf.mxu0  ;;  %v23566_v30 = vld [vmem:[#allocation8 + $0x225c] ss:$24 sps:$4 sm:$0xff]  }
 0xa9d   :  { %12894 = vmatpush1.bf16.msra.mxu1 %v23388_v56  ;;  %12935 = vmatpush1.bf16.msra.mxu0 %v23495_v21  ;;  %v23569_v56 = vld [vmem:[#allocation8 + $0x2250] ss:$24 sps:$4 sm:$0xff]   ;;  %v23684_v57 = vld [vmem:[#allocation8 + $0x2234] ss:$24 sps:$4 sm:$0xff]  }
 0xa9e   :  { %v11738_v11 = vpop.f32.mrf.mxu1  ;;  %v11787_v27 = vpop.f32.mrf.mxu0  ;;  %12895 = vmatprep.subr.bf16.mxu1 %v23394_v14  ;;  %12936 = vmatprep.subr.bf16.mxu0 %v23499_v48  ;;  %v23571_v14 = vld [vmem:[#allocation8 + $0x2258] ss:$24 sps:$4 sm:$0xff]  }
 0xa9f   :  { %v23609_v21 = vld [vmem:[#allocation8 + $0x21f8] ss:$24 sps:$4 sm:$0xff]  }
 0xaa0   :  { %v23619_v48 = vld [vmem:[#allocation8 + $0x21c0] ss:$24 sps:$4 sm:$0xff]  }
 0xaa1   :  { %12896 = vmatpush1.bf16.msra.mxu1 %v23408_v7  ;;  %12937 = vmatpush1.bf16.msra.mxu0 %v23511_v51  ;;  %v23575_v7 = vld [vmem:[#allocation8 + $0x2224] ss:$24 sps:$4 sm:$0xff]  }
 0xaa2   :  { %12897 = vmatprep.subr.bf16.mxu1 %v23414_v59  ;;  %12938 = vmatprep.subr.bf16.mxu0 %v18431_v37  ;;  %v23577_v59 = vld [vmem:[#allocation8 + $0x222c] ss:$24 sps:$4 sm:$0xff]   ;;  %v23627_v51 = vld [vmem:[#allocation8 + $0x219c] ss:$24 sps:$4 sm:$0xff]  }
 0xaa3   :  { %v23637_v37 = vld [vmem:[#allocation8 + $0x2164] ss:$24 sps:$4 sm:$0xff]  }
 0xaa5   :  { %12898 = vmatpush1.bf16.msra.mxu1 %v23420_v19  ;;  %12939 = vmatpush1.bf16.msra.mxu0 %v18429_v47  ;;  %v23639_v47 = vld [vmem:[#allocation8 + $0x216c] ss:$24 sps:$4 sm:$0xff]  }
 0xaa6   :  { %12899 = vmatprep.subr.bf16.mxu1 %v23426_v4  ;;  %12940 = vmatprep.subr.bf16.mxu0 %v18434_v6  ;;  %v23643_v6 = vld [vmem:[#allocation8 + $0x2160] ss:$24 sps:$4 sm:$0xff]  }
 0xaa9   :  { %12900 = vmatpush1.bf16.msra.mxu1 %v23432_v35  ;;  %12941 = vmatpush1.bf16.msra.mxu0 %v18432_v17  ;;  %v23645_v17 = vld [vmem:[#allocation8 + $0x2168] ss:$24 sps:$4 sm:$0xff]  }
 0xaaa   :  { %12901 = vmatprep.subr.bf16.mxu1 %v23438_v38  ;;  %12942 = vmatprep.subr.bf16.mxu0 %v18437_v54  ;;  %v23649_v54 = vld [vmem:[#allocation8 + $0x2134] ss:$24 sps:$4 sm:$0xff]  }
 0xaad   :  { %12902 = vmatpush1.bf16.msra.mxu1 %v23444_v42  ;;  %12943 = vmatpush1.bf16.msra.mxu0 %v18435_v25  ;;  %v23587_v42 = vld [vmem:[#allocation8 + $0x2220] ss:$24 sps:$4 sm:$0xff]   ;;  %v23651_v25 = vld [vmem:[#allocation8 + $0x213c] ss:$24 sps:$4 sm:$0xff]  }
 0xaae   :  { %12903 = vmatprep.subr.bf16.mxu1 %v23450_v58  ;;  %12944 = vmatprep.subr.bf16.mxu0 %v18440_v18  ;;  %v23589_v58 = vld [vmem:[#allocation8 + $0x2228] ss:$24 sps:$4 sm:$0xff]  }
 0xaaf   :  { %v23655_v18 = vld [vmem:[#allocation8 + $0x2130] ss:$24 sps:$4 sm:$0xff]  }
 0xab1   :  { %12904 = vmatpush1.bf16.msra.mxu1 %v23456_v34  ;;  %12945 = vmatpush1.bf16.msra.mxu0 %v18438_v15  ;;  %v23657_v15 = vld [vmem:[#allocation8 + $0x2138] ss:$24 sps:$4 sm:$0xff]  }
 0xab2   :  { %12905 = vmatprep.subr.bf16.mxu1 %v23462_v29  ;;  %12946 = vmatprep.subr.bf16.mxu0 %v18443_v41  ;;  %v23661_v41 = vld [vmem:[#allocation8 + $0x2104] ss:$24 sps:$4 sm:$0xff]  }
 0xab5   :  { %12906 = vmatpush1.bf16.msra.mxu1 %v23468_v8  ;;  %12947 = vmatpush1.bf16.msra.mxu0 %v18441_v44  ;;  %v23593_v8 = vld [vmem:[#allocation8 + $0x21f4] ss:$24 sps:$4 sm:$0xff]  }
 0xab6   :  { %13270 = vmatprep.subr.bf16.mxu1 %v23564_v22  ;;  %13311 = vmatprep.subr.bf16.mxu0 %v23566_v30  ;;  %v23663_v44 = vld [vmem:[#allocation8 + $0x210c] ss:$24 sps:$4 sm:$0xff]  }
 0xab8   :  { %v11823_v19 = vpop.f32.mrf.mxu1  ;;  %v11864_v4 = vpop.f32.mrf.mxu0  ;;  %12924 = vmatmul.mubr.bf16.vlgmr.msra.gmra.mxu1 %v12848_v53  ;;  %12965 = vmatmul.mubr.bf16.vlgmr.msra.gmra.mxu0 %v12848_v53  ;;  %v23667_v53 = vld [vmem:[#allocation8 + $0x2100] ss:$24 sps:$4 sm:$0xff]  }
 0xab9   :  { %v23580_v35 = vadd.f32 %v11823_v19, %v23379_v52  ;;  %v23583_v38 = vadd.f32 %v11864_v4, %v23382_v43  ;;  %13271 = vmatpush1.bf16.msra.mxu1 %v23569_v56  ;;  %13312 = vmatpush1.bf16.msra.mxu0 %v23571_v14  ;;  %v23595_v52 = vld [vmem:[#allocation8 + $0x21fc] ss:$24 sps:$4 sm:$0xff]   ;;  %v23696_v4 = vld [vmem:[#allocation8 + $0x2230] ss:$24 sps:$4 sm:$0xff]  }
 0xaba   :  { %v11825_v34 = vpop.f32.mrf.mxu1  ;;  %v11866_v29 = vpop.f32.mrf.mxu0  ;;  %13272 = vmatprep.subr.bf16.mxu1 %v23575_v7  ;;  %13313 = vmatprep.subr.bf16.mxu0 %v23577_v59 }
 0xabb   :  { %v23598_v43 = vadd.f32 %v11825_v34, %v23397_v63  ;;  %v23601_v28 = vadd.f32 %v11866_v29, %v23400_v5  ;;  %13302 = vmatprep.mubr.bf16.mxu1 %v24500_v40  ;;  %13343 = vmatprep.mubr.bf16.mxu0 %v24500_v40  ;;  %v23613_v5 = vld [vmem:[#allocation8 + $0x21c4] ss:$24 sps:$4 sm:$0xff]  }
 0xabc   :  { %v11827_v36 = vpop.f32.mrf.mxu1  ;;  %v11868_v9 = vpop.f32.mrf.mxu0  ;;  %v23700_v29 = vld [vmem:[#allocation8 + $0x2204] ss:$24 sps:$4 sm:$0xff]  }
 0xabd   :  { %13273 = vmatpush1.bf16.msra.mxu1 %v23587_v42  ;;  %13314 = vmatpush1.bf16.msra.mxu0 %v23589_v58  ;;  %v23712_v9 = vld [vmem:[#allocation8 + $0x2200] ss:$24 sps:$4 sm:$0xff]  }
 0xabe   :  { %v11828_v61 = vpop.f32.mrf.mxu1  ;;  %v11869_v63 = vpop.f32.mrf.mxu0  ;;  %13274 = vmatprep.subr.bf16.mxu1 %v23593_v8  ;;  %13315 = vmatprep.subr.bf16.mxu0 %v23595_v52 }
 0xabf   :  { %v18506_v63 = vld [vmem:[#allocation8 + $0x21a4] ss:$24 sps:$4 sm:$0xff]  }
 0xac1   :  { %13275 = vmatpush1.bf16.msra.mxu1 %v23607_v26  ;;  %13316 = vmatpush1.bf16.msra.mxu0 %v23609_v21 }
 0xac2   :  { %13276 = vmatprep.subr.bf16.mxu1 %v23613_v5  ;;  %13317 = vmatprep.subr.bf16.mxu0 %v23615_v55 }
 0xac5   :  { %13277 = vmatpush1.bf16.msra.mxu1 %v23619_v48  ;;  %13318 = vmatpush1.bf16.msra.mxu0 %v23621_v24 }
 0xac6   :  { %13278 = vmatprep.subr.bf16.mxu1 %v23625_v2  ;;  %13319 = vmatprep.subr.bf16.mxu0 %v23627_v51 }
 0xac9   :  { %13279 = vmatpush1.bf16.msra.mxu1 %v23631_v1  ;;  %13320 = vmatpush1.bf16.msra.mxu0 %v23633_v13 }
 0xaca   :  { %13280 = vmatprep.subr.bf16.mxu1 %v23637_v37  ;;  %13321 = vmatprep.subr.bf16.mxu0 %v23639_v47 }
 0xacd   :  { %13281 = vmatpush1.bf16.msra.mxu1 %v23643_v6  ;;  %13322 = vmatpush1.bf16.msra.mxu0 %v23645_v17 }
 0xace   :  { %13282 = vmatprep.subr.bf16.mxu1 %v23649_v54  ;;  %13323 = vmatprep.subr.bf16.mxu0 %v23651_v25 }
 0xad1   :  { %13283 = vmatpush1.bf16.msra.mxu1 %v23655_v18  ;;  %13324 = vmatpush1.bf16.msra.mxu0 %v23657_v15 }
 0xad2   :  { %13284 = vmatprep.subr.bf16.mxu1 %v23661_v41  ;;  %13325 = vmatprep.subr.bf16.mxu0 %v23663_v44 }
 0xad5   :  { %13285 = vmatpush1.bf16.msra.mxu1 %v23667_v53  ;;  %13326 = vmatpush1.bf16.msra.mxu0 %v23669_v32 }
 0xad6   :  { %13352 = vmatprep.subr.bf16.mxu1 %v23673_v50  ;;  %13401 = vmatprep.subr.bf16.mxu0 %v23564_v22 }
 0xad8   :  { %v12202_v16 = vpop.f32.mrf.mxu1  ;;  %v12243_v11 = vpop.f32.mrf.mxu0  ;;  %13303 = vmatmul.mubr.bf16.vlgmr.msra.gmra.mxu1 %v23680_v46  ;;  %13344 = vmatmul.mubr.bf16.vlgmr.msra.gmra.mxu0 %v23680_v46 }
 0xad9   :  { %v23689_v27 = vadd.f32 %v12202_v16, %v23488_v49  ;;  %v23692_v19 = vadd.f32 %v12243_v11, %v23491_v39  ;;  %13353 = vmatpush1.bf16.msra.mxu1 %v23677_v12  ;;  %13402 = vmatpush1.bf16.msra.mxu0 %v23569_v56  ;;  %v18509_v16 = vld [vmem:[#allocation8 + $0x2174] ss:$24 sps:$4 sm:$0xff]   ;;  %v23808_v11 = vld [vmem:[#allocation8 + $0x2370] ss:$24 sps:$4 sm:$0xff]  }
 0xada   :  { %v12204_v22 = vpop.f32.mrf.mxu1  ;;  %v12245_v34 = vpop.f32.mrf.mxu0  ;;  %13354 = vmatprep.subr.bf16.mxu1 %v23684_v57  ;;  %13403 = vmatprep.subr.bf16.mxu0 %v23575_v7 }
 0xadb   :  { %v23703_v49 = vadd.f32 %v12204_v22, %v23502_v62  ;;  %v23706_v39 = vadd.f32 %v12245_v34, %v23505_v45  ;;  %13384 = vmatprep.mubr.bf16.mxu1 %v24500_v40  ;;  %13433 = vmatprep.mubr.bf16.mxu0 %v24500_v40  ;;  %v18503_v62 = vld [vmem:[#allocation8 + $0x21d4] ss:$24 sps:$4 sm:$0xff]   ;;  %v18501_v45 = vld [vmem:[#allocation8 + $0x21d0] ss:$24 sps:$4 sm:$0xff]  }
 0xadc   :  { %v12206_v56 = vpop.f32.mrf.mxu1  ;;  %v12247_v36 = vpop.f32.mrf.mxu0  ;;  %v23816_v34 = vld [vmem:[#allocation8 + $0x234c] ss:$24 sps:$4 sm:$0xff]  }
 0xadd   :  { %13355 = vmatpush1.bf16.msra.mxu1 %v23696_v4  ;;  %13404 = vmatpush1.bf16.msra.mxu0 %v23587_v42  ;;  %v18504_v42 = vld [vmem:[#allocation8 + $0x21a0] ss:$24 sps:$4 sm:$0xff]   ;;  %v23826_v36 = vld [vmem:[#allocation8 + $0x2314] ss:$24 sps:$4 sm:$0xff]  }
 0xade   :  { %v12207_v7 = vpop.f32.mrf.mxu1  ;;  %v12248_v61 = vpop.f32.mrf.mxu0  ;;  %13356 = vmatprep.subr.bf16.mxu1 %v23700_v29  ;;  %13405 = vmatprep.subr.bf16.mxu0 %v23593_v8  ;;  %v18507_v8 = vld [vmem:[#allocation8 + $0x2170] ss:$24 sps:$4 sm:$0xff]  }
 0xadf   :  { %v23822_v56 = vld [vmem:[#allocation8 + $0x2348] ss:$24 sps:$4 sm:$0xff]   ;;  %v23834_v61 = vld [vmem:[#allocation8 + $0x2318] ss:$24 sps:$4 sm:$0xff]  }
 0xae0   :  { %v23832_v7 = vld [vmem:[#allocation8 + $0x2310] ss:$24 sps:$4 sm:$0xff]  }
 0xae1   :  { %13357 = vmatpush1.bf16.msra.mxu1 %v23712_v9  ;;  %13406 = vmatpush1.bf16.msra.mxu0 %v23607_v26  ;;  %v18512_v26 = vld [vmem:[#allocation8 + $0x2144] ss:$24 sps:$4 sm:$0xff]  }
 0xae2   :  { %13358 = vmatprep.subr.bf16.mxu1 %v18503_v62  ;;  %13407 = vmatprep.subr.bf16.mxu0 %v23613_v5  ;;  %v18510_v5 = vld [vmem:[#allocation8 + $0x2140] ss:$24 sps:$4 sm:$0xff]  }
 0xae5   :  { %13359 = vmatpush1.bf16.msra.mxu1 %v18501_v45  ;;  %13408 = vmatpush1.bf16.msra.mxu0 %v23619_v48  ;;  %v18515_v48 = vld [vmem:[#allocation8 + $0x2114] ss:$24 sps:$4 sm:$0xff]  }
 0xae6   :  { %13360 = vmatprep.subr.bf16.mxu1 %v18506_v63  ;;  %13409 = vmatprep.subr.bf16.mxu0 %v23625_v2  ;;  %v18513_v2 = vld [vmem:[#allocation8 + $0x2110] ss:$24 sps:$4 sm:$0xff]  }
 0xae9   :  { %13361 = vmatpush1.bf16.msra.mxu1 %v18504_v42  ;;  %13410 = vmatpush1.bf16.msra.mxu0 %v23631_v1  ;;  %v13399_v1 = vrot.slane %v22510_v60, 3 }
 0xaea   :  { %13362 = vmatprep.subr.bf16.mxu1 %v18509_v16  ;;  %13411 = vmatprep.subr.bf16.mxu0 %v23637_v37 }
 0xaed   :  { %13363 = vmatpush1.bf16.msra.mxu1 %v18507_v8  ;;  %13412 = vmatpush1.bf16.msra.mxu0 %v23643_v6 }
 0xaee   :  { %13364 = vmatprep.subr.bf16.mxu1 %v18512_v26  ;;  %13413 = vmatprep.subr.bf16.mxu0 %v23649_v54 }
 0xaf1   :  { %13365 = vmatpush1.bf16.msra.mxu1 %v18510_v5  ;;  %13414 = vmatpush1.bf16.msra.mxu0 %v23655_v18 }
 0xaf2   :  { %13366 = vmatprep.subr.bf16.mxu1 %v18515_v48  ;;  %13415 = vmatprep.subr.bf16.mxu0 %v23661_v41 }
 0xaf5   :  { %13367 = vmatpush1.bf16.msra.mxu1 %v18513_v2  ;;  %13416 = vmatpush1.bf16.msra.mxu0 %v23667_v53 }
 0xaf6   :  { %13442 = vmatprep.subr.bf16.mxu1 %v23566_v30  ;;  %13483 = vmatprep.subr.bf16.mxu0 %v23673_v50 }
 0xaf8   :  { %v12284_v37 = vpop.f32.mrf.mxu1  ;;  %v12333_v6 = vpop.f32.mrf.mxu0  ;;  %13385 = vmatmul.mubr.bf16.vlgmr.msra.gmra.mxu1 %v23680_v46  ;;  %13434 = vmatmul.mubr.bf16.vlgmr.msra.gmra.mxu0 %v13399_v1 }
 0xaf9   :  { %v23733_v54 = vadd.f32 %v12284_v37, %v23532_v0  ;;  %v23736_v18 = vadd.f32 %v12333_v6, %v23535_v3  ;;  %13443 = vmatpush1.bf16.msra.mxu1 %v23571_v14  ;;  %13484 = vmatpush1.bf16.msra.mxu0 %v23677_v12  ;;  %v23870_v37 = vld [vmem:[#allocation8 + $0x2288] ss:$24 sps:$4 sm:$0xff]   ;;  %v23874_v6 = vld [vmem:[#allocation8 + $0x23e4] ss:$24 sps:$4 sm:$0xff]  }
 0xafa   :  { %v12286_v41 = vpop.f32.mrf.mxu1  ;;  %v12335_v53 = vpop.f32.mrf.mxu0  ;;  %13444 = vmatprep.subr.bf16.mxu1 %v23577_v59  ;;  %13485 = vmatprep.subr.bf16.mxu0 %v23684_v57 }
 0xafb   :  { %v23743_v30 = vadd.f32 %v12286_v41, %v23542_v23  ;;  %v23746_v50 = vadd.f32 %v12335_v53, %v23545_v33  ;;  %13474 = vmatprep.mubr.bf16.mxu1 %v24500_v40  ;;  %13515 = vmatprep.mubr.bf16.mxu0 %v24500_v40  ;;  %v23765_v23 = vld [vmem:[#allocation8 + $0x23d4] ss:$24 sps:$4 sm:$0xff]   ;;  %v23878_v41 = vld [vmem:[#allocation8 + $0x23e0] ss:$24 sps:$4 sm:$0xff]   ;;  %v23881_v53 = vrot.slane %v22670_v31, 3 }
 0xafc   :  { %v12288_v0 = vpop.f32.mrf.mxu1  ;;  %v12337_v3 = vpop.f32.mrf.mxu0  ;;  %v23767_v33 = vld [vmem:[#allocation8 + $0x23dc] ss:$24 sps:$4 sm:$0xff]   ;;  %v23897_v31 = vld [vmem:[#allocation8 + $0x23b0] ss:$24 sps:$4 sm:$0xff]  }
 0xafd   :  { %13445 = vmatpush1.bf16.msra.mxu1 %v23589_v58  ;;  %13486 = vmatpush1.bf16.msra.mxu0 %v23696_v4  ;;  %v23770_v58 = vld [vmem:[#allocation8 + $0x23d0] ss:$24 sps:$4 sm:$0xff]   ;;  %v23885_v0 = vld [vmem:[#allocation8 + $0x23b4] ss:$24 sps:$4 sm:$0xff]  }
 0xafe   :  { %v12289_v14 = vpop.f32.mrf.mxu1  ;;  %v12338_v59 = vpop.f32.mrf.mxu0  ;;  %13446 = vmatprep.subr.bf16.mxu1 %v23595_v52  ;;  %13487 = vmatprep.subr.bf16.mxu0 %v23700_v29  ;;  %v23772_v52 = vld [vmem:[#allocation8 + $0x23d8] ss:$24 sps:$4 sm:$0xff]  }
 0xaff   :  { %v23810_v4 = vld [vmem:[#allocation8 + $0x2378] ss:$24 sps:$4 sm:$0xff]  }
 0xb00   :  { %v23820_v29 = vld [vmem:[#allocation8 + $0x2340] ss:$24 sps:$4 sm:$0xff]  }
 0xb01   :  { %13447 = vmatpush1.bf16.msra.mxu1 %v23609_v21  ;;  %13488 = vmatpush1.bf16.msra.mxu0 %v23712_v9  ;;  %v23776_v21 = vld [vmem:[#allocation8 + $0x23a4] ss:$24 sps:$4 sm:$0xff]  }
 0xb02   :  { %13448 = vmatprep.subr.bf16.mxu1 %v23615_v55  ;;  %13489 = vmatprep.subr.bf16.mxu0 %v18503_v62  ;;  %v23778_v55 = vld [vmem:[#allocation8 + $0x23ac] ss:$24 sps:$4 sm:$0xff]   ;;  %v23828_v9 = vld [vmem:[#allocation8 + $0x231c] ss:$24 sps:$4 sm:$0xff]  }
 0xb03   :  { %v23838_v62 = vld [vmem:[#allocation8 + $0x22e4] ss:$24 sps:$4 sm:$0xff]  }
 0xb05   :  { %13449 = vmatpush1.bf16.msra.mxu1 %v23621_v24  ;;  %13490 = vmatpush1.bf16.msra.mxu0 %v18501_v45  ;;  %v23840_v45 = vld [vmem:[#allocation8 + $0x22ec] ss:$24 sps:$4 sm:$0xff]  }
 0xb06   :  { %13450 = vmatprep.subr.bf16.mxu1 %v23627_v51  ;;  %13491 = vmatprep.subr.bf16.mxu0 %v18506_v63  ;;  %v23844_v63 = vld [vmem:[#allocation8 + $0x22e0] ss:$24 sps:$4 sm:$0xff]  }
 0xb09   :  { %13451 = vmatpush1.bf16.msra.mxu1 %v23633_v13  ;;  %13492 = vmatpush1.bf16.msra.mxu0 %v18504_v42  ;;  %v23846_v42 = vld [vmem:[#allocation8 + $0x22e8] ss:$24 sps:$4 sm:$0xff]  }
 0xb0a   :  { %13452 = vmatprep.subr.bf16.mxu1 %v23639_v47  ;;  %13493 = vmatprep.subr.bf16.mxu0 %v18509_v16  ;;  %v23850_v16 = vld [vmem:[#allocation8 + $0x22b4] ss:$24 sps:$4 sm:$0xff]  }
 0xb0d   :  { %13453 = vmatpush1.bf16.msra.mxu1 %v23645_v17  ;;  %13494 = vmatpush1.bf16.msra.mxu0 %v18507_v8  ;;  %v23788_v17 = vld [vmem:[#allocation8 + $0x23a0] ss:$24 sps:$4 sm:$0xff]   ;;  %v23852_v8 = vld [vmem:[#allocation8 + $0x22bc] ss:$24 sps:$4 sm:$0xff]  }
 0xb0e   :  { %13454 = vmatprep.subr.bf16.mxu1 %v23651_v25  ;;  %13495 = vmatprep.subr.bf16.mxu0 %v18512_v26  ;;  %v23790_v25 = vld [vmem:[#allocation8 + $0x23a8] ss:$24 sps:$4 sm:$0xff]  }
 0xb0f   :  { %v23856_v26 = vld [vmem:[#allocation8 + $0x22b0] ss:$24 sps:$4 sm:$0xff]  }
 0xb11   :  { %13455 = vmatpush1.bf16.msra.mxu1 %v23657_v15  ;;  %13496 = vmatpush1.bf16.msra.mxu0 %v18510_v5  ;;  %v23858_v5 = vld [vmem:[#allocation8 + $0x22b8] ss:$24 sps:$4 sm:$0xff]  }
 0xb12   :  { %13456 = vmatprep.subr.bf16.mxu1 %v23663_v44  ;;  %13497 = vmatprep.subr.bf16.mxu0 %v18515_v48  ;;  %v23862_v48 = vld [vmem:[#allocation8 + $0x2284] ss:$24 sps:$4 sm:$0xff]  }
 0xb15   :  { %13457 = vmatpush1.bf16.msra.mxu1 %v23669_v32  ;;  %13498 = vmatpush1.bf16.msra.mxu0 %v18513_v2  ;;  %v23794_v32 = vld [vmem:[#allocation8 + $0x2374] ss:$24 sps:$4 sm:$0xff]  }
 0xb16   :  { %13821 = vmatprep.subr.bf16.mxu1 %v23765_v23  ;;  %13862 = vmatprep.subr.bf16.mxu0 %v23767_v33  ;;  %v23864_v2 = vld [vmem:[#allocation8 + $0x228c] ss:$24 sps:$4 sm:$0xff]  }
 0xb18   :  { %v12374_v24 = vpop.f32.mrf.mxu1  ;;  %v12415_v51 = vpop.f32.mrf.mxu0  ;;  %13475 = vmatmul.mubr.bf16.vlgmr.msra.gmra.mxu1 %v13399_v1  ;;  %13516 = vmatmul.mubr.bf16.vlgmr.msra.gmra.mxu0 %v13399_v1  ;;  %v23868_v1 = vld [vmem:[#allocation8 + $0x2280] ss:$24 sps:$4 sm:$0xff]  }
 0xb19   :  { %v23781_v13 = vadd.f32 %v12374_v24, %v23580_v35  ;;  %v23784_v47 = vadd.f32 %v12415_v51, %v23583_v38  ;;  %13822 = vmatpush1.bf16.msra.mxu1 %v23770_v58  ;;  %13863 = vmatpush1.bf16.msra.mxu0 %v23772_v52  ;;  %v23796_v35 = vld [vmem:[#allocation8 + $0x237c] ss:$24 sps:$4 sm:$0xff]  }
 0xb1a   :  { %v12376_v15 = vpop.f32.mrf.mxu1  ;;  %v12417_v44 = vpop.f32.mrf.mxu0  ;;  %13823 = vmatprep.subr.bf16.mxu1 %v23776_v21  ;;  %13864 = vmatprep.subr.bf16.mxu0 %v23778_v55 }
 0xb1b   :  { %v23799_v38 = vadd.f32 %v12376_v15, %v23598_v43  ;;  %v23802_v12 = vadd.f32 %v12417_v44, %v23601_v28  ;;  %13853 = vmatprep.mubr.bf16.mxu1 %v24500_v40  ;;  %13894 = vmatprep.mubr.bf16.mxu0 %v24500_v40  ;;  %v23814_v28 = vld [vmem:[#allocation8 + $0x2344] ss:$24 sps:$4 sm:$0xff]  }
 0xb1c   :  { %v12378_v46 = vpop.f32.mrf.mxu1  ;;  %v12419_v57 = vpop.f32.mrf.mxu0  ;;  %v23901_v15 = vld [vmem:[#allocation8 + $0x2384] ss:$24 sps:$4 sm:$0xff]  }
 0xb1d   :  { %13824 = vmatpush1.bf16.msra.mxu1 %v23788_v17  ;;  %13865 = vmatpush1.bf16.msra.mxu0 %v23790_v25  ;;  %v23913_v46 = vld [vmem:[#allocation8 + $0x2380] ss:$24 sps:$4 sm:$0xff]  }
 0xb1e   :  { %v12379_v22 = vpop.f32.mrf.mxu1  ;;  %v12420_v43 = vpop.f32.mrf.mxu0  ;;  %13825 = vmatprep.subr.bf16.mxu1 %v23794_v32  ;;  %13866 = vmatprep.subr.bf16.mxu0 %v23796_v35 }
 0xb1f   :  { %v18578_v22 = vld [vmem:[#allocation8 + $0x2324] ss:$24 sps:$4 sm:$0xff]   ;;  %v18581_v43 = vld [vmem:[#allocation8 + $0x22f4] ss:$24 sps:$4 sm:$0xff]  }
 0xb21   :  { %13826 = vmatpush1.bf16.msra.mxu1 %v23808_v11  ;;  %13867 = vmatpush1.bf16.msra.mxu0 %v23810_v4 }
 0xb22   :  { %13827 = vmatprep.subr.bf16.mxu1 %v23814_v28  ;;  %13868 = vmatprep.subr.bf16.mxu0 %v23816_v34 }
 0xb25   :  { %13828 = vmatpush1.bf16.msra.mxu1 %v23820_v29  ;;  %13869 = vmatpush1.bf16.msra.mxu0 %v23822_v56 }
 0xb26   :  { %13829 = vmatprep.subr.bf16.mxu1 %v23826_v36  ;;  %13870 = vmatprep.subr.bf16.mxu0 %v23828_v9 }
 0xb29   :  { %13830 = vmatpush1.bf16.msra.mxu1 %v23832_v7  ;;  %13871 = vmatpush1.bf16.msra.mxu0 %v23834_v61 }
 0xb2a   :  { %13831 = vmatprep.subr.bf16.mxu1 %v23838_v62  ;;  %13872 = vmatprep.subr.bf16.mxu0 %v23840_v45 }
 0xb2d   :  { %13832 = vmatpush1.bf16.msra.mxu1 %v23844_v63  ;;  %13873 = vmatpush1.bf16.msra.mxu0 %v23846_v42 }
 0xb2e   :  { %13833 = vmatprep.subr.bf16.mxu1 %v23850_v16  ;;  %13874 = vmatprep.subr.bf16.mxu0 %v23852_v8 }
 0xb31   :  { %13834 = vmatpush1.bf16.msra.mxu1 %v23856_v26  ;;  %13875 = vmatpush1.bf16.msra.mxu0 %v23858_v5 }
 0xb32   :  { %13835 = vmatprep.subr.bf16.mxu1 %v23862_v48  ;;  %13876 = vmatprep.subr.bf16.mxu0 %v23864_v2 }
 0xb35   :  { %13836 = vmatpush1.bf16.msra.mxu1 %v23868_v1  ;;  %13877 = vmatpush1.bf16.msra.mxu0 %v23870_v37 }
 0xb36   :  { %13903 = vmatprep.subr.bf16.mxu1 %v23874_v6  ;;  %13952 = vmatprep.subr.bf16.mxu0 %v23765_v23 }
 0xb38   :  { %v12753_v3 = vpop.f32.mrf.mxu1  ;;  %v12794_v14 = vpop.f32.mrf.mxu0  ;;  %13854 = vmatmul.mubr.bf16.vlgmr.msra.gmra.mxu1 %v23881_v53  ;;  %13895 = vmatmul.mubr.bf16.vlgmr.msra.gmra.mxu0 %v23881_v53 }
 0xb39   :  { %v23890_v59 = vadd.f32 %v12753_v3, %v23689_v27  ;;  %v23893_v24 = vadd.f32 %v12794_v14, %v23692_v19  ;;  %13904 = vmatpush1.bf16.msra.mxu1 %v23878_v41  ;;  %13953 = vmatpush1.bf16.msra.mxu0 %v23770_v58  ;;  %v24011_v3 = vld [vmem:[#allocation8 + $0x24f8] ss:$24 sps:$4 sm:$0xff]  }
 0xb3a   :  { %v12755_v23 = vpop.f32.mrf.mxu1  ;;  %v12796_v51 = vpop.f32.mrf.mxu0  ;;  %13905 = vmatprep.subr.bf16.mxu1 %v23885_v0  ;;  %13954 = vmatprep.subr.bf16.mxu0 %v23776_v21 }
 0xb3b   :  { %v23904_v27 = vadd.f32 %v12755_v23, %v23703_v49  ;;  %v23907_v19 = vadd.f32 %v12796_v51, %v23706_v39  ;;  %13935 = vmatprep.mubr.bf16.mxu1 %v24500_v40  ;;  %13984 = vmatprep.mubr.bf16.mxu0 %v24500_v40  ;;  %v18575_v49 = vld [vmem:[#allocation8 + $0x2354] ss:$24 sps:$4 sm:$0xff]   ;;  %v18573_v39 = vld [vmem:[#allocation8 + $0x2350] ss:$24 sps:$4 sm:$0xff]   ;;  %v24021_v23 = vld [vmem:[#allocation8 + $0x24c0] ss:$24 sps:$4 sm:$0xff]  }
 0xb3c   :  { %v12757_v58 = vpop.f32.mrf.mxu1  ;;  %v12798_v44 = vpop.f32.mrf.mxu0  ;;  %v24023_v51 = vld [vmem:[#allocation8 + $0x24c8] ss:$24 sps:$4 sm:$0xff]  }
 0xb3d   :  { %13906 = vmatpush1.bf16.msra.mxu1 %v23897_v31  ;;  %13955 = vmatpush1.bf16.msra.mxu0 %v23788_v17  ;;  %v18576_v17 = vld [vmem:[#allocation8 + $0x2320] ss:$24 sps:$4 sm:$0xff]   ;;  %v24029_v58 = vld [vmem:[#allocation8 + $0x249c] ss:$24 sps:$4 sm:$0xff]   ;;  %v24033_v44 = vld [vmem:[#allocation8 + $0x2490] ss:$24 sps:$4 sm:$0xff]  }
 0xb3e   :  { %v12758_v21 = vpop.f32.mrf.mxu1  ;;  %v12799_v57 = vpop.f32.mrf.mxu0  ;;  %13907 = vmatprep.subr.bf16.mxu1 %v23901_v15  ;;  %13956 = vmatprep.subr.bf16.mxu0 %v23794_v32  ;;  %v18579_v32 = vld [vmem:[#allocation8 + $0x22f0] ss:$24 sps:$4 sm:$0xff]  }
 0xb3f   :  { %v24039_v21 = vld [vmem:[#allocation8 + $0x2464] ss:$24 sps:$4 sm:$0xff]  }
 0xb40   :  { %v24041_v57 = vld [vmem:[#allocation8 + $0x246c] ss:$24 sps:$4 sm:$0xff]  }
 0xb41   :  { %13908 = vmatpush1.bf16.msra.mxu1 %v23913_v46  ;;  %13957 = vmatpush1.bf16.msra.mxu0 %v23808_v11  ;;  %v18584_v11 = vld [vmem:[#allocation8 + $0x22c4] ss:$24 sps:$4 sm:$0xff]  }
 0xb42   :  { %13909 = vmatprep.subr.bf16.mxu1 %v18575_v49  ;;  %13958 = vmatprep.subr.bf16.mxu0 %v23814_v28  ;;  %v18582_v28 = vld [vmem:[#allocation8 + $0x22c0] ss:$24 sps:$4 sm:$0xff]  }
 0xb45   :  { %13910 = vmatpush1.bf16.msra.mxu1 %v18573_v39  ;;  %13959 = vmatpush1.bf16.msra.mxu0 %v23820_v29  ;;  %v18587_v29 = vld [vmem:[#allocation8 + $0x2294] ss:$24 sps:$4 sm:$0xff]  }
 0xb46   :  { %13911 = vmatprep.subr.bf16.mxu1 %v18578_v22  ;;  %13960 = vmatprep.subr.bf16.mxu0 %v23826_v36  ;;  %v18585_v36 = vld [vmem:[#allocation8 + $0x2290] ss:$24 sps:$4 sm:$0xff]  }
 0xb49   :  { %13912 = vmatpush1.bf16.msra.mxu1 %v18576_v17  ;;  %13961 = vmatpush1.bf16.msra.mxu0 %v23832_v7  ;;  %v13950_v7 = vrot.slane %v22719_v20, 3 }
 0xb4a   :  { %13913 = vmatprep.subr.bf16.mxu1 %v18581_v43  ;;  %13962 = vmatprep.subr.bf16.mxu0 %v23838_v62 }
 0xb4d   :  { %13914 = vmatpush1.bf16.msra.mxu1 %v18579_v32  ;;  %13963 = vmatpush1.bf16.msra.mxu0 %v23844_v63 }
 0xb4e   :  { %13915 = vmatprep.subr.bf16.mxu1 %v18584_v11  ;;  %13964 = vmatprep.subr.bf16.mxu0 %v23850_v16 }
 0xb51   :  { %13916 = vmatpush1.bf16.msra.mxu1 %v18582_v28  ;;  %13965 = vmatpush1.bf16.msra.mxu0 %v23856_v26 }
 0xb52   :  { %13917 = vmatprep.subr.bf16.mxu1 %v18587_v29  ;;  %13966 = vmatprep.subr.bf16.mxu0 %v23862_v48 }
 0xb55   :  { %13918 = vmatpush1.bf16.msra.mxu1 %v18585_v36  ;;  %13967 = vmatpush1.bf16.msra.mxu0 %v23868_v1 }
 0xb56   :  { %13993 = vmatprep.subr.bf16.mxu1 %v23767_v33  ;;  %14034 = vmatprep.subr.bf16.mxu0 %v23874_v6 }
 0xb58   :  { %v12835_v62 = vpop.f32.mrf.mxu1  ;;  %v12884_v63 = vpop.f32.mrf.mxu0  ;;  %13936 = vmatmul.mubr.bf16.vlgmr.msra.gmra.mxu1 %v23881_v53  ;;  %13985 = vmatmul.mubr.bf16.vlgmr.msra.gmra.mxu0 %v13950_v7 }
 0xb59   :  { %v23934_v16 = vadd.f32 %v12835_v62, %v23733_v54  ;;  %v23937_v26 = vadd.f32 %v12884_v63, %v23736_v18  ;;  %13994 = vmatpush1.bf16.msra.mxu1 %v23772_v52  ;;  %14035 = vmatpush1.bf16.msra.mxu0 %v23878_v41  ;;  %v24079_v62 = vld [vmem:[#allocation8 + $0x2560] ss:$24 sps:$4 sm:$0xff]   ;;  %v24082_v63 = vrot.slane %v22449_v10, 4  ;;  %v24098_v10 = vld [vmem:[#allocation8 + $0x2530] ss:$24 sps:$4 sm:$0xff]  }
 0xb5a   :  { %v12837_v20 = vpop.f32.mrf.mxu1  ;;  %v12886_v48 = vpop.f32.mrf.mxu0  ;;  %13995 = vmatprep.subr.bf16.mxu1 %v23778_v55  ;;  %14036 = vmatprep.subr.bf16.mxu0 %v23885_v0  ;;  %v24009_v0 = vld [vmem:[#allocation8 + $0x24f0] ss:$24 sps:$4 sm:$0xff]  }
 0xb5b   :  { %v23944_v33 = vadd.f32 %v12837_v20, %v23743_v30  ;;  %v23947_v1 = vadd.f32 %v12886_v48, %v23746_v50  ;;  %14025 = vmatprep.mubr.bf16.mxu1 %v24500_v40  ;;  %14066 = vmatprep.mubr.bf16.mxu0 %v24500_v40  ;;  %v23966_v30 = vld [vmem:[#allocation8 + $0x2554] ss:$24 sps:$4 sm:$0xff]  }
 0xb5c   :  { %v12839_v54 = vpop.f32.mrf.mxu1  ;;  %v12888_v18 = vpop.f32.mrf.mxu0  ;;  %v23968_v50 = vld [vmem:[#allocation8 + $0x255c] ss:$24 sps:$4 sm:$0xff]  }
 0xb5d   :  { %13996 = vmatpush1.bf16.msra.mxu1 %v23790_v25  ;;  %14037 = vmatpush1.bf16.msra.mxu0 %v23897_v31  ;;  %v23971_v25 = vld [vmem:[#allocation8 + $0x2550] ss:$24 sps:$4 sm:$0xff]   ;;  %v24017_v31 = vld [vmem:[#allocation8 + $0x24cc] ss:$24 sps:$4 sm:$0xff]  }
 0xb5e   :  { %v12840_v52 = vpop.f32.mrf.mxu1  ;;  %v12889_v55 = vpop.f32.mrf.mxu0  ;;  %13997 = vmatprep.subr.bf16.mxu1 %v23796_v35  ;;  %14038 = vmatprep.subr.bf16.mxu0 %v23901_v15  ;;  %v23973_v35 = vld [vmem:[#allocation8 + $0x2558] ss:$24 sps:$4 sm:$0xff]   ;;  %v24027_v15 = vld [vmem:[#allocation8 + $0x2494] ss:$24 sps:$4 sm:$0xff]  }
 0xb5f   :  { %v24086_v20 = vld [vmem:[#allocation8 + $0x2534] ss:$24 sps:$4 sm:$0xff]  }
 0xb61   :  { %13998 = vmatpush1.bf16.msra.mxu1 %v23810_v4  ;;  %14039 = vmatpush1.bf16.msra.mxu0 %v23913_v46  ;;  %v23977_v4 = vld [vmem:[#allocation8 + $0x2524] ss:$24 sps:$4 sm:$0xff]   ;;  %v24035_v46 = vld [vmem:[#allocation8 + $0x2498] ss:$24 sps:$4 sm:$0xff]  }
 0xb62   :  { %13999 = vmatprep.subr.bf16.mxu1 %v23816_v34  ;;  %14040 = vmatprep.subr.bf16.mxu0 %v18575_v49  ;;  %v23979_v34 = vld [vmem:[#allocation8 + $0x252c] ss:$24 sps:$4 sm:$0xff]   ;;  %v24045_v49 = vld [vmem:[#allocation8 + $0x2460] ss:$24 sps:$4 sm:$0xff]  }
 0xb65   :  { %14000 = vmatpush1.bf16.msra.mxu1 %v23822_v56  ;;  %14041 = vmatpush1.bf16.msra.mxu0 %v18573_v39  ;;  %v24047_v39 = vld [vmem:[#allocation8 + $0x2468] ss:$24 sps:$4 sm:$0xff]  }
 0xb66   :  { %14001 = vmatprep.subr.bf16.mxu1 %v23828_v9  ;;  %14042 = vmatprep.subr.bf16.mxu0 %v18578_v22  ;;  %v24051_v22 = vld [vmem:[#allocation8 + $0x2434] ss:$24 sps:$4 sm:$0xff]  }
 0xb69   :  { %14002 = vmatpush1.bf16.msra.mxu1 %v23834_v61  ;;  %14043 = vmatpush1.bf16.msra.mxu0 %v18576_v17  ;;  %v24053_v17 = vld [vmem:[#allocation8 + $0x243c] ss:$24 sps:$4 sm:$0xff]  }
 0xb6a   :  { %14003 = vmatprep.subr.bf16.mxu1 %v23840_v45  ;;  %14044 = vmatprep.subr.bf16.mxu0 %v18581_v43  ;;  %v24057_v43 = vld [vmem:[#allocation8 + $0x2430] ss:$24 sps:$4 sm:$0xff]  }
 0xb6d   :  { %14004 = vmatpush1.bf16.msra.mxu1 %v23846_v42  ;;  %14045 = vmatpush1.bf16.msra.mxu0 %v18579_v32  ;;  %v23989_v42 = vld [vmem:[#allocation8 + $0x2520] ss:$24 sps:$4 sm:$0xff]  }
 0xb6e   :  { %14005 = vmatprep.subr.bf16.mxu1 %v23852_v8  ;;  %14046 = vmatprep.subr.bf16.mxu0 %v18584_v11  ;;  %v23991_v8 = vld [vmem:[#allocation8 + $0x2528] ss:$24 sps:$4 sm:$0xff]   ;;  %v24059_v32 = vld [vmem:[#allocation8 + $0x2438] ss:$24 sps:$4 sm:$0xff]   ;;  %v24063_v11 = vld [vmem:[#allocation8 + $0x2404] ss:$24 sps:$4 sm:$0xff]  }
 0xb71   :  { %14006 = vmatpush1.bf16.msra.mxu1 %v23858_v5  ;;  %14047 = vmatpush1.bf16.msra.mxu0 %v18582_v28  ;;  %v24065_v28 = vld [vmem:[#allocation8 + $0x240c] ss:$24 sps:$4 sm:$0xff]  }
 0xb72   :  { %14007 = vmatprep.subr.bf16.mxu1 %v23864_v2  ;;  %14048 = vmatprep.subr.bf16.mxu0 %v18587_v29  ;;  %v24069_v29 = vld [vmem:[#allocation8 + $0x2400] ss:$24 sps:$4 sm:$0xff]  }
 0xb75   :  { %14008 = vmatpush1.bf16.msra.mxu1 %v23870_v37  ;;  %14049 = vmatpush1.bf16.msra.mxu0 %v18585_v36  ;;  %v23995_v37 = vld [vmem:[#allocation8 + $0x24f4] ss:$24 sps:$4 sm:$0xff]   ;;  %v24071_v36 = vld [vmem:[#allocation8 + $0x2408] ss:$24 sps:$4 sm:$0xff]  }
 0xb76   :  { %14372 = vmatprep.subr.bf16.mxu1 %v23966_v30  ;;  %14413 = vmatprep.subr.bf16.mxu0 %v23968_v50 }
 0xb78   :  { %v12925_v56 = vpop.f32.mrf.mxu1  ;;  %v12966_v9 = vpop.f32.mrf.mxu0  ;;  %14026 = vmatmul.mubr.bf16.vlgmr.msra.gmra.mxu1 %v13950_v7  ;;  %14067 = vmatmul.mubr.bf16.vlgmr.msra.gmra.mxu0 %v13950_v7  ;;  %v24075_v7 = vld [vmem:[#allocation8 + $0x2564] ss:$24 sps:$4 sm:$0xff]  }
 0xb79   :  { %v23982_v61 = vadd.f32 %v12925_v56, %v23781_v13  ;;  %v23985_v45 = vadd.f32 %v12966_v9, %v23784_v47  ;;  %14373 = vmatpush1.bf16.msra.mxu1 %v23971_v25  ;;  %14414 = vmatpush1.bf16.msra.mxu0 %v23973_v35  ;;  %v23997_v13 = vld [vmem:[#allocation8 + $0x24fc] ss:$24 sps:$4 sm:$0xff]  }
 0xb7a   :  { %v12927_v5 = vpop.f32.mrf.mxu1  ;;  %v12968_v2 = vpop.f32.mrf.mxu0  ;;  %14374 = vmatprep.subr.bf16.mxu1 %v23977_v4  ;;  %14415 = vmatprep.subr.bf16.mxu0 %v23979_v34  ;;  %v24102_v56 = vld [vmem:[#allocation8 + $0x2504] ss:$24 sps:$4 sm:$0xff]  }
 0xb7b   :  { %v24000_v47 = vadd.f32 %v12927_v5, %v23799_v38  ;;  %v24003_v6 = vadd.f32 %v12968_v2, %v23802_v12  ;;  %14404 = vmatprep.mubr.bf16.mxu1 %v24500_v40  ;;  %14445 = vmatprep.mubr.bf16.mxu0 %v24500_v40  ;;  %v24015_v12 = vld [vmem:[#allocation8 + $0x24c4] ss:$24 sps:$4 sm:$0xff]   ;;  %v24114_v5 = vld [vmem:[#allocation8 + $0x2500] ss:$24 sps:$4 sm:$0xff]  }
 0xb7c   :  { %v12929_v41 = vpop.f32.mrf.mxu1  ;;  %v12970_v53 = vpop.f32.mrf.mxu0 }
 0xb7d   :  { %14375 = vmatpush1.bf16.msra.mxu1 %v23989_v42  ;;  %14416 = vmatpush1.bf16.msra.mxu0 %v23991_v8  ;;  %v18650_v41 = vld [vmem:[#allocation8 + $0x24a4] ss:$24 sps:$4 sm:$0xff]   ;;  %v18653_v53 = vld [vmem:[#allocation8 + $0x2474] ss:$24 sps:$4 sm:$0xff]  }
 0xb7e   :  { %v12930_v14 = vpop.f32.mrf.mxu1  ;;  %v12971_v38 = vpop.f32.mrf.mxu0  ;;  %14376 = vmatprep.subr.bf16.mxu1 %v23995_v37  ;;  %14417 = vmatprep.subr.bf16.mxu0 %v23997_v13 }
 0xb7f   :  { %v18654_v14 = vld [vmem:[#allocation8 + $0x2440] ss:$24 sps:$4 sm:$0xff]   ;;  %v18659_v38 = vld [vmem:[#allocation8 + $0x2414] ss:$24 sps:$4 sm:$0xff]  }
 0xb81   :  { %14377 = vmatpush1.bf16.msra.mxu1 %v24009_v0  ;;  %14418 = vmatpush1.bf16.msra.mxu0 %v24011_v3 }
 0xb82   :  { %14378 = vmatprep.subr.bf16.mxu1 %v24015_v12  ;;  %14419 = vmatprep.subr.bf16.mxu0 %v24017_v31 }
 0xb85   :  { %14379 = vmatpush1.bf16.msra.mxu1 %v24021_v23  ;;  %14420 = vmatpush1.bf16.msra.mxu0 %v24023_v51 }
 0xb86   :  { %14380 = vmatprep.subr.bf16.mxu1 %v24027_v15  ;;  %14421 = vmatprep.subr.bf16.mxu0 %v24029_v58 }
 0xb89   :  { %14381 = vmatpush1.bf16.msra.mxu1 %v24033_v44  ;;  %14422 = vmatpush1.bf16.msra.mxu0 %v24035_v46 }
 0xb8a   :  { %14382 = vmatprep.subr.bf16.mxu1 %v24039_v21  ;;  %14423 = vmatprep.subr.bf16.mxu0 %v24041_v57 }
 0xb8d   :  { %14383 = vmatpush1.bf16.msra.mxu1 %v24045_v49  ;;  %14424 = vmatpush1.bf16.msra.mxu0 %v24047_v39 }
 0xb8e   :  { %14384 = vmatprep.subr.bf16.mxu1 %v24051_v22  ;;  %14425 = vmatprep.subr.bf16.mxu0 %v24053_v17 }
 0xb91   :  { %14385 = vmatpush1.bf16.msra.mxu1 %v24057_v43  ;;  %14426 = vmatpush1.bf16.msra.mxu0 %v24059_v32 }
 0xb92   :  { %14386 = vmatprep.subr.bf16.mxu1 %v24063_v11  ;;  %14427 = vmatprep.subr.bf16.mxu0 %v24065_v28 }
 0xb95   :  { %14387 = vmatpush1.bf16.msra.mxu1 %v24069_v29  ;;  %14428 = vmatpush1.bf16.msra.mxu0 %v24071_v36 }
 0xb96   :  { %14454 = vmatprep.subr.bf16.mxu1 %v24075_v7  ;;  %14503 = vmatprep.subr.bf16.mxu0 %v23966_v30 }
 0xb98   :  { %v13304_v48 = vpop.f32.mrf.mxu1  ;;  %v13345_v54 = vpop.f32.mrf.mxu0  ;;  %14405 = vmatmul.mubr.bf16.vlgmr.msra.gmra.mxu1 %v24082_v63  ;;  %14446 = vmatmul.mubr.bf16.vlgmr.msra.gmra.mxu0 %v24082_v63 }
 0xb99   :  { %v24091_v18 = vadd.f32 %v13304_v48, %v23890_v59  ;;  %v24094_v52 = vadd.f32 %v13345_v54, %v23893_v24  ;;  %14455 = vmatpush1.bf16.msra.mxu1 %v24079_v62  ;;  %14504 = vmatpush1.bf16.msra.mxu0 %v23971_v25  ;;  %v24220_v48 = vld [vmem:[#allocation11 + $0x20] sm:$0xff]  }
 0xb9a   :  { %v13306_v55 = vpop.f32.mrf.mxu1  ;;  %v13347_v30 = vpop.f32.mrf.mxu0  ;;  %14456 = vmatprep.subr.bf16.mxu1 %v24086_v20  ;;  %14505 = vmatprep.subr.bf16.mxu0 %v23977_v4  ;;  %v24222_v54 = vld [vmem:[#allocation11 + $0xa0] sm:$0xff]  }
 0xb9b   :  { %v24105_v59 = vadd.f32 %v13306_v55, %v23904_v27  ;;  %v24108_v24 = vadd.f32 %v13347_v30, %v23907_v19  ;;  %14486 = vmatprep.mubr.bf16.mxu1 %v24500_v40  ;;  %14535 = vmatprep.mubr.bf16.mxu0 %v24500_v40  ;;  %v18647_v27 = vld [vmem:[#allocation8 + $0x24d4] ss:$24 sps:$4 sm:$0xff]   ;;  %v18645_v19 = vld [vmem:[#allocation8 + $0x24d0] ss:$24 sps:$4 sm:$0xff]   ;;  %v24228_v55 = vld [vmem:[#allocation11 + $0xd8] sm:$0xff]  }
 0xb9c   :  { %v13308_v25 = vpop.f32.mrf.mxu1  ;;  %v13349_v9 = vpop.f32.mrf.mxu0  ;;  %v24232_v30 = vld [vmem:[#allocation11 + $0x18] sm:$0xff]  }
 0xb9d   :  { %14457 = vmatpush1.bf16.msra.mxu1 %v24098_v10  ;;  %14506 = vmatpush1.bf16.msra.mxu0 %v23989_v42  ;;  %v18648_v42 = vld [vmem:[#allocation8 + $0x24a0] ss:$24 sps:$4 sm:$0xff]  }
 0xb9e   :  { %v13309_v4 = vpop.f32.mrf.mxu1  ;;  %v13350_v2 = vpop.f32.mrf.mxu0  ;;  %14458 = vmatprep.subr.bf16.mxu1 %v24102_v56  ;;  %14507 = vmatprep.subr.bf16.mxu0 %v23995_v37  ;;  %v18651_v37 = vld [vmem:[#allocation8 + $0x2470] ss:$24 sps:$4 sm:$0xff]   ;;  %v24238_v25 = vld [vmem:[#allocation11 + $0x50] sm:$0xff]  }
 0xb9f   :  { %v24240_v9 = vld [vmem:[#allocation11 + $0xd0] sm:$0xff]   ;;  %v24250_v2 = vld [vmem:[#allocation11 + $0x48] sm:$0xff]  }
 0xba0   :  { %v24246_v4 = vld [vmem:[#allocation11 + $0x90] sm:$0xff]  }
 0xba1   :  { %14459 = vmatpush1.bf16.msra.mxu1 %v24114_v5  ;;  %14508 = vmatpush1.bf16.msra.mxu0 %v24009_v0  ;;  %v18656_v0 = vld [vmem:[#allocation8 + $0x2444] ss:$24 sps:$4 sm:$0xff]  }
 0xba2   :  { %14460 = vmatprep.subr.bf16.mxu1 %v18647_v27  ;;  %14509 = vmatprep.subr.bf16.mxu0 %v24015_v12  ;;  %v18657_v12 = vld [vmem:[#allocation8 + $0x2410] ss:$24 sps:$4 sm:$0xff]  }
 0xba5   :  { %14461 = vmatpush1.bf16.msra.mxu1 %v18645_v19  ;;  %14510 = vmatpush1.bf16.msra.mxu0 %v24021_v23  ;;  %v14501_v23 = vrot.slane %v22510_v60, 4 }
 0xba6   :  { %14462 = vmatprep.subr.bf16.mxu1 %v18650_v41  ;;  %14511 = vmatprep.subr.bf16.mxu0 %v24027_v15 }
 0xba9   :  { %14463 = vmatpush1.bf16.msra.mxu1 %v18648_v42  ;;  %14512 = vmatpush1.bf16.msra.mxu0 %v24033_v44 }
 0xbaa   :  { %14464 = vmatprep.subr.bf16.mxu1 %v18653_v53  ;;  %14513 = vmatprep.subr.bf16.mxu0 %v24039_v21 }
 0xbad   :  { %14465 = vmatpush1.bf16.msra.mxu1 %v18651_v37  ;;  %14514 = vmatpush1.bf16.msra.mxu0 %v24045_v49 }
 0xbae   :  { %14466 = vmatprep.subr.bf16.mxu1 %v18656_v0  ;;  %14515 = vmatprep.subr.bf16.mxu0 %v24051_v22 }
 0xbb1   :  { %14467 = vmatpush1.bf16.msra.mxu1 %v18654_v14  ;;  %14516 = vmatpush1.bf16.msra.mxu0 %v24057_v43 }
 0xbb2   :  { %14468 = vmatprep.subr.bf16.mxu1 %v18659_v38  ;;  %14517 = vmatprep.subr.bf16.mxu0 %v24063_v11  ;;  %v24196_v11 = vld [vmem:[#allocation11 + $0x68] sm:$0xff]  }
 0xbb5   :  { %14469 = vmatpush1.bf16.msra.mxu1 %v18657_v12  ;;  %14518 = vmatpush1.bf16.msra.mxu0 %v24069_v29 }
 0xbb6   :  { %14544 = vmatprep.subr.bf16.mxu1 %v23968_v50  ;;  %14585 = vmatprep.subr.bf16.mxu0 %v24075_v7  ;;  %v24208_v7 = vld [vmem:[#allocation11 + $0x28] sm:$0xff]  }
 0xbb8   :  { %v13386_v15 = vpop.f32.mrf.mxu1  ;;  %v13435_v44 = vpop.f32.mrf.mxu0  ;;  %14487 = vmatmul.mubr.bf16.vlgmr.msra.gmra.mxu1 %v24082_v63  ;;  %14536 = vmatmul.mubr.bf16.vlgmr.msra.gmra.mxu0 %v14501_v23 }
 0xbb9   :  { %v24135_v21 = vadd.f32 %v13386_v15, %v23934_v16  ;;  %v24138_v49 = vadd.f32 %v13435_v44, %v23937_v26  ;;  %14545 = vmatpush1.bf16.msra.mxu1 %v23973_v35  ;;  %14586 = vmatpush1.bf16.msra.mxu0 %v24079_v62  ;;  %v24210_v62 = vld [vmem:[#allocation11 + $0xa8] sm:$0xff]  }
 0xbba   :  { %v13388_v60 = vpop.f32.mrf.mxu1  ;;  %v13437_v22 = vpop.f32.mrf.mxu0  ;;  %14546 = vmatprep.subr.bf16.mxu1 %v23979_v34  ;;  %14587 = vmatprep.subr.bf16.mxu0 %v24086_v20 }
 0xbbb   :  { %v24145_v50 = vadd.f32 %v13388_v60, %v23944_v33  ;;  %v24148_v43 = vadd.f32 %v13437_v22, %v23947_v1  ;;  %14576 = vmatprep.mubr.bf16.mxu1 %v24500_v40  ;;  %14617 = vmatprep.mubr.bf16.mxu0 %v24500_v40  ;;  %v24167_v40 = vld [vmem:[#allocation11 + $0x78] sm:$0xff]  }
 0xbbc   :  { %v13390_v16 = vpop.f32.mrf.mxu1  ;;  %v13439_v26 = vpop.f32.mrf.mxu0  ;;  %v24169_v33 = vld [vmem:[#allocation11 + $0xf8] sm:$0xff]  }
 0xbbd   :  { %14547 = vmatpush1.bf16.msra.mxu1 %v23991_v8  ;;  %14588 = vmatpush1.bf16.msra.mxu0 %v24098_v10  ;;  %v24172_v1 = vld [vmem:[#allocation11 + $0x38] sm:$0xff]  }
 0xbbe   :  { %v13391_v35 = vpop.f32.mrf.mxu1  ;;  %v13440_v34 = vpop.f32.mrf.mxu0  ;;  %14548 = vmatprep.subr.bf16.mxu1 %v23997_v13  ;;  %14589 = vmatprep.subr.bf16.mxu0 %v24102_v56  ;;  %v24174_v8 = vld [vmem:[#allocation11 + $0xb8] sm:$0xff]   ;;  %v24178_v13 = vld [vmem:[#allocation11 + $0x70] sm:$0xff]  }
 0xbbf   :  { %v24226_v10 = vld [vmem:[#allocation11 + $0x58] sm:$0xff]  }
 0xbc0   :  { %v24234_v56 = vld [vmem:[#allocation11 + $0x98] sm:$0xff]  }
 0xbc1   :  { %14549 = vmatpush1.bf16.msra.mxu1 %v24011_v3  ;;  %14590 = vmatpush1.bf16.msra.mxu0 %v24114_v5  ;;  %v24180_v3 = vld [vmem:[#allocation11 + $0xf0] sm:$0xff]  }
 0xbc2   :  { %14550 = vmatprep.subr.bf16.mxu1 %v24017_v31  ;;  %14591 = vmatprep.subr.bf16.mxu0 %v18647_v27  ;;  %v24244_v5 = vld [vmem:[#allocation11 + $0x10] sm:$0xff]   ;;  %v24252_v27 = vld [vmem:[#allocation11 + $0xc8] sm:$0xff]  }
 0xbc5   :  { %14551 = vmatpush1.bf16.msra.mxu1 %v24023_v51  ;;  %14592 = vmatpush1.bf16.msra.mxu0 %v18645_v19  ;;  %v24256_v19 = vld [vmem:[#allocation11 + $0x8] sm:$0xff]  }
 0xbc6   :  { %14552 = vmatprep.subr.bf16.mxu1 %v24029_v58  ;;  %14593 = vmatprep.subr.bf16.mxu0 %v18650_v41  ;;  %v24258_v41 = vld [vmem:[#allocation11 + $0x88] sm:$0xff]  }
 0xbc7   :  { %24532 = vst [vmem:[#allocation23_spill] sm:$0xff] %v24258_v41 }
 0xbc9   :  { %14553 = vmatpush1.bf16.msra.mxu1 %v24035_v46  ;;  %14594 = vmatpush1.bf16.msra.mxu0 %v18648_v42  ;;  %v24262_v42 = vld [vmem:[#allocation11 + $0x40] sm:$0xff]  }
 0xbca   :  { %14554 = vmatprep.subr.bf16.mxu1 %v24041_v57  ;;  %14595 = vmatprep.subr.bf16.mxu0 %v18653_v53  ;;  %v24190_v57 = vld [vmem:[#allocation11 + $0x30] sm:$0xff]   ;;  %v24264_v53 = vld [vmem:[#allocation11 + $0xc0] sm:$0xff]  }
 0xbcb   :  { %24533 = vst [vmem:[#allocation35_spill] sm:$0xff] %v24264_v53 }
 0xbcd   :  { %14555 = vmatpush1.bf16.msra.mxu1 %v24047_v39  ;;  %14596 = vmatpush1.bf16.msra.mxu0 %v18651_v37  ;;  %v24192_v39 = vld [vmem:[#allocation11 + $0xb0] sm:$0xff]   ;;  %v24268_v37 = vld [vmem:[#allocation11] sm:$0xff]  }
 0xbce   :  { %14556 = vmatprep.subr.bf16.mxu1 %v24053_v17  ;;  %14597 = vmatprep.subr.bf16.mxu0 %v18656_v0  ;;  %v24270_v0 = vld [vmem:[#allocation11 + $0x80] sm:$0xff]  }
 0xbcf   :  { %24534 = vst [vmem:[#allocation24_spill] sm:$0xff] %v24270_v0 }
 0xbd1   :  { %14557 = vmatpush1.bf16.msra.mxu1 %v24059_v32  ;;  %14598 = vmatpush1.bf16.msra.mxu0 %v18654_v14  ;;  %v24274_v14 = vld [vmem:[#allocation11 + $0x178] sm:$0xff]  }
 0xbd2   :  { %14558 = vmatprep.subr.bf16.mxu1 %v24065_v28  ;;  %14599 = vmatprep.subr.bf16.mxu0 %v18659_v38 }
 0xbd5   :  { %14559 = vmatpush1.bf16.msra.mxu1 %v24071_v36  ;;  %14600 = vmatpush1.bf16.msra.mxu0 %v18657_v12 }
 0xbd6   :  { %16667 = vmatprep.subr.bf16.mxu1 %v24167_v40  ;;  %16689 = vmatprep.subr.bf16.mxu0 %v24169_v33 }
 0xbd8   :  { %v13476_v31 = vpop.f32.mrf.mxu1  ;;  %v13517_v51 = vpop.f32.mrf.mxu0  ;;  %14577 = vmatmul.mubr.bf16.vlgmr.msra.gmra.mxu1 %v14501_v23  ;;  %14618 = vmatmul.mubr.bf16.vlgmr.msra.gmra.mxu0 %v14501_v23 }
 0xbd9   :  { %v24183_v58 = vadd.f32 %v13476_v31, %v23982_v61  ;;  %v24186_v46 = vadd.f32 %v13517_v51, %v23985_v45  ;;  %16668 = vmatpush3.bf16.msra.mxu1 %v24172_v1  ;;  %16690 = vmatpush3.bf16.msra.mxu0 %v24174_v8  ;;  %v24198_v61 = vld [vmem:[#allocation11 + $0xe8] sm:$0xff]  }
 0xbda   :  { %v13478_v17 = vpop.f32.mrf.mxu1  ;;  %v13519_v32 = vpop.f32.mrf.mxu0  ;;  %16669 = vmatprep.subr.bf16.mxu1 %v24178_v13  ;;  %16691 = vmatprep.subr.bf16.mxu0 %v24180_v3 }
 0xbdb   :  { %v24201_v45 = vadd.f32 %v13478_v17, %v24000_v47  ;;  %v24204_v28 = vadd.f32 %v13519_v32, %v24003_v6  ;;  %v24214_v47 = vld [vmem:[#allocation11 + $0x60] sm:$0xff]  }
 0xbdc   :  { %v13480_v29 = vpop.f32.mrf.mxu1  ;;  %v13521_v36 = vpop.f32.mrf.mxu0  ;;  %v24216_v6 = vld [vmem:[#allocation11 + $0xe0] sm:$0xff]  }
 0xbdd   :  { %16670 = vmatpush3.bf16.msra.mxu1 %v24190_v57  ;;  %16692 = vmatpush3.bf16.msra.mxu0 %v24192_v39 }
 0xbde   :  { %v13481_v63 = vpop.f32.mrf.mxu1  ;;  %v13522_v20 = vpop.f32.mrf.mxu0  ;;  %16671 = vmatprep.subr.bf16.mxu1 %v24196_v11  ;;  %16693 = vmatprep.subr.bf16.mxu0 %v24198_v61 }
 0xbe1   :  { %16672 = vmatpush3.bf16.msra.mxu1 %v24208_v7  ;;  %16694 = vmatpush3.bf16.msra.mxu0 %v24210_v62 }
 0xbe2   :  { %16673 = vmatprep.subr.bf16.mxu1 %v24214_v47  ;;  %16695 = vmatprep.subr.bf16.mxu0 %v24216_v6 }
 0xbe5   :  { %16674 = vmatpush3.bf16.msra.mxu1 %v24220_v48  ;;  %16696 = vmatpush3.bf16.msra.mxu0 %v24222_v54 }
 0xbe6   :  { %16675 = vmatprep.subr.bf16.mxu1 %v24226_v10  ;;  %16697 = vmatprep.subr.bf16.mxu0 %v24228_v55 }
 0xbe9   :  { %16676 = vmatpush3.bf16.msra.mxu1 %v24232_v30  ;;  %16698 = vmatpush3.bf16.msra.mxu0 %v24234_v56 }
 0xbea   :  { %16677 = vmatprep.subr.bf16.mxu1 %v24238_v25  ;;  %16699 = vmatprep.subr.bf16.mxu0 %v24240_v9 }
 0xbed   :  { %16678 = vmatpush3.bf16.msra.mxu1 %v24244_v5  ;;  %16700 = vmatpush3.bf16.msra.mxu0 %v24246_v4 }
 0xbee   :  { %16679 = vmatprep.subr.bf16.mxu1 %v24250_v2  ;;  %16701 = vmatprep.subr.bf16.mxu0 %v24252_v27 }
 0xbf1   :  { %16680 = vmatpush3.bf16.msra.mxu1 %v24256_v19  ;;  %16702 = vmatpush3.bf16.msra.mxu0 %v24258_v41 }
 0xbf2   :  { %16681 = vmatprep.subr.bf16.mxu1 %v24262_v42  ;;  %16703 = vmatprep.subr.bf16.mxu0 %v24264_v53 }
 0xbf5   :  { %16682 = vmatpush3.bf16.msra.mxu1 %v24268_v37  ;;  %16704 = vmatpush3.bf16.msra.mxu0 %v24270_v0 }
 0xbf6   :  { %16711 = vmatprep.subr.bf16.mxu1 %v24274_v14  ;;  %16733 = vmatprep.subr.bf16.mxu0 %v24167_v40 }
 0xbf8   :  { %v13855_v38 = vpop.f32.mrf.mxu1  ;;  %v13896_v12 = vpop.f32.mrf.mxu0 }
 0xbf9   :  { %v13944_v23 = vadd.f32 %v13855_v38, %v24091_v18  ;;  %v13946_v15 = vadd.f32 %v13896_v12, %v24094_v52 }
 0xbfa   :  { %v13857_v44 = vpop.f32.mrf.mxu1  ;;  %v13898_v60 = vpop.f32.mrf.mxu0 }
 0xbfb   :  { %v13945_v22 = vadd.f32 %v13857_v44, %v24105_v59  ;;  %v13947_v16 = vadd.f32 %v13898_v60, %v24108_v24 }
 0xbfc   :  { %v13859_v26 = vpop.f32.mrf.mxu1  ;;  %v13900_v35 = vpop.f32.mrf.mxu0 }
 0xbfe   :  { %v13860_v34 = vpop.f32.mrf.mxu1  ;;  %v13901_v31 = vpop.f32.mrf.mxu0 }
 0xc18   :  { %v13937_v51 = vpop.f32.mrf.mxu1  ;;  %v13986_v17 = vpop.f32.mrf.mxu0 }
 0xc19   :  { %v24285_v40 = vadd.f32 %v13937_v51, %v24135_v21  ;;  %v24288_v32 = vadd.f32 %v13986_v17, %v24138_v49  ;;  %v14633_v51 = vlaneseq }
 0xc1a   :  { %v13939_v18 = vpop.f32.mrf.mxu1  ;;  %v13988_v52 = vpop.f32.mrf.mxu0 }
 0xc1b   :  { %v24291_v29 = vadd.f32 %v13939_v18, %v24145_v50  ;;  %v24294_v59 = vadd.f32 %v13988_v52, %v24148_v43  ;;  %v24308_v17 = vshrl.u32 %v14633_v51, 7  ;;  %v24312_v18 = vld [vmem:[#allocation10] sm:$0x3f] }
 0xc1c   :  { %v13941_v24 = vpop.f32.mrf.mxu1  ;;  %v13990_v36 = vpop.f32.mrf.mxu0 }
 0xc1d   :  { %v14639_v52 = vsub.s32 1, %v24308_v17 }
 0xc1e   :  { %v13942_v63 = vpop.f32.mrf.mxu1  ;;  %v13991_v20 = vpop.f32.mrf.mxu0 }
 0xc38   :  { %v14027_v38 = vpop.f32.mrf.mxu1  ;;  %v14068_v12 = vpop.f32.mrf.mxu0 }
 0xc39   :  { %v24297_v21 = vadd.f32 %v14027_v38, %v24183_v58  ;;  %v24300_v49 = vadd.f32 %v14068_v12, %v24186_v46  ;;  %v14635_v58 = vsub.s32 0, %v24308_v17  ;;  %v14643_v46 = vsub.s32 2, %v24308_v17 }
 0xc3a   :  { %v14029_v44 = vpop.f32.mrf.mxu1  ;;  %v14070_v60 = vpop.f32.mrf.mxu0  ;;  %v24323_v12 = vrot.slane %v24312_v18, %v14639_v52 }
 0xc3b   :  { %v24303_v50 = vadd.f32 %v14029_v44, %v24201_v45  ;;  %v24306_v43 = vadd.f32 %v14070_v60, %v24204_v28  ;;  %v14647_v45 = vsub.s32 3, %v24308_v17  ;;  %v24317_v28 = vrot.slane %v24312_v18, %v14635_v58 }
 0xc3c   :  { %v14031_v26 = vpop.f32.mrf.mxu1  ;;  %v14072_v35 = vpop.f32.mrf.mxu0  ;;  %v24320_v24 = vrot.slane %v24312_v18, %v14643_v46 }
 0xc3d   :  { %24535 = vst [vmem:[#allocation36_spill] sm:$0xff] %v24303_v50  ;;  %24536 = vst [vmem:[#allocation25_spill] sm:$0xff] %v24306_v43  ;;  %v24326_v44 = vrot.slane %v24312_v18, %v14647_v45  ;;  %v24332_v50 = vld [vmem:[#allocation11 + $0x138] sm:$0xff]  }
 0xc3e   :  { %v14032_v34 = vpop.f32.mrf.mxu1  ;;  %v14073_v31 = vpop.f32.mrf.mxu0 }
 0xc58   :  { %v14406_v36 = vpop.f32.mrf.mxu1  ;;  %v14447_v63 = vpop.f32.mrf.mxu0 }
 0xc59   :  { %v14495_v20 = vadd.f32 %v14406_v36, %v13944_v23  ;;  %v14497_v38 = vadd.f32 %v14447_v63, %v13946_v15 }
 0xc5a   :  { %v14408_v60 = vpop.f32.mrf.mxu1  ;;  %v14449_v26 = vpop.f32.mrf.mxu0 }
 0xc5b   :  { %v14663_v35 = vadd.f32 %v24317_v28, %v14495_v20  ;;  %v14665_v34 = vadd.f32 %v24320_v24, %v14497_v38  ;;  %v14496_v31 = vadd.f32 %v14408_v60, %v13945_v22  ;;  %v14498_v51 = vadd.f32 %v14449_v26, %v13947_v16  ;;  %v24334_v22 = vld [vmem:[#allocation11 + $0x170] sm:$0xff]  }
 0xc5c   :  { %v14410_v58 = vpop.f32.mrf.mxu1  ;;  %v14451_v46 = vpop.f32.mrf.mxu0  ;;  %v24338_v16 = vld [vmem:[#allocation11 + $0x130] sm:$0xff]  }
 0xc5d   :  { %v14664_v0 = vadd.f32 %v24323_v12, %v14496_v31  ;;  %v14666_v23 = vadd.f32 %v24326_v44, %v14498_v51  ;;  %v14669_v15 = vmax.f32 %v14663_v35, 0.0  ;;  %v14671_v52 = vmax.f32 %v14665_v34, 0.0  ;;  %v24392_v51 = vld [vmem:[#allocation11 + $0x140] sm:$0xff]  }
 0xc5e   :  { %v14411_v36 = vpop.f32.mrf.mxu1  ;;  %v14452_v63 = vpop.f32.mrf.mxu0 }
 0xc5f   :  { %v14670_v45 = vmax.f32 %v14664_v0, 0.0  ;;  %v14672_v53 = vmax.f32 %v14666_v23, 0.0  ;;  %v14675_v20 = vpack.c.bf16 %v14669_v15, %v14669_v15  ;;  %v14677_v38 = vpack.c.bf16 %v14671_v52, %v14671_v52  ;;  %v24350_v0 = vld [vmem:[#allocation11 + $0x160] sm:$0xff]  }
 0xc61   :  { %v14676_v41 = vpack.c.bf16 %v14670_v45, %v14670_v45  ;;  %v14678_v43 = vpack.c.bf16 %v14672_v53, %v14672_v53  ;;  %v24342_v53 = vld [vmem:[#allocation11 + $0x168] sm:$0xff]  }
 0xc63   :  { %15001 = vmatprep.mubr.bf16.mxu1 %v14676_v41  ;;  %15041 = vmatprep.mubr.bf16.mxu0 %v14678_v43  ;;  %v24346_v41 = vld [vmem:[#allocation11 + $0x128] sm:$0xff]   ;;  %v14655_v43 = vsub.s32 5, %v24308_v17 }
 0xc64   :  { %15002 = vmatmul.mubr.bf16.vlgmr.msra.gmra.mxu1 %v14675_v20  ;;  %15042 = vmatmul.mubr.bf16.vlgmr.msra.gmra.mxu0 %v14677_v38 }
 0xc65   :  { %16712 = vmatpush3.bf16.msra.mxu1 %v24332_v50  ;;  %16734 = vmatpush3.bf16.msra.mxu0 %v24172_v1  ;;  %v24354_v1 = vld [vmem:[#allocation11 + $0x120] sm:$0xff]  }
 0xc66   :  { %16713 = vmatprep.subr.bf16.mxu1 %v24334_v22  ;;  %16735 = vmatprep.subr.bf16.mxu0 %v24178_v13  ;;  %v24358_v13 = vld [vmem:[#allocation11 + $0x158] sm:$0xff]  }
 0xc69   :  { %16714 = vmatpush3.bf16.msra.mxu1 %v24338_v16  ;;  %16736 = vmatpush3.bf16.msra.mxu0 %v24190_v57  ;;  %v24362_v57 = vld [vmem:[#allocation11 + $0x118] sm:$0xff]  }
 0xc6a   :  { %16715 = vmatprep.subr.bf16.mxu1 %v24342_v53  ;;  %16737 = vmatprep.subr.bf16.mxu0 %v24196_v11  ;;  %v24366_v11 = vld [vmem:[#allocation11 + $0x150] sm:$0xff]  }
 0xc6d   :  { %16716 = vmatpush3.bf16.msra.mxu1 %v24346_v41  ;;  %16738 = vmatpush3.bf16.msra.mxu0 %v24208_v7  ;;  %v14651_v7 = vsub.s32 4, %v24308_v17  ;;  %v24388_v17 = vld [vmem:[#allocation11 + $0x108] sm:$0xff]  }
 0xc6e   :  { %16717 = vmatprep.subr.bf16.mxu1 %v24350_v0  ;;  %16739 = vmatprep.subr.bf16.mxu0 %v24214_v47  ;;  %v24371_v47 = vld [vmem:[#allocation11 + $0x110] sm:$0xff]  }
 0xc71   :  { %16718 = vmatpush3.bf16.msra.mxu1 %v24354_v1  ;;  %16740 = vmatpush3.bf16.msra.mxu0 %v24220_v48  ;;  %v24376_v48 = vld [vmem:[#allocation11 + $0x148] sm:$0xff]  }
 0xc72   :  { %16719 = vmatprep.subr.bf16.mxu1 %v24358_v13  ;;  %16741 = vmatprep.subr.bf16.mxu0 %v24226_v10  ;;  %v24379_v10 = vrot.slane %v24312_v18, %v14651_v7 }
 0xc75   :  { %16720 = vmatpush3.bf16.msra.mxu1 %v24362_v57  ;;  %16742 = vmatpush3.bf16.msra.mxu0 %v24232_v30  ;;  %v24386_v30 = vrot.slane %v24312_v18, %v14655_v43 }
 0xc76   :  { %16721 = vmatprep.subr.bf16.mxu1 %v24366_v11  ;;  %16743 = vmatprep.subr.bf16.mxu0 %v24238_v25 }
 0xc78   :  { %v14488_v60 = vpop.f32.mrf.mxu1  ;;  %v14537_v26 = vpop.f32.mrf.mxu0 }
 0xc79   :  { %v14499_v35 = vadd.f32 %v14488_v60, %v24285_v40  ;;  %v14626_v34 = vadd.f32 %v14537_v26, %v24288_v32  ;;  %16722 = vmatpush3.bf16.msra.mxu1 %v24371_v47  ;;  %16744 = vmatpush3.bf16.msra.mxu0 %v24244_v5 }
 0xc7a   :  { %v14490_v25 = vpop.f32.mrf.mxu1  ;;  %v14539_v31 = vpop.f32.mrf.mxu0  ;;  %16723 = vmatprep.subr.bf16.mxu1 %v24376_v48  ;;  %16745 = vmatprep.subr.bf16.mxu0 %v24250_v2  ;;  %v24402_v2 = vld [vmem:[#allocation11 + $0x100] sm:$0xff]  }
 0xc7b   :  { %v14667_v40 = vadd.f32 %v24379_v10, %v14499_v35  ;;  %v15090_v32 = vadd.f32 %v24317_v28, %v14626_v34  ;;  %v14500_v58 = vadd.f32 %v14490_v25, %v24291_v29  ;;  %v14627_v5 = vadd.f32 %v14539_v31, %v24294_v59  ;;  %v229_v35 = vld [vmem:[#allocation13] sm:$0x1] }
 0xc7c   :  { %v14492_v18 = vpop.f32.mrf.mxu1  ;;  %v14541_v46 = vpop.f32.mrf.mxu0 }
 0xc7d   :  { %v14668_v23 = vadd.f32 %v24386_v30, %v14500_v58  ;;  %v15091_v15 = vadd.f32 %v24323_v12, %v14627_v5  ;;  %16724 = vmatpush3.bf16.msra.mxu1 %v24388_v17  ;;  %16746 = vmatpush3.bf16.msra.mxu0 %v24256_v19  ;;  %v14673_v52 = vmax.f32 %v14667_v40, 0.0  ;;  %v15096_v36 = vmax.f32 %v15090_v32, 0.0 }
 0xc7e   :  { %v14493_v63 = vpop.f32.mrf.mxu1  ;;  %v14542_v28 = vpop.f32.mrf.mxu0  ;;  %16725 = vmatprep.subr.bf16.mxu1 %v24392_v51  ;;  %16747 = vmatprep.subr.bf16.mxu0 %v24262_v42 }
 0xc7f   :  { %v14674_v29 = vmax.f32 %v14668_v23, 0.0  ;;  %v15097_v59 = vmax.f32 %v15091_v15, 0.0  ;;  %v14679_v12 = vpack.c.bf16 %v14673_v52, %v14673_v52  ;;  %v15102_v19 = vpack.c.bf16 %v15096_v36, %v15096_v36 }
 0xc81   :  { %v14680_v45 = vpack.c.bf16 %v14674_v29, %v14674_v29  ;;  %v15103_v20 = vpack.c.bf16 %v15097_v59, %v15097_v59  ;;  %16726 = vmatpush3.bf16.msra.mxu1 %v24402_v2  ;;  %16748 = vmatpush3.bf16.msra.mxu0 %v24268_v37 }
 0xc82   :  { %16755 = vmatprep.subr.bf16.mxu1 %v24169_v33  ;;  %16777 = vmatprep.subr.bf16.mxu0 %v24274_v14 }
 0xc83   :  { %15081 = vmatprep.mubr.bf16.mxu1 %v14680_v45  ;;  %15140 = vmatprep.mubr.bf16.mxu0 %v15103_v20 }
 0xc84   :  { %15082 = vmatmul.mubr.bf16.vlgmr.msra.gmra.mxu1 %v14679_v12  ;;  %15141 = vmatmul.mubr.bf16.vlgmr.msra.gmra.mxu0 %v15102_v19 }
 0xc85   :  { %16756 = vmatpush3.bf16.msra.mxu1 %v24174_v8  ;;  %16778 = vmatpush3.bf16.msra.mxu0 %v24332_v50 }
 0xc86   :  { %16757 = vmatprep.subr.bf16.mxu1 %v24180_v3  ;;  %16779 = vmatprep.subr.bf16.mxu0 %v24334_v22  ;;  %v24540_v22 = vld [vmem:[#allocation35_spill] sm:$0xff] }
 0xc89   :  { %16758 = vmatpush3.bf16.msra.mxu1 %v24192_v39  ;;  %16780 = vmatpush3.bf16.msra.mxu0 %v24338_v16 }
 0xc8a   :  { %16759 = vmatprep.subr.bf16.mxu1 %v24198_v61  ;;  %16781 = vmatprep.subr.bf16.mxu0 %v24342_v53 }
 0xc8d   :  { %16760 = vmatpush3.bf16.msra.mxu1 %v24210_v62  ;;  %16782 = vmatpush3.bf16.msra.mxu0 %v24346_v41 }
 0xc8e   :  { %16761 = vmatprep.subr.bf16.mxu1 %v24216_v6  ;;  %16783 = vmatprep.subr.bf16.mxu0 %v24350_v0 }
 0xc91   :  { %16762 = vmatpush3.bf16.msra.mxu1 %v24222_v54  ;;  %16784 = vmatpush3.bf16.msra.mxu0 %v24354_v1  ;;  %v24541_v1 = vld [vmem:[#allocation24_spill] sm:$0xff] }
 0xc92   :  { %16763 = vmatprep.subr.bf16.mxu1 %v24228_v55  ;;  %16785 = vmatprep.subr.bf16.mxu0 %v24358_v13  ;;  %v24537_v55 = vld [vmem:[#allocation36_spill] sm:$0xff] }
 0xc95   :  { %16764 = vmatpush3.bf16.msra.mxu1 %v24234_v56  ;;  %16786 = vmatpush3.bf16.msra.mxu0 %v24362_v57 }
 0xc96   :  { %16765 = vmatprep.subr.bf16.mxu1 %v24240_v9  ;;  %16787 = vmatprep.subr.bf16.mxu0 %v24366_v11  ;;  %v24538_v9 = vld [vmem:[#allocation25_spill] sm:$0xff] }
 0xc98   :  { %v14578_v33 = vpop.f32.mrf.mxu1  ;;  %v14619_v8 = vpop.f32.mrf.mxu0 }
 0xc99   :  { %v14628_v3 = vadd.f32 %v14578_v33, %v24297_v21  ;;  %v14630_v39 = vadd.f32 %v14619_v8, %v24300_v49  ;;  %16766 = vmatpush3.bf16.msra.mxu1 %v24246_v4  ;;  %16788 = vmatpush3.bf16.msra.mxu0 %v24371_v47  ;;  %v24539_v49 = vld [vmem:[#allocation23_spill] sm:$0xff] }
 0xc9a   :  { %v14580_v61 = vpop.f32.mrf.mxu1  ;;  %v14621_v62 = vpop.f32.mrf.mxu0  ;;  %16767 = vmatprep.subr.bf16.mxu1 %v24252_v27  ;;  %16789 = vmatprep.subr.bf16.mxu0 %v24376_v48 }
 0xc9b   :  { %v15092_v6 = vadd.f32 %v24320_v24, %v14628_v3  ;;  %v15094_v54 = vadd.f32 %v24379_v10, %v14630_v39  ;;  %v14629_v56 = vadd.f32 %v14580_v61, %v24537_v55  ;;  %v14631_v42 = vadd.f32 %v14621_v62, %v24538_v9 }
 0xc9c   :  { %v14582_v37 = vpop.f32.mrf.mxu1  ;;  %v14623_v14 = vpop.f32.mrf.mxu0 }
 0xc9d   :  { %v15093_v4 = vadd.f32 %v24326_v44, %v14629_v56  ;;  %v15095_v21 = vadd.f32 %v24386_v30, %v14631_v42  ;;  %16768 = vmatpush3.bf16.msra.mxu1 %v24539_v49  ;;  %16790 = vmatpush3.bf16.msra.mxu0 %v24388_v17  ;;  %v15098_v27 = vmax.f32 %v15092_v6, 0.0  ;;  %v15100_v50 = vmax.f32 %v15094_v54, 0.0 }
 0xc9e   :  { %v14583_v38 = vpop.f32.mrf.mxu1  ;;  %v14624_v24 = vpop.f32.mrf.mxu0  ;;  %16769 = vmatprep.subr.bf16.mxu1 %v24540_v22  ;;  %16791 = vmatprep.subr.bf16.mxu0 %v24392_v51 }
 0xc9f   :  { %v15099_v16 = vmax.f32 %v15093_v4, 0.0  ;;  %v15101_v53 = vmax.f32 %v15095_v21, 0.0  ;;  %v15104_v44 = vpack.c.bf16 %v15098_v27, %v15098_v27  ;;  %v15106_v13 = vpack.c.bf16 %v15100_v50, %v15100_v50 }
 0xca1   :  { %v15105_v41 = vpack.c.bf16 %v15099_v16, %v15099_v16  ;;  %v15107_v0 = vpack.c.bf16 %v15101_v53, %v15101_v53  ;;  %16770 = vmatpush3.bf16.msra.mxu1 %v24541_v1  ;;  %16792 = vmatpush3.bf16.msra.mxu0 %v24402_v2 }
 0xca3   :  { %15180 = vmatprep.mubr.bf16.mxu1 %v15105_v41  ;;  %15220 = vmatprep.mubr.bf16.mxu0 %v15107_v0 }
 0xca4   :  { %15181 = vmatmul.mubr.bf16.vlgmr.msra.gmra.mxu1 %v15104_v44  ;;  %15221 = vmatmul.mubr.bf16.vlgmr.msra.gmra.mxu0 %v15106_v13 }
 0xd24   :  { %v16683_v57 = vpop.f32.mrf.mxu1  ;;  %v16705_v11 = vpop.f32.mrf.mxu0 }
 0xd26   :  { %v16684_v7 = vpop.f32.mrf.mxu1  ;;  %v16706_v47 = vpop.f32.mrf.mxu0 }
 0xd27   :  { %v16685_v26 = vadd.f32 %v16684_v7, %v16683_v57  ;;  %v16707_v25 = vadd.f32 %v16706_v47, %v16705_v11 }
 0xd28   :  { %v16686_v43 = vpop.f32.mrf.mxu1  ;;  %v16708_v48 = vpop.f32.mrf.mxu0 }
 0xd29   :  { %v15004_v34 = vadd.f32 %v16685_v26, %v229_v35 }
 0xd2a   :  { %v16687_v10 = vpop.f32.mrf.mxu1  ;;  %v16709_v60 = vpop.f32.mrf.mxu0 }
 0xd2b   :  { %v15044_v40 = vadd.f32 %v16707_v25, %v15004_v34 }
 0xd44   :  { %v16727_v30 = vpop.f32.mrf.mxu1  ;;  %v16749_v17 = vpop.f32.mrf.mxu0 }
 0xd46   :  { %v16728_v31 = vpop.f32.mrf.mxu1  ;;  %v16750_v51 = vpop.f32.mrf.mxu0 }
 0xd47   :  { %v16729_v32 = vadd.f32 %v16728_v31, %v16727_v30  ;;  %v16751_v15 = vadd.f32 %v16750_v51, %v16749_v17 }
 0xd48   :  { %v16730_v58 = vpop.f32.mrf.mxu1  ;;  %v16752_v5 = vpop.f32.mrf.mxu0 }
 0xd49   :  { %v15084_v18 = vadd.f32 %v16729_v32, %v15044_v40  ;;  %v15143_v28 = vadd.f32 %v16751_v15, %v229_v35 }
 0xd4a   :  { %v16731_v46 = vpop.f32.mrf.mxu1  ;;  %v16753_v23 = vpop.f32.mrf.mxu0 }
 0xd4b   :  { %15089 = vst [vmem:[#allocation14] sm:$0x1] %v15084_v18 }
 0xd64   :  { %v16771_v2 = vpop.f32.mrf.mxu1  ;;  %v16793_v52 = vpop.f32.mrf.mxu0 }
 0xd66   :  { %v16772_v36 = vpop.f32.mrf.mxu1  ;;  %v16794_v63 = vpop.f32.mrf.mxu0 }
 0xd67   :  { %v16773_v29 = vadd.f32 %v16772_v36, %v16771_v2  ;;  %v16795_v12 = vadd.f32 %v16794_v63, %v16793_v52 }
 0xd68   :  { %v16774_v59 = vpop.f32.mrf.mxu1  ;;  %v16796_v45 = vpop.f32.mrf.mxu0 }
 0xd69   :  { %v15183_v20 = vadd.f32 %v16773_v29, %v15143_v28 }
 0xd6a   :  { %v16775_v19 = vpop.f32.mrf.mxu1  ;;  %v16797_v33 = vpop.f32.mrf.mxu0 }
 0xd6b   :  { %v15223_v8 = vadd.f32 %v16795_v12, %v15183_v20 }
 0xd6d   :  { %15228 = vst [vmem:[#allocation14 + $0x1] sm:$0x1] %v15223_v8 }
 0xd6e   :  { %18886 = shalt.err (!%p18883_p11)
}
 0xd6f   :  { %15238 = dma.vmem_to_hbm [thread:$0]  %s15236_s20, 32, %s24459_s8, [#allocation4]  }
 0xd70   :  { %18903 = dma.done.wait [#allocation4], 32  }
 0xd71   :  { %18904 = vsyncadd [#allocation4], 4294967264 }
 0xd72   :  { %15242 = vsyncpa [#allocation3], 1 }
 0xd73   :  { %15243 = vsyncpa [#allocation6], 1 }
 0xd74   :  { %15244 = vsyncpa [#allocation9], 1 }
 0xd75   :  { %15245 = vsyncpa [#allocation12], 1 }
 0xd76   :  { %15246 = vsyncpa [#allocation4], 1 }

</bundles_post_ra>
